<compile_context>
chip_gen: v6e
topology: v6e:2x2x1
jax: 0.10.0
libtpu: 0.0.40
codegen_flags: <defaults>
</compile_context>

<pallas_src>
import functools
import math

import numpy as np
import jax
import jax.numpy as jnp
from jax import lax
from jax.experimental import pallas as pl
from jax.experimental.pallas import tpu as pltpu

ACC_DT = jnp.float32    # accumulator / scratch dtype
ACT_DT = jnp.bfloat16   # activation / weight storage dtype


# ------------------------------------------------------------------
# In-kernel helpers (shared by all HGBlock kernels)
# ------------------------------------------------------------------
def _fill_image(s_ref, img, W):
    """Write a flat (H*W, C) image into the padded conv scratch, zeroing the pad rows.

    Scratch layout: rows [0, W+1) zero, rows [W+1, W+1+H*W) image, rows after that zero.
    """
    HW = img.shape[0]
    pad = jnp.zeros((W + 1, s_ref.shape[-1]), s_ref.dtype)
    s_ref[pl.ds(0, W + 1), :] = pad
    s_ref[pl.ds(W + 1 + HW, W + 1), :] = pad
    s_ref[pl.ds(W + 1, HW), :] = img.astype(s_ref.dtype)


def _conv3x3_flat(s_ref, w_ref, b_ref, H, W):
    """ReLU(conv3x3(img, SAME) + bias) on a flat image held in a padded VMEM scratch.

    s_ref : (H*W + 2*W + 2, Cin) f32 scratch filled by _fill_image.
    w_ref : (3, 3, Cin, Cout) bf16,  b_ref : (1, Cout) f32.
    Returns an (H*W, Cout) f32 value.  The 9 taps are contiguous row-shifted slices of the
    scratch; vertical SAME padding comes from the zero pad rows, horizontal padding from the
    two iota masks below.  Each tap is one big (H*W, Cin)x(Cin, Cout) MXU dot.
    """
    HW = H * W
    cout = w_ref.shape[-1]
    col = lax.broadcasted_iota(jnp.int32, (HW, 1), 0) % W
    has_left = col > 0            # pixel (.., w-1) exists
    has_right = col < (W - 1)     # pixel (.., w+1) exists
    acc = jnp.zeros((HW, cout), ACC_DT)
    for dy in range(3):
        for dx in range(3):
            tap = s_ref[pl.ds(dy * W + dx, HW), :].astype(ACT_DT)
            if dx == 0:
                tap = jnp.where(has_left, tap, 0)
            elif dx == 2:
                tap = jnp.where(has_right, tap, 0)
            acc = acc + jnp.dot(tap, w_ref[dy, dx],
                                preferred_element_type=ACC_DT)
    # bias added once to the whole accumulator, then ReLU
    return jnp.maximum(acc + b_ref[...], 0.0)


def _maxpool_dots(psel_ref, x):
    """2x2 / stride-2 max-pool of a flat image via 4 exact 0/1 MXU row-selections."""
    out = None
    for k in range(4):
        phase = jnp.dot(psel_ref[k], x, preferred_element_type=ACC_DT)
        out = phase if out is None else jnp.maximum(out, phase)
    return out


# ------------------------------------------------------------------
# Kernels
# ------------------------------------------------------------------
def _hg_leaf_kernel(x_ref, psel_ref, upsel_ref,
                    wu_ref, bu_ref, w1_ref, b1_ref,
                    w2_ref, b2_ref, w3_ref, b3_ref,
                    o_ref, sf_ref, shf_ref, shn_ref, *, H, W):
    """Fully fused n == 1 HGBlock level for one image (all intermediates stay in VMEM)."""
    Hh, Wh = H // 2, W // 2

    # pool1 = MaxPool2d(2, 2)(x)
    pooled = _maxpool_dots(psel_ref, x_ref[0].astype(ACC_DT))        # (Hh*Wh, f)

    # low1 = Conv(f, nf)(pool1)
    _fill_image(shf_ref, pooled, Wh)
    low1 = _conv3x3_flat(shf_ref, w1_ref, b1_ref, Hh, Wh)            # (Hh*Wh, nf)

    # low2 = Conv(nf, nf)(low1)        (n == 1 leaf)
    _fill_image(shn_ref, low1, Wh)
    low2 = _conv3x3_flat(shn_ref, w2_ref, b2_ref, Hh, Wh)            # (Hh*Wh, nf)

    # low3 = Conv(nf, f)(low2)
    _fill_image(shn_ref, low2, Wh)
    low3 = _conv3x3_flat(shn_ref, w3_ref, b3_ref, Hh, Wh)            # (Hh*Wh, f)

    # up1 = Conv(f, f)(x)   (done last to keep live values small)
    _fill_image(sf_ref, x_ref[0].astype(ACC_DT), W)
    up1 = _conv3x3_flat(sf_ref, wu_ref, bu_ref, H, W)                # (H*W, f)

    # up2 = nearest 2x upsample of low3 (exact 0/1 MXU scatter) ; out = up1 + up2
    up2 = jnp.dot(upsel_ref[...], low3, preferred_element_type=ACC_DT)
    o_ref[0] = (up1 + up2).astype(o_ref.dtype)


def _hg_front_kernel(x_ref, psel_ref, wu_ref, bu_ref, w1_ref, b1_ref,
                     up1_ref, low1_ref, sf_ref, shf_ref, *, H, W):
    """n > 1 level, part before the recursive inner block: up1 conv + pool + low1 conv."""
    Hh, Wh = H // 2, W // 2
    _fill_image(sf_ref, x_ref[0].astype(ACC_DT), W)
    up1 = _conv3x3_flat(sf_ref, wu_ref, bu_ref, H, W)
    up1_ref[0] = up1.astype(up1_ref.dtype)
    pooled = _maxpool_dots(psel_ref, x_ref[0].astype(ACC_DT))
    _fill_image(shf_ref, pooled, Wh)
    low1 = _conv3x3_flat(shf_ref, w1_ref, b1_ref, Hh, Wh)
    low1_ref[0] = low1.astype(low1_ref.dtype)


def _hg_back_kernel(up1_ref, low2_ref, upsel_ref, w3_ref, b3_ref,
                    o_ref, shn_ref, *, H, W):
    """n > 1 level, part after the recursive inner block: low3 conv + upsample + add."""
    Hh, Wh = H // 2, W // 2
    _fill_image(shn_ref, low2_ref[0].astype(ACC_DT), Wh)
    low3 = _conv3x3_flat(shn_ref, w3_ref, b3_ref, Hh, Wh)
    up2 = jnp.dot(upsel_ref[...], low3, preferred_element_type=ACC_DT)
    o_ref[0] = (up1_ref[0].astype(ACC_DT) + up2).astype(o_ref.dtype)


# ------------------------------------------------------------------
# Wrapper-side constants (exact 0/1 selection matrices)
# ------------------------------------------------------------------
def _pool_select(H, W):
    """(4, Hh*Wh, H*W) one-hot rows: phase (a,b) of the 2x2 pooling window."""
    Hh, Wh = H // 2, W // 2
    sel = np.zeros((4, Hh * Wh, H * W), np.float32)
    for a in range(2):
        for b in range(2):
            for i in range(Hh):
                for j in range(Wh):
                    sel[a * 2 + b, i * Wh + j, (2 * i + a) * W + (2 * j + b)] = 1.0
    return jnp.asarray(sel)


def _upsample_select(H, W):
    """(H*W, Hh*Wh) one-hot rows: nearest-neighbour 2x upsample."""
    Wh = W // 2
    sel = np.zeros((H * W, (H // 2) * Wh), np.float32)
    for h in range(H):
        for w in range(W):
            sel[h * W + w, (h // 2) * Wh + (w // 2)] = 1.0
    return jnp.asarray(sel)


def _conv_args(p):
    return p["w"].astype(ACT_DT), p["b"].reshape(1, -1).astype(jnp.float32)


def _full_spec(shape):
    return pl.BlockSpec(shape, lambda n: (0,) * len(shape))


# ------------------------------------------------------------------
# pallas_call wrappers
# ------------------------------------------------------------------
def hg_leaf_call(x_flat, params, H, W, out_dtype):
    N, HW, f = x_flat.shape
    Hh, Wh = H // 2, W // 2
    HhWh = Hh * Wh
    nf = params["low1"]["w"].shape[-1]
    psel = _pool_select(H, W)
    upsel = _upsample_select(H, W)
    wu, bu = _conv_args(params["up1"])
    w1, b1 = _conv_args(params["low1"])
    w2, b2 = _conv_args(params["low2"])
    w3, b3 = _conv_args(params["low3"])

    return pl.pallas_call(
        functools.partial(_hg_leaf_kernel, H=H, W=W),
        out_shape=jax.ShapeDtypeStruct((N, HW, f), out_dtype),
        grid=(N,),
        in_specs=[
            pl.BlockSpec((1, HW, f), lambda n: (n, 0, 0)),
            _full_spec(psel.shape),
            _full_spec(upsel.shape),
            _full_spec(wu.shape), _full_spec(bu.shape),
            _full_spec(w1.shape), _full_spec(b1.shape),
            _full_spec(w2.shape), _full_spec(b2.shape),
            _full_spec(w3.shape), _full_spec(b3.shape),
        ],
        out_specs=pl.BlockSpec((1, HW, f), lambda n: (n, 0, 0)),
        scratch_shapes=[
            pltpu.VMEM((HW + 2 * W + 2, f), ACC_DT),        # padded x  (up1 conv)
            pltpu.VMEM((HhWh + 2 * Wh + 2, f), ACC_DT),     # padded pooled (low1 conv)
            pltpu.VMEM((HhWh + 2 * Wh + 2, nf), ACC_DT),    # padded low1/low2 (low2/low3)
        ],
        compiler_params=pltpu.CompilerParams(dimension_semantics=("parallel",)),
    )(x_flat, psel, upsel, wu, bu, w1, b1, w2, b2, w3, b3)


def hg_front_call(x_flat, params, H, W):
    N, HW, f = x_flat.shape
    Hh, Wh = H // 2, W // 2
    HhWh = Hh * Wh
    nf = params["low1"]["w"].shape[-1]
    psel = _pool_select(H, W)
    wu, bu = _conv_args(params["up1"])
    w1, b1 = _conv_args(params["low1"])
    return pl.pallas_call(
        functools.partial(_hg_front_kernel, H=H, W=W),
        out_shape=(jax.ShapeDtypeStruct((N, HW, f), ACT_DT),
                   jax.ShapeDtypeStruct((N, HhWh, nf), ACT_DT)),
        grid=(N,),
        in_specs=[
            pl.BlockSpec((1, HW, f), lambda n: (n, 0, 0)),
            _full_spec(psel.shape),
            _full_spec(wu.shape), _full_spec(bu.shape),
            _full_spec(w1.shape), _full_spec(b1.shape),
        ],
        out_specs=(pl.BlockSpec((1, HW, f), lambda n: (n, 0, 0)),
                   pl.BlockSpec((1, HhWh, nf), lambda n: (n, 0, 0))),
        scratch_shapes=[
            pltpu.VMEM((HW + 2 * W + 2, f), ACC_DT),
            pltpu.VMEM((HhWh + 2 * Wh + 2, f), ACC_DT),
        ],
        compiler_params=pltpu.CompilerParams(dimension_semantics=("parallel",)),
    )(x_flat, psel, wu, bu, w1, b1)


def hg_back_call(up1_flat, low2_flat, params, H, W, out_dtype):
    N, HW, f = up1_flat.shape
    Hh, Wh = H // 2, W // 2
    HhWh = Hh * Wh
    nf = low2_flat.shape[-1]
    upsel = _upsample_select(H, W)
    w3, b3 = _conv_args(params["low3"])
    return pl.pallas_call(
        functools.partial(_hg_back_kernel, H=H, W=W),
        out_shape=jax.ShapeDtypeStruct((N, HW, f), out_dtype),
        grid=(N,),
        in_specs=[
            pl.BlockSpec((1, HW, f), lambda n: (n, 0, 0)),
            pl.BlockSpec((1, HhWh, nf), lambda n: (n, 0, 0)),
            _full_spec(upsel.shape),
            _full_spec(w3.shape), _full_spec(b3.shape),
        ],
        out_specs=pl.BlockSpec((1, HW, f), lambda n: (n, 0, 0)),
        scratch_shapes=[pltpu.VMEM((HhWh + 2 * Wh + 2, nf), ACC_DT)],
        compiler_params=pltpu.CompilerParams(dimension_semantics=("parallel",)),
    )(up1_flat, low2_flat, upsel, w3, b3)


# ------------------------------------------------------------------
# HGBlock forward (recursive) and parameter init
# ------------------------------------------------------------------
def _hgblock_flat(params, x_flat, n, H, W, out_dtype):
    if n == 1:
        return hg_leaf_call(x_flat, params, H, W, out_dtype)
    up1, low1 = hg_front_call(x_flat, params, H, W)
    low2 = _hgblock_flat(params["low2"], low1, n - 1, H // 2, W // 2, ACT_DT)
    return hg_back_call(up1, low2, params, H, W, out_dtype)


@functools.partial(jax.jit, static_argnums=(2,))
def hgblock_forward(params, x_nchw, n):
    N, f, H, W = x_nchw.shape
    x_flat = jnp.transpose(x_nchw.astype(ACT_DT), (0, 2, 3, 1)).reshape(N, H * W, f)
    out_flat = _hgblock_flat(params, x_flat, n, H, W, jnp.float32)
    return jnp.transpose(out_flat.reshape(N, H, W, f), (0, 3, 1, 2))


def init_conv(key, cin, cout):
    k1, k2 = jax.random.split(key)
    w = jax.random.normal(k1, (3, 3, cin, cout), jnp.float32) / math.sqrt(cin * 9)
    b = 0.01 * jax.random.normal(k2, (cout,), jnp.float32)
    return {"w": w, "b": b}


def init_hgblock(key, n, f, increase=128):
    nf = f + increase
    k = jax.random.split(key, 4)
    p = {"up1": init_conv(k[0], f, f),
         "low1": init_conv(k[1], f, nf),
         "low3": init_conv(k[3], nf, f)}
    if n > 1:
        p["low2"] = init_hgblock(k[2], n - 1, nf)   # inner block: default increase=128
    else:
        p["low2"] = init_conv(k[2], nf, nf)
    return p


# ------------------------------------------------------------------
# Pure-JAX reference (f32 math, same bf16-quantized weights/input)
# ------------------------------------------------------------------
def _q_params(p):
    if "w" in p:
        return {"w": p["w"].astype(jnp.bfloat16).astype(jnp.float32), "b": p["b"]}
    return {k: _q_params(v) for k, v in p.items()}


def ref_conv(x, w, b):
    y = lax.conv_general_dilated(
        x, w, window_strides=(1, 1), padding="SAME",
        dimension_numbers=("NHWC", "HWIO", "NHWC"),
        precision=lax.Precision.HIGHEST)
    return jnp.maximum(y + b, 0.0)


def ref_pool(x):
    return lax.reduce_window(x, -jnp.inf, lax.max, (1, 2, 2, 1), (1, 2, 2, 1), "VALID")


def ref_hgblock(params, x, n):
    up1 = ref_conv(x, params["up1"]["w"], params["up1"]["b"])
    pool1 = ref_pool(x)
    low1 = ref_conv(pool1, params["low1"]["w"], params["low1"]["b"])
    if n > 1:
        low2 = ref_hgblock(params["low2"], low1, n - 1)
    else:
        low2 = ref_conv(low1, params["low2"]["w"], params["low2"]["b"])
    low3 = ref_conv(low2, params["low3"]["w"], params["low3"]["b"])
    up2 = jnp.repeat(jnp.repeat(low3, 2, axis=1), 2, axis=2)
    return up1 + up2


# ------------------------------------------------------------------
if __name__ == "__main__":
    n_levels, f, increase = 1, 4, 4            # nf = 8
    N, H, W = 2, 16, 16

    key = jax.random.PRNGKey(0)
    kx, kp = jax.random.split(key)
    x_nchw = jax.random.normal(kx, (N, f, H, W), jnp.float32)   # PyTorch NCHW layout
    params = init_hgblock(kp, n_levels, f, increase)

    out_nchw = hgblock_forward(params, x_nchw, n_levels)
    out_nchw = jax.block_until_ready(out_nchw)
    assert out_nchw.shape == (N, f, H, W)

    # reference with the same bf16-quantized weights and input, f32 intermediates
    qp = _q_params(params)
    x_ref_nhwc = jnp.transpose(
        x_nchw.astype(jnp.bfloat16).astype(jnp.float32), (0, 2, 3, 1))
    ref_nchw = jnp.transpose(ref_hgblock(qp, x_ref_nhwc, n_levels), (0, 3, 1, 2))

    np.testing.assert_allclose(np.asarray(out_nchw), np.asarray(ref_nchw),
                               atol=5e-2, rtol=5e-2)
    print("KERNEL_OK")
</pallas_src>

<mosaic_0001>
module attributes {stable_mosaic.version = 11 : i64} {
  func.func @_hg_leaf_kernel(%arg0: i32, %arg1: memref<1x256x4xbf16, #tpu.memory_space<vmem>>, %arg2: memref<4x64x256xf32, #tpu.memory_space<vmem>>, %arg3: memref<256x64xf32, #tpu.memory_space<vmem>>, %arg4: memref<3x3x4x4xbf16, #tpu.memory_space<vmem>>, %arg5: memref<1x4xf32, #tpu.memory_space<vmem>>, %arg6: memref<3x3x4x8xbf16, #tpu.memory_space<vmem>>, %arg7: memref<1x8xf32, #tpu.memory_space<vmem>>, %arg8: memref<3x3x8x8xbf16, #tpu.memory_space<vmem>>, %arg9: memref<1x8xf32, #tpu.memory_space<vmem>>, %arg10: memref<3x3x8x4xbf16, #tpu.memory_space<vmem>>, %arg11: memref<1x4xf32, #tpu.memory_space<vmem>>, %arg12: memref<1x256x4xf32, #tpu.memory_space<vmem>>, %arg13: memref<290x4xf32, #tpu.memory_space<vmem>>, %arg14: memref<82x4xf32, #tpu.memory_space<vmem>>, %arg15: memref<82x8xf32, #tpu.memory_space<vmem>>) attributes {dimension_semantics = [#tpu.dimension_semantics<parallel>], iteration_bounds = array<i64: 2>, scalar_prefetch = 0 : i64, scratch_operands = 3 : i64, tpu.core_type = #tpu.core_type<tc>, window_params = [{transform_indices = @transform_0, window_bounds = array<i64: 1, 256, 4>}, {pipeline_mode = #tpu.pipeline_mode<synchronous>, transform_indices = @transform_1, window_bounds = array<i64: 4, 64, 256>}, {pipeline_mode = #tpu.pipeline_mode<synchronous>, transform_indices = @transform_2, window_bounds = array<i64: 256, 64>}, {pipeline_mode = #tpu.pipeline_mode<synchronous>, transform_indices = @transform_3, window_bounds = array<i64: 3, 3, 4, 4>}, {pipeline_mode = #tpu.pipeline_mode<synchronous>, transform_indices = @transform_4, window_bounds = array<i64: 1, 4>}, {pipeline_mode = #tpu.pipeline_mode<synchronous>, transform_indices = @transform_5, window_bounds = array<i64: 3, 3, 4, 8>}, {pipeline_mode = #tpu.pipeline_mode<synchronous>, transform_indices = @transform_6, window_bounds = array<i64: 1, 8>}, {pipeline_mode = #tpu.pipeline_mode<synchronous>, transform_indices = @transform_7, window_bounds = array<i64: 3, 3, 8, 8>}, {pipeline_mode = #tpu.pipeline_mode<synchronous>, transform_indices = @transform_8, window_bounds = array<i64: 1, 8>}, {pipeline_mode = #tpu.pipeline_mode<synchronous>, transform_indices = @transform_9, window_bounds = array<i64: 3, 3, 8, 4>}, {pipeline_mode = #tpu.pipeline_mode<synchronous>, transform_indices = @transform_10, window_bounds = array<i64: 1, 4>}, {transform_indices = @transform_11, window_bounds = array<i64: 1, 256, 4>}]} {
    %c0 = arith.constant 0 : index
    %c0_0 = arith.constant 0 : index
    %c0_1 = arith.constant 0 : index
    %0 = vector.load %arg1[%c0, %c0_0, %c0_1] : memref<1x256x4xbf16, #tpu.memory_space<vmem>>, vector<1x256x4xbf16>
    %1 = vector.shape_cast %0 : vector<1x256x4xbf16> to vector<256x4xbf16>
    %2 = arith.extf %1 : vector<256x4xbf16> to vector<256x4xf32>
    %c0_2 = arith.constant 0 : index
    %c0_3 = arith.constant 0 : index
    %c0_4 = arith.constant 0 : index
    %3 = vector.load %arg2[%c0_2, %c0_3, %c0_4] : memref<4x64x256xf32, #tpu.memory_space<vmem>>, vector<1x64x256xf32>
    %4 = vector.shape_cast %3 : vector<1x64x256xf32> to vector<64x256xf32>
    %cst = arith.constant dense<0.000000e+00> : vector<64x4xf32>
    %5 = tpu.matmul %4, %2, %cst {dimension_numbers = #tpu.dot_dimension_numbers<[1], [0], [0], [1], [0, 0, 1, 1], [], []>} : vector<64x256xf32>, vector<256x4xf32>, vector<64x4xf32> -> vector<64x4xf32>
    %c1 = arith.constant 1 : index
    %c0_5 = arith.constant 0 : index
    %c0_6 = arith.constant 0 : index
    %6 = vector.load %arg2[%c1, %c0_5, %c0_6] : memref<4x64x256xf32, #tpu.memory_space<vmem>>, vector<1x64x256xf32>
    %7 = vector.shape_cast %6 : vector<1x64x256xf32> to vector<64x256xf32>
    %cst_7 = arith.constant dense<0.000000e+00> : vector<64x4xf32>
    %8 = tpu.matmul %7, %2, %cst_7 {dimension_numbers = #tpu.dot_dimension_numbers<[1], [0], [0], [1], [0, 0, 1, 1], [], []>} : vector<64x256xf32>, vector<256x4xf32>, vector<64x4xf32> -> vector<64x4xf32>
    %9 = arith.maximumf %5, %8 : vector<64x4xf32>
    %c2 = arith.constant 2 : index
    %c0_8 = arith.constant 0 : index
    %c0_9 = arith.constant 0 : index
    %10 = vector.load %arg2[%c2, %c0_8, %c0_9] : memref<4x64x256xf32, #tpu.memory_space<vmem>>, vector<1x64x256xf32>
    %11 = vector.shape_cast %10 : vector<1x64x256xf32> to vector<64x256xf32>
    %cst_10 = arith.constant dense<0.000000e+00> : vector<64x4xf32>
    %12 = tpu.matmul %11, %2, %cst_10 {dimension_numbers = #tpu.dot_dimension_numbers<[1], [0], [0], [1], [0, 0, 1, 1], [], []>} : vector<64x256xf32>, vector<256x4xf32>, vector<64x4xf32> -> vector<64x4xf32>
    %13 = arith.maximumf %9, %12 : vector<64x4xf32>
    %c3 = arith.constant 3 : index
    %c0_11 = arith.constant 0 : index
    %c0_12 = arith.constant 0 : index
    %14 = vector.load %arg2[%c3, %c0_11, %c0_12] : memref<4x64x256xf32, #tpu.memory_space<vmem>>, vector<1x64x256xf32>
    %15 = vector.shape_cast %14 : vector<1x64x256xf32> to vector<64x256xf32>
    %cst_13 = arith.constant dense<0.000000e+00> : vector<64x4xf32>
    %16 = tpu.matmul %15, %2, %cst_13 {dimension_numbers = #tpu.dot_dimension_numbers<[1], [0], [0], [1], [0, 0, 1, 1], [], []>} : vector<64x256xf32>, vector<256x4xf32>, vector<64x4xf32> -> vector<64x4xf32>
    %17 = arith.maximumf %13, %16 : vector<64x4xf32>
    %cst_14 = arith.constant 0.000000e+00 : f32
    %18 = vector.broadcast %cst_14 : f32 to vector<9x4xf32>
    %c0_15 = arith.constant 0 : index
    %c0_16 = arith.constant 0 : index
    %19 = vector.load %arg14[%c0_15, %c0_16] : memref<82x4xf32, #tpu.memory_space<vmem>>, vector<9x4xf32>
    tpu.vector_store %arg14[%c0_15, %c0_16], %18 {strides = array<i32>} : memref<82x4xf32, #tpu.memory_space<vmem>>, vector<9x4xf32>,
    %c73 = arith.constant 73 : index
    %c0_17 = arith.constant 0 : index
    %20 = vector.load %arg14[%c73, %c0_17] : memref<82x4xf32, #tpu.memory_space<vmem>>, vector<9x4xf32>
    tpu.vector_store %arg14[%c73, %c0_17], %18 {strides = array<i32>} : memref<82x4xf32, #tpu.memory_space<vmem>>, vector<9x4xf32>,
    %c9 = arith.constant 9 : index
    %c0_18 = arith.constant 0 : index
    %21 = vector.load %arg14[%c9, %c0_18] : memref<82x4xf32, #tpu.memory_space<vmem>>, vector<64x4xf32>
    tpu.vector_store %arg14[%c9, %c0_18], %17 {strides = array<i32>} : memref<82x4xf32, #tpu.memory_space<vmem>>, vector<64x4xf32>,
    %22 = tpu.iota {dimensions = array<i32: 0>} : vector<64x1xi32>
    %c8_i32 = arith.constant 8 : i32
    %c0_i32 = arith.constant 0 : i32
    %23 = arith.cmpi eq, %c8_i32, %c0_i32 : i32
    %c1_i32 = arith.constant 1 : i32
    %24 = arith.select %23, %c1_i32, %c8_i32 : i32
    %25 = vector.broadcast %24 : i32 to vector<64x1xi32>
    %26 = arith.remsi %22, %25 : vector<64x1xi32>
    %c0_i32_19 = arith.constant 0 : i32
    %27 = vector.broadcast %c0_i32_19 : i32 to vector<64x1xi32>
    %28 = arith.cmpi ne, %26, %27 : vector<64x1xi32>
    %c0_i32_20 = arith.constant 0 : i32
    %29 = vector.broadcast %c0_i32_20 : i32 to vector<64x1xi32>
    %30 = arith.cmpi slt, %26, %29 : vector<64x1xi32>
    %c0_i32_21 = arith.constant 0 : i32
    %31 = arith.cmpi slt, %24, %c0_i32_21 : i32
    %32 = vector.broadcast %31 : i1 to vector<64x1xi1>
    %33 = vector.broadcast %32 : vector<64x1xi1> to vector<64x1xi1>
    %34 = arith.xori %30, %33 : vector<64x1xi1>
    %35 = arith.andi %34, %28 : vector<64x1xi1>
    %36 = vector.broadcast %24 : i32 to vector<64x1xi32>
    %37 = arith.addi %26, %36 : vector<64x1xi32>
    %38 = arith.select %35, %37, %26 : vector<64x1xi1>, vector<64x1xi32>
    %c0_i32_22 = arith.constant 0 : i32
    %39 = vector.broadcast %c0_i32_22 : i32 to vector<64x1xi32>
    %40 = arith.cmpi sgt, %38, %39 : vector<64x1xi32>
    %c7_i32 = arith.constant 7 : i32
    %41 = vector.broadcast %c7_i32 : i32 to vector<64x1xi32>
    %42 = arith.cmpi slt, %38, %41 : vector<64x1xi32>
    %cst_23 = arith.constant 0.000000e+00 : f32
    %43 = vector.broadcast %cst_23 : f32 to vector<64x8xf32>
    %c0_24 = arith.constant 0 : index
    %c0_25 = arith.constant 0 : index
    %44 = vector.load %arg14[%c0_24, %c0_25] : memref<82x4xf32, #tpu.memory_space<vmem>>, vector<64x4xf32>
    %45 = arith.truncf %44 : vector<64x4xf32> to vector<64x4xbf16>
    %c0_i32_26 = arith.constant 0 : i32
    %46 = arith.sitofp %c0_i32_26 : i32 to bf16
    %47 = vector.shape_cast %40 : vector<64x1xi1> to vector<64x1xi1>
    %48 = vector.broadcast %47 : vector<64x1xi1> to vector<64x4xi1>
    %49 = vector.broadcast %46 : bf16 to vector<64x4xbf16>
    %50 = arith.select %48, %45, %49 : vector<64x4xi1>, vector<64x4xbf16>
    %c0_27 = arith.constant 0 : index
    %c0_28 = arith.constant 0 : index
    %c0_29 = arith.constant 0 : index
    %c0_30 = arith.constant 0 : index
    %51 = vector.load %arg6[%c0_27, %c0_28, %c0_29, %c0_30] : memref<3x3x4x8xbf16, #tpu.memory_space<vmem>>, vector<1x1x4x8xbf16>
    %52 = vector.shape_cast %51 : vector<1x1x4x8xbf16> to vector<4x8xbf16>
    %cst_31 = arith.constant dense<0.000000e+00> : vector<64x8xf32>
    %53 = tpu.matmul %50, %52, %cst_31 {dimension_numbers = #tpu.dot_dimension_numbers<[1], [0], [0], [1], [0, 0, 1, 1], [], []>} : vector<64x4xbf16>, vector<4x8xbf16>, vector<64x8xf32> -> vector<64x8xf32>
    %54 = arith.addf %43, %53 : vector<64x8xf32>
    %c1_32 = arith.constant 1 : index
    %c0_33 = arith.constant 0 : index
    %55 = vector.load %arg14[%c1_32, %c0_33] : memref<82x4xf32, #tpu.memory_space<vmem>>, vector<64x4xf32>
    %56 = arith.truncf %55 : vector<64x4xf32> to vector<64x4xbf16>
    %c0_34 = arith.constant 0 : index
    %c1_35 = arith.constant 1 : index
    %c0_36 = arith.constant 0 : index
    %c0_37 = arith.constant 0 : index
    %57 = vector.load %arg6[%c0_34, %c1_35, %c0_36, %c0_37] : memref<3x3x4x8xbf16, #tpu.memory_space<vmem>>, vector<1x1x4x8xbf16>
    %58 = vector.shape_cast %57 : vector<1x1x4x8xbf16> to vector<4x8xbf16>
    %cst_38 = arith.constant dense<0.000000e+00> : vector<64x8xf32>
    %59 = tpu.matmul %56, %58, %cst_38 {dimension_numbers = #tpu.dot_dimension_numbers<[1], [0], [0], [1], [0, 0, 1, 1], [], []>} : vector<64x4xbf16>, vector<4x8xbf16>, vector<64x8xf32> -> vector<64x8xf32>
    %60 = arith.addf %54, %59 : vector<64x8xf32>
    %c2_39 = arith.constant 2 : index
    %c0_40 = arith.constant 0 : index
    %61 = vector.load %arg14[%c2_39, %c0_40] : memref<82x4xf32, #tpu.memory_space<vmem>>, vector<64x4xf32>
    %62 = arith.truncf %61 : vector<64x4xf32> to vector<64x4xbf16>
    %c0_i32_41 = arith.constant 0 : i32
    %63 = arith.sitofp %c0_i32_41 : i32 to bf16
    %64 = vector.shape_cast %42 : vector<64x1xi1> to vector<64x1xi1>
    %65 = vector.broadcast %64 : vector<64x1xi1> to vector<64x4xi1>
    %66 = vector.broadcast %63 : bf16 to vector<64x4xbf16>
    %67 = arith.select %65, %62, %66 : vector<64x4xi1>, vector<64x4xbf16>
    %c0_42 = arith.constant 0 : index
    %c2_43 = arith.constant 2 : index
    %c0_44 = arith.constant 0 : index
    %c0_45 = arith.constant 0 : index
    %68 = vector.load %arg6[%c0_42, %c2_43, %c0_44, %c0_45] : memref<3x3x4x8xbf16, #tpu.memory_space<vmem>>, vector<1x1x4x8xbf16>
    %69 = vector.shape_cast %68 : vector<1x1x4x8xbf16> to vector<4x8xbf16>
    %cst_46 = arith.constant dense<0.000000e+00> : vector<64x8xf32>
    %70 = tpu.matmul %67, %69, %cst_46 {dimension_numbers = #tpu.dot_dimension_numbers<[1], [0], [0], [1], [0, 0, 1, 1], [], []>} : vector<64x4xbf16>, vector<4x8xbf16>, vector<64x8xf32> -> vector<64x8xf32>
    %71 = arith.addf %60, %70 : vector<64x8xf32>
    %c8 = arith.constant 8 : index
    %c0_47 = arith.constant 0 : index
    %72 = vector.load %arg14[%c8, %c0_47] : memref<82x4xf32, #tpu.memory_space<vmem>>, vector<64x4xf32>
    %73 = arith.truncf %72 : vector<64x4xf32> to vector<64x4xbf16>
    %c0_i32_48 = arith.constant 0 : i32
    %74 = arith.sitofp %c0_i32_48 : i32 to bf16
    %75 = vector.shape_cast %40 : vector<64x1xi1> to vector<64x1xi1>
    %76 = vector.broadcast %75 : vector<64x1xi1> to vector<64x4xi1>
    %77 = vector.broadcast %74 : bf16 to vector<64x4xbf16>
    %78 = arith.select %76, %73, %77 : vector<64x4xi1>, vector<64x4xbf16>
    %c1_49 = arith.constant 1 : index
    %c0_50 = arith.constant 0 : index
    %c0_51 = arith.constant 0 : index
    %c0_52 = arith.constant 0 : index
    %79 = vector.load %arg6[%c1_49, %c0_50, %c0_51, %c0_52] : memref<3x3x4x8xbf16, #tpu.memory_space<vmem>>, vector<1x1x4x8xbf16>
    %80 = vector.shape_cast %79 : vector<1x1x4x8xbf16> to vector<4x8xbf16>
    %cst_53 = arith.constant dense<0.000000e+00> : vector<64x8xf32>
    %81 = tpu.matmul %78, %80, %cst_53 {dimension_numbers = #tpu.dot_dimension_numbers<[1], [0], [0], [1], [0, 0, 1, 1], [], []>} : vector<64x4xbf16>, vector<4x8xbf16>, vector<64x8xf32> -> vector<64x8xf32>
    %82 = arith.addf %71, %81 : vector<64x8xf32>
    %c9_54 = arith.constant 9 : index
    %c0_55 = arith.constant 0 : index
    %83 = vector.load %arg14[%c9_54, %c0_55] : memref<82x4xf32, #tpu.memory_space<vmem>>, vector<64x4xf32>
    %84 = arith.truncf %83 : vector<64x4xf32> to vector<64x4xbf16>
    %c1_56 = arith.constant 1 : index
    %c1_57 = arith.constant 1 : index
    %c0_58 = arith.constant 0 : index
    %c0_59 = arith.constant 0 : index
    %85 = vector.load %arg6[%c1_56, %c1_57, %c0_58, %c0_59] : memref<3x3x4x8xbf16, #tpu.memory_space<vmem>>, vector<1x1x4x8xbf16>
    %86 = vector.shape_cast %85 : vector<1x1x4x8xbf16> to vector<4x8xbf16>
    %cst_60 = arith.constant dense<0.000000e+00> : vector<64x8xf32>
    %87 = tpu.matmul %84, %86, %cst_60 {dimension_numbers = #tpu.dot_dimension_numbers<[1], [0], [0], [1], [0, 0, 1, 1], [], []>} : vector<64x4xbf16>, vector<4x8xbf16>, vector<64x8xf32> -> vector<64x8xf32>
    %88 = arith.addf %82, %87 : vector<64x8xf32>
    %c10 = arith.constant 10 : index
    %c0_61 = arith.constant 0 : index
    %89 = vector.load %arg14[%c10, %c0_61] : memref<82x4xf32, #tpu.memory_space<vmem>>, vector<64x4xf32>
    %90 = arith.truncf %89 : vector<64x4xf32> to vector<64x4xbf16>
    %c0_i32_62 = arith.constant 0 : i32
    %91 = arith.sitofp %c0_i32_62 : i32 to bf16
    %92 = vector.shape_cast %42 : vector<64x1xi1> to vector<64x1xi1>
    %93 = vector.broadcast %92 : vector<64x1xi1> to vector<64x4xi1>
    %94 = vector.broadcast %91 : bf16 to vector<64x4xbf16>
    %95 = arith.select %93, %90, %94 : vector<64x4xi1>, vector<64x4xbf16>
    %c1_63 = arith.constant 1 : index
    %c2_64 = arith.constant 2 : index
    %c0_65 = arith.constant 0 : index
    %c0_66 = arith.constant 0 : index
    %96 = vector.load %arg6[%c1_63, %c2_64, %c0_65, %c0_66] : memref<3x3x4x8xbf16, #tpu.memory_space<vmem>>, vector<1x1x4x8xbf16>
    %97 = vector.shape_cast %96 : vector<1x1x4x8xbf16> to vector<4x8xbf16>
    %cst_67 = arith.constant dense<0.000000e+00> : vector<64x8xf32>
    %98 = tpu.matmul %95, %97, %cst_67 {dimension_numbers = #tpu.dot_dimension_numbers<[1], [0], [0], [1], [0, 0, 1, 1], [], []>} : vector<64x4xbf16>, vector<4x8xbf16>, vector<64x8xf32> -> vector<64x8xf32>
    %99 = arith.addf %88, %98 : vector<64x8xf32>
    %c16 = arith.constant 16 : index
    %c0_68 = arith.constant 0 : index
    %100 = vector.load %arg14[%c16, %c0_68] : memref<82x4xf32, #tpu.memory_space<vmem>>, vector<64x4xf32>
    %101 = arith.truncf %100 : vector<64x4xf32> to vector<64x4xbf16>
    %c0_i32_69 = arith.constant 0 : i32
    %102 = arith.sitofp %c0_i32_69 : i32 to bf16
    %103 = vector.shape_cast %40 : vector<64x1xi1> to vector<64x1xi1>
    %104 = vector.broadcast %103 : vector<64x1xi1> to vector<64x4xi1>
    %105 = vector.broadcast %102 : bf16 to vector<64x4xbf16>
    %106 = arith.select %104, %101, %105 : vector<64x4xi1>, vector<64x4xbf16>
    %c2_70 = arith.constant 2 : index
    %c0_71 = arith.constant 0 : index
    %c0_72 = arith.constant 0 : index
    %c0_73 = arith.constant 0 : index
    %107 = vector.load %arg6[%c2_70, %c0_71, %c0_72, %c0_73] : memref<3x3x4x8xbf16, #tpu.memory_space<vmem>>, vector<1x1x4x8xbf16>
    %108 = vector.shape_cast %107 : vector<1x1x4x8xbf16> to vector<4x8xbf16>
    %cst_74 = arith.constant dense<0.000000e+00> : vector<64x8xf32>
    %109 = tpu.matmul %106, %108, %cst_74 {dimension_numbers = #tpu.dot_dimension_numbers<[1], [0], [0], [1], [0, 0, 1, 1], [], []>} : vector<64x4xbf16>, vector<4x8xbf16>, vector<64x8xf32> -> vector<64x8xf32>
    %110 = arith.addf %99, %109 : vector<64x8xf32>
    %c17 = arith.constant 17 : index
    %c0_75 = arith.constant 0 : index
    %111 = vector.load %arg14[%c17, %c0_75] : memref<82x4xf32, #tpu.memory_space<vmem>>, vector<64x4xf32>
    %112 = arith.truncf %111 : vector<64x4xf32> to vector<64x4xbf16>
    %c2_76 = arith.constant 2 : index
    %c1_77 = arith.constant 1 : index
    %c0_78 = arith.constant 0 : index
    %c0_79 = arith.constant 0 : index
    %113 = vector.load %arg6[%c2_76, %c1_77, %c0_78, %c0_79] : memref<3x3x4x8xbf16, #tpu.memory_space<vmem>>, vector<1x1x4x8xbf16>
    %114 = vector.shape_cast %113 : vector<1x1x4x8xbf16> to vector<4x8xbf16>
    %cst_80 = arith.constant dense<0.000000e+00> : vector<64x8xf32>
    %115 = tpu.matmul %112, %114, %cst_80 {dimension_numbers = #tpu.dot_dimension_numbers<[1], [0], [0], [1], [0, 0, 1, 1], [], []>} : vector<64x4xbf16>, vector<4x8xbf16>, vector<64x8xf32> -> vector<64x8xf32>
    %116 = arith.addf %110, %115 : vector<64x8xf32>
    %c18 = arith.constant 18 : index
    %c0_81 = arith.constant 0 : index
    %117 = vector.load %arg14[%c18, %c0_81] : memref<82x4xf32, #tpu.memory_space<vmem>>, vector<64x4xf32>
    %118 = arith.truncf %117 : vector<64x4xf32> to vector<64x4xbf16>
    %c0_i32_82 = arith.constant 0 : i32
    %119 = arith.sitofp %c0_i32_82 : i32 to bf16
    %120 = vector.shape_cast %42 : vector<64x1xi1> to vector<64x1xi1>
    %121 = vector.broadcast %120 : vector<64x1xi1> to vector<64x4xi1>
    %122 = vector.broadcast %119 : bf16 to vector<64x4xbf16>
    %123 = arith.select %121, %118, %122 : vector<64x4xi1>, vector<64x4xbf16>
    %c2_83 = arith.constant 2 : index
    %c2_84 = arith.constant 2 : index
    %c0_85 = arith.constant 0 : index
    %c0_86 = arith.constant 0 : index
    %124 = vector.load %arg6[%c2_83, %c2_84, %c0_85, %c0_86] : memref<3x3x4x8xbf16, #tpu.memory_space<vmem>>, vector<1x1x4x8xbf16>
    %125 = vector.shape_cast %124 : vector<1x1x4x8xbf16> to vector<4x8xbf16>
    %cst_87 = arith.constant dense<0.000000e+00> : vector<64x8xf32>
    %126 = tpu.matmul %123, %125, %cst_87 {dimension_numbers = #tpu.dot_dimension_numbers<[1], [0], [0], [1], [0, 0, 1, 1], [], []>} : vector<64x4xbf16>, vector<4x8xbf16>, vector<64x8xf32> -> vector<64x8xf32>
    %127 = arith.addf %116, %126 : vector<64x8xf32>
    %c0_88 = arith.constant 0 : index
    %c0_89 = arith.constant 0 : index
    %128 = vector.load %arg7[%c0_88, %c0_89] : memref<1x8xf32, #tpu.memory_space<vmem>>, vector<1x8xf32>
    %129 = vector.broadcast %128 : vector<1x8xf32> to vector<64x8xf32>
    %130 = arith.addf %127, %129 : vector<64x8xf32>
    %cst_90 = arith.constant 0.000000e+00 : f32
    %131 = vector.broadcast %cst_90 : f32 to vector<64x8xf32>
    %132 = arith.maximumf %130, %131 : vector<64x8xf32>
    %cst_91 = arith.constant 0.000000e+00 : f32
    %133 = vector.broadcast %cst_91 : f32 to vector<9x8xf32>
    %c0_92 = arith.constant 0 : index
    %c0_93 = arith.constant 0 : index
    %134 = vector.load %arg15[%c0_92, %c0_93] : memref<82x8xf32, #tpu.memory_space<vmem>>, vector<9x8xf32>
    tpu.vector_store %arg15[%c0_92, %c0_93], %133 {strides = array<i32>} : memref<82x8xf32, #tpu.memory_space<vmem>>, vector<9x8xf32>,
    %c73_94 = arith.constant 73 : index
    %c0_95 = arith.constant 0 : index
    %135 = vector.load %arg15[%c73_94, %c0_95] : memref<82x8xf32, #tpu.memory_space<vmem>>, vector<9x8xf32>
    tpu.vector_store %arg15[%c73_94, %c0_95], %133 {strides = array<i32>} : memref<82x8xf32, #tpu.memory_space<vmem>>, vector<9x8xf32>,
    %c9_96 = arith.constant 9 : index
    %c0_97 = arith.constant 0 : index
    %136 = vector.load %arg15[%c9_96, %c0_97] : memref<82x8xf32, #tpu.memory_space<vmem>>, vector<64x8xf32>
    tpu.vector_store %arg15[%c9_96, %c0_97], %132 {strides = array<i32>} : memref<82x8xf32, #tpu.memory_space<vmem>>, vector<64x8xf32>,
    %137 = tpu.iota {dimensions = array<i32: 0>} : vector<64x1xi32>
    %c8_i32_98 = arith.constant 8 : i32
    %c0_i32_99 = arith.constant 0 : i32
    %138 = arith.cmpi eq, %c8_i32_98, %c0_i32_99 : i32
    %c1_i32_100 = arith.constant 1 : i32
    %139 = arith.select %138, %c1_i32_100, %c8_i32_98 : i32
    %140 = vector.broadcast %139 : i32 to vector<64x1xi32>
    %141 = arith.remsi %137, %140 : vector<64x1xi32>
    %c0_i32_101 = arith.constant 0 : i32
    %142 = vector.broadcast %c0_i32_101 : i32 to vector<64x1xi32>
    %143 = arith.cmpi ne, %141, %142 : vector<64x1xi32>
    %c0_i32_102 = arith.constant 0 : i32
    %144 = vector.broadcast %c0_i32_102 : i32 to vector<64x1xi32>
    %145 = arith.cmpi slt, %141, %144 : vector<64x1xi32>
    %c0_i32_103 = arith.constant 0 : i32
    %146 = arith.cmpi slt, %139, %c0_i32_103 : i32
    %147 = vector.broadcast %146 : i1 to vector<64x1xi1>
    %148 = vector.broadcast %147 : vector<64x1xi1> to vector<64x1xi1>
    %149 = arith.xori %145, %148 : vector<64x1xi1>
    %150 = arith.andi %149, %143 : vector<64x1xi1>
    %151 = vector.broadcast %139 : i32 to vector<64x1xi32>
    %152 = arith.addi %141, %151 : vector<64x1xi32>
    %153 = arith.select %150, %152, %141 : vector<64x1xi1>, vector<64x1xi32>
    %c0_i32_104 = arith.constant 0 : i32
    %154 = vector.broadcast %c0_i32_104 : i32 to vector<64x1xi32>
    %155 = arith.cmpi sgt, %153, %154 : vector<64x1xi32>
    %c7_i32_105 = arith.constant 7 : i32
    %156 = vector.broadcast %c7_i32_105 : i32 to vector<64x1xi32>
    %157 = arith.cmpi slt, %153, %156 : vector<64x1xi32>
    %cst_106 = arith.constant 0.000000e+00 : f32
    %158 = vector.broadcast %cst_106 : f32 to vector<64x8xf32>
    %c0_107 = arith.constant 0 : index
    %c0_108 = arith.constant 0 : index
    %159 = vector.load %arg15[%c0_107, %c0_108] : memref<82x8xf32, #tpu.memory_space<vmem>>, vector<64x8xf32>
    %160 = arith.truncf %159 : vector<64x8xf32> to vector<64x8xbf16>
    %c0_i32_109 = arith.constant 0 : i32
    %161 = arith.sitofp %c0_i32_109 : i32 to bf16
    %162 = vector.shape_cast %155 : vector<64x1xi1> to vector<64x1xi1>
    %163 = vector.broadcast %162 : vector<64x1xi1> to vector<64x8xi1>
    %164 = vector.broadcast %161 : bf16 to vector<64x8xbf16>
    %165 = arith.select %163, %160, %164 : vector<64x8xi1>, vector<64x8xbf16>
    %c0_110 = arith.constant 0 : index
    %c0_111 = arith.constant 0 : index
    %c0_112 = arith.constant 0 : index
    %c0_113 = arith.constant 0 : index
    %166 = vector.load %arg8[%c0_110, %c0_111, %c0_112, %c0_113] : memref<3x3x8x8xbf16, #tpu.memory_space<vmem>>, vector<1x1x8x8xbf16>
    %167 = vector.shape_cast %166 : vector<1x1x8x8xbf16> to vector<8x8xbf16>
    %cst_114 = arith.constant dense<0.000000e+00> : vector<64x8xf32>
    %168 = tpu.matmul %165, %167, %cst_114 {dimension_numbers = #tpu.dot_dimension_numbers<[1], [0], [0], [1], [0, 0, 1, 1], [], []>} : vector<64x8xbf16>, vector<8x8xbf16>, vector<64x8xf32> -> vector<64x8xf32>
    %169 = arith.addf %158, %168 : vector<64x8xf32>
    %c1_115 = arith.constant 1 : index
    %c0_116 = arith.constant 0 : index
    %170 = vector.load %arg15[%c1_115, %c0_116] : memref<82x8xf32, #tpu.memory_space<vmem>>, vector<64x8xf32>
    %171 = arith.truncf %170 : vector<64x8xf32> to vector<64x8xbf16>
    %c0_117 = arith.constant 0 : index
    %c1_118 = arith.constant 1 : index
    %c0_119 = arith.constant 0 : index
    %c0_120 = arith.constant 0 : index
    %172 = vector.load %arg8[%c0_117, %c1_118, %c0_119, %c0_120] : memref<3x3x8x8xbf16, #tpu.memory_space<vmem>>, vector<1x1x8x8xbf16>
    %173 = vector.shape_cast %172 : vector<1x1x8x8xbf16> to vector<8x8xbf16>
    %cst_121 = arith.constant dense<0.000000e+00> : vector<64x8xf32>
    %174 = tpu.matmul %171, %173, %cst_121 {dimension_numbers = #tpu.dot_dimension_numbers<[1], [0], [0], [1], [0, 0, 1, 1], [], []>} : vector<64x8xbf16>, vector<8x8xbf16>, vector<64x8xf32> -> vector<64x8xf32>
    %175 = arith.addf %169, %174 : vector<64x8xf32>
    %c2_122 = arith.constant 2 : index
    %c0_123 = arith.constant 0 : index
    %176 = vector.load %arg15[%c2_122, %c0_123] : memref<82x8xf32, #tpu.memory_space<vmem>>, vector<64x8xf32>
    %177 = arith.truncf %176 : vector<64x8xf32> to vector<64x8xbf16>
    %c0_i32_124 = arith.constant 0 : i32
    %178 = arith.sitofp %c0_i32_124 : i32 to bf16
    %179 = vector.shape_cast %157 : vector<64x1xi1> to vector<64x1xi1>
    %180 = vector.broadcast %179 : vector<64x1xi1> to vector<64x8xi1>
    %181 = vector.broadcast %178 : bf16 to vector<64x8xbf16>
    %182 = arith.select %180, %177, %181 : vector<64x8xi1>, vector<64x8xbf16>
    %c0_125 = arith.constant 0 : index
    %c2_126 = arith.constant 2 : index
    %c0_127 = arith.constant 0 : index
    %c0_128 = arith.constant 0 : index
    %183 = vector.load %arg8[%c0_125, %c2_126, %c0_127, %c0_128] : memref<3x3x8x8xbf16, #tpu.memory_space<vmem>>, vector<1x1x8x8xbf16>
    %184 = vector.shape_cast %183 : vector<1x1x8x8xbf16> to vector<8x8xbf16>
    %cst_129 = arith.constant dense<0.000000e+00> : vector<64x8xf32>
    %185 = tpu.matmul %182, %184, %cst_129 {dimension_numbers = #tpu.dot_dimension_numbers<[1], [0], [0], [1], [0, 0, 1, 1], [], []>} : vector<64x8xbf16>, vector<8x8xbf16>, vector<64x8xf32> -> vector<64x8xf32>
    %186 = arith.addf %175, %185 : vector<64x8xf32>
    %c8_130 = arith.constant 8 : index
    %c0_131 = arith.constant 0 : index
    %187 = vector.load %arg15[%c8_130, %c0_131] : memref<82x8xf32, #tpu.memory_space<vmem>>, vector<64x8xf32>
    %188 = arith.truncf %187 : vector<64x8xf32> to vector<64x8xbf16>
    %c0_i32_132 = arith.constant 0 : i32
    %189 = arith.sitofp %c0_i32_132 : i32 to bf16
    %190 = vector.shape_cast %155 : vector<64x1xi1> to vector<64x1xi1>
    %191 = vector.broadcast %190 : vector<64x1xi1> to vector<64x8xi1>
    %192 = vector.broadcast %189 : bf16 to vector<64x8xbf16>
    %193 = arith.select %191, %188, %192 : vector<64x8xi1>, vector<64x8xbf16>
    %c1_133 = arith.constant 1 : index
    %c0_134 = arith.constant 0 : index
    %c0_135 = arith.constant 0 : index
    %c0_136 = arith.constant 0 : index
    %194 = vector.load %arg8[%c1_133, %c0_134, %c0_135, %c0_136] : memref<3x3x8x8xbf16, #tpu.memory_space<vmem>>, vector<1x1x8x8xbf16>
    %195 = vector.shape_cast %194 : vector<1x1x8x8xbf16> to vector<8x8xbf16>
    %cst_137 = arith.constant dense<0.000000e+00> : vector<64x8xf32>
    %196 = tpu.matmul %193, %195, %cst_137 {dimension_numbers = #tpu.dot_dimension_numbers<[1], [0], [0], [1], [0, 0, 1, 1], [], []>} : vector<64x8xbf16>, vector<8x8xbf16>, vector<64x8xf32> -> vector<64x8xf32>
    %197 = arith.addf %186, %196 : vector<64x8xf32>
    %c9_138 = arith.constant 9 : index
    %c0_139 = arith.constant 0 : index
    %198 = vector.load %arg15[%c9_138, %c0_139] : memref<82x8xf32, #tpu.memory_space<vmem>>, vector<64x8xf32>
    %199 = arith.truncf %198 : vector<64x8xf32> to vector<64x8xbf16>
    %c1_140 = arith.constant 1 : index
    %c1_141 = arith.constant 1 : index
    %c0_142 = arith.constant 0 : index
    %c0_143 = arith.constant 0 : index
    %200 = vector.load %arg8[%c1_140, %c1_141, %c0_142, %c0_143] : memref<3x3x8x8xbf16, #tpu.memory_space<vmem>>, vector<1x1x8x8xbf16>
    %201 = vector.shape_cast %200 : vector<1x1x8x8xbf16> to vector<8x8xbf16>
    %cst_144 = arith.constant dense<0.000000e+00> : vector<64x8xf32>
    %202 = tpu.matmul %199, %201, %cst_144 {dimension_numbers = #tpu.dot_dimension_numbers<[1], [0], [0], [1], [0, 0, 1, 1], [], []>} : vector<64x8xbf16>, vector<8x8xbf16>, vector<64x8xf32> -> vector<64x8xf32>
    %203 = arith.addf %197, %202 : vector<64x8xf32>
    %c10_145 = arith.constant 10 : index
    %c0_146 = arith.constant 0 : index
    %204 = vector.load %arg15[%c10_145, %c0_146] : memref<82x8xf32, #tpu.memory_space<vmem>>, vector<64x8xf32>
    %205 = arith.truncf %204 : vector<64x8xf32> to vector<64x8xbf16>
    %c0_i32_147 = arith.constant 0 : i32
    %206 = arith.sitofp %c0_i32_147 : i32 to bf16
    %207 = vector.shape_cast %157 : vector<64x1xi1> to vector<64x1xi1>
    %208 = vector.broadcast %207 : vector<64x1xi1> to vector<64x8xi1>
    %209 = vector.broadcast %206 : bf16 to vector<64x8xbf16>
    %210 = arith.select %208, %205, %209 : vector<64x8xi1>, vector<64x8xbf16>
    %c1_148 = arith.constant 1 : index
    %c2_149 = arith.constant 2 : index
    %c0_150 = arith.constant 0 : index
    %c0_151 = arith.constant 0 : index
    %211 = vector.load %arg8[%c1_148, %c2_149, %c0_150, %c0_151] : memref<3x3x8x8xbf16, #tpu.memory_space<vmem>>, vector<1x1x8x8xbf16>
    %212 = vector.shape_cast %211 : vector<1x1x8x8xbf16> to vector<8x8xbf16>
    %cst_152 = arith.constant dense<0.000000e+00> : vector<64x8xf32>
    %213 = tpu.matmul %210, %212, %cst_152 {dimension_numbers = #tpu.dot_dimension_numbers<[1], [0], [0], [1], [0, 0, 1, 1], [], []>} : vector<64x8xbf16>, vector<8x8xbf16>, vector<64x8xf32> -> vector<64x8xf32>
    %214 = arith.addf %203, %213 : vector<64x8xf32>
    %c16_153 = arith.constant 16 : index
    %c0_154 = arith.constant 0 : index
    %215 = vector.load %arg15[%c16_153, %c0_154] : memref<82x8xf32, #tpu.memory_space<vmem>>, vector<64x8xf32>
    %216 = arith.truncf %215 : vector<64x8xf32> to vector<64x8xbf16>
    %c0_i32_155 = arith.constant 0 : i32
    %217 = arith.sitofp %c0_i32_155 : i32 to bf16
    %218 = vector.shape_cast %155 : vector<64x1xi1> to vector<64x1xi1>
    %219 = vector.broadcast %218 : vector<64x1xi1> to vector<64x8xi1>
    %220 = vector.broadcast %217 : bf16 to vector<64x8xbf16>
    %221 = arith.select %219, %216, %220 : vector<64x8xi1>, vector<64x8xbf16>
    %c2_156 = arith.constant 2 : index
    %c0_157 = arith.constant 0 : index
    %c0_158 = arith.constant 0 : index
    %c0_159 = arith.constant 0 : index
    %222 = vector.load %arg8[%c2_156, %c0_157, %c0_158, %c0_159] : memref<3x3x8x8xbf16, #tpu.memory_space<vmem>>, vector<1x1x8x8xbf16>
    %223 = vector.shape_cast %222 : vector<1x1x8x8xbf16> to vector<8x8xbf16>
    %cst_160 = arith.constant dense<0.000000e+00> : vector<64x8xf32>
    %224 = tpu.matmul %221, %223, %cst_160 {dimension_numbers = #tpu.dot_dimension_numbers<[1], [0], [0], [1], [0, 0, 1, 1], [], []>} : vector<64x8xbf16>, vector<8x8xbf16>, vector<64x8xf32> -> vector<64x8xf32>
    %225 = arith.addf %214, %224 : vector<64x8xf32>
    %c17_161 = arith.constant 17 : index
    %c0_162 = arith.constant 0 : index
    %226 = vector.load %arg15[%c17_161, %c0_162] : memref<82x8xf32, #tpu.memory_space<vmem>>, vector<64x8xf32>
    %227 = arith.truncf %226 : vector<64x8xf32> to vector<64x8xbf16>
    %c2_163 = arith.constant 2 : index
    %c1_164 = arith.constant 1 : index
    %c0_165 = arith.constant 0 : index
    %c0_166 = arith.constant 0 : index
    %228 = vector.load %arg8[%c2_163, %c1_164, %c0_165, %c0_166] : memref<3x3x8x8xbf16, #tpu.memory_space<vmem>>, vector<1x1x8x8xbf16>
    %229 = vector.shape_cast %228 : vector<1x1x8x8xbf16> to vector<8x8xbf16>
    %cst_167 = arith.constant dense<0.000000e+00> : vector<64x8xf32>
    %230 = tpu.matmul %227, %229, %cst_167 {dimension_numbers = #tpu.dot_dimension_numbers<[1], [0], [0], [1], [0, 0, 1, 1], [], []>} : vector<64x8xbf16>, vector<8x8xbf16>, vector<64x8xf32> -> vector<64x8xf32>
    %231 = arith.addf %225, %230 : vector<64x8xf32>
    %c18_168 = arith.constant 18 : index
    %c0_169 = arith.constant 0 : index
    %232 = vector.load %arg15[%c18_168, %c0_169] : memref<82x8xf32, #tpu.memory_space<vmem>>, vector<64x8xf32>
    %233 = arith.truncf %232 : vector<64x8xf32> to vector<64x8xbf16>
    %c0_i32_170 = arith.constant 0 : i32
    %234 = arith.sitofp %c0_i32_170 : i32 to bf16
    %235 = vector.shape_cast %157 : vector<64x1xi1> to vector<64x1xi1>
    %236 = vector.broadcast %235 : vector<64x1xi1> to vector<64x8xi1>
    %237 = vector.broadcast %234 : bf16 to vector<64x8xbf16>
    %238 = arith.select %236, %233, %237 : vector<64x8xi1>, vector<64x8xbf16>
    %c2_171 = arith.constant 2 : index
    %c2_172 = arith.constant 2 : index
    %c0_173 = arith.constant 0 : index
    %c0_174 = arith.constant 0 : index
    %239 = vector.load %arg8[%c2_171, %c2_172, %c0_173, %c0_174] : memref<3x3x8x8xbf16, #tpu.memory_space<vmem>>, vector<1x1x8x8xbf16>
    %240 = vector.shape_cast %239 : vector<1x1x8x8xbf16> to vector<8x8xbf16>
    %cst_175 = arith.constant dense<0.000000e+00> : vector<64x8xf32>
    %241 = tpu.matmul %238, %240, %cst_175 {dimension_numbers = #tpu.dot_dimension_numbers<[1], [0], [0], [1], [0, 0, 1, 1], [], []>} : vector<64x8xbf16>, vector<8x8xbf16>, vector<64x8xf32> -> vector<64x8xf32>
    %242 = arith.addf %231, %241 : vector<64x8xf32>
    %c0_176 = arith.constant 0 : index
    %c0_177 = arith.constant 0 : index
    %243 = vector.load %arg9[%c0_176, %c0_177] : memref<1x8xf32, #tpu.memory_space<vmem>>, vector<1x8xf32>
    %244 = vector.broadcast %243 : vector<1x8xf32> to vector<64x8xf32>
    %245 = arith.addf %242, %244 : vector<64x8xf32>
    %cst_178 = arith.constant 0.000000e+00 : f32
    %246 = vector.broadcast %cst_178 : f32 to vector<64x8xf32>
    %247 = arith.maximumf %245, %246 : vector<64x8xf32>
    %cst_179 = arith.constant 0.000000e+00 : f32
    %248 = vector.broadcast %cst_179 : f32 to vector<9x8xf32>
    %c0_180 = arith.constant 0 : index
    %c0_181 = arith.constant 0 : index
    %249 = vector.load %arg15[%c0_180, %c0_181] : memref<82x8xf32, #tpu.memory_space<vmem>>, vector<9x8xf32>
    tpu.vector_store %arg15[%c0_180, %c0_181], %248 {strides = array<i32>} : memref<82x8xf32, #tpu.memory_space<vmem>>, vector<9x8xf32>,
    %c73_182 = arith.constant 73 : index
    %c0_183 = arith.constant 0 : index
    %250 = vector.load %arg15[%c73_182, %c0_183] : memref<82x8xf32, #tpu.memory_space<vmem>>, vector<9x8xf32>
    tpu.vector_store %arg15[%c73_182, %c0_183], %248 {strides = array<i32>} : memref<82x8xf32, #tpu.memory_space<vmem>>, vector<9x8xf32>,
    %c9_184 = arith.constant 9 : index
    %c0_185 = arith.constant 0 : index
    %251 = vector.load %arg15[%c9_184, %c0_185] : memref<82x8xf32, #tpu.memory_space<vmem>>, vector<64x8xf32>
    tpu.vector_store %arg15[%c9_184, %c0_185], %247 {strides = array<i32>} : memref<82x8xf32, #tpu.memory_space<vmem>>, vector<64x8xf32>,
    %252 = tpu.iota {dimensions = array<i32: 0>} : vector<64x1xi32>
    %c8_i32_186 = arith.constant 8 : i32
    %c0_i32_187 = arith.constant 0 : i32
    %253 = arith.cmpi eq, %c8_i32_186, %c0_i32_187 : i32
    %c1_i32_188 = arith.constant 1 : i32
    %254 = arith.select %253, %c1_i32_188, %c8_i32_186 : i32
    %255 = vector.broadcast %254 : i32 to vector<64x1xi32>
    %256 = arith.remsi %252, %255 : vector<64x1xi32>
    %c0_i32_189 = arith.constant 0 : i32
    %257 = vector.broadcast %c0_i32_189 : i32 to vector<64x1xi32>
    %258 = arith.cmpi ne, %256, %257 : vector<64x1xi32>
    %c0_i32_190 = arith.constant 0 : i32
    %259 = vector.broadcast %c0_i32_190 : i32 to vector<64x1xi32>
    %260 = arith.cmpi slt, %256, %259 : vector<64x1xi32>
    %c0_i32_191 = arith.constant 0 : i32
    %261 = arith.cmpi slt, %254, %c0_i32_191 : i32
    %262 = vector.broadcast %261 : i1 to vector<64x1xi1>
    %263 = vector.broadcast %262 : vector<64x1xi1> to vector<64x1xi1>
    %264 = arith.xori %260, %263 : vector<64x1xi1>
    %265 = arith.andi %264, %258 : vector<64x1xi1>
    %266 = vector.broadcast %254 : i32 to vector<64x1xi32>
    %267 = arith.addi %256, %266 : vector<64x1xi32>
    %268 = arith.select %265, %267, %256 : vector<64x1xi1>, vector<64x1xi32>
    %c0_i32_192 = arith.constant 0 : i32
    %269 = vector.broadcast %c0_i32_192 : i32 to vector<64x1xi32>
    %270 = arith.cmpi sgt, %268, %269 : vector<64x1xi32>
    %c7_i32_193 = arith.constant 7 : i32
    %271 = vector.broadcast %c7_i32_193 : i32 to vector<64x1xi32>
    %272 = arith.cmpi slt, %268, %271 : vector<64x1xi32>
    %cst_194 = arith.constant 0.000000e+00 : f32
    %273 = vector.broadcast %cst_194 : f32 to vector<64x4xf32>
    %c0_195 = arith.constant 0 : index
    %c0_196 = arith.constant 0 : index
    %274 = vector.load %arg15[%c0_195, %c0_196] : memref<82x8xf32, #tpu.memory_space<vmem>>, vector<64x8xf32>
    %275 = arith.truncf %274 : vector<64x8xf32> to vector<64x8xbf16>
    %c0_i32_197 = arith.constant 0 : i32
    %276 = arith.sitofp %c0_i32_197 : i32 to bf16
    %277 = vector.shape_cast %270 : vector<64x1xi1> to vector<64x1xi1>
    %278 = vector.broadcast %277 : vector<64x1xi1> to vector<64x8xi1>
    %279 = vector.broadcast %276 : bf16 to vector<64x8xbf16>
    %280 = arith.select %278, %275, %279 : vector<64x8xi1>, vector<64x8xbf16>
    %c0_198 = arith.constant 0 : index
    %c0_199 = arith.constant 0 : index
    %c0_200 = arith.constant 0 : index
    %c0_201 = arith.constant 0 : index
    %281 = vector.load %arg10[%c0_198, %c0_199, %c0_200, %c0_201] : memref<3x3x8x4xbf16, #tpu.memory_space<vmem>>, vector<1x1x8x4xbf16>
    %282 = vector.shape_cast %281 : vector<1x1x8x4xbf16> to vector<8x4xbf16>
    %cst_202 = arith.constant dense<0.000000e+00> : vector<64x4xf32>
    %283 = tpu.matmul %280, %282, %cst_202 {dimension_numbers = #tpu.dot_dimension_numbers<[1], [0], [0], [1], [0, 0, 1, 1], [], []>} : vector<64x8xbf16>, vector<8x4xbf16>, vector<64x4xf32> -> vector<64x4xf32>
    %284 = arith.addf %273, %283 : vector<64x4xf32>
    %c1_203 = arith.constant 1 : index
    %c0_204 = arith.constant 0 : index
    %285 = vector.load %arg15[%c1_203, %c0_204] : memref<82x8xf32, #tpu.memory_space<vmem>>, vector<64x8xf32>
    %286 = arith.truncf %285 : vector<64x8xf32> to vector<64x8xbf16>
    %c0_205 = arith.constant 0 : index
    %c1_206 = arith.constant 1 : index
    %c0_207 = arith.constant 0 : index
    %c0_208 = arith.constant 0 : index
    %287 = vector.load %arg10[%c0_205, %c1_206, %c0_207, %c0_208] : memref<3x3x8x4xbf16, #tpu.memory_space<vmem>>, vector<1x1x8x4xbf16>
    %288 = vector.shape_cast %287 : vector<1x1x8x4xbf16> to vector<8x4xbf16>
    %cst_209 = arith.constant dense<0.000000e+00> : vector<64x4xf32>
    %289 = tpu.matmul %286, %288, %cst_209 {dimension_numbers = #tpu.dot_dimension_numbers<[1], [0], [0], [1], [0, 0, 1, 1], [], []>} : vector<64x8xbf16>, vector<8x4xbf16>, vector<64x4xf32> -> vector<64x4xf32>
    %290 = arith.addf %284, %289 : vector<64x4xf32>
    %c2_210 = arith.constant 2 : index
    %c0_211 = arith.constant 0 : index
    %291 = vector.load %arg15[%c2_210, %c0_211] : memref<82x8xf32, #tpu.memory_space<vmem>>, vector<64x8xf32>
    %292 = arith.truncf %291 : vector<64x8xf32> to vector<64x8xbf16>
    %c0_i32_212 = arith.constant 0 : i32
    %293 = arith.sitofp %c0_i32_212 : i32 to bf16
    %294 = vector.shape_cast %272 : vector<64x1xi1> to vector<64x1xi1>
    %295 = vector.broadcast %294 : vector<64x1xi1> to vector<64x8xi1>
    %296 = vector.broadcast %293 : bf16 to vector<64x8xbf16>
    %297 = arith.select %295, %292, %296 : vector<64x8xi1>, vector<64x8xbf16>
    %c0_213 = arith.constant 0 : index
    %c2_214 = arith.constant 2 : index
    %c0_215 = arith.constant 0 : index
    %c0_216 = arith.constant 0 : index
    %298 = vector.load %arg10[%c0_213, %c2_214, %c0_215, %c0_216] : memref<3x3x8x4xbf16, #tpu.memory_space<vmem>>, vector<1x1x8x4xbf16>
    %299 = vector.shape_cast %298 : vector<1x1x8x4xbf16> to vector<8x4xbf16>
    %cst_217 = arith.constant dense<0.000000e+00> : vector<64x4xf32>
    %300 = tpu.matmul %297, %299, %cst_217 {dimension_numbers = #tpu.dot_dimension_numbers<[1], [0], [0], [1], [0, 0, 1, 1], [], []>} : vector<64x8xbf16>, vector<8x4xbf16>, vector<64x4xf32> -> vector<64x4xf32>
    %301 = arith.addf %290, %300 : vector<64x4xf32>
    %c8_218 = arith.constant 8 : index
    %c0_219 = arith.constant 0 : index
    %302 = vector.load %arg15[%c8_218, %c0_219] : memref<82x8xf32, #tpu.memory_space<vmem>>, vector<64x8xf32>
    %303 = arith.truncf %302 : vector<64x8xf32> to vector<64x8xbf16>
    %c0_i32_220 = arith.constant 0 : i32
    %304 = arith.sitofp %c0_i32_220 : i32 to bf16
    %305 = vector.shape_cast %270 : vector<64x1xi1> to vector<64x1xi1>
    %306 = vector.broadcast %305 : vector<64x1xi1> to vector<64x8xi1>
    %307 = vector.broadcast %304 : bf16 to vector<64x8xbf16>
    %308 = arith.select %306, %303, %307 : vector<64x8xi1>, vector<64x8xbf16>
    %c1_221 = arith.constant 1 : index
    %c0_222 = arith.constant 0 : index
    %c0_223 = arith.constant 0 : index
    %c0_224 = arith.constant 0 : index
    %309 = vector.load %arg10[%c1_221, %c0_222, %c0_223, %c0_224] : memref<3x3x8x4xbf16, #tpu.memory_space<vmem>>, vector<1x1x8x4xbf16>
    %310 = vector.shape_cast %309 : vector<1x1x8x4xbf16> to vector<8x4xbf16>
    %cst_225 = arith.constant dense<0.000000e+00> : vector<64x4xf32>
    %311 = tpu.matmul %308, %310, %cst_225 {dimension_numbers = #tpu.dot_dimension_numbers<[1], [0], [0], [1], [0, 0, 1, 1], [], []>} : vector<64x8xbf16>, vector<8x4xbf16>, vector<64x4xf32> -> vector<64x4xf32>
    %312 = arith.addf %301, %311 : vector<64x4xf32>
    %c9_226 = arith.constant 9 : index
    %c0_227 = arith.constant 0 : index
    %313 = vector.load %arg15[%c9_226, %c0_227] : memref<82x8xf32, #tpu.memory_space<vmem>>, vector<64x8xf32>
    %314 = arith.truncf %313 : vector<64x8xf32> to vector<64x8xbf16>
    %c1_228 = arith.constant 1 : index
    %c1_229 = arith.constant 1 : index
    %c0_230 = arith.constant 0 : index
    %c0_231 = arith.constant 0 : index
    %315 = vector.load %arg10[%c1_228, %c1_229, %c0_230, %c0_231] : memref<3x3x8x4xbf16, #tpu.memory_space<vmem>>, vector<1x1x8x4xbf16>
    %316 = vector.shape_cast %315 : vector<1x1x8x4xbf16> to vector<8x4xbf16>
    %cst_232 = arith.constant dense<0.000000e+00> : vector<64x4xf32>
    %317 = tpu.matmul %314, %316, %cst_232 {dimension_numbers = #tpu.dot_dimension_numbers<[1], [0], [0], [1], [0, 0, 1, 1], [], []>} : vector<64x8xbf16>, vector<8x4xbf16>, vector<64x4xf32> -> vector<64x4xf32>
    %318 = arith.addf %312, %317 : vector<64x4xf32>
    %c10_233 = arith.constant 10 : index
    %c0_234 = arith.constant 0 : index
    %319 = vector.load %arg15[%c10_233, %c0_234] : memref<82x8xf32, #tpu.memory_space<vmem>>, vector<64x8xf32>
    %320 = arith.truncf %319 : vector<64x8xf32> to vector<64x8xbf16>
    %c0_i32_235 = arith.constant 0 : i32
    %321 = arith.sitofp %c0_i32_235 : i32 to bf16
    %322 = vector.shape_cast %272 : vector<64x1xi1> to vector<64x1xi1>
    %323 = vector.broadcast %322 : vector<64x1xi1> to vector<64x8xi1>
    %324 = vector.broadcast %321 : bf16 to vector<64x8xbf16>
    %325 = arith.select %323, %320, %324 : vector<64x8xi1>, vector<64x8xbf16>
    %c1_236 = arith.constant 1 : index
    %c2_237 = arith.constant 2 : index
    %c0_238 = arith.constant 0 : index
    %c0_239 = arith.constant 0 : index
    %326 = vector.load %arg10[%c1_236, %c2_237, %c0_238, %c0_239] : memref<3x3x8x4xbf16, #tpu.memory_space<vmem>>, vector<1x1x8x4xbf16>
    %327 = vector.shape_cast %326 : vector<1x1x8x4xbf16> to vector<8x4xbf16>
    %cst_240 = arith.constant dense<0.000000e+00> : vector<64x4xf32>
    %328 = tpu.matmul %325, %327, %cst_240 {dimension_numbers = #tpu.dot_dimension_numbers<[1], [0], [0], [1], [0, 0, 1, 1], [], []>} : vector<64x8xbf16>, vector<8x4xbf16>, vector<64x4xf32> -> vector<64x4xf32>
    %329 = arith.addf %318, %328 : vector<64x4xf32>
    %c16_241 = arith.constant 16 : index
    %c0_242 = arith.constant 0 : index
    %330 = vector.load %arg15[%c16_241, %c0_242] : memref<82x8xf32, #tpu.memory_space<vmem>>, vector<64x8xf32>
    %331 = arith.truncf %330 : vector<64x8xf32> to vector<64x8xbf16>
    %c0_i32_243 = arith.constant 0 : i32
    %332 = arith.sitofp %c0_i32_243 : i32 to bf16
    %333 = vector.shape_cast %270 : vector<64x1xi1> to vector<64x1xi1>
    %334 = vector.broadcast %333 : vector<64x1xi1> to vector<64x8xi1>
    %335 = vector.broadcast %332 : bf16 to vector<64x8xbf16>
    %336 = arith.select %334, %331, %335 : vector<64x8xi1>, vector<64x8xbf16>
    %c2_244 = arith.constant 2 : index
    %c0_245 = arith.constant 0 : index
    %c0_246 = arith.constant 0 : index
    %c0_247 = arith.constant 0 : index
    %337 = vector.load %arg10[%c2_244, %c0_245, %c0_246, %c0_247] : memref<3x3x8x4xbf16, #tpu.memory_space<vmem>>, vector<1x1x8x4xbf16>
    %338 = vector.shape_cast %337 : vector<1x1x8x4xbf16> to vector<8x4xbf16>
    %cst_248 = arith.constant dense<0.000000e+00> : vector<64x4xf32>
    %339 = tpu.matmul %336, %338, %cst_248 {dimension_numbers = #tpu.dot_dimension_numbers<[1], [0], [0], [1], [0, 0, 1, 1], [], []>} : vector<64x8xbf16>, vector<8x4xbf16>, vector<64x4xf32> -> vector<64x4xf32>
    %340 = arith.addf %329, %339 : vector<64x4xf32>
    %c17_249 = arith.constant 17 : index
    %c0_250 = arith.constant 0 : index
    %341 = vector.load %arg15[%c17_249, %c0_250] : memref<82x8xf32, #tpu.memory_space<vmem>>, vector<64x8xf32>
    %342 = arith.truncf %341 : vector<64x8xf32> to vector<64x8xbf16>
    %c2_251 = arith.constant 2 : index
    %c1_252 = arith.constant 1 : index
    %c0_253 = arith.constant 0 : index
    %c0_254 = arith.constant 0 : index
    %343 = vector.load %arg10[%c2_251, %c1_252, %c0_253, %c0_254] : memref<3x3x8x4xbf16, #tpu.memory_space<vmem>>, vector<1x1x8x4xbf16>
    %344 = vector.shape_cast %343 : vector<1x1x8x4xbf16> to vector<8x4xbf16>
    %cst_255 = arith.constant dense<0.000000e+00> : vector<64x4xf32>
    %345 = tpu.matmul %342, %344, %cst_255 {dimension_numbers = #tpu.dot_dimension_numbers<[1], [0], [0], [1], [0, 0, 1, 1], [], []>} : vector<64x8xbf16>, vector<8x4xbf16>, vector<64x4xf32> -> vector<64x4xf32>
    %346 = arith.addf %340, %345 : vector<64x4xf32>
    %c18_256 = arith.constant 18 : index
    %c0_257 = arith.constant 0 : index
    %347 = vector.load %arg15[%c18_256, %c0_257] : memref<82x8xf32, #tpu.memory_space<vmem>>, vector<64x8xf32>
    %348 = arith.truncf %347 : vector<64x8xf32> to vector<64x8xbf16>
    %c0_i32_258 = arith.constant 0 : i32
    %349 = arith.sitofp %c0_i32_258 : i32 to bf16
    %350 = vector.shape_cast %272 : vector<64x1xi1> to vector<64x1xi1>
    %351 = vector.broadcast %350 : vector<64x1xi1> to vector<64x8xi1>
    %352 = vector.broadcast %349 : bf16 to vector<64x8xbf16>
    %353 = arith.select %351, %348, %352 : vector<64x8xi1>, vector<64x8xbf16>
    %c2_259 = arith.constant 2 : index
    %c2_260 = arith.constant 2 : index
    %c0_261 = arith.constant 0 : index
    %c0_262 = arith.constant 0 : index
    %354 = vector.load %arg10[%c2_259, %c2_260, %c0_261, %c0_262] : memref<3x3x8x4xbf16, #tpu.memory_space<vmem>>, vector<1x1x8x4xbf16>
    %355 = vector.shape_cast %354 : vector<1x1x8x4xbf16> to vector<8x4xbf16>
    %cst_263 = arith.constant dense<0.000000e+00> : vector<64x4xf32>
    %356 = tpu.matmul %353, %355, %cst_263 {dimension_numbers = #tpu.dot_dimension_numbers<[1], [0], [0], [1], [0, 0, 1, 1], [], []>} : vector<64x8xbf16>, vector<8x4xbf16>, vector<64x4xf32> -> vector<64x4xf32>
    %357 = arith.addf %346, %356 : vector<64x4xf32>
    %c0_264 = arith.constant 0 : index
    %c0_265 = arith.constant 0 : index
    %358 = vector.load %arg11[%c0_264, %c0_265] : memref<1x4xf32, #tpu.memory_space<vmem>>, vector<1x4xf32>
    %359 = vector.broadcast %358 : vector<1x4xf32> to vector<64x4xf32>
    %360 = arith.addf %357, %359 : vector<64x4xf32>
    %cst_266 = arith.constant 0.000000e+00 : f32
    %361 = vector.broadcast %cst_266 : f32 to vector<64x4xf32>
    %362 = arith.maximumf %360, %361 : vector<64x4xf32>
    %c0_267 = arith.constant 0 : index
    %c0_268 = arith.constant 0 : index
    %c0_269 = arith.constant 0 : index
    %363 = vector.load %arg1[%c0_267, %c0_268, %c0_269] : memref<1x256x4xbf16, #tpu.memory_space<vmem>>, vector<1x256x4xbf16>
    %364 = vector.shape_cast %363 : vector<1x256x4xbf16> to vector<256x4xbf16>
    %365 = arith.extf %364 : vector<256x4xbf16> to vector<256x4xf32>
    %cst_270 = arith.constant 0.000000e+00 : f32
    %366 = vector.broadcast %cst_270 : f32 to vector<17x4xf32>
    %c0_271 = arith.constant 0 : index
    %c0_272 = arith.constant 0 : index
    %367 = vector.load %arg13[%c0_271, %c0_272] : memref<290x4xf32, #tpu.memory_space<vmem>>, vector<17x4xf32>
    tpu.vector_store %arg13[%c0_271, %c0_272], %366 {strides = array<i32>} : memref<290x4xf32, #tpu.memory_space<vmem>>, vector<17x4xf32>,
    %c273 = arith.constant 273 : index
    %c0_273 = arith.constant 0 : index
    %368 = vector.load %arg13[%c273, %c0_273] : memref<290x4xf32, #tpu.memory_space<vmem>>, vector<17x4xf32>
    tpu.vector_store %arg13[%c273, %c0_273], %366 {strides = array<i32>} : memref<290x4xf32, #tpu.memory_space<vmem>>, vector<17x4xf32>,
    %c17_274 = arith.constant 17 : index
    %c0_275 = arith.constant 0 : index
    %369 = vector.load %arg13[%c17_274, %c0_275] : memref<290x4xf32, #tpu.memory_space<vmem>>, vector<256x4xf32>
    tpu.vector_store %arg13[%c17_274, %c0_275], %365 {strides = array<i32>} : memref<290x4xf32, #tpu.memory_space<vmem>>, vector<256x4xf32>,
    %370 = tpu.iota {dimensions = array<i32: 0>} : vector<256x1xi32>
    %c16_i32 = arith.constant 16 : i32
    %c0_i32_276 = arith.constant 0 : i32
    %371 = arith.cmpi eq, %c16_i32, %c0_i32_276 : i32
    %c1_i32_277 = arith.constant 1 : i32
    %372 = arith.select %371, %c1_i32_277, %c16_i32 : i32
    %373 = vector.broadcast %372 : i32 to vector<256x1xi32>
    %374 = arith.remsi %370, %373 : vector<256x1xi32>
    %c0_i32_278 = arith.constant 0 : i32
    %375 = vector.broadcast %c0_i32_278 : i32 to vector<256x1xi32>
    %376 = arith.cmpi ne, %374, %375 : vector<256x1xi32>
    %c0_i32_279 = arith.constant 0 : i32
    %377 = vector.broadcast %c0_i32_279 : i32 to vector<256x1xi32>
    %378 = arith.cmpi slt, %374, %377 : vector<256x1xi32>
    %c0_i32_280 = arith.constant 0 : i32
    %379 = arith.cmpi slt, %372, %c0_i32_280 : i32
    %380 = vector.broadcast %379 : i1 to vector<256x1xi1>
    %381 = vector.broadcast %380 : vector<256x1xi1> to vector<256x1xi1>
    %382 = arith.xori %378, %381 : vector<256x1xi1>
    %383 = arith.andi %382, %376 : vector<256x1xi1>
    %384 = vector.broadcast %372 : i32 to vector<256x1xi32>
    %385 = arith.addi %374, %384 : vector<256x1xi32>
    %386 = arith.select %383, %385, %374 : vector<256x1xi1>, vector<256x1xi32>
    %c0_i32_281 = arith.constant 0 : i32
    %387 = vector.broadcast %c0_i32_281 : i32 to vector<256x1xi32>
    %388 = arith.cmpi sgt, %386, %387 : vector<256x1xi32>
    %c15_i32 = arith.constant 15 : i32
    %389 = vector.broadcast %c15_i32 : i32 to vector<256x1xi32>
    %390 = arith.cmpi slt, %386, %389 : vector<256x1xi32>
    %cst_282 = arith.constant 0.000000e+00 : f32
    %391 = vector.broadcast %cst_282 : f32 to vector<256x4xf32>
    %c0_283 = arith.constant 0 : index
    %c0_284 = arith.constant 0 : index
    %392 = vector.load %arg13[%c0_283, %c0_284] : memref<290x4xf32, #tpu.memory_space<vmem>>, vector<256x4xf32>
    %393 = arith.truncf %392 : vector<256x4xf32> to vector<256x4xbf16>
    %c0_i32_285 = arith.constant 0 : i32
    %394 = arith.sitofp %c0_i32_285 : i32 to bf16
    %395 = vector.shape_cast %388 : vector<256x1xi1> to vector<256x1xi1>
    %396 = vector.broadcast %395 : vector<256x1xi1> to vector<256x4xi1>
    %397 = vector.broadcast %394 : bf16 to vector<256x4xbf16>
    %398 = arith.select %396, %393, %397 : vector<256x4xi1>, vector<256x4xbf16>
    %c0_286 = arith.constant 0 : index
    %c0_287 = arith.constant 0 : index
    %c0_288 = arith.constant 0 : index
    %c0_289 = arith.constant 0 : index
    %399 = vector.load %arg4[%c0_286, %c0_287, %c0_288, %c0_289] : memref<3x3x4x4xbf16, #tpu.memory_space<vmem>>, vector<1x1x4x4xbf16>
    %400 = vector.shape_cast %399 : vector<1x1x4x4xbf16> to vector<4x4xbf16>
    %cst_290 = arith.constant dense<0.000000e+00> : vector<256x4xf32>
    %401 = tpu.matmul %398, %400, %cst_290 {dimension_numbers = #tpu.dot_dimension_numbers<[1], [0], [0], [1], [0, 0, 1, 1], [], []>} : vector<256x4xbf16>, vector<4x4xbf16>, vector<256x4xf32> -> vector<256x4xf32>
    %402 = arith.addf %391, %401 : vector<256x4xf32>
    %c1_291 = arith.constant 1 : index
    %c0_292 = arith.constant 0 : index
    %403 = vector.load %arg13[%c1_291, %c0_292] : memref<290x4xf32, #tpu.memory_space<vmem>>, vector<256x4xf32>
    %404 = arith.truncf %403 : vector<256x4xf32> to vector<256x4xbf16>
    %c0_293 = arith.constant 0 : index
    %c1_294 = arith.constant 1 : index
    %c0_295 = arith.constant 0 : index
    %c0_296 = arith.constant 0 : index
    %405 = vector.load %arg4[%c0_293, %c1_294, %c0_295, %c0_296] : memref<3x3x4x4xbf16, #tpu.memory_space<vmem>>, vector<1x1x4x4xbf16>
    %406 = vector.shape_cast %405 : vector<1x1x4x4xbf16> to vector<4x4xbf16>
    %cst_297 = arith.constant dense<0.000000e+00> : vector<256x4xf32>
    %407 = tpu.matmul %404, %406, %cst_297 {dimension_numbers = #tpu.dot_dimension_numbers<[1], [0], [0], [1], [0, 0, 1, 1], [], []>} : vector<256x4xbf16>, vector<4x4xbf16>, vector<256x4xf32> -> vector<256x4xf32>
    %408 = arith.addf %402, %407 : vector<256x4xf32>
    %c2_298 = arith.constant 2 : index
    %c0_299 = arith.constant 0 : index
    %409 = vector.load %arg13[%c2_298, %c0_299] : memref<290x4xf32, #tpu.memory_space<vmem>>, vector<256x4xf32>
    %410 = arith.truncf %409 : vector<256x4xf32> to vector<256x4xbf16>
    %c0_i32_300 = arith.constant 0 : i32
    %411 = arith.sitofp %c0_i32_300 : i32 to bf16
    %412 = vector.shape_cast %390 : vector<256x1xi1> to vector<256x1xi1>
    %413 = vector.broadcast %412 : vector<256x1xi1> to vector<256x4xi1>
    %414 = vector.broadcast %411 : bf16 to vector<256x4xbf16>
    %415 = arith.select %413, %410, %414 : vector<256x4xi1>, vector<256x4xbf16>
    %c0_301 = arith.constant 0 : index
    %c2_302 = arith.constant 2 : index
    %c0_303 = arith.constant 0 : index
    %c0_304 = arith.constant 0 : index
    %416 = vector.load %arg4[%c0_301, %c2_302, %c0_303, %c0_304] : memref<3x3x4x4xbf16, #tpu.memory_space<vmem>>, vector<1x1x4x4xbf16>
    %417 = vector.shape_cast %416 : vector<1x1x4x4xbf16> to vector<4x4xbf16>
    %cst_305 = arith.constant dense<0.000000e+00> : vector<256x4xf32>
    %418 = tpu.matmul %415, %417, %cst_305 {dimension_numbers = #tpu.dot_dimension_numbers<[1], [0], [0], [1], [0, 0, 1, 1], [], []>} : vector<256x4xbf16>, vector<4x4xbf16>, vector<256x4xf32> -> vector<256x4xf32>
    %419 = arith.addf %408, %418 : vector<256x4xf32>
    %c16_306 = arith.constant 16 : index
    %c0_307 = arith.constant 0 : index
    %420 = vector.load %arg13[%c16_306, %c0_307] : memref<290x4xf32, #tpu.memory_space<vmem>>, vector<256x4xf32>
    %421 = arith.truncf %420 : vector<256x4xf32> to vector<256x4xbf16>
    %c0_i32_308 = arith.constant 0 : i32
    %422 = arith.sitofp %c0_i32_308 : i32 to bf16
    %423 = vector.shape_cast %388 : vector<256x1xi1> to vector<256x1xi1>
    %424 = vector.broadcast %423 : vector<256x1xi1> to vector<256x4xi1>
    %425 = vector.broadcast %422 : bf16 to vector<256x4xbf16>
    %426 = arith.select %424, %421, %425 : vector<256x4xi1>, vector<256x4xbf16>
    %c1_309 = arith.constant 1 : index
    %c0_310 = arith.constant 0 : index
    %c0_311 = arith.constant 0 : index
    %c0_312 = arith.constant 0 : index
    %427 = vector.load %arg4[%c1_309, %c0_310, %c0_311, %c0_312] : memref<3x3x4x4xbf16, #tpu.memory_space<vmem>>, vector<1x1x4x4xbf16>
    %428 = vector.shape_cast %427 : vector<1x1x4x4xbf16> to vector<4x4xbf16>
    %cst_313 = arith.constant dense<0.000000e+00> : vector<256x4xf32>
    %429 = tpu.matmul %426, %428, %cst_313 {dimension_numbers = #tpu.dot_dimension_numbers<[1], [0], [0], [1], [0, 0, 1, 1], [], []>} : vector<256x4xbf16>, vector<4x4xbf16>, vector<256x4xf32> -> vector<256x4xf32>
    %430 = arith.addf %419, %429 : vector<256x4xf32>
    %c17_314 = arith.constant 17 : index
    %c0_315 = arith.constant 0 : index
    %431 = vector.load %arg13[%c17_314, %c0_315] : memref<290x4xf32, #tpu.memory_space<vmem>>, vector<256x4xf32>
    %432 = arith.truncf %431 : vector<256x4xf32> to vector<256x4xbf16>
    %c1_316 = arith.constant 1 : index
    %c1_317 = arith.constant 1 : index
    %c0_318 = arith.constant 0 : index
    %c0_319 = arith.constant 0 : index
    %433 = vector.load %arg4[%c1_316, %c1_317, %c0_318, %c0_319] : memref<3x3x4x4xbf16, #tpu.memory_space<vmem>>, vector<1x1x4x4xbf16>
    %434 = vector.shape_cast %433 : vector<1x1x4x4xbf16> to vector<4x4xbf16>
    %cst_320 = arith.constant dense<0.000000e+00> : vector<256x4xf32>
    %435 = tpu.matmul %432, %434, %cst_320 {dimension_numbers = #tpu.dot_dimension_numbers<[1], [0], [0], [1], [0, 0, 1, 1], [], []>} : vector<256x4xbf16>, vector<4x4xbf16>, vector<256x4xf32> -> vector<256x4xf32>
    %436 = arith.addf %430, %435 : vector<256x4xf32>
    %c18_321 = arith.constant 18 : index
    %c0_322 = arith.constant 0 : index
    %437 = vector.load %arg13[%c18_321, %c0_322] : memref<290x4xf32, #tpu.memory_space<vmem>>, vector<256x4xf32>
    %438 = arith.truncf %437 : vector<256x4xf32> to vector<256x4xbf16>
    %c0_i32_323 = arith.constant 0 : i32
    %439 = arith.sitofp %c0_i32_323 : i32 to bf16
    %440 = vector.shape_cast %390 : vector<256x1xi1> to vector<256x1xi1>
    %441 = vector.broadcast %440 : vector<256x1xi1> to vector<256x4xi1>
    %442 = vector.broadcast %439 : bf16 to vector<256x4xbf16>
    %443 = arith.select %441, %438, %442 : vector<256x4xi1>, vector<256x4xbf16>
    %c1_324 = arith.constant 1 : index
    %c2_325 = arith.constant 2 : index
    %c0_326 = arith.constant 0 : index
    %c0_327 = arith.constant 0 : index
    %444 = vector.load %arg4[%c1_324, %c2_325, %c0_326, %c0_327] : memref<3x3x4x4xbf16, #tpu.memory_space<vmem>>, vector<1x1x4x4xbf16>
    %445 = vector.shape_cast %444 : vector<1x1x4x4xbf16> to vector<4x4xbf16>
    %cst_328 = arith.constant dense<0.000000e+00> : vector<256x4xf32>
    %446 = tpu.matmul %443, %445, %cst_328 {dimension_numbers = #tpu.dot_dimension_numbers<[1], [0], [0], [1], [0, 0, 1, 1], [], []>} : vector<256x4xbf16>, vector<4x4xbf16>, vector<256x4xf32> -> vector<256x4xf32>
    %447 = arith.addf %436, %446 : vector<256x4xf32>
    %c32 = arith.constant 32 : index
    %c0_329 = arith.constant 0 : index
    %448 = vector.load %arg13[%c32, %c0_329] : memref<290x4xf32, #tpu.memory_space<vmem>>, vector<256x4xf32>
    %449 = arith.truncf %448 : vector<256x4xf32> to vector<256x4xbf16>
    %c0_i32_330 = arith.constant 0 : i32
    %450 = arith.sitofp %c0_i32_330 : i32 to bf16
    %451 = vector.shape_cast %388 : vector<256x1xi1> to vector<256x1xi1>
    %452 = vector.broadcast %451 : vector<256x1xi1> to vector<256x4xi1>
    %453 = vector.broadcast %450 : bf16 to vector<256x4xbf16>
    %454 = arith.select %452, %449, %453 : vector<256x4xi1>, vector<256x4xbf16>
    %c2_331 = arith.constant 2 : index
    %c0_332 = arith.constant 0 : index
    %c0_333 = arith.constant 0 : index
    %c0_334 = arith.constant 0 : index
    %455 = vector.load %arg4[%c2_331, %c0_332, %c0_333, %c0_334] : memref<3x3x4x4xbf16, #tpu.memory_space<vmem>>, vector<1x1x4x4xbf16>
    %456 = vector.shape_cast %455 : vector<1x1x4x4xbf16> to vector<4x4xbf16>
    %cst_335 = arith.constant dense<0.000000e+00> : vector<256x4xf32>
    %457 = tpu.matmul %454, %456, %cst_335 {dimension_numbers = #tpu.dot_dimension_numbers<[1], [0], [0], [1], [0, 0, 1, 1], [], []>} : vector<256x4xbf16>, vector<4x4xbf16>, vector<256x4xf32> -> vector<256x4xf32>
    %458 = arith.addf %447, %457 : vector<256x4xf32>
    %c33 = arith.constant 33 : index
    %c0_336 = arith.constant 0 : index
    %459 = vector.load %arg13[%c33, %c0_336] : memref<290x4xf32, #tpu.memory_space<vmem>>, vector<256x4xf32>
    %460 = arith.truncf %459 : vector<256x4xf32> to vector<256x4xbf16>
    %c2_337 = arith.constant 2 : index
    %c1_338 = arith.constant 1 : index
    %c0_339 = arith.constant 0 : index
    %c0_340 = arith.constant 0 : index
    %461 = vector.load %arg4[%c2_337, %c1_338, %c0_339, %c0_340] : memref<3x3x4x4xbf16, #tpu.memory_space<vmem>>, vector<1x1x4x4xbf16>
    %462 = vector.shape_cast %461 : vector<1x1x4x4xbf16> to vector<4x4xbf16>
    %cst_341 = arith.constant dense<0.000000e+00> : vector<256x4xf32>
    %463 = tpu.matmul %460, %462, %cst_341 {dimension_numbers = #tpu.dot_dimension_numbers<[1], [0], [0], [1], [0, 0, 1, 1], [], []>} : vector<256x4xbf16>, vector<4x4xbf16>, vector<256x4xf32> -> vector<256x4xf32>
    %464 = arith.addf %458, %463 : vector<256x4xf32>
    %c34 = arith.constant 34 : index
    %c0_342 = arith.constant 0 : index
    %465 = vector.load %arg13[%c34, %c0_342] : memref<290x4xf32, #tpu.memory_space<vmem>>, vector<256x4xf32>
    %466 = arith.truncf %465 : vector<256x4xf32> to vector<256x4xbf16>
    %c0_i32_343 = arith.constant 0 : i32
    %467 = arith.sitofp %c0_i32_343 : i32 to bf16
    %468 = vector.shape_cast %390 : vector<256x1xi1> to vector<256x1xi1>
    %469 = vector.broadcast %468 : vector<256x1xi1> to vector<256x4xi1>
    %470 = vector.broadcast %467 : bf16 to vector<256x4xbf16>
    %471 = arith.select %469, %466, %470 : vector<256x4xi1>, vector<256x4xbf16>
    %c2_344 = arith.constant 2 : index
    %c2_345 = arith.constant 2 : index
    %c0_346 = arith.constant 0 : index
    %c0_347 = arith.constant 0 : index
    %472 = vector.load %arg4[%c2_344, %c2_345, %c0_346, %c0_347] : memref<3x3x4x4xbf16, #tpu.memory_space<vmem>>, vector<1x1x4x4xbf16>
    %473 = vector.shape_cast %472 : vector<1x1x4x4xbf16> to vector<4x4xbf16>
    %cst_348 = arith.constant dense<0.000000e+00> : vector<256x4xf32>
    %474 = tpu.matmul %471, %473, %cst_348 {dimension_numbers = #tpu.dot_dimension_numbers<[1], [0], [0], [1], [0, 0, 1, 1], [], []>} : vector<256x4xbf16>, vector<4x4xbf16>, vector<256x4xf32> -> vector<256x4xf32>
    %475 = arith.addf %464, %474 : vector<256x4xf32>
    %c0_349 = arith.constant 0 : index
    %c0_350 = arith.constant 0 : index
    %476 = vector.load %arg5[%c0_349, %c0_350] : memref<1x4xf32, #tpu.memory_space<vmem>>, vector<1x4xf32>
    %477 = vector.broadcast %476 : vector<1x4xf32> to vector<256x4xf32>
    %478 = arith.addf %475, %477 : vector<256x4xf32>
    %cst_351 = arith.constant 0.000000e+00 : f32
    %479 = vector.broadcast %cst_351 : f32 to vector<256x4xf32>
    %480 = arith.maximumf %478, %479 : vector<256x4xf32>
    %c0_352 = arith.constant 0 : index
    %c0_353 = arith.constant 0 : index
    %481 = vector.load %arg3[%c0_352, %c0_353] : memref<256x64xf32, #tpu.memory_space<vmem>>, vector<256x64xf32>
    %cst_354 = arith.constant dense<0.000000e+00> : vector<256x4xf32>
    %482 = tpu.matmul %481, %362, %cst_354 {dimension_numbers = #tpu.dot_dimension_numbers<[1], [0], [0], [1], [0, 0, 1, 1], [], []>} : vector<256x64xf32>, vector<64x4xf32>, vector<256x4xf32> -> vector<256x4xf32>
    %483 = arith.addf %480, %482 : vector<256x4xf32>
    %c0_355 = arith.constant 0 : index
    %c0_356 = arith.constant 0 : index
    %c0_357 = arith.constant 0 : index
    %484 = vector.load %arg12[%c0_355, %c0_356, %c0_357] : memref<1x256x4xf32, #tpu.memory_space<vmem>>, vector<1x256x4xf32>
    %485 = vector.shape_cast %484 : vector<1x256x4xf32> to vector<256x4xf32>
    %486 = vector.shape_cast %483 : vector<256x4xf32> to vector<1x256x4xf32>
    tpu.vector_store %arg12[%c0_355, %c0_356, %c0_357], %486 {strides = array<i32>} : memref<1x256x4xf32, #tpu.memory_space<vmem>>, vector<1x256x4xf32>,
    return
  }
  func.func @transform_0(%arg0: i32) -> (i32, i32, i32) {
    %c0_i32 = arith.constant 0 : i32
    %c0_i32_0 = arith.constant 0 : i32
    %c0_i32_1 = arith.constant 0 : i32
    return %arg0, %c0_i32, %c0_i32_0 : i32, i32, i32
  }
  func.func @transform_1(%arg0: i32) -> (i32, i32, i32) {
    %c0_i32 = arith.constant 0 : i32
    %c0_i32_0 = arith.constant 0 : i32
    %c0_i32_1 = arith.constant 0 : i32
    %c0_i32_2 = arith.constant 0 : i32
    return %c0_i32, %c0_i32_0, %c0_i32_1 : i32, i32, i32
  }
  func.func @transform_2(%arg0: i32) -> (i32, i32) {
    %c0_i32 = arith.constant 0 : i32
    %c0_i32_0 = arith.constant 0 : i32
    %c0_i32_1 = arith.constant 0 : i32
    return %c0_i32, %c0_i32_0 : i32, i32
  }
  func.func @transform_3(%arg0: i32) -> (i32, i32, i32, i32) {
    %c0_i32 = arith.constant 0 : i32
    %c0_i32_0 = arith.constant 0 : i32
    %c0_i32_1 = arith.constant 0 : i32
    %c0_i32_2 = arith.constant 0 : i32
    %c0_i32_3 = arith.constant 0 : i32
    return %c0_i32, %c0_i32_0, %c0_i32_1, %c0_i32_2 : i32, i32, i32, i32
  }
  func.func @transform_4(%arg0: i32) -> (i32, i32) {
    %c0_i32 = arith.constant 0 : i32
    %c0_i32_0 = arith.constant 0 : i32
    %c0_i32_1 = arith.constant 0 : i32
    return %c0_i32, %c0_i32_0 : i32, i32
  }
  func.func @transform_5(%arg0: i32) -> (i32, i32, i32, i32) {
    %c0_i32 = arith.constant 0 : i32
    %c0_i32_0 = arith.constant 0 : i32
    %c0_i32_1 = arith.constant 0 : i32
    %c0_i32_2 = arith.constant 0 : i32
    %c0_i32_3 = arith.constant 0 : i32
    return %c0_i32, %c0_i32_0, %c0_i32_1, %c0_i32_2 : i32, i32, i32, i32
  }
  func.func @transform_6(%arg0: i32) -> (i32, i32) {
    %c0_i32 = arith.constant 0 : i32
    %c0_i32_0 = arith.constant 0 : i32
    %c0_i32_1 = arith.constant 0 : i32
    return %c0_i32, %c0_i32_0 : i32, i32
  }
  func.func @transform_7(%arg0: i32) -> (i32, i32, i32, i32) {
    %c0_i32 = arith.constant 0 : i32
    %c0_i32_0 = arith.constant 0 : i32
    %c0_i32_1 = arith.constant 0 : i32
    %c0_i32_2 = arith.constant 0 : i32
    %c0_i32_3 = arith.constant 0 : i32
    return %c0_i32, %c0_i32_0, %c0_i32_1, %c0_i32_2 : i32, i32, i32, i32
  }
  func.func @transform_8(%arg0: i32) -> (i32, i32) {
    %c0_i32 = arith.constant 0 : i32
    %c0_i32_0 = arith.constant 0 : i32
    %c0_i32_1 = arith.constant 0 : i32
    return %c0_i32, %c0_i32_0 : i32, i32
  }
  func.func @transform_9(%arg0: i32) -> (i32, i32, i32, i32) {
    %c0_i32 = arith.constant 0 : i32
    %c0_i32_0 = arith.constant 0 : i32
    %c0_i32_1 = arith.constant 0 : i32
    %c0_i32_2 = arith.constant 0 : i32
    %c0_i32_3 = arith.constant 0 : i32
    return %c0_i32, %c0_i32_0, %c0_i32_1, %c0_i32_2 : i32, i32, i32, i32
  }
  func.func @transform_10(%arg0: i32) -> (i32, i32) {
    %c0_i32 = arith.constant 0 : i32
    %c0_i32_0 = arith.constant 0 : i32
    %c0_i32_1 = arith.constant 0 : i32
    return %c0_i32, %c0_i32_0 : i32, i32
  }
  func.func @transform_11(%arg0: i32) -> (i32, i32, i32) {
    %c0_i32 = arith.constant 0 : i32
    %c0_i32_0 = arith.constant 0 : i32
    %c0_i32_1 = arith.constant 0 : i32
    return %arg0, %c0_i32, %c0_i32_0 : i32, i32, i32
  }
}

</mosaic_0001>

<bundles_post_ra>
// kernel: hgblock_forward.1
= control target key start
LH: loop header
LB: loop body
LE: loop exit
PB: predicated region body
PF: predicated region fallthrough
CT: control target
= control target key end

     0   :  { %s10139_s17 = smov 0   ;;  %s13887_s0 = inlined_call_operand.vmem [shape: bf16[2,256,4], index: 0, kind: input, shape index: {}]   ;;  %s13888_s1 = inlined_call_operand.vmem [shape: f32[4,64,256], index: 1, kind: input, shape index: {}]   ;;  %s13889_s2 = inlined_call_operand.vmem [shape: f32[256,64], index: 2, kind: input, shape index: {}]   ;;  %s13890_s3 = inlined_call_operand.vmem [shape: bf16[3,3,4,4], index: 3, kind: input, shape index: {}]   ;;  %s13891_s4 = inlined_call_operand.vmem [shape: f32[1,4], index: 4, kind: input, shape index: {}]   ;;  %s13892_s5 = inlined_call_operand.vmem [shape: bf16[3,3,4,8], index: 5, kind: input, shape index: {}]   ;;  %s13893_s6 = inlined_call_operand.vmem [shape: f32[1,8], index: 6, kind: input, shape index: {}]   ;;  %s13894_s7 = inlined_call_operand.vmem [shape: bf16[3,3,8,8], index: 7, kind: input, shape index: {}]   ;;  %s13895_s8 = inlined_call_operand.vmem [shape: f32[1,8], index: 8, kind: input, shape index: {}]   ;;  %s13896_s9 = inlined_call_operand.vmem [shape: bf16[3,3,8,4], index: 9, kind: input, shape index: {}]   ;;  %s13897_s10 = inlined_call_operand.vmem [shape: f32[1,4], index: 10, kind: input, shape index: {}]   ;;  %s13898_s11 = inlined_call_operand.vmem [shape: f32[2,256,4], index: 11, kind: output, shape index: {}]  }
   0x1 LB: > { %s8247_s18 = sadd.s32 4294967295, %s10074_s17   ;;  %p8251_p0 = scmp.ge.s32.totalorder %s10074_s17, 1  ;;  %s10074_s17 = sphi %s10139_s17, %s21_s17  }
   0x2   : > { %p337_p1 = scmp.lt.s32.totalorder %s10074_s17, 3 }
   0x4   : > { %p338_p2 = pnand %p8251_p0, %p337_p1 }
   0x6   : > { %341 = sbr.rel (%p338_p2) target bundleno = 1480 (0x5c8), region = 64 }
   0xb   : > { %p377_p3 = scmp.lt.s32.totalorder %s8247_s18, 1  ;;  %v455_v0 = vld [vmem:[%s13888_s1 + $0x8] sm:$0xff]  ;;  %v454_v50 = vld [vmem:[%s13888_s1] sm:$0xff]  ;;  %v457_v52 = vld [vmem:[%s13888_s1 + $0x18] sm:$0xff]  ;;  %vm13938_vm0 = vcmask 31744   ;;  %vm967_vm1 = vcmask 24576  }
   0xc   : > { %v8257_v1 = vld [vmem:[%s13888_s1 + $0x88] sm:$0xff]  ;;  %534 = vmatprep.mubr.f32.mxu0 %v455_v0  ;;  %v8256_v51 = vld [vmem:[%s13888_s1 + $0x80] sm:$0xff]  ;;  %v8259_v53 = vld [vmem:[%s13888_s1 + $0x98] sm:$0xff]  ;;  %vm13935_vm2 = vcmask 1041408  }
   0xd   : > { %656 = vmatprep.mubr.f32.mxu1 %v8257_v1  ;;  %s14567_s18 = smov (!%p377_p3, %s8247_s18), 1  ;;  %v456_v54 = vld [vmem:[%s13888_s1 + $0x10] sm:$0xff]  ;;  %v459_v56 = vld [vmem:[%s13888_s1 + $0x28] sm:$0xff]  ;;  %v458_v58 = vld [vmem:[%s13888_s1 + $0x20] sm:$0xff] }
   0xe   : > { %s8666_s23 = sshll.u32 %s14567_s18, 7  ;;  %v8258_v55 = vld [vmem:[%s13888_s1 + $0x90] sm:$0xff]  ;;  %v8261_v57 = vld [vmem:[%s13888_s1 + $0xa8] sm:$0xff]  ;;  %v8260_v59 = vld [vmem:[%s13888_s1 + $0xa0] sm:$0xff]  ;;  %s8667_s15 = sshll.u32 %s14567_s18, 8 }
   0xf   : > { %s10159_s26 = scalar_lea.vmem %s13887_s0, %s8666_s23  ;;  %v461_v60 = vld [vmem:[%s13888_s1 + $0x38] sm:$0xff]  ;;  %v460_v62 = vld [vmem:[%s13888_s1 + $0x30] sm:$0xff]  ;;  %v463_v0 = vld [vmem:[%s13888_s1 + $0x48] sm:$0xff] }
  0x10   : > { %v8810_v2 = vld [vmem:[%s10159_s26 + $0x78] sm:$0xff]   ;;  %v8809_v4 = vld [vmem:[%s10159_s26 + $0x70] sm:$0xff]   ;;  %v8808_v12 = vld [vmem:[%s10159_s26 + $0x68] sm:$0xff]  }
  0x11   : > { %v8802_v3 = vld [vmem:[%s10159_s26 + $0x38] sm:$0xff]   ;;  %v10164_v5 = vunpack.c.h.bf16 %v8810_v2  ;;  %v10168_v7 = vunpack.c.l.bf16 %v8810_v2  ;;  %v8801_v8 = vld [vmem:[%s10159_s26 + $0x30] sm:$0xff]   ;;  %v10175_v10 = vunpack.c.h.bf16 %v8809_v4  ;;  %v10184_v13 = vunpack.c.l.bf16 %v8809_v4  ;;  %v8800_v14 = vld [vmem:[%s10159_s26 + $0x28] sm:$0xff]  }
  0x12   : > { %v10166_v6 = vunpack.c.h.bf16 %v8802_v3  ;;  %v10171_v9 = vunpack.c.l.bf16 %v8802_v3  ;;  %v10179_v11 = vunpack.c.h.bf16 %v8801_v8  ;;  %v10189_v15 = vunpack.c.l.bf16 %v8801_v8  ;;  %v8807_v18 = vld [vmem:[%s10159_s26 + $0x60] sm:$0xff]   ;;  %v8806_v24 = vld [vmem:[%s10159_s26 + $0x58] sm:$0xff]   ;;  %v8805_v30 = vld [vmem:[%s10159_s26 + $0x50] sm:$0xff]  }
  0x13   : > { %8826 = vmatprep.subr.mxu0 %v10164_v5  ;;  %8882 = vmatprep.subr.mxu1 %v10164_v5  ;;  %v10193_v16 = vunpack.c.h.bf16 %v8808_v12  ;;  %v10197_v17 = vunpack.c.h.bf16 %v8800_v14  ;;  %v10202_v19 = vunpack.c.l.bf16 %v8808_v12  ;;  %v8799_v20 = vld [vmem:[%s10159_s26 + $0x20] sm:$0xff]   ;;  %v10207_v21 = vunpack.c.l.bf16 %v8800_v14  ;;  %v8798_v26 = vld [vmem:[%s10159_s26 + $0x18] sm:$0xff]   ;;  %v8797_v32 = vld [vmem:[%s10159_s26 + $0x10] sm:$0xff]  }
  0x14   : > { %8827 = vmatpush3.msra.mxu0 %v10166_v6  ;;  %8883 = vmatpush3.msra.mxu1 %v10166_v6  ;;  %v10211_v22 = vunpack.c.h.bf16 %v8807_v18  ;;  %v10215_v23 = vunpack.c.h.bf16 %v8799_v20  ;;  %v10220_v25 = vunpack.c.l.bf16 %v8807_v18  ;;  %v10225_v27 = vunpack.c.l.bf16 %v8799_v20  ;;  %v8804_v36 = vld [vmem:[%s10159_s26 + $0x48] sm:$0xff]   ;;  %v8803_v42 = vld [vmem:[%s10159_s26 + $0x40] sm:$0xff]   ;;  %v8263_v61 = vld [vmem:[%s13888_s1 + $0xb8] sm:$0xff] }
  0x15   : > { %8828 = vmatprep.subr.mxu0 %v10168_v7  ;;  %8884 = vmatprep.subr.mxu1 %v10168_v7  ;;  %v10229_v28 = vunpack.c.h.bf16 %v8806_v24  ;;  %v10233_v29 = vunpack.c.h.bf16 %v8798_v26  ;;  %v10238_v31 = vunpack.c.l.bf16 %v8806_v24  ;;  %v10243_v33 = vunpack.c.l.bf16 %v8798_v26  ;;  %v8796_v38 = vld [vmem:[%s10159_s26 + $0x8] sm:$0xff]   ;;  %v8669_v44 = vld [vmem:[%s10159_s26] sm:$0xff]   ;;  %v8262_v63 = vld [vmem:[%s13888_s1 + $0xb0] sm:$0xff] }
  0x16   : > { %8829 = vmatpush3.msra.mxu0 %v10171_v9  ;;  %8885 = vmatpush3.msra.mxu1 %v10171_v9  ;;  %v10247_v34 = vunpack.c.h.bf16 %v8805_v30  ;;  %v10251_v35 = vunpack.c.h.bf16 %v8797_v32  ;;  %v10256_v37 = vunpack.c.l.bf16 %v8805_v30  ;;  %v10261_v39 = vunpack.c.l.bf16 %v8797_v32  ;;  %v8265_v1 = vld [vmem:[%s13888_s1 + $0xc8] sm:$0xff]  ;;  %v462_v2 = vld [vmem:[%s13888_s1 + $0x40] sm:$0xff]  ;;  %v465_v4 = vld [vmem:[%s13888_s1 + $0x58] sm:$0xff] }
  0x17   : > { %8830 = vmatprep.subr.mxu0 %v10175_v10  ;;  %8886 = vmatprep.subr.mxu1 %v10175_v10  ;;  %v10265_v40 = vunpack.c.h.bf16 %v8804_v36  ;;  %v10269_v41 = vunpack.c.h.bf16 %v8796_v38  ;;  %v10274_v43 = vunpack.c.l.bf16 %v8804_v36  ;;  %v10279_v45 = vunpack.c.l.bf16 %v8796_v38  ;;  %v8264_v3 = vld [vmem:[%s13888_s1 + $0xc0] sm:$0xff]  ;;  %v467_v8 = vld [vmem:[%s13888_s1 + $0x68] sm:$0xff]  ;;  %v469_v12 = vld [vmem:[%s13888_s1 + $0x78] sm:$0xff] }
  0x18   : > { %8831 = vmatpush3.msra.mxu0 %v10179_v11  ;;  %8887 = vmatpush3.msra.mxu1 %v10179_v11  ;;  %v10283_v46 = vunpack.c.h.bf16 %v8803_v42  ;;  %v10287_v47 = vunpack.c.h.bf16 %v8669_v44  ;;  %v10291_v48 = vunpack.c.l.bf16 %v8803_v42  ;;  %v10295_v49 = vunpack.c.l.bf16 %v8669_v44  ;;  %v468_v14 = vld [vmem:[%s13888_s1 + $0x70] sm:$0xff]  ;;  %v8272_v18 = vld [vmem:[%s13888_s1 + $0x100] sm:$0xff]  ;;  %v8275_v20 = vld [vmem:[%s13888_s1 + $0x118] sm:$0xff] }
  0x19   : > { %8832 = vmatprep.subr.mxu0 %v10184_v13  ;;  %8888 = vmatprep.subr.mxu1 %v10184_v13  ;;  %v8277_v24 = vld [vmem:[%s13888_s1 + $0x128] sm:$0xff]  ;;  %v8276_v26 = vld [vmem:[%s13888_s1 + $0x120] sm:$0xff]  ;;  %v8278_v30 = vld [vmem:[%s13888_s1 + $0x130] sm:$0xff] }
  0x1a   : > { %8833 = vmatpush3.msra.mxu0 %v10189_v15  ;;  %8889 = vmatpush3.msra.mxu1 %v10189_v15  ;;  %v8281_v32 = vld [vmem:[%s13888_s1 + $0x148] sm:$0xff]  ;;  %v8283_v36 = vld [vmem:[%s13888_s1 + $0x158] sm:$0xff]  ;;  %v8282_v38 = vld [vmem:[%s13888_s1 + $0x150] sm:$0xff] }
  0x1b   : > { %8834 = vmatprep.subr.mxu0 %v10193_v16  ;;  %8890 = vmatprep.subr.mxu1 %v10193_v16  ;;  %v8284_v42 = vld [vmem:[%s13888_s1 + $0x160] sm:$0xff]  ;;  %v8287_v44 = vld [vmem:[%s13888_s1 + $0x178] sm:$0xff] }
  0x1c   : > { %8835 = vmatpush3.msra.mxu0 %v10197_v17  ;;  %8891 = vmatpush3.msra.mxu1 %v10197_v17 }
  0x1d   : > { %8836 = vmatprep.subr.mxu0 %v10202_v19  ;;  %8892 = vmatprep.subr.mxu1 %v10202_v19 }
  0x1e   : > { %8837 = vmatpush3.msra.mxu0 %v10207_v21  ;;  %8893 = vmatpush3.msra.mxu1 %v10207_v21 }
  0x1f   : > { %8838 = vmatprep.subr.mxu0 %v10211_v22  ;;  %8894 = vmatprep.subr.mxu1 %v10211_v22 }
  0x20   : > { %8839 = vmatpush3.msra.mxu0 %v10215_v23  ;;  %8895 = vmatpush3.msra.mxu1 %v10215_v23 }
  0x21   : > { %8840 = vmatprep.subr.mxu0 %v10220_v25  ;;  %8896 = vmatprep.subr.mxu1 %v10220_v25 }
  0x22   : > { %8841 = vmatpush3.msra.mxu0 %v10225_v27  ;;  %8897 = vmatpush3.msra.mxu1 %v10225_v27 }
  0x23   : > { %8842 = vmatprep.subr.mxu0 %v10229_v28  ;;  %8898 = vmatprep.subr.mxu1 %v10229_v28 }
  0x24   : > { %8843 = vmatpush3.msra.mxu0 %v10233_v29  ;;  %8899 = vmatpush3.msra.mxu1 %v10233_v29 }
  0x25   : > { %8844 = vmatprep.subr.mxu0 %v10238_v31  ;;  %8900 = vmatprep.subr.mxu1 %v10238_v31 }
  0x26   : > { %8845 = vmatpush3.msra.mxu0 %v10243_v33  ;;  %8901 = vmatpush3.msra.mxu1 %v10243_v33 }
  0x27   : > { %8846 = vmatprep.subr.mxu0 %v10247_v34  ;;  %8902 = vmatprep.subr.mxu1 %v10247_v34 }
  0x28   : > { %8847 = vmatpush3.msra.mxu0 %v10251_v35  ;;  %8903 = vmatpush3.msra.mxu1 %v10251_v35 }
  0x29   : > { %8848 = vmatprep.subr.mxu0 %v10256_v37  ;;  %8904 = vmatprep.subr.mxu1 %v10256_v37 }
  0x2a   : > { %8849 = vmatpush3.msra.mxu0 %v10261_v39  ;;  %8905 = vmatpush3.msra.mxu1 %v10261_v39 }
  0x2b   : > { %8850 = vmatprep.subr.mxu0 %v10265_v40  ;;  %8906 = vmatprep.subr.mxu1 %v10265_v40 }
  0x2c   : > { %8851 = vmatpush3.msra.mxu0 %v10269_v41  ;;  %8907 = vmatpush3.msra.mxu1 %v10269_v41 }
  0x2d   : > { %8852 = vmatprep.subr.mxu0 %v10274_v43  ;;  %8908 = vmatprep.subr.mxu1 %v10274_v43 }
  0x2e   : > { %8853 = vmatpush3.msra.mxu0 %v10279_v45  ;;  %8909 = vmatpush3.msra.mxu1 %v10279_v45 }
  0x2f   : > { %8854 = vmatprep.subr.mxu0 %v10283_v46  ;;  %8910 = vmatprep.subr.mxu1 %v10283_v46 }
  0x30   : > { %8855 = vmatpush3.msra.mxu0 %v10287_v47  ;;  %8911 = vmatpush3.msra.mxu1 %v10287_v47 }
  0x31   : > { %8856 = vmatprep.subr.mxu0 %v10291_v48  ;;  %8912 = vmatprep.subr.mxu1 %v10291_v48 }
  0x32   : > { %8857 = vmatpush3.msra.mxu0 %v10295_v49  ;;  %8913 = vmatpush3.msra.mxu1 %v10295_v49 }
  0x33   : > { %535 = vmatmul.mubr.f32.vlgmr.msra.gmra.mxu0 %v454_v50  ;;  %657 = vmatmul.mubr.f32.vlgmr.msra.gmra.mxu1 %v8256_v51  ;;  %v10580_v51 = vld [vmem:[%s13892_s5 + $0x4] sm:$0x3] }
  0x34   : > { %8938 = vmatprep.subr.mxu0 %v10164_v5  ;;  %8994 = vmatprep.subr.mxu1 %v10164_v5  ;;  %v8267_v5 = vld [vmem:[%s13888_s1 + $0xd8] sm:$0xff] }
  0x35   : > { %8939 = vmatpush3.msra.mxu0 %v10166_v6  ;;  %8995 = vmatpush3.msra.mxu1 %v10166_v6  ;;  %v464_v6 = vld [vmem:[%s13888_s1 + $0x50] sm:$0xff] }
  0x36   : > { %8940 = vmatprep.subr.mxu0 %v10168_v7  ;;  %8996 = vmatprep.subr.mxu1 %v10168_v7  ;;  %v8266_v7 = vld [vmem:[%s13888_s1 + $0xd0] sm:$0xff] }
  0x37   : > { %539 = vmatprep.mubr.f32.mxu0 %v457_v52  ;;  %661 = vmatprep.mubr.f32.mxu1 %v8259_v53  ;;  %v10587_v52 = vld [vmem:[%s13892_s5] sm:$0x3] }
  0x38   : > { %8941 = vmatpush3.msra.mxu0 %v10171_v9  ;;  %8997 = vmatpush3.msra.mxu1 %v10171_v9  ;;  %v8269_v9 = vld [vmem:[%s13888_s1 + $0xe8] sm:$0xff] }
  0x39   : > { %540 = vmatmul.mubr.f32.gmra.mxu0 %v456_v54  ;;  %662 = vmatmul.mubr.f32.gmra.mxu1 %v8258_v55 }
  0x3a   : > { %8942 = vmatprep.subr.mxu0 %v10175_v10  ;;  %8998 = vmatprep.subr.mxu1 %v10175_v10  ;;  %v466_v10 = vld [vmem:[%s13888_s1 + $0x60] sm:$0xff] }
  0x3b   : > { %8943 = vmatpush3.msra.mxu0 %v10179_v11  ;;  %8999 = vmatpush3.msra.mxu1 %v10179_v11  ;;  %v8268_v11 = vld [vmem:[%s13888_s1 + $0xe0] sm:$0xff] }
  0x3c   : > { %8944 = vmatprep.subr.mxu0 %v10184_v13  ;;  %9000 = vmatprep.subr.mxu1 %v10184_v13  ;;  %v8271_v13 = vld [vmem:[%s13888_s1 + $0xf8] sm:$0xff] }
  0x3d   : > { %544 = vmatprep.mubr.f32.mxu0 %v459_v56  ;;  %666 = vmatprep.mubr.f32.mxu1 %v8261_v57 }
  0x3e   : > { %8945 = vmatpush3.msra.mxu0 %v10189_v15  ;;  %9001 = vmatpush3.msra.mxu1 %v10189_v15  ;;  %v8270_v15 = vld [vmem:[%s13888_s1 + $0xf0] sm:$0xff] }
  0x3f   : > { %545 = vmatmul.mubr.f32.gmra.mxu0 %v458_v58  ;;  %667 = vmatmul.mubr.f32.gmra.mxu1 %v8260_v59 }
  0x40   : > { %8946 = vmatprep.subr.mxu0 %v10193_v16  ;;  %9002 = vmatprep.subr.mxu1 %v10193_v16  ;;  %v8273_v16 = vld [vmem:[%s13888_s1 + $0x108] sm:$0xff] }
  0x41   : > { %8947 = vmatpush3.msra.mxu0 %v10197_v17  ;;  %9003 = vmatpush3.msra.mxu1 %v10197_v17  ;;  %v8289_v17 = vld [vmem:[%s13888_s1 + $0x188] sm:$0xff] }
  0x42   : > { %8948 = vmatprep.subr.mxu0 %v10202_v19  ;;  %9004 = vmatprep.subr.mxu1 %v10202_v19  ;;  %v8288_v19 = vld [vmem:[%s13888_s1 + $0x180] sm:$0xff] }
  0x43   : > { %549 = vmatprep.mubr.f32.mxu0 %v461_v60  ;;  %671 = vmatprep.mubr.f32.mxu1 %v8263_v61 }
  0x44   : > { %8949 = vmatpush3.msra.mxu0 %v10207_v21  ;;  %9005 = vmatpush3.msra.mxu1 %v10207_v21  ;;  %v8291_v21 = vld [vmem:[%s13888_s1 + $0x198] sm:$0xff] }
  0x45   : > { %550 = vmatmul.mubr.f32.gmra.mxu0 %v460_v62  ;;  %672 = vmatmul.mubr.f32.gmra.mxu1 %v8262_v63 }
  0x46   : > { %8950 = vmatprep.subr.mxu0 %v10211_v22  ;;  %9006 = vmatprep.subr.mxu1 %v10211_v22  ;;  %v8274_v22 = vld [vmem:[%s13888_s1 + $0x110] sm:$0xff] }
  0x47   : > { %8951 = vmatpush3.msra.mxu0 %v10215_v23  ;;  %9007 = vmatpush3.msra.mxu1 %v10215_v23  ;;  %v8290_v23 = vld [vmem:[%s13888_s1 + $0x190] sm:$0xff] }
  0x48   : > { %8952 = vmatprep.subr.mxu0 %v10220_v25  ;;  %9008 = vmatprep.subr.mxu1 %v10220_v25  ;;  %v8293_v25 = vld [vmem:[%s13888_s1 + $0x1a8] sm:$0xff] }
  0x49   : > { %554 = vmatprep.mubr.f32.mxu0 %v463_v0  ;;  %676 = vmatprep.mubr.f32.mxu1 %v8265_v1 }
  0x4a   : > { %8953 = vmatpush3.msra.mxu0 %v10225_v27  ;;  %9009 = vmatpush3.msra.mxu1 %v10225_v27  ;;  %v8292_v27 = vld [vmem:[%s13888_s1 + $0x1a0] sm:$0xff] }
  0x4b   : > { %555 = vmatmul.mubr.f32.gmra.mxu0 %v462_v2  ;;  %677 = vmatmul.mubr.f32.gmra.mxu1 %v8264_v3 }
  0x4c   : > { %8954 = vmatprep.subr.mxu0 %v10229_v28  ;;  %9010 = vmatprep.subr.mxu1 %v10229_v28  ;;  %v8279_v28 = vld [vmem:[%s13888_s1 + $0x138] sm:$0xff] }
  0x4d   : > { %8955 = vmatpush3.msra.mxu0 %v10233_v29  ;;  %9011 = vmatpush3.msra.mxu1 %v10233_v29  ;;  %v8295_v29 = vld [vmem:[%s13888_s1 + $0x1b8] sm:$0xff] }
  0x4e   : > { %8956 = vmatprep.subr.mxu0 %v10238_v31  ;;  %9012 = vmatprep.subr.mxu1 %v10238_v31  ;;  %v8294_v31 = vld [vmem:[%s13888_s1 + $0x1b0] sm:$0xff] }
  0x4f   : > { %559 = vmatprep.mubr.f32.mxu0 %v465_v4  ;;  %681 = vmatprep.mubr.f32.mxu1 %v8267_v5 }
  0x50   : > { %8957 = vmatpush3.msra.mxu0 %v10243_v33  ;;  %9013 = vmatpush3.msra.mxu1 %v10243_v33  ;;  %v8297_v33 = vld [vmem:[%s13888_s1 + $0x1c8] sm:$0xff] }
  0x51   : > { %560 = vmatmul.mubr.f32.gmra.mxu0 %v464_v6  ;;  %682 = vmatmul.mubr.f32.gmra.mxu1 %v8266_v7 }
  0x52   : > { %8958 = vmatprep.subr.mxu0 %v10247_v34  ;;  %9014 = vmatprep.subr.mxu1 %v10247_v34  ;;  %v8280_v34 = vld [vmem:[%s13888_s1 + $0x140] sm:$0xff] }
  0x53   : > { %8959 = vmatpush3.msra.mxu0 %v10251_v35  ;;  %9015 = vmatpush3.msra.mxu1 %v10251_v35  ;;  %v8296_v35 = vld [vmem:[%s13888_s1 + $0x1c0] sm:$0xff] }
  0x54   : > { %8960 = vmatprep.subr.mxu0 %v10256_v37  ;;  %9016 = vmatprep.subr.mxu1 %v10256_v37  ;;  %v8299_v37 = vld [vmem:[%s13888_s1 + $0x1d8] sm:$0xff] }
  0x55   : > { %564 = vmatprep.mubr.f32.mxu0 %v467_v8  ;;  %686 = vmatprep.mubr.f32.mxu1 %v8269_v9 }
  0x56   : > { %8961 = vmatpush3.msra.mxu0 %v10261_v39  ;;  %9017 = vmatpush3.msra.mxu1 %v10261_v39  ;;  %v8298_v39 = vld [vmem:[%s13888_s1 + $0x1d0] sm:$0xff] }
  0x57   : > { %565 = vmatmul.mubr.f32.gmra.mxu0 %v466_v10  ;;  %687 = vmatmul.mubr.f32.gmra.mxu1 %v8268_v11 }
  0x58   : > { %8962 = vmatprep.subr.mxu0 %v10265_v40  ;;  %9018 = vmatprep.subr.mxu1 %v10265_v40  ;;  %v8285_v40 = vld [vmem:[%s13888_s1 + $0x168] sm:$0xff] }
  0x59   : > { %8963 = vmatpush3.msra.mxu0 %v10269_v41  ;;  %9019 = vmatpush3.msra.mxu1 %v10269_v41  ;;  %v8301_v41 = vld [vmem:[%s13888_s1 + $0x1e8] sm:$0xff] }
  0x5a   : > { %8964 = vmatprep.subr.mxu0 %v10274_v43  ;;  %9020 = vmatprep.subr.mxu1 %v10274_v43  ;;  %v8300_v43 = vld [vmem:[%s13888_s1 + $0x1e0] sm:$0xff] }
  0x5b   : > { %569 = vmatprep.mubr.f32.mxu0 %v469_v12  ;;  %691 = vmatprep.mubr.f32.mxu1 %v8271_v13 }
  0x5c   : > { %8965 = vmatpush3.msra.mxu0 %v10279_v45  ;;  %9021 = vmatpush3.msra.mxu1 %v10279_v45  ;;  %v8303_v45 = vld [vmem:[%s13888_s1 + $0x1f8] sm:$0xff] }
  0x5d   : > { %570 = vmatmul.mubr.f32.gmra.mxu0 %v468_v14  ;;  %692 = vmatmul.mubr.f32.gmra.mxu1 %v8270_v15 }
  0x5e   : > { %8966 = vmatprep.subr.mxu0 %v10283_v46  ;;  %9022 = vmatprep.subr.mxu1 %v10283_v46  ;;  %v8286_v46 = vld [vmem:[%s13888_s1 + $0x170] sm:$0xff] }
  0x5f   : > { %8967 = vmatpush3.msra.mxu0 %v10287_v47  ;;  %9023 = vmatpush3.msra.mxu1 %v10287_v47  ;;  %v8302_v47 = vld [vmem:[%s13888_s1 + $0x1f0] sm:$0xff] }
  0x60   : > { %8968 = vmatprep.subr.mxu0 %v10291_v48  ;;  %9024 = vmatprep.subr.mxu1 %v10291_v48  ;;  %v13901_v48 = vmov 0.0  }
  0x61   : > { %8969 = vmatpush3.msra.mxu0 %v10295_v49  ;;  %786 = vmatprep.mubr.f32.mxu0 %v8273_v16  ;;  %966 = vst.msk [vmem:[#allocation3] sm:$0xff] %vm13938_vm0, %v13901_v48  ;;  %969 = vst.msk [vmem:[#allocation3 + $0x49] sm:$0xff] %vm13938_vm0, %v13901_v48 }
  0x62   : > { %9025 = vmatpush3.msra.mxu1 %v10295_v49  ;;  %916 = vmatprep.mubr.f32.mxu1 %v8289_v17  ;;  %968 = vst.msk [vmem:[#allocation3 + $0x8] sm:$0x1] %vm967_vm1, %v13901_v48  ;;  %970 = vst.msk [vmem:[#allocation3 + $0x51] sm:$0x1] %vm967_vm1, %v13901_v48  ;;  %v8308_v49 = vld [vmem:[%s13892_s5 + $0x2] sm:$0x3] }
  0x63   : > { %787 = vmatmul.mubr.f32.vlgmr.msra.gmra.mxu0 %v8272_v18  ;;  %917 = vmatmul.mubr.f32.vlgmr.msra.gmra.mxu1 %v8288_v19  ;;  %4132 = vst.msk [vmem:[#allocation2] sm:$0xff] %vm13938_vm0, %v13901_v48  ;;  %4133 = vst.msk [vmem:[#allocation2 + $0x8] sm:$0xff] %vm13938_vm0, %v13901_v48  ;;  %v1193_v50 = vsel %vm13935_vm2, %v8308_v49, 0 }
  0x64   : > { %791 = vmatprep.mubr.f32.mxu0 %v8275_v20  ;;  %921 = vmatprep.mubr.f32.mxu1 %v8291_v21  ;;  %4134 = vst.msk [vmem:[#allocation2 + $0x10] sm:$0x1] %vm967_vm1, %v13901_v48  ;;  %4137 = vst.msk [vmem:[#allocation2 + $0x121] sm:$0x1] %vm967_vm1, %v13901_v48  ;;  %v979_v21 = vlaneseq }
  0x65   : > { %4135 = vst.msk [vmem:[#allocation2 + $0x111] sm:$0xff] %vm13938_vm0, %v13901_v48  ;;  %4136 = vst.msk [vmem:[#allocation2 + $0x119] sm:$0xff] %vm13938_vm0, %v13901_v48  ;;  %10021 = vmatprep.subr.msk.bf16.mxu1 %vm13935_vm2, %v8308_v49  ;;  %10020 = vmatprep.subr.msk.bf16.mxu0 %vm13935_vm2, %v8308_v49 }
  0x66   : > { %10019 = vmatpush3.bf16.msra.mxu1 %v1193_v50  ;;  %9379 = vmatpush3.bf16.msra.mxu0 %v1193_v50 }
  0x67   : > { %792 = vmatmul.mubr.f32.gmra.mxu0 %v8274_v22  ;;  %922 = vmatmul.mubr.f32.gmra.mxu1 %v8290_v23 }
  0x68   : > { %796 = vmatprep.mubr.f32.mxu0 %v8277_v24  ;;  %926 = vmatprep.mubr.f32.mxu1 %v8293_v25 }
  0x69   : > { %10023 = vmatprep.subr.msk.bf16.mxu0 %vm13935_vm2, %v10580_v51  ;;  %10022 = vmatprep.subr.msk.bf16.mxu1 %vm13935_vm2, %v10587_v52 }
  0x6b   : > { %797 = vmatmul.mubr.f32.gmra.mxu0 %v8276_v26  ;;  %927 = vmatmul.mubr.f32.gmra.mxu1 %v8292_v27  ;;  %v10623_v26 = vshrl.u32 %v979_v21, 7 }
  0x6c   : > { %801 = vmatprep.mubr.f32.mxu0 %v8279_v28  ;;  %931 = vmatprep.mubr.f32.mxu1 %v8295_v29 }
  0x6d   : > { %14016 = vst [vmem:[#allocation5_spill] sm:$0xff] %v10623_v26  ;;  %v10631_v50 = vadd.s32 16, %v10623_v26 }
  0x6f   : > { %802 = vmatmul.mubr.f32.gmra.mxu0 %v8278_v30  ;;  %932 = vmatmul.mubr.f32.gmra.mxu1 %v8294_v31  ;;  %14018 = vst [vmem:[#allocation7_spill] sm:$0xff] %v10631_v50 }
  0x70   : > { %806 = vmatprep.mubr.f32.mxu0 %v8281_v32  ;;  %936 = vmatprep.mubr.f32.mxu1 %v8297_v33 }
  0x73   : > { %807 = vmatmul.mubr.f32.gmra.mxu0 %v8280_v34  ;;  %937 = vmatmul.mubr.f32.gmra.mxu1 %v8296_v35  ;;  %v10626_v35 = vadd.s32 8, %v10623_v26 }
  0x74   : > { %811 = vmatprep.mubr.f32.mxu0 %v8283_v36  ;;  %941 = vmatprep.mubr.f32.mxu1 %v8299_v37 }
  0x75   : > { %14017 = vst [vmem:[#allocation6_spill] sm:$0xff] %v10626_v35  ;;  %v999_v49 = vand.u32 7, %v10626_v35 }
  0x77   : > { %812 = vmatmul.mubr.f32.gmra.mxu0 %v8282_v38  ;;  %942 = vmatmul.mubr.f32.gmra.mxu1 %v8298_v39  ;;  %vm10645_vm4 = vcmp.lt.s32.totalorder %v999_v49, 7 }
  0x78   : > { %816 = vmatprep.mubr.f32.mxu0 %v8285_v40  ;;  %946 = vmatprep.mubr.f32.mxu1 %v8301_v41  ;;  %vm1369_vm6 = vmpackc.low %vm10645_vm4, %vm10645_vm4 }
  0x7b   : > { %817 = vmatmul.mubr.f32.gmra.mxu0 %v8284_v42  ;;  %947 = vmatmul.mubr.f32.gmra.mxu1 %v8300_v43 }
  0x7c   : > { %821 = vmatprep.mubr.f32.mxu0 %v8287_v44  ;;  %951 = vmatprep.mubr.f32.mxu1 %v8303_v45 }
  0x7f   : > { %822 = vmatmul.mubr.f32.gmra.mxu0 %v8286_v46  ;;  %952 = vmatmul.mubr.f32.gmra.mxu1 %v8302_v47  ;;  %v992_v47 = vand.u32 7, %v10623_v26 }
  0x81   : > { %vm10639_vm3 = vcmp.lt.s32.totalorder %v992_v47, 7  ;;  %vm10751_vm14 = vcmp.gt.s32.totalorder %v992_v47, 0  ;;  %v1419_v47 = vsel %vm13935_vm2, %v10580_v51, 0  ;;  %v8331_v51 = vld [vmem:[%s13892_s5 + $0x8] sm:$0x3] }
  0x82   : > { %vm1368_vm5 = vmpackc.low %vm10639_vm3, %vm10639_vm3  ;;  %vm10778_vm3 = vcmp.gt.s32.totalorder %v999_v49, 0 }
  0x83   : > { %vm1128_vm4 = vmpackc.low %vm10751_vm14, %vm10751_vm14 }
  0xf3   : > { %v8858_v53 = vpop.f32.mrf.mxu0  ;;  %v8914_v54 = vpop.f32.mrf.mxu1 }
  0xf5   : > { %v8859_v55 = vpop.f32.mrf.mxu0  ;;  %v8915_v56 = vpop.f32.mrf.mxu1 }
  0xf6   : > { %v8860_v22 = vadd.f32 %v8859_v55, %v8858_v53  ;;  %v8916_v23 = vadd.f32 %v8915_v56, %v8914_v54  ;;  %v10635_v55 = vadd.s32 24, %v10623_v26 }
  0xf8   : > { %v697_v29 = vmax.f32 %v8860_v22, %v8916_v23  ;;  %14019 = vst [vmem:[#allocation8_spill] sm:$0xff] %v10635_v55  ;;  %v1006_v23 = vand.u32 7, %v10631_v50 }
  0xf9   : > { %v8861_v57 = vpop.f32.mrf.mxu0  ;;  %v8917_v58 = vpop.f32.mrf.mxu1 }
  0xfa   : > { %vm10664_vm7 = vcmp.lt.s32.totalorder %v1006_v23, 7 }
  0xfb   : > { %v8862_v59 = vpop.f32.mrf.mxu0  ;;  %v8918_v60 = vpop.f32.mrf.mxu1  ;;  %vm1370_vm9 = vmpackc.low %vm10664_vm7, %vm10664_vm7 }
  0xfc   : > { %v8863_v30 = vadd.f32 %v8862_v59, %v8861_v57  ;;  %v8919_v31 = vadd.f32 %v8918_v60, %v8917_v58 }
  0xfe   : > { %v698_v42 = vmax.f32 %v8863_v30, %v8919_v31 }
  0xff   : > { %v8864_v61 = vpop.f32.mrf.mxu0  ;;  %v8920_v62 = vpop.f32.mrf.mxu1 }
 0x101   : > { %v8865_v63 = vpop.f32.mrf.mxu0  ;;  %v8921_v0 = vpop.f32.mrf.mxu1 }
 0x102   : > { %v8866_v38 = vadd.f32 %v8865_v63, %v8864_v61  ;;  %v8922_v39 = vadd.f32 %v8921_v0, %v8920_v62 }
 0x104   : > { %v699_v56 = vmax.f32 %v8866_v38, %v8922_v39 }
 0x105   : > { %v8867_v1 = vpop.f32.mrf.mxu0  ;;  %v8923_v2 = vpop.f32.mrf.mxu1 }
 0x107   : > { %v8868_v3 = vpop.f32.mrf.mxu0  ;;  %v8924_v4 = vpop.f32.mrf.mxu1 }
 0x108   : > { %v8869_v61 = vadd.f32 %v8868_v3, %v8867_v1  ;;  %v8925_v62 = vadd.f32 %v8924_v4, %v8923_v2 }
 0x10a   : > { %v700_v30 = vmax.f32 %v8869_v61, %v8925_v62 }
 0x10b   : > { %v10591_v5 = vpop.f32.mrf.mxu0  ;;  %v10593_v6 = vpop.f32.mrf.mxu1 }
 0x10d   : > { %v10595_v7 = vpop.f32.mrf.mxu0  ;;  %v10597_v8 = vpop.f32.mrf.mxu1 }
 0x10e   : > { %v8872_v1 = vadd.f32 %v10595_v7, %v10591_v5  ;;  %v8928_v2 = vadd.f32 %v10597_v8, %v10593_v6 }
 0x111   : > { %v10599_v9 = vpop.f32.mrf.mxu0  ;;  %v10601_v10 = vpop.f32.mrf.mxu1 }
 0x113   : > { %v10603_v11 = vpop.f32.mrf.mxu0  ;;  %v10605_v12 = vpop.f32.mrf.mxu1 }
 0x117   : > { %v10607_v13 = vpop.f32.mrf.mxu0  ;;  %v10609_v14 = vpop.f32.mrf.mxu1 }
 0x119   : > { %v10611_v15 = vpop.f32.mrf.mxu0  ;;  %v10613_v16 = vpop.f32.mrf.mxu1 }
 0x11d   : > { %v10615_v17 = vpop.f32.mrf.mxu0  ;;  %v10617_v18 = vpop.f32.mrf.mxu1 }
 0x11f   : > { %v10619_v19 = vpop.f32.mrf.mxu0  ;;  %v10621_v20 = vpop.f32.mrf.mxu1 }
 0x123   : > { %v8970_v24 = vpop.f32.mrf.mxu0  ;;  %v9026_v25 = vpop.f32.mrf.mxu1 }
 0x125   : > { %v8971_v27 = vpop.f32.mrf.mxu0  ;;  %v9027_v28 = vpop.f32.mrf.mxu1 }
 0x126   : > { %v8972_v32 = vadd.f32 %v8971_v27, %v8970_v24  ;;  %v9028_v37 = vadd.f32 %v9027_v28, %v9026_v25  ;;  %v1013_v27 = vand.u32 7, %v10635_v55  ;;  %v1165_v28 = vld [vmem:[#allocation3 + $0x1] sm:$0xff] }
 0x127   : > { %v8973_v33 = vpop.f32.mrf.mxu0  ;;  %v9029_v34 = vpop.f32.mrf.mxu1 }
 0x128   : > { %v827_v36 = vmax.f32 %v697_v29, %v8972_v32  ;;  %vm10670_vm8 = vcmp.lt.s32.totalorder %v1013_v27, 7 }
 0x129   : > { %v8974_v40 = vpop.f32.mrf.mxu0  ;;  %v9030_v41 = vpop.f32.mrf.mxu1  ;;  %vm1371_vm10 = vmpackc.low %vm10670_vm8, %vm10670_vm8 }
 0x12a   : > { %v957_v43 = vmax.f32 %v827_v36, %v9028_v37  ;;  %v8975_v44 = vadd.f32 %v8974_v40, %v8973_v33  ;;  %v9031_v54 = vadd.f32 %v9030_v41, %v9029_v34  ;;  %v13899_v33 = vmov 0  }
 0x12b   : > { %v8976_v45 = vpop.f32.mrf.mxu0  ;;  %v9032_v46 = vpop.f32.mrf.mxu1  ;;  %v1376_v34 = vsel %vm1368_vm5, 65537, %v13899_v33  ;;  %v10683_v36 = vadd.s32 32, %v10623_v26  ;;  %v10686_v37 = vadd.s32 40, %v10623_v26  ;;  %v1377_v41 = vsel %vm1369_vm6, 65537, %v13899_v33  ;;  %vm1129_vm6 = vmpackc.low %vm10778_vm3, %vm10778_vm3 }
 0x12c   : > { %971 = vst.msk [vmem:[#allocation3 + $0x9] sm:$0xff] %vm13938_vm0, %v957_v43  ;;  %v828_v53 = vmax.f32 %v698_v42, %v8975_v44  ;;  %v701_v42 = vmax.f32 %v8872_v1, %v8928_v2  ;;  %v8317_v59 = vcombine.low %v1376_v34, %v1377_v41  ;;  %v8881_v34 = vadd.f32 %v10619_v19, %v10615_v17 }
 0x12d   : > { %v8977_v57 = vpop.f32.mrf.mxu0  ;;  %v9033_v58 = vpop.f32.mrf.mxu1  ;;  %14028 = vst [vmem:[#allocation9_spill] sm:$0xff] %v10683_v36  ;;  %14029 = vst [vmem:[#allocation10_spill] sm:$0xff] %v10686_v37  ;;  %v1020_v60 = vand.u32 7, %v10683_v36  ;;  %v1027_v61 = vand.u32 7, %v10686_v37  ;;  %v8937_v17 = vadd.f32 %v10621_v20, %v10617_v18  ;;  %vm10801_vm5 = vcmp.gt.s32.totalorder %v1006_v23, 0 }
 0x12e   : > { %v958_v63 = vmax.f32 %v828_v53, %v9031_v54  ;;  %v8978_v0 = vadd.f32 %v8977_v57, %v8976_v45  ;;  %v9034_v25 = vadd.f32 %v9033_v58, %v9032_v46  ;;  %v8875_v45 = vadd.f32 %v10603_v11, %v10599_v9 }
 0x12f   : > { %v8979_v21 = vpop.f32.mrf.mxu0  ;;  %v9035_v22 = vpop.f32.mrf.mxu1  ;;  %v8931_v46 = vadd.f32 %v10605_v12, %v10601_v10  ;;  %v1378_v10 = vsel %vm1370_vm9, 65537, %v13899_v33  ;;  %v1379_v11 = vsel %vm1371_vm10, 65537, %v13899_v33  ;;  %v8878_v12 = vadd.f32 %v10611_v15, %v10607_v13 }
 0x130   : > { %972 = vst.msk [vmem:[#allocation3 + $0x11] sm:$0xff] %vm13938_vm0, %v958_v63  ;;  %v829_v24 = vmax.f32 %v699_v56, %v8978_v0  ;;  %v8934_v63 = vadd.f32 %v10613_v16, %v10609_v14  ;;  %vm10730_vm11 = vcmp.lt.s32.totalorder %v1020_v60, 7  ;;  %vm10736_vm12 = vcmp.lt.s32.totalorder %v1027_v61, 7 }
 0x131   : > { %v8980_v3 = vpop.f32.mrf.mxu0  ;;  %v9036_v4 = vpop.f32.mrf.mxu1  ;;  %v702_v1 = vmax.f32 %v8875_v45, %v8931_v46  ;;  %vm10745_vm13 = vcmp.ne.s16.totalorder %v8317_v59, 0  ;;  %vm1372_vm15 = vmpackc.low %vm10730_vm11, %vm10730_vm11  ;;  %vm10862_vm10 = vcmp.gt.s32.totalorder %v1013_v27, 0  ;;  %v1627_v27 = vsel %vm13935_vm2, %v8331_v51, 0 }
 0x132   : > { %v959_v31 = vmax.f32 %v829_v24, %v9034_v25  ;;  %v8981_v32 = vadd.f32 %v8980_v3, %v8979_v21  ;;  %v9037_v39 = vadd.f32 %v9036_v4, %v9035_v22  ;;  %vm1373_vm1 = vmpackc.low %vm10736_vm12, %vm10736_vm12  ;;  %vm10903_vm3 = vcmp.gt.s32.totalorder %v1027_v61, 0 }
 0x133   : > { %v8982_v6 = vpop.f32.mrf.mxu0  ;;  %v9038_v7 = vpop.f32.mrf.mxu1  ;;  %v10674_v8 = vld [vmem:[#allocation3 + $0x9] sm:$0xff]  ;;  %v1381_v23 = vsel %vm1373_vm1, 65537, %v13899_v33  ;;  %vm1130_vm11 = vmpackc.low %vm10801_vm5, %vm10801_vm5  ;;  %v1273_v46 = vsel %vm13935_vm2, %v10587_v52, 0 }
 0x134   : > { %973 = vst.msk [vmem:[#allocation3 + $0x19] sm:$0xff] %vm13938_vm0, %v959_v31  ;;  %v830_v38 = vmax.f32 %v700_v30, %v8981_v32  ;;  %v1173_v40 = vpack.c.bf16 %v10674_v8, %v1165_v28  ;;  %v1340_v22 = vld [vmem:[#allocation3 + $0x2] sm:$0xff]  ;;  %v14034_v28 = vmov 0  ;;  %v10756_v30 = vadd.s32 48, %v10623_v26  ;;  %vm1133_vm1 = vmpackc.low %vm10903_vm3, %vm10903_vm3 }
 0x135   : > { %v8983_v43 = vpop.f32.mrf.mxu0  ;;  %v9039_v44 = vpop.f32.mrf.mxu1  ;;  %v14035_v28 = vsel %vm10745_vm13, 4294967295, %v14034_v28  ;;  %v10759_v31 = vadd.s32 56, %v10623_v26  ;;  %v10915_v41 = vld [vmem:[#allocation3 + $0x8] sm:$0xff] }
 0x136   : > { %v960_v53 = vmax.f32 %v830_v38, %v9037_v39  ;;  %v8984_v54 = vadd.f32 %v8983_v43, %v8982_v6  ;;  %9380 = vmatprep.mubr.msk.bf16.mxu0 %vm13938_vm0, %v1173_v40  ;;  %v9040_v9 = vadd.f32 %v9039_v44, %v9038_v7  ;;  %14036 = vst [vmem:[#allocation11_spill] sm:$0xff] %v14035_v28  ;;  %14039 = vst [vmem:[#allocation12_spill] sm:$0xff] %v10756_v30 }
 0x137   : > { %v8985_v56 = vpop.f32.mrf.mxu0  ;;  %v9041_v57 = vpop.f32.mrf.mxu1  ;;  %v10707_v58 = vld [vmem:[#allocation3 + $0xa] sm:$0xff]  ;;  %14040 = vst [vmem:[#allocation13_spill] sm:$0xff] %v10759_v31  ;;  %v703_v7 = vmax.f32 %v8878_v12, %v8934_v63  ;;  %v8318_v40 = vcombine.low %v1378_v10, %v1379_v11  ;;  %v1034_v18 = vand.u32 7, %v10756_v30  ;;  %v1041_v20 = vand.u32 7, %v10759_v31  ;;  %v8326_v12 = vld [vmem:[%s13892_s5 + $0x6] sm:$0x3] }
 0x138   : > { %974 = vst.msk [vmem:[#allocation3 + $0x21] sm:$0xff] %vm13938_vm0, %v960_v53  ;;  %v831_v62 = vmax.f32 %v701_v42, %v8984_v54  ;;  %v1348_v14 = vpack.c.bf16 %v10707_v58, %v1340_v22  ;;  %v10741_v3 = vld [vmem:[#allocation3 + $0x11] sm:$0xff]  ;;  %v14045_v10 = vmov 0  ;;  %v704_v63 = vmax.f32 %v8881_v34, %v8937_v17 }
 0x139   : > { %v8986_v0 = vpop.f32.mrf.mxu0  ;;  %v9042_v21 = vpop.f32.mrf.mxu1  ;;  %vm10828_vm7 = vcmp.ne.s16.totalorder %v8318_v40, 0  ;;  %vm10834_vm8 = vcmp.lt.s32.totalorder %v1034_v18, 7  ;;  %vm10840_vm9 = vcmp.lt.s32.totalorder %v1041_v20, 7  ;;  %v14058_v40 = vmov 0 }
 0x13a   : > { %v961_v13 = vmax.f32 %v831_v62, %v9040_v9  ;;  %v8987_v15 = vadd.f32 %v8986_v0, %v8985_v56  ;;  %v9043_v5 = vadd.f32 %v9042_v21, %v9041_v57  ;;  %v1400_v43 = vsel %vm10745_vm13, %v1348_v14, 0  ;;  %vm1374_vm12 = vmpackc.low %vm10834_vm8, %vm10834_vm8  ;;  %v1102_v14 = vld [vmem:[#allocation3 + $0x10] sm:$0xff] }
 0x13b   : > { %v8988_v16 = vpop.f32.mrf.mxu0  ;;  %v9044_v2 = vpop.f32.mrf.mxu1  ;;  %v10743_v4 = vld [vmem:[#allocation3 + $0x19] sm:$0xff]  ;;  %v1380_v57 = vsel %vm1372_vm15, 65537, %v13899_v33  ;;  %v14046_v10 = vsel %vm10828_vm7, 4294967295, %v14045_v10  ;;  %vm1375_vm14 = vmpackc.low %vm10840_vm9, %vm10840_vm9  ;;  %vm10886_vm15 = vcmp.gt.s32.totalorder %v1020_v60, 0  ;;  %v1382_v61 = vsel %vm1374_vm12, 65537, %v13899_v33 }
 0x13c   : > { %975 = vst.msk [vmem:[#allocation3 + $0x29] sm:$0xff] %vm13938_vm0, %v961_v13  ;;  %v832_v32 = vmax.f32 %v702_v1, %v8987_v15  ;;  %v10764_v6 = vpack.c.bf16 %v10743_v4, %v10741_v3  ;;  %v10806_v56 = vld [vmem:[#allocation3 + $0x12] sm:$0xff]  ;;  %14047 = vst [vmem:[#allocation14_spill] sm:$0xff] %v14046_v10  ;;  %v8319_v1 = vcombine.low %v1380_v57, %v1381_v23  ;;  %v1136_v13 = vsel %vm1128_vm4, 65537, %v13899_v33 }
 0x13d   : > { %v8989_v38 = vpop.f32.mrf.mxu0  ;;  %v9045_v39 = vpop.f32.mrf.mxu1  ;;  %v1137_v15 = vsel %vm1129_vm6, 65537, %v13899_v33  ;;  %v1383_v17 = vsel %vm1375_vm14, 65537, %v13899_v33  ;;  %vm1132_vm6 = vmpackc.low %vm10886_vm15, %vm10886_vm15  ;;  %vm10967_vm12 = vcmp.gt.s32.totalorder %v1034_v18, 0  ;;  %v1141_v11 = vsel %vm1133_vm1, 65537, %v13899_v33  ;;  %v8351_v18 = vld [vmem:[%s13892_s5 + $0x10] sm:$0x3] }
 0x13e   : > { %v962_v19 = vmax.f32 %v832_v32, %v9043_v5  ;;  %v8990_v42 = vadd.f32 %v8989_v38, %v8988_v16  ;;  %9381 = vmatmul.mubr.msk.bf16.vlgmr.msra.gmra.mxu0 %vm13938_vm0, %v10764_v6  ;;  %v9046_v54 = vadd.f32 %v9045_v39, %v9044_v2  ;;  %v10893_v5 = vld [vmem:[%s13892_s5 + $0xc] sm:$0x3]  ;;  %v8304_v34 = vcombine.low %v1136_v13, %v1137_v15  ;;  %vm14064_vm9 = vmpackc.low %vm10862_vm10, %vm10862_vm10 }
 0x13f   : > { %v8991_v44 = vpop.f32.mrf.mxu0  ;;  %9400 = vmatprep.mubr.msk.bf16.mxu0 %vm13938_vm0, %v1400_v43  ;;  %v9047_v49 = vpop.f32.mrf.mxu1  ;;  %9399 = vmatpush3.bf16.msra.mxu0 %v1419_v47  ;;  %v10792_v45 = vld [vmem:[#allocation3 + $0x1a] sm:$0xff]  ;;  %vm10911_vm4 = vcmp.ne.s16.totalorder %v8319_v1, 0  ;;  %v14061_v43 = vmov 0  ;;  %v1139_v57 = vsel %vm14064_vm9, 65537, %v13899_v33  ;;  %vm10983_vm5 = vcmp.gt.s32.totalorder %v1041_v20, 0  ;;  %vm1134_vm10 = vmpackc.low %vm10967_vm12, %vm10967_vm12 }
 0x140   : > { %976 = vst.msk [vmem:[#allocation3 + $0x31] sm:$0xff] %vm13938_vm0, %v962_v19  ;;  %v833_v53 = vmax.f32 %v703_v7, %v8990_v42  ;;  %10025 = vmatprep.subr.msk.bf16.mxu0 %vm13935_vm2, %v8331_v51  ;;  %v10826_v9 = vpack.c.bf16 %v10792_v45, %v10806_v56  ;;  %v10844_v24 = vld [vmem:[#allocation3 + $0x21] sm:$0xff]  ;;  %v14059_v40 = vsel %vm10911_vm4, 4294967295, %v14058_v40  ;;  %vm10946_vm8 = vcmp.ne.s16.totalorder %v8304_v34, 0  ;;  %vm1135_vm14 = vmpackc.low %vm10983_vm5, %vm10983_vm5 }
 0x141   : > { %v8992_v59 = vpop.f32.mrf.mxu0  ;;  %v9048_v62 = vpop.f32.mrf.mxu1  ;;  %v1100_v7 = vld [vmem:[#allocation3] sm:$0xff]  ;;  %14060 = vst [vmem:[#allocation15_spill] sm:$0xff] %v14059_v40  ;;  %v14062_v43 = vsel %vm10946_vm8, 4294967295, %v14061_v43  ;;  %v1608_v32 = vpack.c.bf16 %v10741_v3, %v10674_v8  ;;  %v14075_v34 = vmov 0  ;;  %v1142_v60 = vsel %vm1134_vm10, 65537, %v13899_v33 }
 0x142   : > { %v963_v0 = vmax.f32 %v833_v53, %v9046_v54  ;;  %v8993_v21 = vadd.f32 %v8992_v59, %v8991_v44  ;;  %v9049_v22 = vadd.f32 %v9048_v62, %v9047_v49  ;;  %v1401_v29 = vsel %vm10828_vm7, %v10826_v9, 0  ;;  %14063 = vst [vmem:[#allocation16_spill] sm:$0xff] %v14062_v43 }
 0x143   : > { %v10846_v25 = vld [vmem:[#allocation3 + $0x29] sm:$0xff]  ;;  %v1108_v42 = vpack.c.bf16 %v10915_v41, %v1100_v7  ;;  %v8320_v53 = vcombine.low %v1382_v61, %v1383_v17  ;;  %v1138_v54 = vsel %vm1130_vm11, 65537, %v13899_v33  ;;  %v1140_v62 = vsel %vm1132_vm6, 65537, %v13899_v33  ;;  %v8336_v17 = vld [vmem:[%s13892_s5 + $0xa] sm:$0x3] }
 0x144   : > { %977 = vst.msk [vmem:[#allocation3 + $0x39] sm:$0xff] %vm13938_vm0, %v963_v0  ;;  %v834_v16 = vmax.f32 %v704_v63, %v8993_v21  ;;  %v10872_v2 = vpack.c.bf16 %v10846_v25, %v10844_v24  ;;  %v10907_v38 = vld [vmem:[#allocation3 + $0x22] sm:$0xff]  ;;  %v1103_v63 = vld [vmem:[#allocation3 + $0x18] sm:$0xff]  ;;  %v8305_v0 = vcombine.low %v1138_v54, %v1139_v57  ;;  %v8306_v13 = vcombine.low %v1140_v62, %v1141_v11 }
 0x145   : > { %v1160_v52 = vsel %vm10946_vm8, %v1108_v42, 0  ;;  %vm10999_vm11 = vcmp.ne.s16.totalorder %v8320_v53, 0  ;;  %v1105_v1 = vld [vmem:[#allocation3 + $0x28] sm:$0xff]  ;;  %v1143_v8 = vsel %vm1135_vm14, 65537, %v13899_v33  ;;  %v1525_v3 = vsel %vm13935_vm2, %v8326_v12, 0 }
 0x146   : > { %v964_v47 = vmax.f32 %v834_v16, %v9049_v22  ;;  %9384 = vmatprep.mubr.msk.bf16.mxu1 %vm13938_vm0, %v10872_v2  ;;  %9401 = vmatmul.mubr.msk.bf16.vlgmr.msra.gmra.mxu0 %vm13938_vm0, %v1401_v29  ;;  %v14069_v22 = vmov 0  ;;  %v1109_v16 = vpack.c.bf16 %v1103_v63, %v1102_v14  ;;  %vm11016_vm15 = vcmp.ne.s16.totalorder %v8305_v0, 0 }
 0x147   : > { %v10909_v39 = vld [vmem:[#allocation3 + $0x2a] sm:$0xff]  ;;  %9419 = vmatpush3.bf16.msra.mxu0 %v1627_v27  ;;  %v14070_v22 = vsel %vm10999_vm11, 4294967295, %v14069_v22  ;;  %v1104_v27 = vld [vmem:[#allocation3 + $0x20] sm:$0xff]  ;;  %vm11021_vm1 = vcmp.ne.s16.totalorder %v8306_v13, 0  ;;  %v8307_v53 = vcombine.low %v1142_v60, %v1143_v8  ;;  %v1609_v57 = vpack.c.bf16 %v10844_v24, %v10743_v4 }
 0x148   : > { %978 = vst.msk [vmem:[#allocation3 + $0x41] sm:$0xff] %vm13938_vm0, %v964_v47  ;;  %v10920_v51 = vpack.c.bf16 %v10909_v39, %v10907_v38  ;;  %10027 = vmatprep.subr.msk.bf16.mxu0 %vm13935_vm2, %v10893_v5  ;;  %v1171_v44 = vld [vmem:[#allocation3 + $0x31] sm:$0xff]  ;;  %14071 = vst [vmem:[#allocation17_spill] sm:$0xff] %v14070_v22  ;;  %v14072_v47 = vmov 0  ;;  %v1110_v7 = vpack.c.bf16 %v1105_v1, %v1104_v27  ;;  %v14076_v34 = vsel %vm11021_vm1, 4294967295, %v14075_v34 }
 0x149   : > { %v14073_v47 = vsel %vm11016_vm15, 4294967295, %v14072_v47  ;;  %14077 = vst [vmem:[#allocation19_spill] sm:$0xff] %v14076_v34  ;;  %v1161_v61 = vsel %vm11016_vm15, %v1109_v16, 0  ;;  %v1106_v54 = vld [vmem:[#allocation3 + $0x30] sm:$0xff]  ;;  %v1610_v62 = vpack.c.bf16 %v1171_v44, %v10846_v25  ;;  %vm11049_vm3 = vcmp.ne.s16.totalorder %v8307_v53, 0 }
 0x14a   : > { %v1402_v19 = vsel %vm10911_vm4, %v10920_v51, 0  ;;  %14074 = vst [vmem:[#allocation18_spill] sm:$0xff] %v14073_v47  ;;  %v14078_v11 = vmov 0  ;;  %v1733_v0 = vsel %vm13935_vm2, %v8336_v17, 0  ;;  %v2023_v53 = vld [vmem:[#allocation3 + $0x4a] sm:$0xff]  ;;  %vm2145_vm6 = vcmask 64512  }
 0x14b   : > { %9404 = vmatprep.mubr.msk.bf16.mxu0 %vm13938_vm0, %v1402_v19  ;;  %v10951_v49 = vld [vmem:[#allocation3 + $0x39] sm:$0xff]  ;;  %v1162_v19 = vsel %vm11021_vm1, %v1110_v7, 0  ;;  %v14079_v11 = vsel %vm11049_vm3, 4294967295, %v14078_v11  ;;  %2146 = vst.msk [vmem:[#allocation4] sm:$0xff] %vm2145_vm6, %v13901_v48  ;;  %2149 = vst.msk [vmem:[#allocation4 + $0x49] sm:$0xff] %vm2145_vm6, %v13901_v48  ;;  %vm2147_vm9 = vcmask 57344  }
 0x14c   : > { %v10972_v59 = vpack.c.bf16 %v10951_v49, %v1171_v44  ;;  %v10995_v21 = vld [vmem:[#allocation3 + $0x32] sm:$0xff]  ;;  %14080 = vst [vmem:[#allocation20_spill] sm:$0xff] %v14079_v11  ;;  %v1504_v44 = vpack.c.bf16 %v1106_v54, %v1105_v1  ;;  %2148 = vst.msk [vmem:[#allocation4 + $0x8] sm:$0x1] %vm2147_vm9, %v13901_v48  ;;  %vm2202_vm12 = vcmask 1043456   ;;  %vm10078_vm5 = vmmov 1  }
 0x14d   : > { %v1107_v42 = vld [vmem:[#allocation3 + $0x38] sm:$0xff]  ;;  %2150 = vst.msk [vmem:[#allocation4 + $0x51] sm:$0x1] %vm2147_vm9, %v13901_v48  ;;  %vm4755_vm10 = vmpackc.low %vm10078_vm5, %vm10078_vm5 }
 0x14e   : > { %9385 = vmatmul.mubr.msk.bf16.vlgmr.msra.gmra.mxu1 %vm13938_vm0, %v10972_v59  ;;  %v1111_v23 = vpack.c.bf16 %v1107_v42, %v1106_v54 }
 0x14f   : > { %9390 = vmatprep.mubr.msk.bf16.mxu1 %vm13938_vm0, %v1160_v52  ;;  %9389 = vmatpush3.bf16.msra.mxu1 %v1273_v46  ;;  %v10997_v20 = vld [vmem:[#allocation3 + $0x3a] sm:$0xff]  ;;  %v1839_v46 = vsel %vm13935_vm2, %v10893_v5, 0  ;;  %v1820_v52 = vsel %vm10946_vm8, %v1109_v16, 0  ;;  %v2047_v16 = vsel %vm13935_vm2, %v8351_v18, 0  ;;  %v1815_v60 = vld [vmem:[#allocation3 + $0x48] sm:$0xff] }
 0x150   : > { %v11005_v15 = vpack.c.bf16 %v10997_v20, %v10995_v21  ;;  %10024 = vmatprep.subr.msk.bf16.mxu1 %vm13935_vm2, %v8326_v12  ;;  %v1502_v12 = vpack.c.bf16 %v1102_v14, %v10915_v41  ;;  %v1163_v4 = vsel %vm11049_vm3, %v1111_v23, 0  ;;  %v1607_v25 = vld [vmem:[#allocation3 + $0x41] sm:$0xff]  ;;  %v1503_v41 = vpack.c.bf16 %v1104_v27, %v1103_v63 }
 0x151   : > { %v1611_v5 = vpack.c.bf16 %v1607_v25, %v10951_v49  ;;  %v8346_v14 = vld [vmem:[%s13892_s5 + $0xe] sm:$0x3]  ;;  %v1508_v49 = vsel %vm11021_vm1, %v1504_v44, 0  ;;  %v1821_v27 = vsel %vm11016_vm15, %v1110_v7, 0 }
 0x152   : > { %v1403_v29 = vsel %vm10999_vm11, %v11005_v15, 0  ;;  %v1506_v24 = vsel %vm10946_vm8, %v1502_v12, 0  ;;  %v1507_v13 = vsel %vm11016_vm15, %v1503_v41, 0  ;;  %v1501_v63 = vld [vmem:[#allocation3 + $0x40] sm:$0xff] }
 0x153   : > { %9405 = vmatmul.mubr.msk.bf16.gmra.mxu0 %vm13938_vm0, %v1403_v29  ;;  %v1505_v1 = vpack.c.bf16 %v1501_v63, %v1107_v42  ;;  %v1710_v29 = vpack.c.bf16 %v10806_v56, %v10707_v58  ;;  %v1711_v58 = vpack.c.bf16 %v10907_v38, %v10792_v45  ;;  %v1709_v38 = vld [vmem:[#allocation3 + $0x42] sm:$0xff] }
 0x154   : > { %9420 = vmatprep.mubr.msk.bf16.mxu0 %vm13938_vm0, %v1608_v32  ;;  %v1822_v32 = vsel %vm11021_vm1, %v1111_v23, 0  ;;  %v11169_v12 = vld [vmem:[%s13894_s7 + $0xc] sm:$0xf] }
 0x155   : > { %v1509_v8 = vsel %vm11049_vm3, %v1505_v1, 0  ;;  %v1714_v7 = vsel %vm10745_vm13, %v1710_v29, 0  ;;  %v1715_v42 = vsel %vm10828_vm7, %v1711_v58, 0  ;;  %14083 = vst [vmem:[#allocation23_spill] sm:$0xff] %v11169_v12 }
 0x156   : > { %9391 = vmatmul.mubr.msk.bf16.vlgmr.msra.gmra.mxu1 %vm13938_vm0, %v1161_v61  ;;  %v1712_v61 = vpack.c.bf16 %v10995_v21, %v10909_v39  ;;  %v1713_v39 = vpack.c.bf16 %v1709_v38, %v10997_v20  ;;  %v2030_v21 = vsel %vm10911_vm4, %v11005_v15, 0  ;;  %v1921_v20 = vld [vmem:[#allocation3 + $0x49] sm:$0xff] }
 0x157   : > { %9394 = vmatprep.mubr.msk.bf16.mxu1 %vm13938_vm0, %v1162_v19  ;;  %9409 = vmatpush3.bf16.msra.mxu1 %v1525_v3  ;;  %v1819_v3 = vpack.c.bf16 %v1815_v60, %v1501_v63  ;;  %v1941_v19 = vsel %vm13935_vm2, %v8346_v14, 0  ;;  %v1925_v15 = vpack.c.bf16 %v1921_v20, %v1607_v25 }
 0x158   : > { %10026 = vmatprep.subr.msk.bf16.mxu1 %vm13935_vm2, %v8336_v17  ;;  %v2028_v17 = vsel %vm10745_vm13, %v10826_v9, 0  ;;  %v1716_v45 = vsel %vm10911_vm4, %v1712_v61, 0  ;;  %v2029_v9 = vsel %vm10828_vm7, %v10920_v51, 0  ;;  %v1717_v54 = vsel %vm10999_vm11, %v1713_v39, 0 }
 0x159   : > { %v1823_v56 = vsel %vm11049_vm3, %v1819_v3, 0 }
 0x15b   : > { %9421 = vmatmul.mubr.msk.bf16.vlgmr.msra.gmra.mxu0 %vm13938_vm0, %v1609_v57  ;;  %v2027_v57 = vpack.c.bf16 %v2023_v53, %v1709_v38 }
 0x15c   : > { %9424 = vmatprep.mubr.msk.bf16.mxu0 %vm13938_vm0, %v1610_v62  ;;  %9439 = vmatpush3.bf16.msra.mxu0 %v1839_v46  ;;  %v11158_v46 = vld [vmem:[%s13894_s7 + $0x8] sm:$0xf] }
 0x15d   : > { %10029 = vmatprep.subr.msk.bf16.mxu0 %vm13935_vm2, %v8351_v18  ;;  %v2031_v51 = vsel %vm10999_vm11, %v2027_v57, 0  ;;  %14081 = vst [vmem:[#allocation21_spill] sm:$0xff] %v11158_v46  ;;  %v11162_v62 = vld [vmem:[#allocation4 + $0x4a] sm:$0xff] }
 0x15e   : > { %9395 = vmatmul.mubr.msk.bf16.gmra.mxu1 %vm13938_vm0, %v1163_v4  ;;  %14082 = vst [vmem:[#allocation22_spill] sm:$0xff] %v11162_v62  ;;  %3111 = vst.msk [vmem:[#allocation4 + $0x51] sm:$0x1] %vm2147_vm9, %v13901_v48 }
 0x15f   : > { %9410 = vmatprep.mubr.msk.bf16.mxu1 %vm13938_vm0, %v1506_v24 }
 0x163   : > { %9425 = vmatmul.mubr.msk.bf16.gmra.mxu0 %vm13938_vm0, %v1611_v5 }
 0x164   : > { %9440 = vmatprep.mubr.msk.bf16.mxu0 %vm13938_vm0, %v1820_v52 }
 0x166   : > { %9411 = vmatmul.mubr.msk.bf16.vlgmr.msra.gmra.mxu1 %vm13938_vm0, %v1507_v13 }
 0x167   : > { %9414 = vmatprep.mubr.msk.bf16.mxu1 %vm13938_vm0, %v1508_v49  ;;  %9429 = vmatpush3.bf16.msra.mxu1 %v1733_v0 }
 0x168   : > { %10028 = vmatprep.subr.msk.bf16.mxu1 %vm13935_vm2, %v8346_v14 }
 0x16b   : > { %9441 = vmatmul.mubr.msk.bf16.vlgmr.msra.gmra.mxu0 %vm13938_vm0, %v1821_v27 }
 0x16c   : > { %9444 = vmatprep.mubr.msk.bf16.mxu0 %vm13938_vm0, %v1822_v32  ;;  %9459 = vmatpush3.bf16.msra.mxu0 %v2047_v16 }
 0x16e   : > { %9415 = vmatmul.mubr.msk.bf16.gmra.mxu1 %vm13938_vm0, %v1509_v8 }
 0x16f   : > { %9430 = vmatprep.mubr.msk.bf16.mxu1 %vm13938_vm0, %v1714_v7 }
 0x173   : > { %9445 = vmatmul.mubr.msk.bf16.gmra.mxu0 %vm13938_vm0, %v1823_v56 }
 0x174   : > { %9460 = vmatprep.mubr.msk.bf16.mxu0 %vm13938_vm0, %v2028_v17 }
 0x176   : > { %9431 = vmatmul.mubr.msk.bf16.vlgmr.msra.gmra.mxu1 %vm13938_vm0, %v1715_v42 }
 0x177   : > { %9434 = vmatprep.mubr.msk.bf16.mxu1 %vm13938_vm0, %v1716_v45  ;;  %9449 = vmatpush3.bf16.msra.mxu1 %v1941_v19 }
 0x17b   : > { %9461 = vmatmul.mubr.msk.bf16.vlgmr.msra.gmra.mxu0 %vm13938_vm0, %v2029_v9 }
 0x17c   : > { %9464 = vmatprep.mubr.msk.bf16.mxu0 %vm13938_vm0, %v2030_v21 }
 0x17e   : > { %9435 = vmatmul.mubr.msk.bf16.gmra.mxu1 %vm13938_vm0, %v1717_v54 }
 0x17f   : > { %9450 = vmatprep.mubr.msk.bf16.mxu1 %vm13938_vm0, %v10764_v6  ;;  %v8357_v6 = vld [vmem:[%s13894_s7 + $0x4] sm:$0xf] }
 0x180   : > { %10030 = vmatprep.subr.msk.bf16.mxu1 %vm2202_vm12, %v8357_v6 }
 0x183   : > { %9465 = vmatmul.mubr.msk.bf16.gmra.mxu0 %vm13938_vm0, %v2031_v51 }
 0x186   : > { %9451 = vmatmul.mubr.msk.bf16.vlgmr.msra.gmra.mxu1 %vm13938_vm0, %v10872_v2  ;;  %v2204_v2 = vsel %vm2202_vm12, %v8357_v6, 0 }
 0x187   : > { %9454 = vmatprep.mubr.msk.bf16.mxu1 %vm13938_vm0, %v10972_v59  ;;  %v2175_v59 = vld [vmem:[%s13894_s7] sm:$0xf]  ;;  %9469 = vmatpush3.bf16.msra.mxu1 %v2204_v2 }
 0x188   : > { %10031 = vmatprep.subr.msk.bf16.mxu0 %vm2202_vm12, %v2175_v59  ;;  %v2284_v23 = vsel %vm2202_vm12, %v2175_v59, 0  ;;  %10032 = vmatprep.subr.msk.bf16.mxu1 %vm2202_vm12, %v11158_v46 }
 0x189   : > { %9479 = vmatpush3.bf16.msra.mxu0 %v2284_v23 }
 0x18a   : > { %10033 = vmatprep.subr.msk.bf16.mxu0 %vm2202_vm12, %v11169_v12 }
 0x18e   : > { %9455 = vmatmul.mubr.msk.bf16.gmra.mxu1 %vm13938_vm0, %v1925_v15 }
 0x1fe   : > { %v9382_v18 = vpop.f32.mrf.mxu0 }
 0x200   : > { %v1229_v4 = vpop.f32.mrf.mxu0 }
 0x202   : > { %v9383_v24 = vpop.f32.mrf.mxu0 }
 0x204   : > { %v1232_v25 = vpop.f32.mrf.mxu0 }
 0x206   : > { %v9402_v5 = vpop.f32.mrf.mxu0 }
 0x208   : > { %v1455_v41 = vpop.f32.mrf.mxu0 }
 0x20a   : > { %v9403_v44 = vpop.f32.mrf.mxu0 }
 0x20c   : > { %v1458_v13 = vpop.f32.mrf.mxu0 }
 0x20e   : > { %v9386_v52 = vpop.f32.mrf.mxu1 }
 0x210   : > { %v1245_v0 = vpop.f32.mrf.mxu1 }
 0x212   : > { %v9387_v14 = vpop.f32.mrf.mxu1 }
 0x213   : > { %v9406_v49 = vpop.f32.mrf.mxu0 }
 0x214   : > { %v11173_v63 = vpop.f32.mrf.mxu1 }
 0x215   : > { %v11175_v1 = vpop.f32.mrf.mxu0 }
 0x216   : > { %v9392_v16 = vpop.f32.mrf.mxu1 }
 0x217   : > { %v11177_v27 = vpop.f32.mrf.mxu0  ;;  %v1318_v31 = vadd.f32 %v9392_v16, %v9382_v18 }
 0x218   : > { %v1309_v29 = vpop.f32.mrf.mxu1 }
 0x219   : > { %v11179_v32 = vpop.f32.mrf.mxu0  ;;  %v1310_v35 = vadd.f32 %v1309_v29, %v1229_v4  ;;  %v1488_v26 = vadd.f32 %v9402_v5, %v1318_v31 }
 0x21a   : > { %v9393_v60 = vpop.f32.mrf.mxu1 }
 0x21b   : > { %v9422_v8 = vpop.f32.mrf.mxu0  ;;  %v1321_v50 = vadd.f32 %v9393_v60, %v9383_v24  ;;  %v1486_v28 = vadd.f32 %v1455_v41, %v1310_v35 }
 0x21c   : > { %v1312_v7 = vpop.f32.mrf.mxu1 }
 0x21d   : > { %v1663_v3 = vpop.f32.mrf.mxu0  ;;  %v1313_v40 = vadd.f32 %v1312_v7, %v1232_v25  ;;  %v1489_v18 = vadd.f32 %v9403_v44, %v1321_v50 }
 0x21e   : > { %v9396_v58 = vpop.f32.mrf.mxu1 }
 0x21f   : > { %v9423_v56 = vpop.f32.mrf.mxu0  ;;  %v1334_v34 = vadd.f32 %v9396_v58, %v9386_v52  ;;  %v1487_v29 = vadd.f32 %v1458_v13, %v1313_v40 }
 0x220   : > { %v1325_v61 = vpop.f32.mrf.mxu1 }
 0x221   : > { %v1666_v17 = vpop.f32.mrf.mxu0  ;;  %v1326_v16 = vadd.f32 %v1325_v61, %v1245_v0  ;;  %v1492_v24 = vadd.f32 %v9406_v49, %v1334_v34 }
 0x222   : > { %v9397_v19 = vpop.f32.mrf.mxu1 }
 0x223   : > { %v11181_v42 = vpop.f32.mrf.mxu0  ;;  %v1490_v25 = vadd.f32 %v11175_v1, %v1326_v16 }
 0x224   : > { %v1328_v45 = vpop.f32.mrf.mxu1 }
 0x225   : > { %v11183_v38 = vpop.f32.mrf.mxu0 }
 0x226   : > { %v9412_v39 = vpop.f32.mrf.mxu1 }
 0x227   : > { %v11185_v9 = vpop.f32.mrf.mxu0  ;;  %v1594_v10 = vadd.f32 %v9412_v39, %v1488_v26  ;;  %v1329_v26 = vadd.f32 %v1328_v45, %v11173_v63 }
 0x228   : > { %v1561_v21 = vpop.f32.mrf.mxu1 }
 0x229   : > { %v11187_v53 = vpop.f32.mrf.mxu0  ;;  %v1592_v12 = vadd.f32 %v1561_v21, %v1486_v28 }
 0x22a   : > { %v9413_v54 = vpop.f32.mrf.mxu1 }
 0x22b   : > { %v9442_v57 = vpop.f32.mrf.mxu0  ;;  %v1595_v4 = vadd.f32 %v9413_v54, %v1489_v18 }
 0x22c   : > { %v1564_v51 = vpop.f32.mrf.mxu1 }
 0x22d   : > { %v1875_v20 = vpop.f32.mrf.mxu0  ;;  %v1593_v5 = vadd.f32 %v1564_v51, %v1487_v29  ;;  %v1697_v44 = vadd.f32 %v9423_v56, %v1595_v4 }
 0x22e   : > { %v9416_v15 = vpop.f32.mrf.mxu1 }
 0x22f   : > { %v11189_v6 = vpop.f32.mrf.mxu0  ;;  %v1598_v35 = vadd.f32 %v9416_v15, %v1492_v24  ;;  %v1695_v13 = vadd.f32 %v1666_v17, %v1593_v5 }
 0x230   : > { %v1577_v2 = vpop.f32.mrf.mxu1 }
 0x231   : > { %v11191_v59 = vpop.f32.mrf.mxu0  ;;  %v1596_v52 = vadd.f32 %v1577_v2, %v1490_v25 }
 0x232   : > { %v9417_v23 = vpop.f32.mrf.mxu1 }
 0x233   : > { %v11193_v33 = vpop.f32.mrf.mxu0 }
 0x234   : > { %v1580_v48 = vpop.f32.mrf.mxu1 }
 0x235   : > { %v11195_v37 = vpop.f32.mrf.mxu0 }
 0x236   : > { %14084 = vst [vmem:[#allocation24_spill] sm:$0xff] %v11195_v37  ;;  %v9432_v55 = vpop.f32.mrf.mxu1  ;;  %v1337_v37 = vadd.f32 %v9397_v19, %v9387_v14 }
 0x237   : > { %v11197_v30 = vpop.f32.mrf.mxu0 }
 0x238   : > { %14085 = vst [vmem:[#allocation25_spill] sm:$0xff] %v11197_v30  ;;  %v1769_v36 = vpop.f32.mrf.mxu1  ;;  %v1696_v30 = vadd.f32 %v9422_v8, %v1594_v10  ;;  %v1493_v0 = vadd.f32 %v11177_v27, %v1337_v37  ;;  %v11210_v37 = vld [vmem:[%s13893_s6] ss:$0 sm:$0xff] }
 0x239   : > { %v11199_v62 = vpop.f32.mrf.mxu0 }
 0x23a   : > { %14086 = vst [vmem:[#allocation26_spill] sm:$0xff] %v11199_v62  ;;  %v9433_v22 = vpop.f32.mrf.mxu1  ;;  %v1802_v60 = vadd.f32 %v9432_v55, %v1696_v30  ;;  %v1694_v62 = vadd.f32 %v1663_v3, %v1592_v12  ;;  %v1599_v14 = vadd.f32 %v9417_v23, %v1493_v0  ;;  %v1491_v55 = vadd.f32 %v11179_v32, %v1329_v26 }
 0x23b   : > { %v9462_v11 = vpop.f32.mrf.mxu0  ;;  %v1803_v10 = vadd.f32 %v9433_v22, %v1697_v44  ;;  %v1700_v30 = vadd.f32 %v11181_v42, %v1598_v35 }
 0x23c   : > { %v1772_v47 = vpop.f32.mrf.mxu1  ;;  %v1800_v50 = vadd.f32 %v1769_v36, %v1694_v62  ;;  %v1908_v34 = vadd.f32 %v9442_v57, %v1802_v60  ;;  %v1597_v7 = vadd.f32 %v1580_v48, %v1491_v55  ;;  %v1698_v62 = vadd.f32 %v11183_v38, %v1596_v52 }
 0x23d   : > { %v2083_v46 = vpop.f32.mrf.mxu0  ;;  %v1801_v63 = vadd.f32 %v1772_v47, %v1695_v13  ;;  %v1909_v32 = vadd.f32 %v11189_v6, %v1803_v10  ;;  %v1701_v56 = vadd.f32 %v11185_v9, %v1599_v14  ;;  %v14087_v15 = vld [vmem:[#allocation24_spill] sm:$0xff]  ;;  %v2176_v13 = vld [vmem:[#allocation4 + $0x1] sm:$0xff] }
 0x23e   : > { %v9436_v43 = vpop.f32.mrf.mxu1  ;;  %v1906_v8 = vadd.f32 %v1875_v20, %v1800_v50  ;;  %v1699_v45 = vadd.f32 %v11187_v53, %v1597_v7 }
 0x23f   : > { %v9463_v41 = vpop.f32.mrf.mxu0  ;;  %v1806_v36 = vadd.f32 %v9436_v43, %v1700_v30  ;;  %v1907_v19 = vadd.f32 %v11191_v59, %v1801_v63  ;;  %v14088_v18 = vld [vmem:[#allocation25_spill] sm:$0xff] }
 0x240   : > { %v1785_v31 = vpop.f32.mrf.mxu1 }
 0x241   : > { %v2086_v12 = vpop.f32.mrf.mxu0  ;;  %v1804_v58 = vadd.f32 %v1785_v31, %v1698_v62  ;;  %v14089_v60 = vld [vmem:[#allocation26_spill] sm:$0xff]  ;;  %v14090_v62 = vmov 0.0  }
 0x242   : > { %v9437_v28 = vpop.f32.mrf.mxu1 }
 0x243   : > { %v9466_v47 = vpop.f32.mrf.mxu0  ;;  %v1807_v42 = vadd.f32 %v9437_v28, %v1701_v56  ;;  %v1910_v6 = vadd.f32 %v14087_v15, %v1804_v58  ;;  %v11287_v15 = vld [vmem:[#allocation4 + $0x49] sm:$0xff] }
 0x244   : > { %v1788_v40 = vpop.f32.mrf.mxu1 }
 0x245   : > { %v1805_v9 = vadd.f32 %v1788_v40, %v1699_v45  ;;  %v2099_v51 = vpop.f32.mrf.mxu0 }
 0x246   : > { %v9452_v49 = vpop.f32.mrf.mxu1 }
 0x247   : > { %v2010_v1 = vadd.f32 %v9452_v49, %v1908_v34  ;;  %v9467_v31 = vpop.f32.mrf.mxu0  ;;  %v1911_v26 = vadd.f32 %v14089_v60, %v1805_v9  ;;  %v2159_v34 = vld [vmem:[#allocation4] sm:$0xff] }
 0x248   : > { %v1977_v22 = vpop.f32.mrf.mxu1 }
 0x249   : > { %v2116_v27 = vadd.f32 %v9462_v11, %v2010_v1  ;;  %v2008_v3 = vadd.f32 %v1977_v22, %v1906_v8  ;;  %v1912_v11 = vadd.f32 %v11193_v33, %v1806_v36  ;;  %v1913_v33 = vadd.f32 %v14088_v18, %v1807_v42  ;;  %v2102_v10 = vpop.f32.mrf.mxu0  ;;  %v8376_v42 = vld [vmem:[%s13894_s7 + $0x10] sm:$0xf] }
 0x24a   : > { %v9453_v61 = vpop.f32.mrf.mxu1 }
 0x24b   : > { %v2131_v48 = vadd.f32 %v11210_v37, %v2116_v27  ;;  %v2114_v43 = vadd.f32 %v2083_v46, %v2008_v3  ;;  %v2011_v17 = vadd.f32 %v9453_v61, %v1909_v32 }
 0x24c   : > { %v1980_v38 = vpop.f32.mrf.mxu1 }
 0x24d   : > { %v2139_v39 = vmax.f32 %v2131_v48, 0.0  ;;  %v2129_v21 = vadd.f32 %v11210_v37, %v2114_v43  ;;  %v2117_v54 = vadd.f32 %v9463_v41, %v2011_v17  ;;  %v2009_v57 = vadd.f32 %v1980_v38, %v1907_v19  ;;  %v14092_v48 = vld [vmem:[#allocation21_spill] sm:$0xff]  ;;  %v14093_v17 = vld [vmem:[#allocation23_spill] sm:$0xff] }
 0x24e   : > { %v9456_v20 = vpop.f32.mrf.mxu1  ;;  %v2382_v43 = vsel %vm2202_vm12, %v14092_v48, 0  ;;  %v2488_v19 = vsel %vm2202_vm12, %v14093_v17, 0 }
 0x24f   : > { %2153 = vst.msk [vmem:[#allocation4 + $0x19] sm:$0xff] %vm2145_vm6, %v2139_v39  ;;  %v2137_v46 = vmax.f32 %v2129_v21, 0.0  ;;  %v2132_v2 = vadd.f32 %v11210_v37, %v2117_v54  ;;  %v2115_v59 = vadd.f32 %v2086_v12, %v2009_v57  ;;  %v2014_v53 = vadd.f32 %v9456_v20, %v1912_v11  ;;  %v8381_v21 = vld [vmem:[%s13894_s7 + $0x14] sm:$0xf] }
 0x250   : > { %v1993_v23 = vpop.f32.mrf.mxu1 }
 0x251   : > { %2151 = vst.msk [vmem:[#allocation4 + $0x9] sm:$0xff] %vm2145_vm6, %v2137_v46  ;;  %v2140_v16 = vmax.f32 %v2132_v2, 0.0  ;;  %v2130_v4 = vadd.f32 %v11210_v37, %v2115_v59  ;;  %v2120_v29 = vadd.f32 %v9466_v47, %v2014_v53  ;;  %v2012_v24 = vadd.f32 %v1993_v23, %v1910_v6  ;;  %v14107_v6 = vld [vmem:[#allocation5_spill] sm:$0xff] }
 0x252   : > { %v9457_v5 = vpop.f32.mrf.mxu1 }
 0x253   : > { %2154 = vst.msk [vmem:[#allocation4 + $0x21] sm:$0xff] %vm2145_vm6, %v2140_v16  ;;  %v2138_v35 = vmax.f32 %v2130_v4, 0.0  ;;  %v2135_v25 = vadd.f32 %v11210_v37, %v2120_v29  ;;  %v2118_v41 = vadd.f32 %v2099_v51, %v2012_v24  ;;  %v2015_v28 = vadd.f32 %v9457_v5, %v1913_v33 }
 0x254   : > { %v1996_v50 = vpop.f32.mrf.mxu1 }
 0x255   : > { %2152 = vst.msk [vmem:[#allocation4 + $0x11] sm:$0xff] %vm2145_vm6, %v2138_v35  ;;  %v2143_v44 = vmax.f32 %v2135_v25, 0.0  ;;  %v2133_v52 = vadd.f32 %v11210_v37, %v2118_v41  ;;  %v2121_v0 = vadd.f32 %v9467_v31, %v2015_v28  ;;  %v2013_v40 = vadd.f32 %v1996_v50, %v1911_v26 }
 0x256   : > { %v11245_v32 = vld [vmem:[#allocation4 + $0x19] sm:$0xff] }
 0x257   : > { %2157 = vst.msk [vmem:[#allocation4 + $0x39] sm:$0xff] %vm2145_vm6, %v2143_v44  ;;  %v2141_v14 = vmax.f32 %v2133_v52, 0.0  ;;  %v2136_v55 = vadd.f32 %v11210_v37, %v2121_v0  ;;  %v2119_v30 = vadd.f32 %v2102_v10, %v2013_v40 }
 0x258   : > { %v11232_v12 = vld [vmem:[#allocation4 + $0x9] sm:$0xff] }
 0x259   : > { %v2160_v49 = vld [vmem:[#allocation4 + $0x8] sm:$0xff]  ;;  %2155 = vst.msk [vmem:[#allocation4 + $0x29] sm:$0xff] %vm2145_vm6, %v2141_v14  ;;  %v2144_v1 = vmax.f32 %v2136_v55, 0.0  ;;  %v2134_v8 = vadd.f32 %v11210_v37, %v2119_v30  ;;  %v2184_v7 = vpack.c.bf16 %v11232_v12, %v2176_v13 }
 0x25a   : > { %v2351_v63 = vld [vmem:[#allocation4 + $0x2] sm:$0xff]  ;;  %v2167_v36 = vpack.c.bf16 %v2160_v49, %v2159_v34  ;;  %v2354_v28 = vld [vmem:[#allocation4 + $0x1a] sm:$0xff]  ;;  %v2590_v34 = vsel %vm2202_vm12, %v8376_v42, 0 }
 0x25b   : > { %3108 = vst.msk [vmem:[#allocation4] sm:$0xff] %vm2145_vm6, %v14090_v62  ;;  %2158 = vst.msk [vmem:[#allocation4 + $0x41] sm:$0xff] %vm2145_vm6, %v2144_v1  ;;  %v2142_v22 = vmax.f32 %v2134_v8, 0.0  ;;  %9470 = vmatprep.mubr.msk.bf16.mxu1 %vm2145_vm6, %v2184_v7  ;;  %v11269_v11 = vld [vmem:[#allocation4 + $0x21] sm:$0xff]  ;;  %v8386_v1 = vld [vmem:[%s13894_s7 + $0x18] sm:$0xf] }
 0x25c   : > { %3109 = vst.msk [vmem:[#allocation4 + $0x8] sm:$0x1] %vm2147_vm9, %v14090_v62  ;;  %v2171_v3 = vsel %vm10946_vm8, %v2167_v36, 0  ;;  %v11248_v37 = vld [vmem:[#allocation4 + $0x11] sm:$0xff]  ;;  %v2163_v39 = vld [vmem:[#allocation4 + $0x20] sm:$0xff] }
 0x25d   : > { %9480 = vmatprep.mubr.msk.bf16.mxu0 %vm2145_vm6, %v2171_v3  ;;  %v2161_v58 = vld [vmem:[#allocation4 + $0x10] sm:$0xff]  ;;  %v2162_v56 = vld [vmem:[#allocation4 + $0x18] sm:$0xff]  ;;  %2156 = vst.msk [vmem:[#allocation4 + $0x31] sm:$0xff] %vm2145_vm6, %v2142_v22  ;;  %v11253_v47 = vpack.c.bf16 %v11245_v32, %v11248_v37 }
 0x25e   : > { %v11255_v61 = vpack.c.bf16 %v2162_v56, %v2161_v58  ;;  %v11277_v9 = vld [vmem:[#allocation4 + $0xa] sm:$0xff]  ;;  %v11294_v2 = vld [vmem:[#allocation4 + $0x39] sm:$0xff]  ;;  %v2465_v4 = vpack.c.bf16 %v2161_v58, %v2160_v49  ;;  %v2466_v0 = vpack.c.bf16 %v2163_v39, %v2162_v56 }
 0x25f   : > { %9471 = vmatmul.mubr.msk.bf16.vlgmr.msra.gmra.mxu1 %vm2145_vm6, %v11253_v47  ;;  %v2359_v59 = vpack.c.bf16 %v11277_v9, %v2351_v63  ;;  %v2353_v35 = vld [vmem:[#allocation4 + $0x12] sm:$0xff]  ;;  %v2696_v63 = vsel %vm2202_vm12, %v8381_v21, 0  ;;  %v8391_v7 = vld [vmem:[%s13894_s7 + $0x1c] sm:$0xf] }
 0x260   : > { %v2172_v38 = vsel %vm11016_vm15, %v11255_v61, 0  ;;  %v11275_v54 = vld [vmem:[#allocation4 + $0x29] sm:$0xff]  ;;  %9489 = vmatpush3.bf16.msra.mxu1 %v2382_v43  ;;  %v2469_v25 = vsel %vm10946_vm8, %v2465_v4, 0  ;;  %v11321_v50 = vpack.c.bf16 %v2354_v28, %v2353_v35  ;;  %v2470_v30 = vsel %vm11016_vm15, %v2466_v0, 0 }
 0x261   : > { %9481 = vmatmul.mubr.msk.bf16.vlgmr.msra.gmra.mxu0 %vm2145_vm6, %v2172_v38  ;;  %v2164_v57 = vld [vmem:[#allocation4 + $0x28] sm:$0xff]  ;;  %v11281_v51 = vpack.c.bf16 %v11275_v54, %v11269_v11  ;;  %10034 = vmatprep.subr.msk.bf16.mxu1 %vm2202_vm12, %v8376_v42  ;;  %v2363_v26 = vsel %vm10745_vm13, %v2359_v59, 0  ;;  %v2673_v58 = vpack.c.bf16 %v2353_v35, %v11277_v9  ;;  %v2571_v43 = vpack.c.bf16 %v11248_v37, %v11232_v12  ;;  %v8396_v9 = vld [vmem:[%s13894_s7 + $0x20] sm:$0xf] }
 0x262   : > { %v11283_v20 = vpack.c.bf16 %v2164_v57, %v2163_v39  ;;  %9499 = vmatpush3.bf16.msra.mxu0 %v2488_v19  ;;  %v11297_v53 = vld [vmem:[#allocation4 + $0x42] sm:$0xff]  ;;  %v2364_v13 = vsel %vm10828_vm7, %v11321_v50, 0  ;;  %v2358_v36 = vld [vmem:[#allocation4 + $0x3a] sm:$0xff]  ;;  %v2572_v39 = vpack.c.bf16 %v11269_v11, %v11245_v32  ;;  %v2802_v37 = vsel %vm2202_vm12, %v8386_v1, 0 }
 0x263   : > { %10035 = vmatprep.subr.msk.bf16.mxu0 %vm2202_vm12, %v8381_v21  ;;  %9474 = vmatprep.mubr.msk.bf16.mxu1 %vm2145_vm6, %v11281_v51  ;;  %v11299_v23 = vld [vmem:[#allocation4 + $0x48] sm:$0xff]  ;;  %v2464_v22 = vld [vmem:[#allocation4 + $0x40] sm:$0xff]  ;;  %v2677_v19 = vsel %vm10745_vm13, %v2673_v58, 0  ;;  %v2991_v4 = vsel %vm10745_vm13, %v11321_v50, 0 }
 0x264   : > { %v2173_v46 = vsel %vm11021_vm1, %v11283_v20, 0  ;;  %v2182_v18 = vld [vmem:[#allocation4 + $0x31] sm:$0xff]  ;;  %3110 = vst.msk [vmem:[#allocation4 + $0x49] sm:$0xff] %vm2145_vm6, %v14090_v62  ;;  %v2355_v44 = vld [vmem:[#allocation4 + $0x22] sm:$0xff] }
 0x265   : > { %9484 = vmatprep.mubr.msk.bf16.mxu0 %vm2145_vm6, %v2173_v46  ;;  %v2165_v33 = vld [vmem:[#allocation4 + $0x30] sm:$0xff]  ;;  %v2166_v16 = vld [vmem:[#allocation4 + $0x38] sm:$0xff]  ;;  %v11305_v29 = vpack.c.bf16 %v11294_v2, %v2182_v18  ;;  %v2674_v42 = vpack.c.bf16 %v2355_v44, %v2354_v28  ;;  %v2573_v12 = vpack.c.bf16 %v2182_v18, %v11275_v54  ;;  %v2570_v11 = vld [vmem:[#allocation4 + $0x41] sm:$0xff]  ;;  %v2676_v54 = vpack.c.bf16 %v11297_v53, %v2358_v36 }
 0x266   : > { %v11307_v24 = vpack.c.bf16 %v2166_v16, %v2165_v33  ;;  %v2356_v41 = vld [vmem:[#allocation4 + $0x2a] sm:$0xff]  ;;  %v2467_v40 = vpack.c.bf16 %v2165_v33, %v2164_v57  ;;  %v2357_v49 = vld [vmem:[#allocation4 + $0x32] sm:$0xff]  ;;  %v2468_v3 = vpack.c.bf16 %v2464_v22, %v2166_v16  ;;  %v2904_v57 = vsel %vm2202_vm12, %v8391_v7, 0  ;;  %v3136_v35 = vld [vmem:[%s13896_s9] sm:$0xf] }
 0x267   : > { %9475 = vmatmul.mubr.msk.bf16.gmra.mxu1 %vm2145_vm6, %v11305_v29  ;;  %v11323_v52 = vpack.c.bf16 %v2356_v41, %v2355_v44  ;;  %v2362_v62 = vpack.c.bf16 %v2358_v36, %v2357_v49  ;;  %v2675_v38 = vpack.c.bf16 %v2357_v49, %v2356_v41  ;;  %v2678_v21 = vsel %vm10828_vm7, %v2674_v42, 0  ;;  %v11446_v41 = vld [vmem:[%s13896_s9 + $0xc] sm:$0xf] }
 0x268   : > { %v2174_v5 = vsel %vm11049_vm3, %v11307_v24, 0  ;;  %9490 = vmatprep.mubr.msk.bf16.mxu1 %vm2145_vm6, %v2363_v26  ;;  %v2471_v8 = vsel %vm11021_vm1, %v2467_v40, 0  ;;  %v2472_v17 = vsel %vm11049_vm3, %v2468_v3, 0  ;;  %v2574_v46 = vpack.c.bf16 %v2570_v11, %v11294_v2 }
 0x269   : > { %9485 = vmatmul.mubr.msk.bf16.gmra.mxu0 %vm2145_vm6, %v2174_v5  ;;  %v2365_v55 = vsel %vm10911_vm4, %v11323_v52, 0  ;;  %v2366_v48 = vsel %vm10999_vm11, %v2362_v62, 0  ;;  %v2679_v32 = vsel %vm10911_vm4, %v2675_v38, 0  ;;  %v2680_v59 = vsel %vm10999_vm11, %v2676_v54, 0  ;;  %v8402_v5 = vld [vmem:[%s13896_s9 + $0x4] sm:$0xf] }
 0x26a   : > { %9500 = vmatprep.mubr.msk.bf16.mxu0 %vm2145_vm6, %v2469_v25  ;;  %v2783_v18 = vsel %vm10946_vm8, %v11255_v61, 0  ;;  %v2784_v2 = vsel %vm11016_vm15, %v11283_v20, 0  ;;  %v3010_v33 = vsel %vm2202_vm12, %v8396_v9, 0  ;;  %v2785_v16 = vsel %vm11021_vm1, %v11307_v24, 0  ;;  %v11439_v25 = vld [vmem:[%s13896_s9 + $0x8] sm:$0xf] }
 0x26b   : > { %v2888_v20 = vpack.c.bf16 %v11287_v15, %v2570_v11  ;;  %v14101_v15 = vld [vmem:[#allocation22_spill] sm:$0xff]  ;;  %v3164_v26 = vsel %vm2202_vm12, %v8402_v5, 0 }
 0x26f   : > { %9491 = vmatmul.mubr.msk.bf16.vlgmr.msra.gmra.mxu1 %vm2145_vm6, %v2364_v13 }
 0x270   : > { %9494 = vmatprep.mubr.msk.bf16.mxu1 %vm2145_vm6, %v2365_v55  ;;  %9509 = vmatpush3.bf16.msra.mxu1 %v2590_v34 }
 0x271   : > { %9501 = vmatmul.mubr.msk.bf16.vlgmr.msra.gmra.mxu0 %vm2145_vm6, %v2470_v30  ;;  %10036 = vmatprep.subr.msk.bf16.mxu1 %vm2202_vm12, %v8386_v1 }
 0x272   : > { %9504 = vmatprep.mubr.msk.bf16.mxu0 %vm2145_vm6, %v2471_v8  ;;  %9519 = vmatpush3.bf16.msra.mxu0 %v2696_v63 }
 0x273   : > { %10037 = vmatprep.subr.msk.bf16.mxu0 %vm2202_vm12, %v8391_v7 }
 0x277   : > { %9495 = vmatmul.mubr.msk.bf16.gmra.mxu1 %vm2145_vm6, %v2366_v48 }
 0x278   : > { %9510 = vmatprep.mubr.msk.bf16.mxu1 %vm2145_vm6, %v2571_v43 }
 0x279   : > { %9505 = vmatmul.mubr.msk.bf16.gmra.mxu0 %vm2145_vm6, %v2472_v17 }
 0x27a   : > { %9520 = vmatprep.mubr.msk.bf16.mxu0 %vm2145_vm6, %v2677_v19 }
 0x27f   : > { %9511 = vmatmul.mubr.msk.bf16.vlgmr.msra.gmra.mxu1 %vm2145_vm6, %v2572_v39  ;;  %v8811_v39 = vld [vmem:[%s10159_s26 + $0x8] sm:$0xff]  }
 0x280   : > { %9514 = vmatprep.mubr.msk.bf16.mxu1 %vm2145_vm6, %v2573_v12  ;;  %9529 = vmatpush3.bf16.msra.mxu1 %v2802_v37  ;;  %v8738_v37 = vunpack.c.l.bf16 %v8811_v39 }
 0x281   : > { %9521 = vmatmul.mubr.msk.bf16.vlgmr.msra.gmra.mxu0 %vm2145_vm6, %v2678_v21  ;;  %10038 = vmatprep.subr.msk.bf16.mxu1 %vm2202_vm12, %v8396_v9  ;;  %v8739_v21 = vunpack.c.h.bf16 %v8811_v39 }
 0x282   : > { %9524 = vmatprep.mubr.msk.bf16.mxu0 %vm2145_vm6, %v2679_v32  ;;  %9539 = vmatpush3.bf16.msra.mxu0 %v2904_v57  ;;  %v8812_v57 = vld [vmem:[%s10159_s26 + $0x10] sm:$0xff]   ;;  %4140 = vst.msk [vmem:[#allocation2 + $0x21] sm:$0xff] %vm13938_vm0, %v8738_v37 }
 0x283   : > { %10039 = vmatprep.subr.msk.bf16.mxu0 %vm2202_vm12, %v8402_v5  ;;  %v8742_v32 = vunpack.c.l.bf16 %v8812_v57  ;;  %v8743_v11 = vunpack.c.h.bf16 %v8812_v57  ;;  %4141 = vst.msk [vmem:[#allocation2 + $0x29] sm:$0xff] %vm13938_vm0, %v8739_v21  ;;  %v8816_v57 = vld [vmem:[%s10159_s26 + $0x30] sm:$0xff]  }
 0x285   : > { %4142 = vst.msk [vmem:[#allocation2 + $0x31] sm:$0xff] %vm13938_vm0, %v8742_v32  ;;  %4143 = vst.msk [vmem:[#allocation2 + $0x39] sm:$0xff] %vm13938_vm0, %v8743_v11 }
 0x287   : > { %9515 = vmatmul.mubr.msk.bf16.gmra.mxu1 %vm2145_vm6, %v2574_v46 }
 0x288   : > { %9530 = vmatprep.mubr.msk.bf16.mxu1 %vm2145_vm6, %v2783_v18 }
 0x289   : > { %9525 = vmatmul.mubr.msk.bf16.gmra.mxu0 %vm2145_vm6, %v2680_v59 }
 0x28a   : > { %9540 = vmatprep.mubr.msk.bf16.mxu0 %vm2145_vm6, %v11253_v47  ;;  %v2782_v47 = vpack.c.bf16 %v11299_v23, %v2464_v22  ;;  %v2993_v23 = vsel %vm10911_vm4, %v2362_v62, 0  ;;  %v8733_v62 = vld [vmem:[%s10159_s26] sm:$0xff]  }
 0x28b   : > { %v8734_v3 = vunpack.c.l.bf16 %v8733_v62  ;;  %v8735_v58 = vunpack.c.h.bf16 %v8733_v62  ;;  %v8815_v62 = vld [vmem:[%s10159_s26 + $0x28] sm:$0xff]  }
 0x28c   : > { %v2786_v61 = vsel %vm11049_vm3, %v2782_v47, 0  ;;  %v8754_v39 = vunpack.c.l.bf16 %v8815_v62  ;;  %v8755_v37 = vunpack.c.h.bf16 %v8815_v62  ;;  %v8817_v62 = vld [vmem:[%s10159_s26 + $0x38] sm:$0xff]  }
 0x28d   : > { %4138 = vst.msk [vmem:[#allocation2 + $0x11] sm:$0xff] %vm13938_vm0, %v8734_v3  ;;  %4139 = vst.msk [vmem:[#allocation2 + $0x19] sm:$0xff] %vm13938_vm0, %v8735_v58  ;;  %v8762_v14 = vunpack.c.l.bf16 %v8817_v62  ;;  %v8763_v60 = vunpack.c.h.bf16 %v8817_v62 }
 0x28e   : > { %4148 = vst.msk [vmem:[#allocation2 + $0x61] sm:$0xff] %vm13938_vm0, %v8754_v39  ;;  %4149 = vst.msk [vmem:[#allocation2 + $0x69] sm:$0xff] %vm13938_vm0, %v8755_v37 }
 0x28f   : > { %9531 = vmatmul.mubr.msk.bf16.vlgmr.msra.gmra.mxu1 %vm2145_vm6, %v2784_v2  ;;  %4152 = vst.msk [vmem:[#allocation2 + $0x81] sm:$0xff] %vm13938_vm0, %v8762_v14  ;;  %4153 = vst.msk [vmem:[#allocation2 + $0x89] sm:$0xff] %vm13938_vm0, %v8763_v60  ;;  %v8819_v60 = vld [vmem:[%s10159_s26 + $0x48] sm:$0xff]  }
 0x290   : > { %9534 = vmatprep.mubr.msk.bf16.mxu1 %vm2145_vm6, %v2785_v16  ;;  %9549 = vmatpush3.bf16.msra.mxu1 %v3010_v33  ;;  %v8813_v16 = vld [vmem:[%s10159_s26 + $0x18] sm:$0xff]  }
 0x291   : > { %9541 = vmatmul.mubr.msk.bf16.vlgmr.msra.gmra.mxu0 %vm2145_vm6, %v11281_v51  ;;  %v2992_v51 = vsel %vm10828_vm7, %v11323_v52, 0  ;;  %10040 = vmatprep.subr.msk.bf16.mxu1 %vm2202_vm12, %v3136_v35 }
 0x292   : > { %9544 = vmatprep.mubr.msk.bf16.mxu0 %vm2145_vm6, %v11305_v29  ;;  %v2990_v29 = vpack.c.bf16 %v14101_v15, %v11297_v53  ;;  %9559 = vmatpush3.bf16.msra.mxu0 %v3164_v26  ;;  %v3244_v53 = vsel %vm2202_vm12, %v3136_v35, 0 }
 0x293   : > { %10041 = vmatprep.subr.msk.bf16.mxu0 %vm2202_vm12, %v11439_v25 }
 0x294   : > { %v2994_v24 = vsel %vm10999_vm11, %v2990_v29, 0 }
 0x297   : > { %9535 = vmatmul.mubr.msk.bf16.gmra.mxu1 %vm2145_vm6, %v2786_v61  ;;  %v8746_v61 = vunpack.c.l.bf16 %v8813_v16 }
 0x298   : > { %9550 = vmatprep.mubr.msk.bf16.mxu1 %vm2145_vm6, %v2991_v4  ;;  %v8814_v4 = vld [vmem:[%s10159_s26 + $0x20] sm:$0xff]  }
 0x299   : > { %9545 = vmatmul.mubr.msk.bf16.gmra.mxu0 %vm2145_vm6, %v2888_v20  ;;  %v8747_v20 = vunpack.c.h.bf16 %v8813_v16  ;;  %v8751_v15 = vunpack.c.h.bf16 %v8814_v4  ;;  %4144 = vst.msk [vmem:[#allocation2 + $0x41] sm:$0xff] %vm13938_vm0, %v8746_v61  ;;  %v8758_v61 = vunpack.c.l.bf16 %v8816_v57 }
 0x29b   : > { %4145 = vst.msk [vmem:[#allocation2 + $0x49] sm:$0xff] %vm13938_vm0, %v8747_v20  ;;  %4147 = vst.msk [vmem:[#allocation2 + $0x59] sm:$0xff] %vm13938_vm0, %v8751_v15  ;;  %v8759_v20 = vunpack.c.h.bf16 %v8816_v57 }
 0x29c   : > { %4150 = vst.msk [vmem:[#allocation2 + $0x71] sm:$0xff] %vm13938_vm0, %v8758_v61  ;;  %v8818_v61 = vld [vmem:[%s10159_s26 + $0x40] sm:$0xff]  }
 0x29d   : > { %4151 = vst.msk [vmem:[#allocation2 + $0x79] sm:$0xff] %vm13938_vm0, %v8759_v20 }
 0x29f   : > { %9551 = vmatmul.mubr.msk.bf16.vlgmr.msra.gmra.mxu1 %vm2145_vm6, %v2992_v51 }
 0x2a0   : > { %9554 = vmatprep.mubr.msk.bf16.mxu1 %vm2145_vm6, %v2993_v23  ;;  %9569 = vmatpush3.bf16.msra.mxu1 %v3244_v53  ;;  %v8750_v23 = vunpack.c.l.bf16 %v8814_v4 }
 0x2a1   : > { %10042 = vmatprep.subr.msk.bf16.mxu1 %vm2202_vm12, %v11446_v41 }
 0x2a2   : > { %4146 = vst.msk [vmem:[#allocation2 + $0x51] sm:$0xff] %vm13938_vm0, %v8750_v23 }
 0x2a7   : > { %9555 = vmatmul.mubr.msk.bf16.gmra.mxu1 %vm2145_vm6, %v2994_v24 }
 0x31f   : > { %v11450_v28 = vpop.f32.mrf.mxu1 }
 0x321   : > { %v11452_v50 = vpop.f32.mrf.mxu0  ;;  %v11454_v44 = vpop.f32.mrf.mxu1 }
 0x322   : > { %v2329_v4 = vadd.f32 %v11452_v50, %v11450_v28 }
 0x323   : > { %v11456_v52 = vpop.f32.mrf.mxu0  ;;  %v11458_v0 = vpop.f32.mrf.mxu1 }
 0x324   : > { %v2321_v39 = vadd.f32 %v11456_v52, %v11454_v44 }
 0x325   : > { %v11460_v40 = vpop.f32.mrf.mxu0  ;;  %v11462_v13 = vpop.f32.mrf.mxu1 }
 0x326   : > { %v2332_v28 = vadd.f32 %v11460_v40, %v11458_v0 }
 0x327   : > { %v11464_v34 = vpop.f32.mrf.mxu0  ;;  %v11466_v55 = vpop.f32.mrf.mxu1 }
 0x328   : > { %v2324_v44 = vadd.f32 %v11464_v34, %v11462_v13 }
 0x329   : > { %v11468_v30 = vpop.f32.mrf.mxu0  ;;  %v11470_v49 = vpop.f32.mrf.mxu1 }
 0x32a   : > { %v2345_v0 = vadd.f32 %v11468_v30, %v11466_v55 }
 0x32b   : > { %v11472_v63 = vpop.f32.mrf.mxu0  ;;  %v11474_v1 = vpop.f32.mrf.mxu1 }
 0x32c   : > { %v2337_v13 = vadd.f32 %v11472_v63, %v11470_v49  ;;  %v8770_v49 = vunpack.c.l.bf16 %v8819_v60  ;;  %v8771_v63 = vunpack.c.h.bf16 %v8819_v60 }
 0x32d   : > { %v11476_v8 = vpop.f32.mrf.mxu0  ;;  %v11478_v7 = vpop.f32.mrf.mxu1 }
 0x32e   : > { %4156 = vst.msk [vmem:[#allocation2 + $0xa1] sm:$0xff] %vm13938_vm0, %v8770_v49  ;;  %4157 = vst.msk [vmem:[#allocation2 + $0xa9] sm:$0xff] %vm13938_vm0, %v8771_v63 }
 0x32f   : > { %v11480_v36 = vpop.f32.mrf.mxu0  ;;  %v11483_v22 = vpop.f32.mrf.mxu1 }
 0x330   : > { %v2451_v37 = vadd.f32 %v11483_v22, %v2329_v4  ;;  %v8767_v4 = vunpack.c.h.bf16 %v8818_v61 }
 0x331   : > { %v11485_v48 = vpop.f32.mrf.mxu0  ;;  %v11487_v43 = vpop.f32.mrf.mxu1 }
 0x332   : > { %v2449_v50 = vadd.f32 %v11487_v43, %v2321_v39  ;;  %v2557_v52 = vadd.f32 %v11485_v48, %v2451_v37  ;;  %v8766_v43 = vunpack.c.l.bf16 %v8818_v61  ;;  %4155 = vst.msk [vmem:[#allocation2 + $0x99] sm:$0xff] %vm13938_vm0, %v8767_v4 }
 0x333   : > { %v11491_v17 = vpop.f32.mrf.mxu0  ;;  %v11493_v19 = vpop.f32.mrf.mxu1 }
 0x334   : > { %v2452_v22 = vadd.f32 %v11493_v19, %v2332_v28  ;;  %v2555_v62 = vadd.f32 %v11491_v17, %v2449_v50  ;;  %4154 = vst.msk [vmem:[#allocation2 + $0x91] sm:$0xff] %vm13938_vm0, %v8766_v43  ;;  %v2348_v17 = vadd.f32 %v11476_v8, %v11474_v1  ;;  %v8820_v8 = vld [vmem:[%s10159_s26 + $0x50] sm:$0xff]  }
 0x335   : > { %v11495_v42 = vpop.f32.mrf.mxu0  ;;  %v11497_v38 = vpop.f32.mrf.mxu1 }
 0x336   : > { %v2450_v14 = vadd.f32 %v11497_v38, %v2324_v44  ;;  %v2558_v55 = vadd.f32 %v11495_v42, %v2452_v22  ;;  %v8775_v22 = vunpack.c.h.bf16 %v8820_v8 }
 0x337   : > { %v11500_v12 = vpop.f32.mrf.mxu0  ;;  %v11503_v9 = vpop.f32.mrf.mxu1 }
 0x338   : > { %v2455_v34 = vadd.f32 %v11503_v9, %v2345_v0  ;;  %v2340_v9 = vadd.f32 %v11480_v36, %v11478_v7  ;;  %v2556_v37 = vadd.f32 %v11500_v12, %v2450_v14  ;;  %4159 = vst.msk [vmem:[#allocation2 + $0xb9] sm:$0xff] %vm13938_vm0, %v8775_v22 }
 0x339   : > { %v11505_v54 = vpop.f32.mrf.mxu0  ;;  %v11509_v46 = vpop.f32.mrf.mxu1 }
 0x33a   : > { %v2453_v38 = vadd.f32 %v11509_v46, %v2337_v13  ;;  %v2561_v42 = vadd.f32 %v11505_v54, %v2455_v34 }
 0x33b   : > { %v11513_v59 = vpop.f32.mrf.mxu0  ;;  %v11515_v18 = vpop.f32.mrf.mxu1 }
 0x33d   : > { %v11517_v2 = vpop.f32.mrf.mxu0  ;;  %v11519_v33 = vpop.f32.mrf.mxu1 }
 0x33e   : > { %v2454_v7 = vadd.f32 %v11519_v33, %v2340_v9 }
 0x33f   : > { %v11522_v47 = vpop.f32.mrf.mxu0  ;;  %v9512_v51 = vpop.f32.mrf.mxu1 }
 0x340   : > { %v2659_v39 = vadd.f32 %v9512_v51, %v2557_v52  ;;  %v8774_v52 = vunpack.c.l.bf16 %v8820_v8 }
 0x341   : > { %v11525_v29 = vpop.f32.mrf.mxu0  ;;  %v2626_v24 = vpop.f32.mrf.mxu1 }
 0x342   : > { %v2657_v30 = vadd.f32 %v2626_v24, %v2555_v62  ;;  %v2765_v28 = vadd.f32 %v11525_v29, %v2659_v39  ;;  %v2456_v24 = vadd.f32 %v11515_v18, %v2348_v17  ;;  %v2559_v29 = vadd.f32 %v11513_v59, %v2453_v38  ;;  %4158 = vst.msk [vmem:[#allocation2 + $0xb1] sm:$0xff] %vm13938_vm0, %v8774_v52 }
 0x343   : > { %v11531_v5 = vpop.f32.mrf.mxu0  ;;  %v11533_v26 = vpop.f32.mrf.mxu1 }
 0x344   : > { %v2660_v50 = vadd.f32 %v11533_v26, %v2558_v55  ;;  %v2763_v36 = vadd.f32 %v11531_v5, %v2657_v30  ;;  %v2562_v0 = vadd.f32 %v11517_v2, %v2456_v24  ;;  %v8821_v5 = vld [vmem:[%s10159_s26 + $0x58] sm:$0xff]  }
 0x345   : > { %v11535_v35 = vpop.f32.mrf.mxu0  ;;  %v11537_v53 = vpop.f32.mrf.mxu1  ;;  %v8778_v62 = vunpack.c.l.bf16 %v8821_v5 }
 0x346   : > { %v2658_v12 = vadd.f32 %v11537_v53, %v2556_v37  ;;  %v2766_v26 = vadd.f32 %v11535_v35, %v2660_v50  ;;  %v2560_v53 = vadd.f32 %v11522_v47, %v2454_v7  ;;  %v8779_v47 = vunpack.c.h.bf16 %v8821_v5  ;;  %v8823_v50 = vld [vmem:[%s10159_s26 + $0x68] sm:$0xff]  }
 0x347   : > { %v11540_v3 = vpop.f32.mrf.mxu0  ;;  %v11542_v58 = vpop.f32.mrf.mxu1  ;;  %4160 = vst.msk [vmem:[#allocation2 + $0xc1] sm:$0xff] %vm13938_vm0, %v8778_v62  ;;  %v8786_v7 = vunpack.c.l.bf16 %v8823_v50 }
 0x348   : > { %v2663_v54 = vadd.f32 %v11542_v58, %v2561_v42  ;;  %v2764_v59 = vadd.f32 %v11540_v3, %v2658_v12  ;;  %4161 = vst.msk [vmem:[#allocation2 + $0xc9] sm:$0xff] %vm13938_vm0, %v8779_v47 }
 0x349   : > { %v11544_v21 = vpop.f32.mrf.mxu0  ;;  %v11547_v32 = vpop.f32.mrf.mxu1  ;;  %4164 = vst.msk [vmem:[#allocation2 + $0xe1] sm:$0xff] %vm13938_vm0, %v8786_v7 }
 0x34a   : > { %v2661_v43 = vadd.f32 %v11547_v32, %v2559_v29  ;;  %v11621_v32 = vld [vmem:[%s13895_s8] ss:$0 sm:$0xff] }
 0x34b   : > { %v11551_v11 = vpop.f32.mrf.mxu0  ;;  %v11553_v16 = vpop.f32.mrf.mxu1 }
 0x34c   : > { %v2664_v2 = vadd.f32 %v11553_v16, %v2562_v0  ;;  %v2767_v39 = vadd.f32 %v11551_v11, %v2661_v43  ;;  %v8787_v0 = vunpack.c.h.bf16 %v8823_v50 }
 0x34d   : > { %v11557_v23 = vpop.f32.mrf.mxu0  ;;  %v11559_v15 = vpop.f32.mrf.mxu1 }
 0x34e   : > { %v2662_v13 = vadd.f32 %v11559_v15, %v2560_v53  ;;  %v8824_v53 = vld [vmem:[%s10159_s26 + $0x70] sm:$0xff]   ;;  %4165 = vst.msk [vmem:[#allocation2 + $0xe9] sm:$0xff] %vm13938_vm0, %v8787_v0 }
 0x34f   : > { %v11567_v56 = vpop.f32.mrf.mxu0  ;;  %v9532_v57 = vpop.f32.mrf.mxu1 }
 0x350   : > { %v2871_v46 = vadd.f32 %v9532_v57, %v2765_v28  ;;  %v2768_v9 = vadd.f32 %v11567_v56, %v2662_v13 }
 0x351   : > { %v9542_v10 = vpop.f32.mrf.mxu0  ;;  %v2838_v31 = vpop.f32.mrf.mxu1 }
 0x352   : > { %v2869_v44 = vadd.f32 %v2838_v31, %v2763_v36  ;;  %v2973_v57 = vadd.f32 %v9542_v10, %v2871_v46  ;;  %v2769_v31 = vadd.f32 %v11544_v21, %v2663_v54 }
 0x353   : > { %v2940_v20 = vpop.f32.mrf.mxu0  ;;  %v9533_v40 = vpop.f32.mrf.mxu1 }
 0x354   : > { %v2872_v58 = vadd.f32 %v9533_v40, %v2766_v26  ;;  %v2971_v14 = vadd.f32 %v2940_v20, %v2869_v44  ;;  %v8822_v40 = vld [vmem:[%s10159_s26 + $0x60] sm:$0xff]   ;;  %v2770_v20 = vadd.f32 %v11557_v23, %v2664_v2 }
 0x355   : > { %v9543_v48 = vpop.f32.mrf.mxu0  ;;  %v2841_v19 = vpop.f32.mrf.mxu1  ;;  %v8782_v38 = vunpack.c.l.bf16 %v8822_v40  ;;  %v8783_v11 = vunpack.c.h.bf16 %v8822_v40 }
 0x356   : > { %v2870_v3 = vadd.f32 %v2841_v19, %v2764_v59  ;;  %v2974_v16 = vadd.f32 %v9543_v48, %v2872_v58  ;;  %v3120_v58 = vld [vmem:[#allocation4] sm:$0xff] }
 0x357   : > { %v9536_v51 = vpop.f32.mrf.mxu1  ;;  %v2943_v61 = vpop.f32.mrf.mxu0  ;;  %4162 = vst.msk [vmem:[#allocation2 + $0xd1] sm:$0xff] %vm13938_vm0, %v8782_v38  ;;  %4163 = vst.msk [vmem:[#allocation2 + $0xd9] sm:$0xff] %vm13938_vm0, %v8783_v11  ;;  %v8421_v38 = vld [vmem:[%s13896_s9 + $0x10] sm:$0xf] }
 0x358   : > { %v2875_v34 = vadd.f32 %v9536_v51, %v2769_v31  ;;  %v2972_v49 = vadd.f32 %v2943_v61, %v2870_v3  ;;  %v8791_v3 = vunpack.c.h.bf16 %v8824_v53 }
 0x359   : > { %v2854_v1 = vpop.f32.mrf.mxu1  ;;  %v9546_v33 = vpop.f32.mrf.mxu0 }
 0x35a   : > { %v2873_v19 = vadd.f32 %v2854_v1, %v2767_v39  ;;  %v2977_v37 = vadd.f32 %v9546_v33, %v2875_v34  ;;  %4167 = vst.msk [vmem:[#allocation2 + $0xf9] sm:$0xff] %vm13938_vm0, %v8791_v3 }
 0x35b   : > { %v9537_v18 = vpop.f32.mrf.mxu1  ;;  %v2956_v21 = vpop.f32.mrf.mxu0 }
 0x35c   : > { %v2876_v23 = vadd.f32 %v9537_v18, %v2770_v20  ;;  %v2975_v1 = vadd.f32 %v2956_v21, %v2873_v19  ;;  %v3342_v19 = vsel %vm2202_vm12, %v11439_v25, 0  ;;  %v8426_v25 = vld [vmem:[%s13896_s9 + $0x14] sm:$0xf] }
 0x35d   : > { %v2857_v4 = vpop.f32.mrf.mxu1  ;;  %v9547_v28 = vpop.f32.mrf.mxu0 }
 0x35e   : > { %v2874_v36 = vadd.f32 %v2857_v4, %v2768_v9  ;;  %v2978_v18 = vadd.f32 %v9547_v28, %v2876_v23 }
 0x35f   : > { %v9552_v35 = vpop.f32.mrf.mxu1  ;;  %v2959_v29 = vpop.f32.mrf.mxu0 }
 0x360   : > { %v3079_v10 = vadd.f32 %v9552_v35, %v2973_v57  ;;  %v2976_v43 = vadd.f32 %v2959_v29, %v2874_v36  ;;  %v3137_v57 = vld [vmem:[#allocation4 + $0x1] sm:$0xff]  ;;  %v4901_v36 = vld [vmem:[#allocation2 + $0x11] sm:$0xff] }
 0x361   : > { %v3046_v60 = vpop.f32.mrf.mxu1 }
 0x362   : > { %v3094_v55 = vadd.f32 %v11621_v32, %v3079_v10  ;;  %v3077_v30 = vadd.f32 %v3046_v60, %v2971_v14  ;;  %v8790_v14 = vunpack.c.l.bf16 %v8824_v53  ;;  %v4905_v53 = vld [vmem:[#allocation2 + $0x31] sm:$0xff] }
 0x363   : > { %v9553_v17 = vpop.f32.mrf.mxu1 }
 0x364   : > { %v3102_v15 = vmax.f32 %v3094_v55, 0.0  ;;  %v3092_v51 = vadd.f32 %v11621_v32, %v3077_v30  ;;  %v3080_v63 = vadd.f32 %v9553_v17, %v2974_v16  ;;  %4166 = vst.msk [vmem:[#allocation2 + $0xf1] sm:$0xff] %vm13938_vm0, %v8790_v14  ;;  %v3448_v17 = vsel %vm2202_vm12, %v11446_v41, 0 }
 0x365   : > { %v3049_v48 = vpop.f32.mrf.mxu1 }
 0x366   : > { %3114 = vst.msk [vmem:[#allocation4 + $0x19] sm:$0xff] %vm2145_vm6, %v3102_v15  ;;  %v3100_v42 = vmax.f32 %v3092_v51, 0.0  ;;  %v3095_v24 = vadd.f32 %v11621_v32, %v3080_v63  ;;  %v3078_v61 = vadd.f32 %v3049_v48, %v2972_v49 }
 0x367   : > { %v9556_v8 = vpop.f32.mrf.mxu1 }
 0x368   : > { %3112 = vst.msk [vmem:[#allocation4 + $0x9] sm:$0xff] %vm2145_vm6, %v3100_v42  ;;  %v3103_v56 = vmax.f32 %v3095_v24, 0.0  ;;  %v3093_v12 = vadd.f32 %v11621_v32, %v3078_v61  ;;  %v3083_v46 = vadd.f32 %v9556_v8, %v2977_v37 }
 0x369   : > { %v3062_v54 = vpop.f32.mrf.mxu1 }
 0x36a   : > { %3115 = vst.msk [vmem:[#allocation4 + $0x21] sm:$0xff] %vm2145_vm6, %v3103_v56  ;;  %v3101_v26 = vmax.f32 %v3093_v12, 0.0  ;;  %v3098_v44 = vadd.f32 %v11621_v32, %v3083_v46  ;;  %v3081_v52 = vadd.f32 %v3062_v54, %v2975_v1  ;;  %v14111_v12 = vld [vmem:[#allocation9_spill] sm:$0xff] }
 0x36b   : > { %v9557_v22 = vpop.f32.mrf.mxu1 }
 0x36c   : > { %3113 = vst.msk [vmem:[#allocation4 + $0x11] sm:$0xff] %vm2145_vm6, %v3101_v26  ;;  %v3106_v33 = vmax.f32 %v3098_v44, 0.0  ;;  %v3096_v4 = vadd.f32 %v11621_v32, %v3081_v52  ;;  %v3084_v5 = vadd.f32 %v9557_v22, %v2978_v18 }
 0x36d   : > { %v3065_v59 = vpop.f32.mrf.mxu1  ;;  %v11659_v60 = vld [vmem:[#allocation4 + $0x19] sm:$0xff] }
 0x36e   : > { %3118 = vst.msk [vmem:[#allocation4 + $0x39] sm:$0xff] %vm2145_vm6, %v3106_v33  ;;  %v3104_v31 = vmax.f32 %v3096_v4, 0.0  ;;  %v3099_v2 = vadd.f32 %v11621_v32, %v3084_v5  ;;  %v3082_v35 = vadd.f32 %v3065_v59, %v2976_v43  ;;  %v3550_v5 = vsel %vm2202_vm12, %v8421_v38, 0  ;;  %v3946_v33 = vld [vmem:[#allocation4 + $0x4a] sm:$0xff] }
 0x36f   : > { %v11648_v62 = vld [vmem:[#allocation4 + $0x9] sm:$0xff] }
 0x370   : > { %v3121_v47 = vld [vmem:[#allocation4 + $0x8] sm:$0xff]  ;;  %3116 = vst.msk [vmem:[#allocation4 + $0x29] sm:$0xff] %vm2145_vm6, %v3104_v31  ;;  %v3107_v10 = vmax.f32 %v3099_v2, 0.0  ;;  %v3097_v40 = vadd.f32 %v11621_v32, %v3082_v35  ;;  %v3145_v39 = vpack.c.bf16 %v11648_v62, %v3137_v57  ;;  %v3656_v31 = vsel %vm2202_vm12, %v8426_v25, 0  ;;  %v8431_v2 = vld [vmem:[%s13896_s9 + $0x18] sm:$0xf] }
 0x371   : > { %v3128_v13 = vpack.c.bf16 %v3121_v47, %v3120_v58  ;;  %v11683_v49 = vld [vmem:[#allocation4 + $0x21] sm:$0xff] }
 0x372   : > { %3119 = vst.msk [vmem:[#allocation4 + $0x41] sm:$0xff] %vm2145_vm6, %v3107_v10  ;;  %v3105_v34 = vmax.f32 %v3097_v40, 0.0  ;;  %9560 = vmatprep.mubr.msk.bf16.mxu0 %vm2145_vm6, %v3145_v39  ;;  %v3124_v15 = vld [vmem:[#allocation4 + $0x20] sm:$0xff] }
 0x373   : > { %v3132_v21 = vsel %vm10946_vm8, %v3128_v13, 0  ;;  %v11662_v32 = vld [vmem:[#allocation4 + $0x11] sm:$0xff]  ;;  %v3311_v28 = vld [vmem:[#allocation4 + $0x2] sm:$0xff]  ;;  %v3314_v26 = vld [vmem:[#allocation4 + $0x1a] sm:$0xff]  ;;  %v14124_v13 = vmov 0 }
 0x374   : > { %9570 = vmatprep.mubr.msk.bf16.mxu1 %vm2145_vm6, %v3132_v21  ;;  %v3122_v16 = vld [vmem:[#allocation4 + $0x10] sm:$0xff]  ;;  %v3123_v55 = vld [vmem:[#allocation4 + $0x18] sm:$0xff]  ;;  %3117 = vst.msk [vmem:[#allocation4 + $0x31] sm:$0xff] %vm2145_vm6, %v3105_v34  ;;  %v11667_v30 = vpack.c.bf16 %v11659_v60, %v11662_v32  ;;  %v3531_v21 = vpack.c.bf16 %v11662_v32, %v11648_v62  ;;  %v3762_v32 = vsel %vm2202_vm12, %v8431_v2, 0 }
 0x375   : > { %v11669_v20 = vpack.c.bf16 %v3123_v55, %v3122_v16  ;;  %v3312_v63 = vld [vmem:[#allocation4 + $0xa] sm:$0xff]  ;;  %v11704_v50 = vld [vmem:[#allocation4 + $0x39] sm:$0xff]  ;;  %v3425_v1 = vpack.c.bf16 %v3122_v16, %v3121_v47  ;;  %v3426_v0 = vpack.c.bf16 %v3124_v15, %v3123_v55 }
 0x376   : > { %9561 = vmatmul.mubr.msk.bf16.vlgmr.msra.gmra.mxu0 %vm2145_vm6, %v11667_v30  ;;  %v3319_v23 = vpack.c.bf16 %v3312_v63, %v3311_v28  ;;  %v3313_v29 = vld [vmem:[#allocation4 + $0x12] sm:$0xff]  ;;  %v8436_v47 = vld [vmem:[%s13896_s9 + $0x1c] sm:$0xf] }
 0x377   : > { %v3133_v11 = vsel %vm11016_vm15, %v11669_v20, 0  ;;  %v11689_v41 = vld [vmem:[#allocation4 + $0x29] sm:$0xff]  ;;  %9579 = vmatpush3.bf16.msra.mxu0 %v3342_v19  ;;  %v3429_v54 = vsel %vm10946_vm8, %v3425_v1, 0  ;;  %v11724_v44 = vpack.c.bf16 %v3314_v26, %v3313_v29  ;;  %v3430_v57 = vsel %vm11016_vm15, %v3426_v0, 0 }
 0x378   : > { %9571 = vmatmul.mubr.msk.bf16.vlgmr.msra.gmra.mxu1 %vm2145_vm6, %v3133_v11  ;;  %v3125_v51 = vld [vmem:[#allocation4 + $0x28] sm:$0xff]  ;;  %v11693_v9 = vpack.c.bf16 %v11689_v41, %v11683_v49  ;;  %10043 = vmatprep.subr.msk.bf16.mxu0 %vm2202_vm12, %v8421_v38  ;;  %v3323_v46 = vsel %vm10745_vm13, %v3319_v23, 0  ;;  %v3633_v39 = vpack.c.bf16 %v3313_v29, %v3312_v63  ;;  %v3532_v38 = vpack.c.bf16 %v11683_v49, %v11659_v60 }
 0x379   : > { %v11695_v37 = vpack.c.bf16 %v3125_v51, %v3124_v15  ;;  %9589 = vmatpush3.bf16.msra.mxu1 %v3448_v17  ;;  %v3315_v52 = vld [vmem:[#allocation4 + $0x22] sm:$0xff]  ;;  %v3324_v4 = vsel %vm10828_vm7, %v11724_v44, 0  ;;  %v3318_v14 = vld [vmem:[#allocation4 + $0x3a] sm:$0xff]  ;;  %v3864_v15 = vsel %vm2202_vm12, %v8436_v47, 0  ;;  %v3743_v23 = vsel %vm10946_vm8, %v11669_v20, 0 }
 0x37a   : > { %10044 = vmatprep.subr.msk.bf16.mxu1 %vm2202_vm12, %v8426_v25  ;;  %9564 = vmatprep.mubr.msk.bf16.mxu0 %vm2145_vm6, %v11693_v9  ;;  %v11752_v10 = vld [vmem:[#allocation4 + $0x40] sm:$0xff]  ;;  %v3637_v55 = vsel %vm10745_vm13, %v3633_v39, 0  ;;  %v3634_v19 = vpack.c.bf16 %v3315_v52, %v3314_v26  ;;  %v3738_v20 = vld [vmem:[#allocation4 + $0x48] sm:$0xff]  ;;  %v4198_v1 = vand.u32 15, %v14107_v6  ;;  %v3951_v26 = vsel %vm10745_vm13, %v11724_v44, 0 }
 0x37b   : > { %v3134_v48 = vsel %vm11021_vm1, %v11695_v37, 0  ;;  %v3143_v42 = vld [vmem:[#allocation4 + $0x31] sm:$0xff]  ;;  %v8441_v25 = vld [vmem:[%s13896_s9 + $0x20] sm:$0xf]  ;;  %v4226_v44 = vand.u32 15, %v14111_v12  ;;  %v4643_v39 = vld [vmem:[#allocation2 + $0x8] sm:$0xff] }
 0x37c   : > { %9574 = vmatprep.mubr.msk.bf16.mxu1 %vm2145_vm6, %v3134_v48  ;;  %v3126_v24 = vld [vmem:[#allocation4 + $0x30] sm:$0xff]  ;;  %v3127_v61 = vld [vmem:[#allocation4 + $0x38] sm:$0xff]  ;;  %v11708_v8 = vpack.c.bf16 %v11704_v50, %v3143_v42  ;;  %v3533_v62 = vpack.c.bf16 %v3143_v42, %v11689_v41  ;;  %v3638_v11 = vsel %vm10828_vm7, %v3634_v19, 0  ;;  %v11785_v49 = vld [vmem:[#allocation4 + $0x42] sm:$0xff]  ;;  %v3970_v42 = vsel %vm2202_vm12, %v8441_v25, 0 }
 0x37d   : > { %v11710_v7 = vpack.c.bf16 %v3127_v61, %v3126_v24  ;;  %v3316_v18 = vld [vmem:[#allocation4 + $0x2a] sm:$0xff]  ;;  %v3427_v43 = vpack.c.bf16 %v3126_v24, %v3125_v51  ;;  %v3317_v58 = vld [vmem:[#allocation4 + $0x32] sm:$0xff]  ;;  %v3428_v40 = vpack.c.bf16 %v11752_v10, %v3127_v61  ;;  %v8463_v41 = vld [vmem:[%s13890_s3 + $0x2] sm:$0x3]  ;;  %v3636_v63 = vpack.c.bf16 %v11785_v49, %v3318_v14 }
 0x37e   : > { %9565 = vmatmul.mubr.msk.bf16.gmra.mxu0 %vm2145_vm6, %v11708_v8  ;;  %v11726_v22 = vpack.c.bf16 %v3316_v18, %v3315_v52  ;;  %v11750_v3 = vpack.c.bf16 %v3318_v14, %v3317_v58  ;;  %v3635_v17 = vpack.c.bf16 %v3317_v58, %v3316_v18  ;;  %v3530_v51 = vld [vmem:[#allocation4 + $0x41] sm:$0xff]  ;;  %v11810_v24 = vld [vmem:[%s10159_s26 + $0x78] sm:$0xff]   ;;  %v4998_v61 = vsel %vm13935_vm2, %v8463_v41, 0  ;;  %s13733_s26 = scalar_lea.vmem %s13898_s11, %s8667_s15 }
 0x37f   : > { %v3135_v56 = vsel %vm11049_vm3, %v11710_v7, 0  ;;  %9580 = vmatprep.mubr.msk.bf16.mxu0 %vm2145_vm6, %v3323_v46  ;;  %v3431_v35 = vsel %vm11021_vm1, %v3427_v43, 0  ;;  %v3432_v16 = vsel %vm11049_vm3, %v3428_v40, 0  ;;  %v3534_v28 = vpack.c.bf16 %v3530_v51, %v11704_v50  ;;  %v4900_v46 = vld [vmem:[#allocation2 + $0x9] sm:$0xff]  ;;  %v4902_v43 = vld [vmem:[#allocation2 + $0x19] sm:$0xff] }
 0x380   : > { %9575 = vmatmul.mubr.msk.bf16.gmra.mxu1 %vm2145_vm6, %v3135_v56  ;;  %v3325_v59 = vsel %vm10911_vm4, %v11726_v22, 0  ;;  %v3326_v34 = vsel %vm10999_vm11, %v11750_v3, 0  ;;  %v3639_v60 = vsel %vm10911_vm4, %v3635_v17, 0  ;;  %v3640_v48 = vsel %vm10999_vm11, %v3636_v63, 0  ;;  %v4899_v56 = vld [vmem:[#allocation2 + $0x1] sm:$0xff]  ;;  %v14117_v17 = vld [vmem:[#allocation12_spill] sm:$0xff] }
 0x381   : > { %9590 = vmatprep.mubr.msk.bf16.mxu1 %vm2145_vm6, %v3429_v54  ;;  %v3744_v50 = vsel %vm11016_vm15, %v11695_v37, 0  ;;  %v3745_v27 = vsel %vm11021_vm1, %v11710_v7, 0  ;;  %v8794_v45 = vunpack.c.l.bf16 %v11810_v24  ;;  %v8512_v37 = vld [vmem:[%s13890_s3 + $0x4] sm:$0x3]  ;;  %v3742_v7 = vpack.c.bf16 %v3738_v20, %v11752_v10  ;;  %v14110_v52 = vld [vmem:[#allocation7_spill] sm:$0xff] }
 0x382   : > { %v4931_v29 = vpack.c.bf16 %v4900_v46, %v4899_v56  ;;  %vm11834_vm8 = vcmp.gt.s32.totalorder %v4198_v1, 0  ;;  %v4212_v0 = vand.u32 15, %v14110_v52  ;;  %v4170_v14 = vadd.s32 64, %v14107_v6  ;;  %v4642_v40 = vld [vmem:[#allocation2] sm:$0xff]  ;;  %v4909_v46 = vld [vmem:[#allocation2 + $0x51] sm:$0xff] }
 0x383   : > { %4168 = vst.msk [vmem:[#allocation2 + $0x101] sm:$0xff] %vm13938_vm0, %v8794_v45  ;;  %vm4754_vm14 = vmpackc.low %vm11834_vm8, %vm11834_vm8  ;;  %v3952_v10 = vsel %vm10828_vm7, %v11726_v22, 0  ;;  %vm11869_vm1 = vcmp.gt.s32.totalorder %v4226_v44, 0  ;;  %v3953_v22 = vsel %vm10911_vm4, %v11750_v3, 0  ;;  %v8529_v19 = vld [vmem:[%s13890_s3 + $0x6] sm:$0x3] }
 0x384   : > { %vm11856_vm13 = vcmp.gt.s32.totalorder %v4212_v0, 0  ;;  %v4906_v3 = vld [vmem:[#allocation2 + $0x39] sm:$0xff]  ;;  %vm4758_vm7 = vmpackc.low %vm11869_vm1, %vm11869_vm1  ;;  %v4172_v63 = vadd.s32 80, %v14107_v6  ;;  %v14126_v52 = vmov 0  ;;  %v5990_v12 = vsel %vm13935_vm2, %v8529_v19, 0 }
 0x385   : > { %vm4756_vm15 = vmpackc.low %vm11856_vm13, %vm11856_vm13  ;;  %v4646_v45 = vld [vmem:[#allocation2 + $0x20] sm:$0xff] }
 0x386   : > { %9581 = vmatmul.mubr.msk.bf16.vlgmr.msra.gmra.mxu0 %vm2145_vm6, %v3324_v4  ;;  %v4903_v4 = vld [vmem:[#allocation2 + $0x21] sm:$0xff] }
 0x387   : > { %9584 = vmatprep.mubr.msk.bf16.mxu0 %vm2145_vm6, %v3325_v59  ;;  %9599 = vmatpush3.bf16.msra.mxu0 %v3550_v5  ;;  %v4904_v5 = vld [vmem:[#allocation2 + $0x29] sm:$0xff]  ;;  %v14112_v59 = vmov 0  }
 0x388   : > { %9591 = vmatmul.mubr.msk.bf16.vlgmr.msra.gmra.mxu1 %vm2145_vm6, %v3430_v57  ;;  %10045 = vmatprep.subr.msk.bf16.mxu0 %vm2202_vm12, %v8431_v2  ;;  %v4786_v57 = vsel %vm4754_vm14, 65537, %v14112_v59  ;;  %v11854_v58 = vsel %vm4755_vm10, 65537, %v14112_v59  ;;  %v4932_v2 = vpack.c.bf16 %v4902_v43, %v4901_v36  ;;  %v4176_v43 = vadd.s32 112, %v14107_v6 }
 0x389   : > { %9594 = vmatprep.mubr.msk.bf16.mxu1 %vm2145_vm6, %v3431_v35  ;;  %9609 = vmatpush3.bf16.msra.mxu1 %v3656_v31  ;;  %v4649_v31 = vld [vmem:[#allocation2 + $0x38] sm:$0xff] }
 0x38a   : > { %10046 = vmatprep.subr.msk.bf16.mxu1 %vm2202_vm12, %v8436_v47  ;;  %v4933_v47 = vpack.c.bf16 %v4904_v5, %v4903_v4 }
 0x38e   : > { %9585 = vmatmul.mubr.msk.bf16.gmra.mxu0 %vm2145_vm6, %v3326_v34  ;;  %v8447_v34 = vcombine.low %v4786_v57, %v11854_v58  ;;  %v4648_v57 = vld [vmem:[#allocation2 + $0x30] sm:$0xff] }
 0x38f   : > { %9600 = vmatprep.mubr.msk.bf16.mxu0 %vm2145_vm6, %v3531_v21  ;;  %v11976_v21 = vld [vmem:[%s13890_s3 + $0xa] sm:$0x3] }
 0x390   : > { %9595 = vmatmul.mubr.msk.bf16.gmra.mxu1 %vm2145_vm6, %v3432_v16  ;;  %v8795_v16 = vunpack.c.h.bf16 %v11810_v24  ;;  %vm11902_vm4 = vcmp.ne.s16.totalorder %v8447_v34, 0  ;;  %v4644_v24 = vld [vmem:[#allocation2 + $0x10] sm:$0xff]  ;;  %v4296_v34 = vand.u32 15, %v4176_v43 }
 0x391   : > { %9610 = vmatprep.mubr.msk.bf16.mxu1 %vm2145_vm6, %v3637_v55  ;;  %v5680_v55 = vsel %vm13935_vm2, %v8512_v37, 0 }
 0x392   : > { %4169 = vst.msk [vmem:[#allocation2 + $0x109] sm:$0xff] %vm13938_vm0, %v8795_v16  ;;  %v11979_v16 = vpack.c.bf16 %v4649_v31, %v4648_v57  ;;  %v4656_v57 = vld [vmem:[#allocation2 + $0x70] sm:$0xff]  ;;  %v4657_v31 = vld [vmem:[#allocation2 + $0x78] sm:$0xff] }
 0x396   : > { %9601 = vmatmul.mubr.msk.bf16.vlgmr.msra.gmra.mxu0 %vm2145_vm6, %v3532_v38  ;;  %v4240_v38 = vand.u32 15, %v14117_v17 }
 0x397   : > { %9604 = vmatprep.mubr.msk.bf16.mxu0 %vm2145_vm6, %v3533_v62  ;;  %9619 = vmatpush3.bf16.msra.mxu0 %v3762_v32  ;;  %v11888_v62 = vld [vmem:[%s13890_s3 + $0x8] sm:$0x3]  ;;  %v4674_v32 = vpack.c.bf16 %v4643_v39, %v4642_v40 }
 0x398   : > { %9611 = vmatmul.mubr.msk.bf16.vlgmr.msra.gmra.mxu1 %vm2145_vm6, %v3638_v11  ;;  %10047 = vmatprep.subr.msk.bf16.mxu0 %vm2202_vm12, %v8441_v25  ;;  %v4788_v11 = vsel %vm4756_vm15, 65537, %v14112_v59  ;;  %v3950_v25 = vpack.c.bf16 %v3946_v33, %v11785_v49  ;;  %v4651_v40 = vld [vmem:[#allocation2 + $0x48] sm:$0xff]  ;;  %v4913_v33 = vld [vmem:[#allocation2 + $0x71] sm:$0xff] }
 0x399   : > { %9614 = vmatprep.mubr.msk.bf16.mxu1 %vm2145_vm6, %v3639_v60  ;;  %9629 = vmatpush3.bf16.msra.mxu1 %v3864_v15  ;;  %v4254_v15 = vand.u32 15, %v4170_v14  ;;  %v14118_v60 = vmov 0 }
 0x39a   : > { %10048 = vmatprep.subr.msk.bf16.mxu1 %vm13935_vm2, %v8463_v41  ;;  %v14119_v60 = vsel %vm11902_vm4, 4294967295, %v14118_v60  ;;  %v4907_v41 = vld [vmem:[#allocation2 + $0x41] sm:$0xff] }
 0x39b   : > { %vm11918_vm9 = vcmp.gt.s32.totalorder %v4254_v15, 0 }
 0x39e   : > { %9605 = vmatmul.mubr.msk.bf16.gmra.mxu0 %vm2145_vm6, %v3534_v28  ;;  %v4934_v28 = vpack.c.bf16 %v4906_v3, %v4905_v53  ;;  %v14134_v53 = vmov 0  ;;  %v4915_v3 = vld [vmem:[#allocation2 + $0x81] sm:$0xff] }
 0x39f   : > { %9620 = vmatprep.mubr.msk.bf16.mxu0 %vm2145_vm6, %v3743_v23  ;;  %v4790_v23 = vsel %vm4758_vm7, 65537, %v14112_v59  ;;  %vm12000_vm7 = vcmp.gt.s32.totalorder %v4296_v34, 0 }
 0x3a0   : > { %9615 = vmatmul.mubr.msk.bf16.gmra.mxu1 %vm2145_vm6, %v3640_v48  ;;  %v8448_v48 = vcombine.low %v4788_v11, %v11854_v58  ;;  %v8449_v1 = vcombine.low %v4790_v23, %v11854_v58 }
 0x3a1   : > { %9630 = vmatprep.mubr.msk.bf16.mxu1 %vm2145_vm6, %v11667_v30  ;;  %v4898_v30 = vld [vmem:[%s13890_s3] sm:$0x3] }
 0x3a2   : > { %v5210_v35 = vsel %vm13935_vm2, %v4898_v30, 0  ;;  %vm11945_vm8 = vcmp.ne.s16.totalorder %v8449_v1, 0  ;;  %v4918_v1 = vld [vmem:[#allocation2 + $0x99] sm:$0xff] }
 0x3a3   : > { %v14127_v52 = vsel %vm11945_vm8, 4294967295, %v14126_v52 }
 0x3a6   : > { %9621 = vmatmul.mubr.msk.bf16.vlgmr.msra.gmra.mxu0 %vm2145_vm6, %v3744_v50  ;;  %v4882_v50 = vsel %vm11902_vm4, %v4674_v32, 0  ;;  %v4916_v32 = vld [vmem:[#allocation2 + $0x89] sm:$0xff] }
 0x3a7   : > { %9624 = vmatprep.mubr.msk.bf16.mxu0 %vm2145_vm6, %v3745_v27  ;;  %9639 = vmatpush3.bf16.msra.mxu0 %v3970_v42  ;;  %v4645_v27 = vld [vmem:[#allocation2 + $0x18] sm:$0xff]  ;;  %v4939_v49 = vpack.c.bf16 %v4916_v32, %v4915_v3  ;;  %v4924_v3 = vld [vmem:[#allocation2 + $0xc9] sm:$0xff] }
 0x3a8   : > { %9631 = vmatmul.mubr.msk.bf16.vlgmr.msra.gmra.mxu1 %vm2145_vm6, %v11693_v9  ;;  %10049 = vmatprep.subr.msk.bf16.mxu0 %vm13935_vm2, %v4898_v30  ;;  %v3844_v9 = vld [vmem:[#allocation4 + $0x49] sm:$0xff]  ;;  %v3954_v30 = vsel %vm10999_vm11, %v3950_v25, 0  ;;  %v11932_v56 = vpack.c.bf16 %v4645_v27, %v4644_v24  ;;  %vm4762_vm11 = vmpackc.low %vm11918_vm9, %vm11918_vm9  ;;  %v4654_v24 = vld [vmem:[#allocation2 + $0x60] sm:$0xff] }
 0x3a9   : > { %9634 = vmatprep.mubr.msk.bf16.mxu1 %vm2145_vm6, %v11708_v8  ;;  %9649 = vmatpush3.bf16.msra.mxu1 %v4998_v61  ;;  %v3746_v8 = vsel %vm11049_vm3, %v3742_v7, 0  ;;  %v3848_v18 = vpack.c.bf16 %v3844_v9, %v3530_v51  ;;  %v4908_v51 = vld [vmem:[#allocation2 + $0x49] sm:$0xff]  ;;  %vm11912_vm3 = vcmp.gt.s32.totalorder %v4240_v38, 0  ;;  %v4174_v61 = vadd.s32 96, %v14107_v6  ;;  %v4910_v9 = vld [vmem:[#allocation2 + $0x59] sm:$0xff]  ;;  %vm4768_vm9 = vmpackc.low %vm12000_vm7, %vm12000_vm7 }
 0x3aa   : > { %10050 = vmatprep.subr.msk.bf16.mxu1 %vm13935_vm2, %v8512_v37  ;;  %v4935_v42 = vpack.c.bf16 %v4908_v51, %v4907_v41  ;;  %v4647_v37 = vld [vmem:[#allocation2 + $0x28] sm:$0xff]  ;;  %vm4760_vm12 = vmpackc.low %vm11912_vm3, %vm11912_vm3  ;;  %v4268_v7 = vand.u32 15, %v4172_v63  ;;  %v4794_v0 = vsel %vm4762_vm11, 65537, %v14112_v59  ;;  %v4936_v5 = vpack.c.bf16 %v4910_v9, %v4909_v46  ;;  %v4652_v51 = vld [vmem:[#allocation2 + $0x50] sm:$0xff] }
 0x3ab   : > { %v11942_v54 = vpack.c.bf16 %v4647_v37, %v4646_v45  ;;  %v8451_v39 = vcombine.low %v4794_v0, %v11854_v58  ;;  %v4653_v63 = vld [vmem:[#allocation2 + $0x58] sm:$0xff]  ;;  %v4655_v27 = vld [vmem:[#allocation2 + $0x68] sm:$0xff]  ;;  %v4800_v46 = vsel %vm4768_vm9, 65537, %v14112_v59 }
 0x3ac   : > { %vm11950_vm5 = vcmp.gt.s32.totalorder %v4268_v7, 0  ;;  %v4917_v37 = vld [vmem:[#allocation2 + $0x91] sm:$0xff]  ;;  %v12034_v7 = vpack.c.bf16 %v4655_v27, %v4654_v24  ;;  %v8454_v43 = vcombine.low %v4800_v46, %v11854_v58 }
 0x3ad   : > { %v4884_v14 = vsel %vm11945_vm8, %v11942_v54, 0  ;;  %vm4764_vm14 = vmpackc.low %vm11950_vm5, %vm11950_vm5  ;;  %vm11993_vm1 = vcmp.ne.s16.totalorder %v8451_v39, 0  ;;  %v4940_v36 = vpack.c.bf16 %v4918_v1, %v4917_v37  ;;  %v4921_v39 = vld [vmem:[#allocation2 + $0xb1] sm:$0xff]  ;;  %v4662_v37 = vld [vmem:[#allocation2 + $0xa0] sm:$0xff] }
 0x3ae   : > { %9625 = vmatmul.mubr.msk.bf16.gmra.mxu0 %vm2145_vm6, %v3746_v8  ;;  %v4911_v8 = vld [vmem:[#allocation2 + $0x61] sm:$0xff]  ;;  %v4796_v17 = vsel %vm4764_vm14, 65537, %v14112_v59  ;;  %v14135_v53 = vsel %vm11993_vm1, 4294967295, %v14134_v53  ;;  %v4661_v24 = vld [vmem:[#allocation2 + $0x98] sm:$0xff] }
 0x3af   : > { %9640 = vmatprep.mubr.msk.bf16.mxu0 %vm2145_vm6, %v3951_v26  ;;  %v4792_v26 = vsel %vm4760_vm12, 65537, %v14112_v59  ;;  %14136 = vst [vmem:[#allocation24_spill] sm:$0xff] %v14135_v53  ;;  %v4663_v1 = vld [vmem:[#allocation2 + $0xa8] sm:$0xff] }
 0x3b0   : > { %9635 = vmatmul.mubr.msk.bf16.gmra.mxu1 %vm2145_vm6, %v3848_v18  ;;  %v4912_v18 = vld [vmem:[#allocation2 + $0x69] sm:$0xff] }
 0x3b1   : > { %9650 = vmatprep.mubr.msk.bf16.mxu1 %vm13938_vm0, %v4931_v29  ;;  %v4282_v29 = vand.u32 15, %v4174_v61  ;;  %v4937_v44 = vpack.c.bf16 %v4912_v18, %v4911_v8  ;;  %v12022_v61 = vpack.c.bf16 %v4653_v63, %v4652_v51  ;;  %v4919_v8 = vld [vmem:[#allocation2 + $0xa1] sm:$0xff]  ;;  %v4920_v18 = vld [vmem:[#allocation2 + $0xa9] sm:$0xff]  ;;  %v4188_v63 = vadd.s32 208, %v14107_v6 }
 0x3b3   : > { %vm11960_vm10 = vcmp.gt.s32.totalorder %v4282_v29, 0  ;;  %v14144_v29 = vmov 0 }
 0x3b4   : > { %vm4766_vm13 = vmpackc.low %vm11960_vm10, %vm11960_vm10 }
 0x3b5   : > { %v4798_v11 = vsel %vm4766_vm13, 65537, %v14112_v59 }
 0x3b6   : > { %9641 = vmatmul.mubr.msk.bf16.vlgmr.msra.gmra.mxu0 %vm2145_vm6, %v3952_v10  ;;  %v4650_v10 = vld [vmem:[#allocation2 + $0x40] sm:$0xff]  ;;  %v8453_v20 = vcombine.low %v4798_v11, %v11854_v58  ;;  %v14154_v11 = vmov 0 }
 0x3b7   : > { %9644 = vmatprep.mubr.msk.bf16.mxu0 %vm2145_vm6, %v3953_v22  ;;  %9683 = vmatpush3.bf16.msra.mxu0 %v5210_v35  ;;  %v14132_v22 = vmov 0  ;;  %v4186_v35 = vadd.s32 192, %v14107_v6 }
 0x3b8   : > { %9651 = vmatmul.mubr.msk.bf16.vlgmr.msra.gmra.mxu1 %vm13938_vm0, %v4932_v2  ;;  %10051 = vmatprep.subr.msk.bf16.mxu0 %vm13935_vm2, %v8529_v19  ;;  %v8450_v2 = vcombine.low %v4792_v26, %v11854_v58  ;;  %v11990_v19 = vpack.c.bf16 %v4651_v40, %v4650_v10  ;;  %vm12037_vm5 = vcmp.ne.s16.totalorder %v8453_v20, 0  ;;  %v12066_v40 = vpack.c.bf16 %v4657_v31, %v4656_v57  ;;  %v4927_v57 = vld [vmem:[#allocation2 + $0xe1] sm:$0xff]  ;;  %v4928_v31 = vld [vmem:[#allocation2 + $0xe9] sm:$0xff] }
 0x3b9   : > { %9654 = vmatprep.mubr.msk.bf16.mxu1 %vm13938_vm0, %v4933_v47  ;;  %9717 = vmatpush3.bf16.msra.mxu1 %v5680_v55  ;;  %v4178_v47 = vadd.s32 128, %v14107_v6  ;;  %v4914_v55 = vld [vmem:[#allocation2 + $0x79] sm:$0xff]  ;;  %v14145_v29 = vsel %vm12037_vm5, 4294967295, %v14144_v29  ;;  %v4366_v32 = vand.u32 15, %v4186_v35 }
 0x3ba   : > { %10052 = vmatprep.subr.msk.bf16.mxu1 %vm13935_vm2, %v11888_v62  ;;  %vm11986_vm15 = vcmp.ne.s16.totalorder %v8450_v2, 0  ;;  %v4938_v41 = vpack.c.bf16 %v4914_v55, %v4913_v33  ;;  %v4886_v23 = vsel %vm11993_vm1, %v11990_v19, 0  ;;  %14146 = vst [vmem:[#allocation26_spill] sm:$0xff] %v14145_v29  ;;  %v14151_v33 = vmov 0  ;;  %v4922_v55 = vld [vmem:[#allocation2 + $0xb9] sm:$0xff] }
 0x3bb   : > { %v14133_v22 = vsel %vm11986_vm15, 4294967295, %v14132_v22  ;;  %v4310_v38 = vand.u32 15, %v4178_v47  ;;  %v4885_v25 = vsel %vm11986_vm15, %v11979_v16, 0  ;;  %v4658_v47 = vld [vmem:[#allocation2 + $0x80] sm:$0xff] }
 0x3bc   : > { %v14172_v35 = vld [vmem:[#allocation10_spill] sm:$0xff] }
 0x3bd   : > { %vm12012_vm3 = vcmp.gt.s32.totalorder %v4310_v38, 0  ;;  %v4923_v38 = vld [vmem:[#allocation2 + $0xc1] sm:$0xff] }
 0x3be   : > { %9645 = vmatmul.mubr.msk.bf16.gmra.mxu0 %vm2145_vm6, %v3954_v30  ;;  %vm11938_vm6 = vcmp.ne.s16.totalorder %v8448_v48, 0  ;;  %v4180_v48 = vadd.s32 144, %v14107_v6  ;;  %v14141_v30 = vmov 0  ;;  %vm4770_vm11 = vmpackc.low %vm12012_vm3, %vm12012_vm3  ;;  %vm12072_vm3 = vcmp.ne.s16.totalorder %v8454_v43, 0 }
 0x3bf   : > { %9684 = vmatprep.mubr.msk.bf16.mxu0 %vm13938_vm0, %v4882_v50  ;;  %v14125_v13 = vsel %vm11938_vm6, 4294967295, %v14124_v13  ;;  %v4883_v4 = vsel %vm11938_vm6, %v11932_v56, 0  ;;  %v4802_v0 = vsel %vm4770_vm11, 65537, %v14112_v59  ;;  %v14152_v33 = vsel %vm12072_vm3, 4294967295, %v14151_v33 }
 0x3c0   : > { %9655 = vmatmul.mubr.msk.bf16.gmra.mxu1 %vm13938_vm0, %v4934_v28  ;;  %v8452_v28 = vcombine.low %v4796_v17, %v11854_v58  ;;  %v4324_v45 = vand.u32 15, %v4180_v48  ;;  %v8455_v10 = vcombine.low %v4802_v0, %v11854_v58  ;;  %14153 = vst [vmem:[#allocation16_spill] sm:$0xff] %v14152_v33  ;;  %v4942_v48 = vpack.c.bf16 %v4922_v55, %v4921_v39  ;;  %v4926_v0 = vld [vmem:[#allocation2 + $0xd9] sm:$0xff] }
 0x3c1   : > { %9658 = vmatprep.mubr.msk.bf16.mxu1 %vm13938_vm0, %v4935_v42  ;;  %v4182_v42 = vadd.s32 160, %v14107_v6 }
 0x3c2   : > { %vm12026_vm12 = vcmp.ne.s16.totalorder %v8452_v28, 0  ;;  %vm12046_vm10 = vcmp.gt.s32.totalorder %v4324_v45, 0  ;;  %vm12078_vm9 = vcmp.ne.s16.totalorder %v8455_v10, 0  ;;  %v4889_v28 = vsel %vm12072_vm3, %v12066_v40, 0 }
 0x3c3   : > { %v14142_v30 = vsel %vm12026_vm12, 4294967295, %v14141_v30  ;;  %v4338_v9 = vand.u32 15, %v4182_v42  ;;  %v4887_v26 = vsel %vm12026_vm12, %v12022_v61, 0  ;;  %vm4772_vm13 = vmpackc.low %vm12046_vm10, %vm12046_vm10  ;;  %v14155_v11 = vsel %vm12078_vm9, 4294967295, %v14154_v11  ;;  %v4660_v42 = vld [vmem:[#allocation2 + $0x90] sm:$0xff] }
 0x3c4   : > { %14143 = vst [vmem:[#allocation25_spill] sm:$0xff] %v14142_v30  ;;  %14156 = vst [vmem:[#allocation21_spill] sm:$0xff] %v14155_v11  ;;  %v4804_v15 = vsel %vm4772_vm13, 65537, %v14112_v59  ;;  %vm12097_vm10 = vcmp.gt.s32.totalorder %v4366_v32, 0  ;;  %v4190_v45 = vadd.s32 224, %v14107_v6 }
 0x3c5   : > { %vm12054_vm14 = vcmp.gt.s32.totalorder %v4338_v9, 0  ;;  %v8456_v27 = vcombine.low %v4804_v15, %v11854_v58  ;;  %v4945_v15 = vpack.c.bf16 %v4928_v31, %v4927_v57 }
 0x3c6   : > { %9685 = vmatmul.mubr.msk.bf16.vlgmr.msra.gmra.mxu0 %vm13938_vm0, %v4883_v4  ;;  %vm4774_vm7 = vmpackc.low %vm12054_vm14, %vm12054_vm14  ;;  %v14165_v4 = vmov 0 }
 0x3c7   : > { %9751 = vmatpush3.bf16.msra.mxu0 %v5990_v12  ;;  %9688 = vmatprep.mubr.msk.bf16.mxu0 %vm13938_vm0, %v4884_v14  ;;  %v4888_v12 = vsel %vm12037_vm5, %v12034_v7, 0  ;;  %v4659_v14 = vld [vmem:[#allocation2 + $0x88] sm:$0xff]  ;;  %v4806_v51 = vsel %vm4774_vm7, 65537, %v14112_v59  ;;  %vm4778_vm7 = vmpackc.low %vm12097_vm10, %vm12097_vm10 }
 0x3c8   : > { %9659 = vmatmul.mubr.msk.bf16.gmra.mxu1 %vm13938_vm0, %v4936_v5  ;;  %10053 = vmatprep.subr.msk.bf16.mxu0 %vm13935_vm2, %v11976_v21  ;;  %v4184_v5 = vadd.s32 176, %v14107_v6  ;;  %v12076_v17 = vpack.c.bf16 %v4659_v14, %v4658_v47  ;;  %v8457_v46 = vcombine.low %v4806_v51, %v11854_v58  ;;  %vm12120_vm2 = vcmp.ne.s16.totalorder %v8456_v27, 0 }
 0x3c9   : > { %9662 = vmatprep.mubr.msk.bf16.mxu1 %vm13938_vm0, %v4937_v44  ;;  %v4941_v44 = vpack.c.bf16 %v4920_v18, %v4919_v8  ;;  %v4380_v8 = vand.u32 15, %v4188_v63  ;;  %v12113_v18 = vpack.c.bf16 %v4661_v24, %v4660_v42  ;;  %v14166_v4 = vsel %vm12120_vm2, 4294967295, %v14165_v4  ;;  %v5373_v42 = vld [vmem:[#allocation2 + $0x2] sm:$0xff]  ;;  %v5374_v24 = vld [vmem:[#allocation2 + $0xa] sm:$0xff] }
 0x3ca   : > { %v4352_v34 = vand.u32 15, %v4184_v5  ;;  %v4890_v50 = vsel %vm12078_vm9, %v12076_v17, 0  ;;  %14167 = vst [vmem:[#allocation23_spill] sm:$0xff] %v14166_v4  ;;  %v12124_v5 = vpack.c.bf16 %v4663_v1, %v4662_v37  ;;  %vm12129_vm9 = vcmp.ne.s16.totalorder %v8457_v46, 0  ;;  %v4930_v37 = vld [vmem:[#allocation2 + $0xf9] sm:$0xff] }
 0x3cb   : > { %v4233_v47 = vand.u32 15, %v14172_v35  ;;  %v4810_v10 = vsel %vm4778_vm7, 65537, %v14112_v59  ;;  %v14185_v46 = vmov 0  ;;  %v4670_v63 = vld [vmem:[#allocation2 + $0xe0] sm:$0xff] }
 0x3cc   : > { %vm12089_vm11 = vcmp.gt.s32.totalorder %v4352_v34, 0  ;;  %v4891_v34 = vsel %vm12120_vm2, %v12113_v18, 0  ;;  %v4892_v32 = vsel %vm12129_vm9, %v12124_v5, 0 }
 0x3cd   : > { %vm14171_vm10 = vmpackc.low %vm12089_vm11, %vm12089_vm11  ;;  %vm12166_vm7 = vcmp.lt.s32.totalorder %v4233_v47, 15 }
 0x3ce   : > { %9689 = vmatmul.mubr.msk.bf16.gmra.mxu0 %vm13938_vm0, %v4885_v25  ;;  %v14157_v25 = vld [vmem:[#allocation6_spill] sm:$0xff]  ;;  %v4808_v2 = vsel %vm14171_vm10, 65537, %v14112_v59  ;;  %vm14181_vm10 = vcmask 31744  }
 0x3cf   : > { %9692 = vmatprep.mubr.msk.bf16.mxu0 %vm13938_vm0, %v4886_v23  ;;  %v4943_v23 = vpack.c.bf16 %v4924_v3, %v4923_v38  ;;  %v4192_v3 = vadd.s32 240, %v14107_v6  ;;  %v8458_v51 = vcombine.low %v4808_v2, %v11854_v58  ;;  %vm14182_vm2 = vmmov %vm14181_vm10  ;;  %v14193_v2 = vmov 0  ;;  %v4669_v38 = vld [vmem:[#allocation2 + $0xd8] sm:$0xff] }
 0x3d0   : > { %9663 = vmatmul.mubr.msk.bf16.gmra.mxu1 %vm13938_vm0, %v4938_v41  ;;  %v4205_v41 = vand.u32 15, %v14157_v25  ;;  %v4664_v25 = vld [vmem:[#allocation2 + $0xb0] sm:$0xff]  ;;  %vm14183_vm3 = vmmov %vm14182_vm2 }
 0x3d1   : > { %9666 = vmatprep.mubr.msk.bf16.mxu1 %vm13938_vm0, %v4939_v49  ;;  %v4408_v1 = vand.u32 15, %v4192_v3  ;;  %vm12184_vm5 = vcmp.ne.s16.totalorder %v8458_v51, 0  ;;  %v5375_v3 = vld [vmem:[#allocation2 + $0x12] sm:$0xff]  ;;  %v4175_v49 = vadd.s32 104, %v14107_v6 }
 0x3d2   : > { %vm12103_vm14 = vcmp.lt.s32.totalorder %v4205_v41, 15  ;;  %v4665_v41 = vld [vmem:[#allocation2 + $0xb8] sm:$0xff]  ;;  %v14186_v46 = vsel %vm12184_vm5, 4294967295, %v14185_v46 }
 0x3d3   : > { %vm5486_vm13 = vmpackc.low %vm12103_vm14, %vm12103_vm14  ;;  %vm12141_vm14 = vcmp.gt.s32.totalorder %v4380_v8, 0  ;;  %v12178_v20 = vpack.c.bf16 %v4665_v41, %v4664_v25  ;;  %14187 = vst [vmem:[#allocation19_spill] sm:$0xff] %v14186_v46  ;;  %v4173_v41 = vadd.s32 88, %v14107_v6  ;;  %v5379_v25 = vld [vmem:[#allocation2 + $0x32] sm:$0xff] }
 0x3d4   : > { %v5518_v55 = vsel %vm5486_vm13, 65537, %v14112_v59  ;;  %vm14184_vm13 = vmmov %vm14182_vm2 }
 0x3d5   : > { %v8496_v27 = vcombine.low %v11854_v58, %v5518_v55  ;;  %v4893_v47 = vsel %vm12184_vm5, %v12178_v20, 0 }
 0x3d6   : > { %9693 = vmatmul.mubr.msk.bf16.gmra.mxu0 %vm13938_vm0, %v4887_v26  ;;  %v4925_v26 = vld [vmem:[#allocation2 + $0xd1] sm:$0xff] }
 0x3d7   : > { %9696 = vmatprep.mubr.msk.bf16.mxu0 %vm13938_vm0, %v4888_v12  ;;  %v4394_v12 = vand.u32 15, %v4190_v45  ;;  %v4944_v14 = vpack.c.bf16 %v4926_v0, %v4925_v26  ;;  %v4929_v45 = vld [vmem:[#allocation2 + $0xf1] sm:$0xff] }
 0x3d8   : > { %9667 = vmatmul.mubr.msk.bf16.gmra.mxu1 %vm13938_vm0, %v4940_v36  ;;  %v14164_v36 = vld [vmem:[#allocation8_spill] sm:$0xff]  ;;  %v14189_v26 = vld [vmem:[#allocation13_spill] sm:$0xff]  ;;  %v4946_v31 = vpack.c.bf16 %v4930_v37, %v4929_v45  ;;  %v14205_v37 = vmov 0 }
 0x3d9   : > { %9670 = vmatprep.mubr.msk.bf16.mxu1 %vm13938_vm0, %v4941_v44  ;;  %v4219_v43 = vand.u32 15, %v14164_v36  ;;  %v14168_v44 = vmov 0  ;;  %vm12158_vm11 = vcmp.gt.s32.totalorder %v4394_v12, 0  ;;  %v4247_v0 = vand.u32 15, %v14189_v26 }
 0x3da   : > { %v14169_v44 = vsel %vm12129_vm9, 4294967295, %v14168_v44  ;;  %v14190_v36 = vmov 0  ;;  %v4275_v26 = vand.u32 15, %v4173_v41  ;;  %v5380_v41 = vld [vmem:[#allocation2 + $0x3a] sm:$0xff] }
 0x3db   : > { %14170 = vst [vmem:[#allocation18_spill] sm:$0xff] %v14169_v44 }
 0x3de   : > { %9697 = vmatmul.mubr.msk.bf16.gmra.mxu0 %vm13938_vm0, %v4889_v28  ;;  %v4666_v28 = vld [vmem:[#allocation2 + $0xc0] sm:$0xff] }
 0x3df   : > { %9700 = vmatprep.mubr.msk.bf16.mxu0 %vm13938_vm0, %v4890_v50  ;;  %v4171_v50 = vadd.s32 72, %v14107_v6 }
 0x3e0   : > { %9671 = vmatmul.mubr.msk.bf16.gmra.mxu1 %vm13938_vm0, %v4942_v48  ;;  %v4667_v48 = vld [vmem:[#allocation2 + $0xc8] sm:$0xff] }
 0x3e1   : > { %9674 = vmatprep.mubr.msk.bf16.mxu1 %vm13938_vm0, %v4943_v23  ;;  %vm12149_vm0 = vcmp.lt.s32.totalorder %v4219_v43, 15  ;;  %v8459_v23 = vcombine.low %v4810_v10, %v11854_v58  ;;  %v12188_v9 = vpack.c.bf16 %v4667_v48, %v4666_v28  ;;  %v5405_v43 = vpack.c.bf16 %v5374_v24, %v5373_v42  ;;  %v4671_v28 = vld [vmem:[#allocation2 + $0xe8] sm:$0xff] }
 0x3e2   : > { %vm5488_vm9 = vmpackc.low %vm12149_vm0, %vm12149_vm0  ;;  %v4261_v57 = vand.u32 15, %v4171_v50  ;;  %vm12228_vm0 = vcmp.lt.s32.totalorder %v4247_v0, 15  ;;  %v5377_v50 = vld [vmem:[#allocation2 + $0x22] sm:$0xff]  ;;  %v5378_v42 = vld [vmem:[#allocation2 + $0x2a] sm:$0xff]  ;;  %v14212_v0 = vmov 0 }
 0x3e3   : > { %v5520_v12 = vsel %vm5488_vm9, 65537, %v14112_v59 }
 0x3e4   : > { %vm12236_vm9 = vcmp.lt.s32.totalorder %v4261_v57, 15  ;;  %v4289_v57 = vand.u32 15, %v4175_v49 }
 0x3e6   : > { %9701 = vmatmul.mubr.msk.bf16.gmra.mxu0 %vm14181_vm10, %v4891_v34  ;;  %vm4782_vm10 = vmpackc.low %vm12158_vm11, %vm12158_vm11  ;;  %vm12200_vm11 = vcmp.ne.s16.totalorder %v8459_v23, 0  ;;  %v5382_v23 = vld [vmem:[#allocation2 + $0x4a] sm:$0xff] }
 0x3e7   : > { %9704 = vmatprep.mubr.msk.bf16.mxu0 %vm14183_vm3, %v4892_v32  ;;  %vm5490_vm3 = vmpackc.low %vm12166_vm7, %vm12166_vm7  ;;  %v14191_v36 = vsel %vm12200_vm11, 4294967295, %v14190_v36  ;;  %v4814_v35 = vsel %vm4782_vm10, 65537, %v14112_v59  ;;  %v4894_v55 = vsel %vm12200_vm11, %v12188_v9, 0  ;;  %v5376_v32 = vld [vmem:[#allocation2 + $0x1a] sm:$0xff]  ;;  %vm14202_vm7 = vcmask 31744  }
 0x3e8   : > { %9675 = vmatmul.mubr.msk.bf16.gmra.mxu1 %vm14182_vm2, %v4944_v14  ;;  %vm14188_vm2 = vmpackc.low %vm12141_vm14, %vm12141_vm14  ;;  %14192 = vst [vmem:[#allocation22_spill] sm:$0xff] %v14191_v36  ;;  %vm12210_vm14 = vcmp.ne.s16.totalorder %v8496_v27, 0  ;;  %v4668_v14 = vld [vmem:[#allocation2 + $0xd0] sm:$0xff]  ;;  %v5522_v34 = vsel %vm5490_vm3, 65537, %v14112_v59  ;;  %v8461_v48 = vcombine.low %v4814_v35, %v11854_v58  ;;  %v12250_v45 = vpack.c.bf16 %v5376_v32, %v5375_v3 }
 0x3e9   : > { %9678 = vmatprep.mubr.msk.bf16.mxu1 %vm14184_vm13, %v4945_v15  ;;  %v4812_v8 = vsel %vm14188_vm2, 65537, %v14112_v59  ;;  %v14194_v2 = vsel %vm12210_vm14, 4294967295, %v14193_v2  ;;  %vm12219_vm13 = vcmp.gt.s32.totalorder %v4408_v1, 0  ;;  %v8497_v15 = vcombine.low %v11854_v58, %v5520_v12  ;;  %vm14203_vm2 = vmmov %vm14202_vm7 }
 0x3ea   : > { %14195 = vst [vmem:[#allocation20_spill] sm:$0xff] %v14194_v2  ;;  %v8460_v10 = vcombine.low %v4812_v8, %v11854_v58  ;;  %v5613_v51 = vsel %vm12210_vm14, %v5405_v43, 0  ;;  %v8498_v24 = vcombine.low %v11854_v58, %v5522_v34  ;;  %vm14204_vm3 = vmmov %vm14203_vm2  ;;  %v12248_v27 = vpack.c.bf16 %v4669_v38, %v4668_v14  ;;  %v4673_v38 = vld [vmem:[#allocation2 + $0xf8] sm:$0xff] }
 0x3eb   : > { %vm14208_vm10 = vmmov %vm14203_vm2  ;;  %vm12260_vm11 = vcmp.ne.s16.totalorder %v8497_v15, 0  ;;  %v14209_v1 = vmov 0  ;;  %v12264_v8 = vpack.c.bf16 %v4671_v28, %v4670_v63  ;;  %v12279_v12 = vpack.c.bf16 %v5378_v42, %v5377_v50  ;;  %v12318_v50 = vld [vmem:[%s13890_s3 + $0xc] sm:$0x3]  ;;  %v5385_v63 = vld [vmem:[#allocation2 + $0x62] sm:$0xff] }
 0x3ec   : > { %vm12255_vm14 = vcmp.ne.s16.totalorder %v8460_v10, 0  ;;  %v14210_v1 = vsel %vm12260_vm11, 4294967295, %v14209_v1  ;;  %v5614_v14 = vsel %vm12260_vm11, %v12250_v45, 0  ;;  %v4177_v15 = vadd.s32 120, %v14107_v6 }
 0x3ed   : > { %v14206_v37 = vsel %vm12255_vm14, 4294967295, %v14205_v37  ;;  %14211 = vst [vmem:[#allocation14_spill] sm:$0xff] %v14210_v1  ;;  %v4179_v28 = vadd.s32 136, %v14107_v6  ;;  %v4181_v32 = vadd.s32 152, %v14107_v6 }
 0x3ee   : > { %9705 = vmatmul.mubr.msk.bf16.gmra.mxu0 %vm14202_vm7, %v4893_v47  ;;  %vm5492_vm7 = vmpackc.low %vm12228_vm0, %vm12228_vm0  ;;  %14207 = vst [vmem:[#allocation11_spill] sm:$0xff] %v14206_v37  ;;  %v4895_v47 = vsel %vm12255_vm14, %v12248_v27, 0 }
 0x3ef   : > { %9708 = vmatprep.mubr.msk.bf16.mxu0 %vm14204_vm3, %v4894_v55  ;;  %vm12269_vm3 = vcmp.ne.s16.totalorder %v8461_v48, 0  ;;  %vm14215_vm0 = vmpackc.low %vm12219_vm13, %vm12219_vm13  ;;  %v5524_v35 = vsel %vm5492_vm7, 65537, %v14112_v59  ;;  %vm14219_vm13 = vcmask 1041408   ;;  %v4672_v55 = vld [vmem:[#allocation2 + $0xf0] sm:$0xff]  ;;  %vm12308_vm7 = vcmp.lt.s32.totalorder %v4289_v57, 15  ;;  %v5381_v48 = vld [vmem:[#allocation2 + $0x42] sm:$0xff] }
 0x3f0   : > { %9679 = vmatmul.mubr.msk.bf16.gmra.mxu1 %vm14203_vm2, %v4946_v31  ;;  %vm5494_vm2 = vmpackc.low %vm12236_vm9, %vm12236_vm9  ;;  %v14213_v0 = vsel %vm12269_vm3, 4294967295, %v14212_v0  ;;  %v4816_v43 = vsel %vm14215_vm0, 65537, %v14112_v59  ;;  %v14216_v31 = vmov 0  ;;  %v6284_v10 = vsel %vm14219_vm13, %v11888_v62, 0 }
 0x3f1   : > { %9718 = vmatprep.mubr.msk.bf16.mxu1 %vm14208_vm10, %v5613_v51  ;;  %14214 = vst [vmem:[#allocation15_spill] sm:$0xff] %v14213_v0  ;;  %vm12281_vm10 = vcmp.ne.s16.totalorder %v8498_v24, 0  ;;  %v5526_v39 = vsel %vm5494_vm2, 65537, %v14112_v59  ;;  %v4896_v34 = vsel %vm12269_vm3, %v12264_v8, 0  ;;  %v8462_v3 = vcombine.low %v4816_v43, %v11854_v58 }
 0x3f2   : > { %v14217_v31 = vsel %vm12281_vm10, 4294967295, %v14216_v31  ;;  %vm12299_vm9 = vcmp.lt.s32.totalorder %v4275_v26, 15  ;;  %v5615_v62 = vsel %vm12281_vm10, %v12279_v12, 0  ;;  %v8499_v51 = vcombine.low %v11854_v58, %v5524_v35 }
 0x3f3   : > { %14218 = vst [vmem:[#allocation17_spill] sm:$0xff] %v14217_v31  ;;  %vm14224_vm2 = vcmask 31744   ;;  %v8500_v49 = vcombine.low %v11854_v58, %v5526_v39  ;;  %v12322_v42 = vpack.c.bf16 %v4673_v38, %v4672_v55  ;;  %vm5496_vm10 = vmpackc.low %vm12299_vm9, %vm12299_vm9  ;;  %v14227_v24 = vmov 0 }
 0x3f4   : > { %vm14225_vm0 = vmmov %vm14224_vm2  ;;  %v12332_v26 = vpack.c.bf16 %v5380_v41, %v5379_v25  ;;  %v4303_v43 = vand.u32 15, %v4177_v15  ;;  %v14231_v57 = vmov 0  ;;  %v12341_v35 = vpack.c.bf16 %v5382_v23, %v5381_v48  ;;  %v5384_v25 = vld [vmem:[#allocation2 + $0x5a] sm:$0xff] }
 0x3f5   : > { %vm14226_vm13 = vmmov %vm14225_vm0  ;;  %vm14234_vm9 = vcmask 1041408   ;;  %vm12345_vm3 = vcmp.ne.s16.totalorder %v8500_v49, 0  ;;  %v5923_v38 = vsel %vm11902_vm4, %v11932_v56, 0  ;;  %v4183_v56 = vadd.s32 168, %v14107_v6 }
 0x3f6   : > { %9709 = vmatmul.mubr.msk.bf16.gmra.mxu0 %vm14224_vm2, %v4895_v47  ;;  %vm12327_vm2 = vcmp.ne.s16.totalorder %v8462_v3, 0  ;;  %vm14230_vm11 = vmmov %vm14225_vm0  ;;  %v4317_v47 = vand.u32 15, %v4179_v28  ;;  %v5617_v15 = vsel %vm12345_vm3, %v12341_v35, 0  ;;  %v5386_v28 = vld [vmem:[#allocation2 + $0x6a] sm:$0xff]  ;;  %v4331_v49 = vand.u32 15, %v4181_v32 }
 0x3f7   : > { %9712 = vmatprep.mubr.msk.bf16.mxu0 %vm14226_vm13, %v4896_v34  ;;  %v14228_v24 = vsel %vm12327_vm2, 4294967295, %v14227_v24  ;;  %vm12337_vm13 = vcmp.ne.s16.totalorder %v8499_v51, 0  ;;  %v4897_v39 = vsel %vm12327_vm2, %v12322_v42, 0 }
 0x3f8   : > { %9719 = vmatmul.mubr.msk.bf16.vlgmr.msra.gmra.mxu1 %vm14225_vm0, %v5614_v14  ;;  %14229 = vst [vmem:[#allocation5_spill] sm:$0xff] %v14228_v24  ;;  %vm5498_vm0 = vmpackc.low %vm12308_vm7, %vm12308_vm7  ;;  %v14232_v57 = vsel %vm12337_vm13, 4294967295, %v14231_v57  ;;  %v14235_v14 = vmov 0  ;;  %v5616_v55 = vsel %vm12337_vm13, %v12332_v26, 0  ;;  %vm14242_vm7 = vcmask 31744  }
 0x3f9   : > { %9722 = vmatprep.mubr.msk.bf16.mxu1 %vm14230_vm11, %v5615_v62  ;;  %9785 = vmatpush3.bf16.msra.mxu1 %v6284_v10  ;;  %14233 = vst [vmem:[#allocation7_spill] sm:$0xff] %v14232_v57  ;;  %v14236_v14 = vsel %vm12345_vm3, 4294967295, %v14235_v14  ;;  %v5528_v10 = vsel %vm5496_vm10, 65537, %v14112_v59  ;;  %v5530_v34 = vsel %vm5498_vm0, 65537, %v14112_v59  ;;  %vm12360_vm11 = vcmp.lt.s32.totalorder %v4303_v43, 15  ;;  %v5383_v62 = vld [vmem:[#allocation2 + $0x52] sm:$0xff]  ;;  %vm14243_vm0 = vmmov %vm14242_vm7 }
 0x3fa   : > { %10054 = vmatprep.subr.msk.bf16.mxu1 %vm14234_vm9, %v12318_v50  ;;  %14237 = vst [vmem:[#allocation9_spill] sm:$0xff] %v14236_v14  ;;  %v8501_v41 = vcombine.low %v11854_v58, %v5528_v10  ;;  %vm12369_vm10 = vcmp.lt.s32.totalorder %v4317_v47, 15  ;;  %v8502_v48 = vcombine.low %v11854_v58, %v5530_v34  ;;  %vm14244_vm9 = vmmov %vm14243_vm0  ;;  %v12382_v23 = vpack.c.bf16 %v5384_v25, %v5383_v62 }
 0x3fb   : > { %vm5500_vm4 = vmpackc.low %vm12360_vm11, %vm12360_vm11  ;;  %v14246_v43 = vmov 0  ;;  %v12391_v47 = vpack.c.bf16 %v5386_v28, %v5385_v63  ;;  %v4345_v10 = vand.u32 15, %v4183_v56  ;;  %vm12410_vm11 = vcmp.lt.s32.totalorder %v4331_v49, 15  ;;  %v5389_v63 = vld [vmem:[#allocation2 + $0x82] sm:$0xff]  ;;  %v5390_v28 = vld [vmem:[#allocation2 + $0x8a] sm:$0xff] }
 0x3fc   : > { %vm14245_vm3 = vmmov %vm14243_vm0  ;;  %vm12387_vm13 = vcmp.ne.s16.totalorder %v8501_v41, 0  ;;  %v5532_v34 = vsel %vm5500_vm4, 65537, %v14112_v59  ;;  %v4185_v25 = vadd.s32 184, %v14107_v6  ;;  %v5388_v41 = vld [vmem:[#allocation2 + $0x7a] sm:$0xff]  ;;  %v12429_v49 = vld [vmem:[%s13890_s3 + $0xe] sm:$0x3] }
 0x3fd   : > { %v14247_v43 = vsel %vm12387_vm13, 4294967295, %v14246_v43  ;;  %v5618_v32 = vsel %vm12387_vm13, %v12382_v23, 0  ;;  %v8503_v51 = vcombine.low %v11854_v58, %v5532_v34  ;;  %vm12419_vm4 = vcmp.lt.s32.totalorder %v4345_v10, 15  ;;  %v5391_v56 = vld [vmem:[#allocation2 + $0x92] sm:$0xff] }
 0x3fe   : > { %9713 = vmatmul.mubr.msk.bf16.gmra.mxu0 %vm14242_vm7, %v4897_v39  ;;  %vm5502_vm7 = vmpackc.low %vm12369_vm10, %vm12369_vm10  ;;  %14248 = vst [vmem:[#allocation12_spill] sm:$0xff] %v14247_v43  ;;  %v14249_v39 = vmov 0  ;;  %v4359_v34 = vand.u32 15, %v4185_v25  ;;  %v5926_v62 = vsel %vm11986_vm15, %v11990_v19, 0 }
 0x3ff   : > { %9752 = vmatprep.mubr.msk.bf16.mxu0 %vm14244_vm9, %v5923_v38  ;;  %v5534_v3 = vsel %vm5502_vm7, 65537, %v14112_v59  ;;  %vm14257_vm10 = vmmov %vm14244_vm9 }
 0x400   : > { %9723 = vmatmul.mubr.msk.bf16.gmra.mxu1 %vm14243_vm0, %v5616_v55  ;;  %vm12393_vm0 = vcmp.ne.s16.totalorder %v8502_v48, 0  ;;  %v5924_v55 = vsel %vm11938_vm6, %v11942_v54, 0  ;;  %v8504_v48 = vcombine.low %v11854_v58, %v5534_v3  ;;  %vm5504_vm7 = vmpackc.low %vm12410_vm11, %vm12410_vm11  ;;  %vm12442_vm6 = vcmp.ne.s16.totalorder %v8503_v51, 0 }
 0x401   : > { %9726 = vmatprep.mubr.msk.bf16.mxu1 %vm14245_vm3, %v5617_v15  ;;  %v14250_v39 = vsel %vm12393_vm0, 4294967295, %v14249_v39  ;;  %vm14252_vm3 = vcmask 1041408   ;;  %v5925_v15 = vsel %vm11945_vm8, %v11979_v16, 0  ;;  %v5619_v54 = vsel %vm12393_vm0, %v12391_v47, 0 }
 0x402   : > { %14251 = vst [vmem:[#allocation6_spill] sm:$0xff] %v14250_v39  ;;  %v6594_v38 = vsel %vm14252_vm3, %v11976_v21, 0  ;;  %v5387_v21 = vld [vmem:[#allocation2 + $0x72] sm:$0xff]  ;;  %v4187_v16 = vadd.s32 200, %v14107_v6  ;;  %vm14258_vm3 = vmmov %vm14244_vm9  ;;  %vm14263_vm11 = vcmask 1041408   ;;  %v4189_v51 = vadd.s32 216, %v14107_v6 }
 0x403   : > { %vm14259_vm8 = vmmov %vm14258_vm3  ;;  %v12437_v10 = vpack.c.bf16 %v5388_v41, %v5387_v21  ;;  %v5927_v21 = vsel %vm11993_vm1, %v12022_v61, 0  ;;  %v4191_v61 = vadd.s32 232, %v14107_v6 }
 0x404   : > { %v4373_v3 = vand.u32 15, %v4187_v16  ;;  %v5392_v16 = vld [vmem:[#allocation2 + $0x9a] sm:$0xff]  ;;  %vm14273_vm1 = vmmov %vm14258_vm3 }
 0x406   : > { %9753 = vmatmul.mubr.msk.bf16.vlgmr.msra.gmra.mxu0 %vm14257_vm10, %v5924_v55  ;;  %vm5506_vm10 = vmpackc.low %vm12419_vm4, %vm12419_vm4  ;;  %v14260_v55 = vmov 0  ;;  %vm12474_vm4 = vcmp.lt.s32.totalorder %v4373_v3, 15  ;;  %v12487_v3 = vpack.c.bf16 %v5392_v16, %v5391_v56 }
 0x407   : > { %9819 = vmatpush3.bf16.msra.mxu0 %v6594_v38  ;;  %9756 = vmatprep.mubr.msk.bf16.mxu0 %vm14258_vm3, %v5925_v15  ;;  %v14261_v55 = vsel %vm12442_vm6, 4294967295, %v14260_v55  ;;  %v12446_v38 = vpack.c.bf16 %v5390_v28, %v5389_v63  ;;  %v5536_v15 = vsel %vm5504_vm7, 65537, %v14112_v59  ;;  %v5538_v25 = vsel %vm5506_vm10, 65537, %v14112_v59  ;;  %vm14271_vm7 = vmmov %vm14258_vm3  ;;  %v5395_v28 = vld [vmem:[#allocation2 + $0xb2] sm:$0xff] }
 0x408   : > { %9727 = vmatmul.mubr.msk.bf16.gmra.mxu1 %vm14244_vm9, %v5618_v32  ;;  %14262 = vst [vmem:[#allocation8_spill] sm:$0xff] %v14261_v55  ;;  %10055 = vmatprep.subr.msk.bf16.mxu0 %vm14263_vm11, %v12429_v49  ;;  %vm12450_vm9 = vcmp.ne.s16.totalorder %v8504_v48, 0  ;;  %v14264_v32 = vmov 0  ;;  %v8505_v63 = vcombine.low %v11854_v58, %v5536_v15  ;;  %v5393_v48 = vld [vmem:[#allocation2 + $0xa2] sm:$0xff]  ;;  %v8506_v53 = vcombine.low %v11854_v58, %v5538_v25  ;;  %vm14272_vm10 = vmmov %vm14258_vm3 }
 0x409   : > { %9730 = vmatprep.mubr.msk.bf16.mxu1 %vm14259_vm8, %v5619_v54  ;;  %v14265_v32 = vsel %vm12450_vm9, 4294967295, %v14264_v32  ;;  %v5620_v54 = vsel %vm12442_vm6, %v12437_v10, 0  ;;  %vm12465_vm8 = vcmp.lt.s32.totalorder %v4359_v34, 15  ;;  %v5621_v19 = vsel %vm12450_vm9, %v12446_v38, 0  ;;  %v5394_v34 = vld [vmem:[#allocation2 + $0xaa] sm:$0xff] }
 0x40a   : > { %14266 = vst [vmem:[#allocation10_spill] sm:$0xff] %v14265_v32  ;;  %vm5508_vm11 = vmpackc.low %vm12465_vm8, %vm12465_vm8  ;;  %v4387_v15 = vand.u32 15, %v4189_v51  ;;  %vm12492_vm15 = vcmp.ne.s16.totalorder %v8505_v63, 0  ;;  %v12496_v25 = vpack.c.bf16 %v5394_v34, %v5393_v48  ;;  %v4193_v63 = vadd.s32 248, %v14107_v6  ;;  %v5401_v34 = vld [vmem:[#allocation2 + $0xe2] sm:$0xff] }
 0x40b   : > { %v5540_v41 = vsel %vm5508_vm11, 65537, %v14112_v59  ;;  %v5622_v51 = vsel %vm12492_vm15, %v12487_v3, 0  ;;  %vm14285_vm11 = vmmov %vm14272_vm10  ;;  %v6534_v43 = vsel %vm12442_vm6, %v12446_v38, 0 }
 0x40c   : > { %vm12513_vm8 = vcmp.lt.s32.totalorder %v4387_v15, 15  ;;  %v8507_v48 = vcombine.low %v11854_v58, %v5540_v41  ;;  %v5398_v15 = vld [vmem:[#allocation2 + $0xca] sm:$0xff]  ;;  %v14288_v41 = vmov 0  ;;  %v6536_v55 = vsel %vm12492_vm15, %v12496_v25, 0 }
 0x40e   : > { %9757 = vmatmul.mubr.msk.bf16.gmra.mxu0 %vm14271_vm7, %v5926_v62  ;;  %vm5510_vm7 = vmpackc.low %vm12474_vm4, %vm12474_vm4  ;;  %v14274_v62 = vmov 0 }
 0x40f   : > { %9760 = vmatprep.mubr.msk.bf16.mxu0 %vm14272_vm10, %v5927_v21  ;;  %v14275_v62 = vsel %vm12492_vm15, 4294967295, %v14274_v62  ;;  %v14277_v21 = vmov 0  ;;  %v5542_v56 = vsel %vm5510_vm7, 65537, %v14112_v59  ;;  %vm14286_vm7 = vmmov %vm14272_vm10 }
 0x410   : > { %9731 = vmatmul.mubr.msk.bf16.gmra.mxu1 %vm14258_vm3, %v5620_v54  ;;  %14276 = vst [vmem:[#allocation13_spill] sm:$0xff] %v14275_v62  ;;  %v4401_v54 = vand.u32 15, %v4191_v61  ;;  %vm12498_vm3 = vcmp.ne.s16.totalorder %v8506_v53, 0  ;;  %v5396_v61 = vld [vmem:[#allocation2 + $0xba] sm:$0xff] }
 0x411   : > { %9734 = vmatprep.mubr.msk.bf16.mxu1 %vm14273_vm1, %v5621_v19  ;;  %v14278_v21 = vsel %vm12498_vm3, 4294967295, %v14277_v21  ;;  %v5928_v19 = vsel %vm12026_vm12, %v12034_v7, 0  ;;  %vm14280_vm1 = vnez %v14145_v29  ;;  %v5623_v7 = vsel %vm12498_vm3, %v12496_v25, 0  ;;  %vm14287_vm12 = vmmov %vm14286_vm7 }
 0x412   : > { %14279 = vst [vmem:[#allocation27_spill] sm:$0xff] %v14278_v21  ;;  %v5929_v16 = vsel %vm14280_vm1, %v12066_v40, 0  ;;  %vm12522_vm4 = vcmp.lt.s32.totalorder %v4401_v54, 15  ;;  %v5397_v40 = vld [vmem:[#allocation2 + $0xc2] sm:$0xff]  ;;  %v8508_v29 = vcombine.low %v11854_v58, %v5542_v56  ;;  %vm5512_vm1 = vmpackc.low %vm12513_vm8, %vm12513_vm8  ;;  %v12534_v6 = vpack.c.bf16 %v5396_v61, %v5395_v28  ;;  %v5399_v61 = vld [vmem:[#allocation2 + $0xd2] sm:$0xff] }
 0x413   : > { %v4415_v54 = vand.u32 15, %v4193_v63  ;;  %vm12539_vm3 = vcmp.ne.s16.totalorder %v8507_v48, 0  ;;  %v14291_v56 = vmov 0  ;;  %vm14295_vm8 = vnez %v14155_v11 }
 0x414   : > { %v14289_v41 = vsel %vm12539_vm3, 4294967295, %v14288_v41  ;;  %v5624_v63 = vsel %vm12539_vm3, %v12534_v6, 0 }
 0x415   : > { %14290 = vst [vmem:[#allocation28_spill] sm:$0xff] %v14289_v41 }
 0x416   : > { %9761 = vmatmul.mubr.msk.bf16.gmra.mxu0 %vm14272_vm10, %v5928_v19  ;;  %vm5514_vm10 = vmpackc.low %vm12522_vm4, %vm12522_vm4  ;;  %v12543_v19 = vpack.c.bf16 %v5398_v15, %v5397_v40  ;;  %vm12560_vm4 = vcmp.lt.s32.totalorder %v4415_v54, 15  ;;  %v5402_v40 = vld [vmem:[#allocation2 + $0xea] sm:$0xff]  ;;  %v14302_v54 = vmov 0 }
 0x417   : > { %9764 = vmatprep.mubr.msk.bf16.mxu0 %vm14286_vm7, %v5929_v16  ;;  %v5546_v53 = vsel %vm5514_vm10, 65537, %v14112_v59 }
 0x418   : > { %9735 = vmatmul.mubr.msk.bf16.gmra.mxu1 %vm14285_vm11, %v5622_v51  ;;  %vm12545_vm11 = vcmp.ne.s16.totalorder %v8508_v29, 0  ;;  %v5544_v51 = vsel %vm5512_vm1, 65537, %v14112_v59  ;;  %vm14298_vm1 = vmmov %vm14286_vm7  ;;  %v8510_v15 = vcombine.low %v11854_v58, %v5546_v53 }
 0x419   : > { %9738 = vmatprep.mubr.msk.bf16.mxu1 %vm14287_vm12, %v5623_v7  ;;  %v14292_v56 = vsel %vm12545_vm11, 4294967295, %v14291_v56  ;;  %vm14294_vm12 = vnez %v14152_v33  ;;  %v5931_v7 = vsel %vm14295_vm8, %v12113_v18, 0  ;;  %v5625_v28 = vsel %vm12545_vm11, %v12543_v19, 0  ;;  %vm14299_vm7 = vmmov %vm14298_vm1 }
 0x41a   : > { %14293 = vst [vmem:[#allocation29_spill] sm:$0xff] %v14292_v56  ;;  %v5930_v16 = vsel %vm14294_vm12, %v12076_v17, 0  ;;  %v5400_v17 = vld [vmem:[#allocation2 + $0xda] sm:$0xff]  ;;  %v8509_v48 = vcombine.low %v11854_v58, %v5544_v51  ;;  %vm14300_vm10 = vmmov %vm14298_vm1  ;;  %v12582_v51 = vpack.c.bf16 %v5402_v40, %v5401_v34 }
 0x41b   : > { %vm5516_vm8 = vmpackc.low %vm12560_vm4, %vm12560_vm4  ;;  %v12576_v18 = vpack.c.bf16 %v5400_v17, %v5399_v61  ;;  %v5403_v61 = vld [vmem:[#allocation2 + $0xf2] sm:$0xff]  ;;  %v5404_v17 = vld [vmem:[#allocation2 + $0xfa] sm:$0xff] }
 0x41c   : > { %vm14301_vm12 = vmmov %vm14298_vm1  ;;  %vm12578_vm11 = vcmp.ne.s16.totalorder %v8509_v48, 0  ;;  %v5548_v53 = vsel %vm5516_vm8, 65537, %v14112_v59  ;;  %v6185_v48 = vld [vmem:[#allocation2 + $0x11] sm:$0xff]  ;;  %v6186_v34 = vld [vmem:[#allocation2 + $0x19] sm:$0xff] }
 0x41d   : > { %v14303_v54 = vsel %vm12578_vm11, 4294967295, %v14302_v54  ;;  %v8511_v59 = vcombine.low %v11854_v58, %v5548_v53  ;;  %vm14308_vm8 = vmmov %vm14300_vm10  ;;  %v5934_v58 = vsel %vm12184_vm5, %v12188_v9, 0  ;;  %v6217_v53 = vpack.c.bf16 %v6186_v34, %v6185_v48  ;;  %v6189_v9 = vld [vmem:[#allocation2 + $0x31] sm:$0xff] }
 0x41e   : > { %9765 = vmatmul.mubr.msk.bf16.gmra.mxu0 %vm14298_vm1, %v5930_v16  ;;  %vm12584_vm1 = vcmp.ne.s16.totalorder %v8510_v15, 0  ;;  %v14304_v16 = vmov 0  ;;  %vm14309_vm4 = vmmov %vm14308_vm8 }
 0x41f   : > { %9768 = vmatprep.mubr.msk.bf16.mxu0 %vm14300_vm10, %v5931_v7  ;;  %v14305_v16 = vsel %vm12584_vm1, 4294967295, %v14304_v16  ;;  %v5626_v7 = vsel %vm12578_vm11, %v12576_v18, 0  ;;  %vm14310_vm10 = vmmov %vm14309_vm4  ;;  %vm12608_vm11 = vcmp.ne.s16.totalorder %v8511_v59, 0  ;;  %v5906_v59 = vld [vmem:[#allocation2 + $0x108] sm:$0xff] }
 0x420   : > { %9739 = vmatmul.mubr.msk.bf16.gmra.mxu1 %vm14299_vm7, %v5624_v63  ;;  %vm14306_vm7 = vnez %v14166_v4 }
 0x421   : > { %9742 = vmatprep.mubr.msk.bf16.mxu1 %vm14301_vm12, %v5625_v28  ;;  %v5932_v63 = vsel %vm14306_vm7, %v12124_v5, 0  ;;  %vm14307_vm12 = vnez %v14169_v44  ;;  %v5627_v28 = vsel %vm12584_vm1, %v12582_v51, 0  ;;  %vm14311_vm7 = vmmov %vm14309_vm4  ;;  %v12606_v5 = vpack.c.bf16 %v5404_v17, %v5403_v61  ;;  %v5905_v17 = vld [vmem:[#allocation2 + $0x100] sm:$0xff] }
 0x422   : > { %v5933_v29 = vsel %vm14307_vm12, %v12178_v20, 0  ;;  %vm14317_vm12 = vmmov %vm14309_vm4  ;;  %v7797_v20 = vld [vmem:[%s13889_s2 + $0xb8] sm:$0xff] }
 0x423   : > { %v5628_v40 = vsel %vm12608_vm11, %v12606_v5, 0 }
 0x426   : > { %9769 = vmatmul.mubr.msk.bf16.gmra.mxu0 %vm14308_vm8, %v5932_v63  ;;  %vm14314_vm8 = vnez %v14191_v36  ;;  %v6187_v63 = vld [vmem:[#allocation2 + $0x21] sm:$0xff] }
 0x427   : > { %9772 = vmatprep.mubr.msk.bf16.mxu0 %vm14310_vm10, %v5933_v29  ;;  %v5935_v15 = vsel %vm14314_vm8, %v12248_v27, 0  ;;  %vm14316_vm10 = vmmov %vm14309_vm4  ;;  %v6190_v29 = vld [vmem:[#allocation2 + $0x39] sm:$0xff]  ;;  %vm14319_vm8 = vnez %v14213_v0 }
 0x428   : > { %9743 = vmatmul.mubr.msk.bf16.gmra.mxu1 %vm14309_vm4, %v5626_v7  ;;  %v6188_v7 = vld [vmem:[#allocation2 + $0x29] sm:$0xff]  ;;  %v5937_v27 = vsel %vm14319_vm8, %v12322_v42, 0  ;;  %v12633_v48 = vpack.c.bf16 %v6190_v29, %v6189_v9  ;;  %v12646_v42 = vpack.c.bf16 %v5906_v59, %v5905_v17  ;;  %v6193_v9 = vld [vmem:[#allocation2 + $0x51] sm:$0xff]  ;;  %v6194_v29 = vld [vmem:[#allocation2 + $0x59] sm:$0xff] }
 0x429   : > { %9746 = vmatprep.mubr.msk.bf16.mxu1 %vm14311_vm7, %v5627_v28  ;;  %vm14315_vm7 = vmmov %vm14309_vm4  ;;  %v5936_v28 = vsel %vm12255_vm14, %v12264_v8, 0  ;;  %v12628_v61 = vpack.c.bf16 %v6188_v7, %v6187_v63  ;;  %v12641_v8 = vld [vmem:[%s13890_s3 + $0x10] sm:$0x3]  ;;  %v12668_v0 = vpack.c.bf16 %v6194_v29, %v6193_v9  ;;  %v6198_v29 = vld [vmem:[#allocation2 + $0x79] sm:$0xff] }
 0x42a   : > { %14320 = vst [vmem:[#allocation31_spill] sm:$0xff] %v12633_v48  ;;  %14324 = vst [vmem:[#allocation32_spill] sm:$0xff] %v12646_v42  ;;  %v6192_v63 = vld [vmem:[#allocation2 + $0x49] sm:$0xff]  ;;  %v5938_v59 = vsel %vm12327_vm2, %v12646_v42, 0  ;;  %v6197_v9 = vld [vmem:[#allocation2 + $0x71] sm:$0xff] }
 0x42b   : > { %14318 = vst [vmem:[#allocation30_spill] sm:$0xff] %v12628_v61  ;;  %14329 = vst [vmem:[#allocation34_spill] sm:$0xff] %v12668_v0  ;;  %v12699_v46 = vpack.c.bf16 %v6198_v29, %v6197_v9  ;;  %v6201_v9 = vld [vmem:[#allocation2 + $0x91] sm:$0xff]  ;;  %v6202_v29 = vld [vmem:[#allocation2 + $0x99] sm:$0xff] }
 0x42d   : > { %14336 = vst [vmem:[#allocation36_spill] sm:$0xff] %v12699_v46 }
 0x42e   : > { %9773 = vmatmul.mubr.msk.bf16.gmra.mxu0 %vm14315_vm7, %v5934_v58  ;;  %vm14322_vm7 = vmmov %vm14309_vm4 }
 0x42f   : > { %9776 = vmatprep.mubr.msk.bf16.mxu0 %vm14316_vm10, %v5935_v15  ;;  %vm14323_vm10 = vmmov %vm14309_vm4 }
 0x430   : > { %9747 = vmatmul.mubr.msk.bf16.gmra.mxu1 %vm14309_vm4, %v5628_v40 }
 0x431   : > { %9786 = vmatprep.mubr.msk.bf16.mxu1 %vm14317_vm12, %v6217_v53  ;;  %vm14321_vm12 = vcmask 1041408  }
 0x432   : > { %v6904_v34 = vsel %vm14321_vm12, %v12318_v50, 0  ;;  %vm14325_vm12 = vmmov %vm14309_vm4  ;;  %v6191_v50 = vld [vmem:[#allocation2 + $0x41] sm:$0xff] }
 0x436   : > { %v9562_v58 = vpop.f32.mrf.mxu0  ;;  %9777 = vmatmul.mubr.msk.bf16.gmra.mxu0 %vm14322_vm7, %v5936_v28  ;;  %vm14326_vm7 = vcmask 1041408  }
 0x437   : > { %9780 = vmatprep.mubr.msk.bf16.mxu0 %vm14323_vm10, %v5937_v27 }
 0x438   : > { %v9572_v40 = vpop.f32.mrf.mxu1  ;;  %9787 = vmatmul.mubr.msk.bf16.vlgmr.msra.gmra.mxu1 %vm14309_vm4, %v12628_v61  ;;  %v3200_v53 = vpop.f32.mrf.mxu0  ;;  %vm14328_vm4 = vnez %v14194_v2 }
 0x439   : > { %v12648_v15 = vadd.f32 %v9572_v40, %v9562_v58  ;;  %9790 = vmatprep.mubr.msk.bf16.mxu1 %vm14325_vm12, %v12633_v48  ;;  %9853 = vmatpush3.bf16.msra.mxu1 %v6904_v34  ;;  %v12663_v58 = vpack.c.bf16 %v6192_v63, %v6191_v50  ;;  %v6527_v34 = vsel %vm14328_vm4, %v12250_v45, 0  ;;  %vm14330_vm12 = vmmov %vm14323_vm10  ;;  %v6195_v45 = vld [vmem:[#allocation2 + $0x61] sm:$0xff]  ;;  %v6196_v63 = vld [vmem:[#allocation2 + $0x69] sm:$0xff] }
 0x43a   : > { %v3280_v7 = vpop.f32.mrf.mxu1  ;;  %10056 = vmatprep.subr.msk.bf16.mxu1 %vm14326_vm7, %v12641_v8  ;;  %v12656_v27 = vpop.f32.mrf.mxu0  ;;  %vm14331_vm7 = vmmov %vm14323_vm10 }
 0x43b   : > { %v12654_v28 = vadd.f32 %v3280_v7, %v3200_v53  ;;  %14327 = vst [vmem:[#allocation33_spill] sm:$0xff] %v12663_v58  ;;  %vm14332_vm4 = vmmov %vm14331_vm7 }
 0x43c   : > { %v12658_v17 = vpop.f32.mrf.mxu1  ;;  %v3203_v40 = vpop.f32.mrf.mxu0 }
 0x43e   : > { %v3283_v37 = vpop.f32.mrf.mxu1  ;;  %v12672_v7 = vpop.f32.mrf.mxu0  ;;  %9781 = vmatmul.mubr.msk.bf16.gmra.mxu0 %vm14323_vm10, %v5938_v59  ;;  %vm14333_vm10 = vnez %v14210_v1 }
 0x43f   : > { %v12670_v53 = vadd.f32 %v3283_v37, %v3203_v40  ;;  %9820 = vmatprep.mubr.msk.bf16.mxu0 %vm14331_vm7, %v6527_v34  ;;  %v6528_v2 = vsel %vm14333_vm10, %v12279_v12, 0  ;;  %v12693_v34 = vpack.c.bf16 %v6196_v63, %v6195_v45  ;;  %vm14338_vm10 = vmmov %vm14331_vm7  ;;  %v6200_v63 = vld [vmem:[#allocation2 + $0x89] sm:$0xff] }
 0x440   : > { %v12675_v36 = vpop.f32.mrf.mxu1  ;;  %9791 = vmatmul.mubr.msk.bf16.gmra.mxu1 %vm14330_vm12, %v12663_v58  ;;  %v12680_v50 = vpop.f32.mrf.mxu0  ;;  %vm14337_vm12 = vnez %v14217_v31 }
 0x441   : > { %9794 = vmatprep.mubr.msk.bf16.mxu1 %vm14332_vm4, %v12668_v0  ;;  %14334 = vst [vmem:[#allocation35_spill] sm:$0xff] %v12693_v34  ;;  %vm14335_vm4 = vcmask 1041408   ;;  %v6529_v4 = vsel %vm14337_vm12, %v12332_v26, 0 }
 0x442   : > { %v12684_v37 = vpop.f32.mrf.mxu1  ;;  %v12686_v40 = vpop.f32.mrf.mxu0  ;;  %v7198_v42 = vsel %vm14335_vm4, %v12429_v49, 0  ;;  %vm14339_vm4 = vmmov %vm14331_vm7  ;;  %v6199_v49 = vld [vmem:[#allocation2 + $0x81] sm:$0xff] }
 0x443   : > { %vm14340_vm2 = vmmov %vm14339_vm4  ;;  %v12727_v1 = vpack.c.bf16 %v6200_v63, %v6199_v49  ;;  %v6204_v49 = vld [vmem:[#allocation2 + $0xa9] sm:$0xff] }
 0x444   : > { %v12688_v59 = vpop.f32.mrf.mxu1  ;;  %v12695_v24 = vpop.f32.mrf.mxu0  ;;  %vm14349_vm12 = vmmov %vm14339_vm4 }
 0x445   : > { %14343 = vst [vmem:[#allocation38_spill] sm:$0xff] %v12727_v1 }
 0x446   : > { %v12701_v44 = vpop.f32.mrf.mxu1  ;;  %v12706_v11 = vpop.f32.mrf.mxu0  ;;  %9821 = vmatmul.mubr.msk.bf16.vlgmr.msra.gmra.mxu0 %vm14331_vm7, %v6528_v2  ;;  %vm14347_vm7 = vmmov %vm14339_vm4 }
 0x447   : > { %9887 = vmatpush3.bf16.msra.mxu0 %v7198_v42  ;;  %9824 = vmatprep.mubr.msk.bf16.mxu0 %vm14339_vm4, %v6529_v4 }
 0x448   : > { %v12709_v12 = vpop.f32.mrf.mxu1  ;;  %9795 = vmatmul.mubr.msk.bf16.gmra.mxu1 %vm14338_vm10, %v12693_v34  ;;  %v12713_v45 = vpop.f32.mrf.mxu0  ;;  %vm14342_vm10 = vnez %v14232_v57  ;;  %v12734_v34 = vpack.c.bf16 %v6202_v29, %v6201_v9  ;;  %v6205_v9 = vld [vmem:[#allocation2 + $0xb1] sm:$0xff]  ;;  %v6206_v29 = vld [vmem:[#allocation2 + $0xb9] sm:$0xff]  ;;  %v6532_v57 = vsel %vm12387_vm13, %v12391_v47, 0 }
 0x449   : > { %9798 = vmatprep.mubr.msk.bf16.mxu1 %vm14340_vm2, %v12699_v46  ;;  %v6530_v42 = vsel %vm14342_vm10, %v12341_v35, 0  ;;  %vm14344_vm2 = vnez %v14236_v14  ;;  %vm14348_vm10 = vmmov %vm14339_vm4  ;;  %v12766_v48 = vpack.c.bf16 %v6206_v29, %v6205_v9  ;;  %v6209_v9 = vld [vmem:[#allocation2 + $0xd1] sm:$0xff]  ;;  %v6210_v29 = vld [vmem:[#allocation2 + $0xd9] sm:$0xff] }
 0x44a   : > { %v12718_v26 = vpop.f32.mrf.mxu1  ;;  %v12720_v2 = vpop.f32.mrf.mxu0  ;;  %v6531_v46 = vsel %vm14344_vm2, %v12382_v23, 0  ;;  %14345 = vst [vmem:[#allocation39_spill] sm:$0xff] %v12734_v34  ;;  %v6203_v23 = vld [vmem:[#allocation2 + $0xa1] sm:$0xff] }
 0x44b   : > { %14341 = vst [vmem:[#allocation37_spill] sm:$0xff] %v12718_v26  ;;  %14351 = vst [vmem:[#allocation42_spill] sm:$0xff] %v12766_v48 }
 0x44c   : > { %v12722_v31 = vpop.f32.mrf.mxu1  ;;  %v12729_v4 = vpop.f32.mrf.mxu0 }
 0x44e   : > { %v12736_v0 = vpop.f32.mrf.mxu1  ;;  %v12738_v33 = vpop.f32.mrf.mxu0  ;;  %9825 = vmatmul.mubr.msk.bf16.gmra.mxu0 %vm14347_vm7, %v6530_v42  ;;  %vm14356_vm7 = vmmov %vm14339_vm4 }
 0x44f   : > { %14346 = vst [vmem:[#allocation40_spill] sm:$0xff] %v12736_v0  ;;  %9828 = vmatprep.mubr.msk.bf16.mxu0 %vm14348_vm10, %v6531_v46  ;;  %v12759_v46 = vpack.c.bf16 %v6204_v49, %v6203_v23  ;;  %vm14355_vm10 = vmmov %vm14339_vm4  ;;  %v6208_v23 = vld [vmem:[#allocation2 + $0xc9] sm:$0xff] }
 0x450   : > { %v12741_v58 = vpop.f32.mrf.mxu1  ;;  %9799 = vmatmul.mubr.msk.bf16.gmra.mxu1 %vm14339_vm4, %v12727_v1  ;;  %v12746_v35 = vpop.f32.mrf.mxu0  ;;  %v6790_v0 = vld [vmem:[#allocation2 + $0x28] sm:$0xff] }
 0x451   : > { %9802 = vmatprep.mubr.msk.bf16.mxu1 %vm14349_vm12, %v12734_v34  ;;  %14350 = vst [vmem:[#allocation41_spill] sm:$0xff] %v12759_v46  ;;  %v6533_v34 = vsel %vm12393_vm0, %v12437_v10, 0  ;;  %vm14353_vm12 = vmmov %vm14339_vm4  ;;  %v6207_v10 = vld [vmem:[#allocation2 + $0xc1] sm:$0xff] }
 0x452   : > { %v12750_v63 = vpop.f32.mrf.mxu1  ;;  %v12752_v14 = vpop.f32.mrf.mxu0 }
 0x454   : > { %v12754_v42 = vpop.f32.mrf.mxu1  ;;  %v12761_v1 = vpop.f32.mrf.mxu0 }
 0x456   : > { %v12768_v30 = vpop.f32.mrf.mxu1  ;;  %v12770_v26 = vpop.f32.mrf.mxu0  ;;  %9829 = vmatmul.mubr.msk.bf16.gmra.mxu0 %vm14353_vm12, %v6532_v57  ;;  %vm14364_vm12 = vmmov %vm14339_vm4 }
 0x457   : > { %14352 = vst [vmem:[#allocation43_spill] sm:$0xff] %v12770_v26  ;;  %9832 = vmatprep.mubr.msk.bf16.mxu0 %vm14356_vm7, %v6533_v34  ;;  %v12791_v34 = vpack.c.bf16 %v6208_v23, %v6207_v10  ;;  %vm14366_vm7 = vmmov %vm14339_vm4  ;;  %v6212_v10 = vld [vmem:[#allocation2 + $0xe9] sm:$0xff]  ;;  %v6789_v26 = vld [vmem:[#allocation2 + $0x20] sm:$0xff] }
 0x458   : > { %v12773_v61 = vpop.f32.mrf.mxu1  ;;  %9803 = vmatmul.mubr.msk.bf16.gmra.mxu1 %vm14355_vm10, %v12759_v46  ;;  %v12778_v47 = vpop.f32.mrf.mxu0  ;;  %vm14365_vm10 = vmmov %vm14339_vm4 }
 0x459   : > { %14354 = vst [vmem:[#allocation44_spill] sm:$0xff] %v12773_v61  ;;  %14357 = vst [vmem:[#allocation45_spill] sm:$0xff] %v12778_v47  ;;  %9806 = vmatprep.mubr.msk.bf16.mxu1 %vm14339_vm4, %v12766_v48  ;;  %v6535_v48 = vsel %vm12450_vm9, %v12487_v3, 0  ;;  %v12798_v47 = vpack.c.bf16 %v6210_v29, %v6209_v9  ;;  %v6211_v3 = vld [vmem:[#allocation2 + $0xe1] sm:$0xff]  ;;  %v6213_v9 = vld [vmem:[#allocation2 + $0xf1] sm:$0xff] }
 0x45a   : > { %v12782_v49 = vpop.f32.mrf.mxu1  ;;  %v12784_v39 = vpop.f32.mrf.mxu0  ;;  %14360 = vst [vmem:[#allocation48_spill] sm:$0xff] %v12791_v34  ;;  %v6214_v29 = vld [vmem:[#allocation2 + $0xf9] sm:$0xff] }
 0x45b   : > { %14358 = vst [vmem:[#allocation46_spill] sm:$0xff] %v12782_v49  ;;  %14362 = vst [vmem:[#allocation50_spill] sm:$0xff] %v12798_v47 }
 0x45c   : > { %v12786_v57 = vpop.f32.mrf.mxu1  ;;  %v12793_v46 = vpop.f32.mrf.mxu0 }
 0x45d   : > { %14359 = vst [vmem:[#allocation47_spill] sm:$0xff] %v12786_v57  ;;  %14361 = vst [vmem:[#allocation49_spill] sm:$0xff] %v12793_v46 }
 0x45e   : > { %v12800_v49 = vpop.f32.mrf.mxu1  ;;  %v12802_v61 = vpop.f32.mrf.mxu0  ;;  %9833 = vmatmul.mubr.msk.bf16.gmra.mxu0 %vm14364_vm12, %v6534_v43  ;;  %vm14369_vm12 = vnez %v14278_v21  ;;  %v6538_v21 = vsel %vm12539_vm3, %v12543_v19, 0  ;;  %v6793_v19 = vld [vmem:[#allocation2 + $0x40] sm:$0xff] }
 0x45f   : > { %14363 = vst [vmem:[#allocation51_spill] sm:$0xff] %v12800_v49  ;;  %9836 = vmatprep.mubr.msk.bf16.mxu0 %vm14366_vm7, %v6535_v48  ;;  %v12823_v48 = vpack.c.bf16 %v6212_v10, %v6211_v3  ;;  %v12830_v49 = vpack.c.bf16 %v6214_v29, %v6213_v9  ;;  %vm14373_vm7 = vmmov %vm14339_vm4  ;;  %v6216_v3 = vld [vmem:[#allocation2 + $0x109] sm:$0xff]  ;;  %v6821_v9 = vpack.c.bf16 %v6790_v0, %v6789_v26 }
 0x460   : > { %v12805_v57 = vpop.f32.mrf.mxu1  ;;  %9807 = vmatmul.mubr.msk.bf16.gmra.mxu1 %vm14365_vm10, %v12791_v34  ;;  %v12810_v38 = vpop.f32.mrf.mxu0  ;;  %vm14371_vm10 = vmmov %vm14339_vm4 }
 0x461   : > { %9810 = vmatprep.mubr.msk.bf16.mxu1 %vm14339_vm4, %v12798_v47  ;;  %14368 = vst [vmem:[#allocation53_spill] sm:$0xff] %v12823_v48  ;;  %v6537_v47 = vsel %vm14369_vm12, %v12534_v6, 0  ;;  %14370 = vst [vmem:[#allocation54_spill] sm:$0xff] %v12830_v49  ;;  %v6215_v6 = vld [vmem:[#allocation2 + $0x101] sm:$0xff] }
 0x462   : > { %v12814_v23 = vpop.f32.mrf.mxu1  ;;  %v12816_v32 = vpop.f32.mrf.mxu0  ;;  %vm14375_vm12 = vmmov %vm14339_vm4 }
 0x463   : > { %14367 = vst [vmem:[#allocation52_spill] sm:$0xff] %v12814_v23 }
 0x464   : > { %v12818_v43 = vpop.f32.mrf.mxu1  ;;  %v12825_v34 = vpop.f32.mrf.mxu0 }
 0x466   : > { %v12832_v46 = vpop.f32.mrf.mxu1  ;;  %v12834_v23 = vpop.f32.mrf.mxu0  ;;  %9837 = vmatmul.mubr.msk.bf16.gmra.mxu0 %vm14371_vm10, %v6536_v55  ;;  %vm14379_vm10 = vnez %v14119_v60 }
 0x467   : > { %9840 = vmatprep.mubr.msk.bf16.mxu0 %vm14339_vm4, %v6537_v47  ;;  %v6837_v26 = vsel %vm14379_vm10, %v6821_v9, 0  ;;  %vm14382_vm10 = vmmov %vm14339_vm4 }
 0x468   : > { %v12837_v62 = vpop.f32.mrf.mxu1  ;;  %9811 = vmatmul.mubr.msk.bf16.gmra.mxu1 %vm14373_vm7, %v12823_v48  ;;  %v12842_v25 = vpop.f32.mrf.mxu0  ;;  %v12855_v48 = vpack.c.bf16 %v6216_v3, %v6215_v6  ;;  %vm14380_vm7 = vmmov %vm14339_vm4  ;;  %v6794_v6 = vld [vmem:[#allocation2 + $0x48] sm:$0xff]  ;;  %v3308_v3 = vadd.f32 %v12688_v59, %v12686_v40  ;;  %v3297_v59 = vadd.f32 %v12684_v37, %v12680_v50 }
 0x469   : > { %14372 = vst [vmem:[#allocation55_spill] sm:$0xff] %v12837_v62  ;;  %14374 = vst [vmem:[#allocation56_spill] sm:$0xff] %v12842_v25  ;;  %9814 = vmatprep.mubr.msk.bf16.mxu1 %vm14375_vm12, %v12830_v49  ;;  %vm14378_vm12 = vnez %v14292_v56  ;;  %v6791_v25 = vld [vmem:[#allocation2 + $0x30] sm:$0xff]  ;;  %v6792_v62 = vld [vmem:[#allocation2 + $0x38] sm:$0xff] }
 0x46a   : > { %v12846_v10 = vpop.f32.mrf.mxu1  ;;  %v12848_v55 = vpop.f32.mrf.mxu0  ;;  %14377 = vst [vmem:[#allocation58_spill] sm:$0xff] %v12855_v48  ;;  %v6539_v49 = vsel %vm14378_vm12, %v12576_v18, 0  ;;  %vm14381_vm12 = vmmov %vm14339_vm4  ;;  %v6510_v37 = vld [vmem:[#allocation2 + $0x10a] sm:$0xff] }
 0x46b   : > { %14376 = vst [vmem:[#allocation57_spill] sm:$0xff] %v12846_v10  ;;  %v3305_v10 = vadd.f32 %v12675_v36, %v12672_v7  ;;  %v6822_v36 = vpack.c.bf16 %v6792_v62, %v6791_v25  ;;  %v3416_v7 = vadd.f32 %v12752_v14, %v3308_v3 }
 0x46c   : > { %v12850_v29 = vpop.f32.mrf.mxu1  ;;  %v12857_v47 = vpop.f32.mrf.mxu0 }
 0x46d   : > { %v3415_v18 = vadd.f32 %v12738_v33, %v3305_v10  ;;  %v6823_v33 = vpack.c.bf16 %v6794_v6, %v6793_v19  ;;  %v3522_v25 = vadd.f32 %v12754_v42, %v3416_v7  ;;  %v6798_v42 = vld [vmem:[#allocation2 + $0x68] sm:$0xff] }
 0x46e   : > { %v12864_v0 = vpop.f32.mrf.mxu1  ;;  %v9626_v41 = vpop.f32.mrf.mxu0  ;;  %9841 = vmatmul.mubr.msk.bf16.gmra.mxu0 %vm14380_vm7, %v6538_v21  ;;  %v3300_v21 = vadd.f32 %v12701_v44, %v12695_v24  ;;  %v3292_v44 = vadd.f32 %v12658_v17, %v12656_v27  ;;  %v3413_v24 = vadd.f32 %v12746_v35, %v3297_v59  ;;  %vm14384_vm7 = vnez %v14125_v13  ;;  %v6795_v17 = vld [vmem:[#allocation2 + $0x50] sm:$0xff]  ;;  %v6796_v35 = vld [vmem:[#allocation2 + $0x58] sm:$0xff] }
 0x46f   : > { %9844 = vmatprep.mubr.msk.bf16.mxu0 %vm14381_vm12, %v6539_v49  ;;  %v3521_v9 = vadd.f32 %v12741_v58, %v3415_v18  ;;  %vm14383_vm12 = vnez %v14303_v54  ;;  %v6838_v50 = vsel %vm14384_vm7, %v6822_v36, 0  ;;  %v6541_v58 = vsel %vm12584_vm1, %v12606_v5, 0  ;;  %v6797_v5 = vld [vmem:[#allocation2 + $0x60] sm:$0xff] }
 0x470   : > { %v12872_v56 = vpop.f32.mrf.mxu1  ;;  %9815 = vmatmul.mubr.msk.bf16.gmra.mxu1 %vm14339_vm4, %v12855_v48  ;;  %v12877_v60 = vpop.f32.mrf.mxu0  ;;  %v3414_v49 = vadd.f32 %v12761_v1, %v3300_v21  ;;  %v6540_v62 = vsel %vm14383_vm12, %v12582_v51, 0  ;;  %v6509_v1 = vld [vmem:[#allocation2 + $0x102] sm:$0xff]  ;;  %vm14385_vm4 = vnez %v14127_v52  ;;  %v3412_v19 = vadd.f32 %v12720_v2, %v3292_v44 }
 0x471   : > { %9854 = vmatprep.mubr.msk.bf16.mxu1 %vm14382_vm10, %v6837_v26  ;;  %v3623_v26 = vadd.f32 %v12802_v61, %v3521_v9  ;;  %v6839_v27 = vsel %vm14385_vm4, %v6823_v33, 0  ;;  %vm14386_vm10 = vcmask 1041408   ;;  %vm14387_vm7 = vcmask 31744  }
 0x472   : > { %v12883_v40 = vpop.f32.mrf.mxu1  ;;  %v9627_v10 = vpop.f32.mrf.mxu0  ;;  %v7508_v13 = vsel %vm14386_vm10, %v12641_v8, 0  ;;  %v3520_v61 = vadd.f32 %v12768_v30, %v3414_v49  ;;  %v3624_v3 = vadd.f32 %v12816_v32, %v3522_v25  ;;  %vm14388_vm4 = vmmov %vm14387_vm7  ;;  %v12920_v52 = vpack.c.bf16 %v6510_v37, %v6509_v1  ;;  %v14394_v1 = vld [vmem:[#allocation40_spill] sm:$0xff] }
 0x473   : > { %vm14389_vm1 = vmmov %vm14388_vm4  ;;  %v3411_v8 = vadd.f32 %v12706_v11, %v12648_v15  ;;  %v3519_v2 = vadd.f32 %v12750_v63, %v3413_v24  ;;  %v6824_v30 = vpack.c.bf16 %v6796_v35, %v6795_v17  ;;  %v3729_v32 = vadd.f32 %v12805_v57, %v3623_v26  ;;  %v14398_v35 = vld [vmem:[#allocation30_spill] sm:$0xff] }
 0x474   : > { %v12889_v48 = vpop.f32.mrf.mxu1  ;;  %v3817_v14 = vpop.f32.mrf.mxu0  ;;  %vm14390_vm10 = vmmov %vm14389_vm1  ;;  %v3622_v21 = vadd.f32 %v12825_v34, %v3520_v61  ;;  %v6825_v33 = vpack.c.bf16 %v6798_v42, %v6797_v5  ;;  %v3518_v59 = vadd.f32 %v12722_v31, %v3412_v19  ;;  %v3410_v11 = vadd.f32 %v12729_v4, %v12670_v53  ;;  %v14400_v19 = vld [vmem:[#allocation37_spill] sm:$0xff]  ;;  %v14401_v42 = vld [vmem:[#allocation47_spill] sm:$0xff] }
 0x475   : > { %v3621_v15 = vadd.f32 %v12810_v38, %v3519_v2  ;;  %v3730_v9 = vadd.f32 %v12818_v43, %v3624_v3  ;;  %v3835_v49 = vadd.f32 %v9626_v41, %v3729_v32  ;;  %v6542_v57 = vsel %vm12608_vm11, %v12920_v52, 0  ;;  %v6799_v43 = vld [vmem:[#allocation2 + $0x70] sm:$0xff]  ;;  %v6800_v41 = vld [vmem:[#allocation2 + $0x78] sm:$0xff] }
 0x476   : > { %v12904_v51 = vpop.f32.mrf.mxu1  ;;  %v12911_v6 = vpop.f32.mrf.mxu0  ;;  %9845 = vmatmul.mubr.msk.bf16.gmra.mxu0 %vm14387_vm7, %v6540_v62  ;;  %v3517_v34 = vadd.f32 %v12709_v12, %v3411_v8  ;;  %v3409_v31 = vadd.f32 %v12713_v45, %v12654_v28  ;;  %v3620_v53 = vadd.f32 %v12784_v39, %v3518_v59  ;;  %v3728_v44 = vadd.f32 %v12832_v46, %v3622_v21  ;;  %v14395_v28 = vld [vmem:[#allocation43_spill] sm:$0xff]  ;;  %v14396_v39 = vld [vmem:[#allocation52_spill] sm:$0xff]  ;;  %v14402_v3 = vld [vmem:[#allocation49_spill] sm:$0xff] }
 0x477   : > { %9848 = vmatprep.mubr.msk.bf16.mxu0 %vm14389_vm1, %v6541_v58  ;;  %vm14391_vm1 = vnez %v14133_v22  ;;  %v3836_v24 = vadd.f32 %v9627_v10, %v3730_v9  ;;  %v14392_v58 = vld [vmem:[#allocation24_spill] sm:$0xff]  ;;  %v3516_v37 = vadd.f32 %v14394_v1, %v3410_v11  ;;  %v3727_v25 = vadd.f32 %v14396_v39, %v3621_v15  ;;  %v6801_v22 = vld [vmem:[#allocation2 + $0x80] sm:$0xff]  ;;  %v14405_v11 = vld [vmem:[#allocation45_spill] sm:$0xff] }
 0x478   : > { %v12916_v18 = vpop.f32.mrf.mxu1  ;;  %9855 = vmatmul.mubr.msk.bf16.vlgmr.msra.gmra.mxu1 %vm14388_vm4, %v6838_v50  ;;  %v12925_v36 = vpop.f32.mrf.mxu0  ;;  %v6840_v38 = vsel %vm14391_vm1, %v6824_v30, 0  ;;  %vm14393_vm7 = vnez %v14392_v58  ;;  %v3619_v45 = vadd.f32 %v14395_v28, %v3517_v34  ;;  %v3937_v17 = vadd.f32 %v12872_v56, %v3835_v49  ;;  %vm14399_vm1 = vmmov %vm14388_vm4  ;;  %v14409_v1 = vld [vmem:[#allocation26_spill] sm:$0xff] }
 0x479   : > { %9858 = vmatprep.mubr.msk.bf16.mxu1 %vm14390_vm10, %v6839_v27  ;;  %9921 = vmatpush3.bf16.msra.mxu1 %v7508_v13  ;;  %v6841_v12 = vsel %vm14393_vm7, %v6825_v33, 0  ;;  %v6802_v27 = vld [vmem:[#allocation2 + $0x88] sm:$0xff]  ;;  %v3834_v46 = vadd.f32 %v3817_v14, %v3728_v44  ;;  %vm14397_vm10 = vmmov %vm14388_vm4  ;;  %v6826_v13 = vpack.c.bf16 %v6800_v41, %v6799_v43  ;;  %v3515_v5 = vadd.f32 %v14400_v19, %v3409_v31  ;;  %v14404_v33 = vld [vmem:[#allocation44_spill] sm:$0xff] }
 0x47a   : > { %v12930_v7 = vpop.f32.mrf.mxu1  ;;  %v12936_v63 = vpop.f32.mrf.mxu0  ;;  %v3726_v61 = vadd.f32 %v14401_v42, %v3620_v53  ;;  %v3618_v8 = vadd.f32 %v14402_v3, %v3516_v37  ;;  %v3833_v2 = vadd.f32 %v12877_v60, %v3727_v25  ;;  %vm14403_vm7 = vmmov %vm14399_vm1  ;;  %v3938_v56 = vadd.f32 %v12889_v48, %v3836_v24  ;;  %v14406_v31 = vld [vmem:[#allocation51_spill] sm:$0xff]  ;;  %v12987_v43 = vld [vmem:[%s13897_s10] ss:$0 sm:$0xff] }
 0x47b   : > { %v6827_v21 = vpack.c.bf16 %v6802_v27, %v6801_v22  ;;  %v3725_v59 = vadd.f32 %v14404_v33, %v3619_v45  ;;  %v3617_v15 = vadd.f32 %v14405_v11, %v3515_v5  ;;  %v14407_v44 = vld [vmem:[#allocation25_spill] sm:$0xff]  ;;  %v14411_v28 = vld [vmem:[#allocation46_spill] sm:$0xff]  ;;  %v14412_v27 = vld [vmem:[#allocation31_spill] sm:$0xff] }
 0x47c   : > { %v12939_v62 = vpop.f32.mrf.mxu1  ;;  %v12948_v4 = vpop.f32.mrf.mxu0  ;;  %v3832_v9 = vadd.f32 %v12848_v55, %v3726_v61  ;;  %v3724_v53 = vadd.f32 %v14406_v31, %v3618_v8  ;;  %v6804_v37 = vld [vmem:[#allocation2 + $0x98] sm:$0xff]  ;;  %v14416_v5 = vld [vmem:[#allocation55_spill] sm:$0xff]  ;;  %v14417_v61 = vld [vmem:[#allocation56_spill] sm:$0xff] }
 0x47d   : > { %v3831_v48 = vadd.f32 %v12834_v23, %v3725_v59  ;;  %v3723_v45 = vadd.f32 %v14411_v28, %v3617_v15  ;;  %v14414_v19 = vld [vmem:[#allocation33_spill] sm:$0xff] }
 0x47e   : > { %v12953_v50 = vpop.f32.mrf.mxu1  ;;  %v9646_v26 = vpop.f32.mrf.mxu0  ;;  %9849 = vmatmul.mubr.msk.bf16.gmra.mxu0 %vm14388_vm4, %v6542_v57  ;;  %v3936_v57 = vadd.f32 %v12904_v51, %v3834_v46  ;;  %vm14408_vm4 = vnez %v14407_v44  ;;  %v3934_v39 = vadd.f32 %v12850_v29, %v3832_v9  ;;  %v3830_v25 = vadd.f32 %v12857_v47, %v3724_v53  ;;  %v6805_v29 = vld [vmem:[#allocation2 + $0xa0] sm:$0xff]  ;;  %v6806_v47 = vld [vmem:[#allocation2 + $0xa8] sm:$0xff] }
 0x47f   : > { %9888 = vmatprep.mubr.msk.bf16.mxu0 %vm14399_vm1, %v14398_v35  ;;  %v4043_v14 = vadd.f32 %v9646_v26, %v3937_v17  ;;  %v6842_v55 = vsel %vm14408_vm4, %v6826_v13, 0  ;;  %vm14415_vm4 = vmmov %vm14399_vm1  ;;  %v3933_v42 = vadd.f32 %v14416_v5, %v3831_v48  ;;  %v3829_v3 = vadd.f32 %v14417_v61, %v3723_v45 }
 0x480   : > { %v12962_v10 = vpop.f32.mrf.mxu1  ;;  %9859 = vmatmul.mubr.msk.bf16.gmra.mxu1 %vm14397_vm10, %v6840_v38  ;;  %v4022_v30 = vpop.f32.mrf.mxu0  ;;  %v3935_v38 = vadd.f32 %v12883_v40, %v3833_v2  ;;  %vm14410_vm10 = vnez %v14409_v1  ;;  %v6803_v40 = vld [vmem:[#allocation2 + $0x90] sm:$0xff]  ;;  %v4040_v8 = vadd.f32 %v12936_v63, %v3934_v39  ;;  %v6829_v63 = vpack.c.bf16 %v6806_v47, %v6805_v29  ;;  %v14427_v39 = vld [vmem:[#allocation35_spill] sm:$0xff] }
 0x481   : > { %9862 = vmatprep.mubr.msk.bf16.mxu1 %vm14403_vm7, %v6841_v12  ;;  %v4058_v51 = vadd.f32 %v12987_v43, %v4043_v14  ;;  %v6843_v23 = vsel %vm14410_vm10, %v6827_v21, 0  ;;  %vm14413_vm7 = vmmov %vm14399_vm1  ;;  %v3932_v21 = vadd.f32 %v12864_v0, %v3830_v25  ;;  %v4039_v33 = vadd.f32 %v12911_v6, %v3933_v42  ;;  %v14420_v6 = vld [vmem:[#allocation16_spill] sm:$0xff] }
 0x482   : > { %v12973_v32 = vpop.f32.mrf.mxu1  ;;  %v9647_v49 = vpop.f32.mrf.mxu0  ;;  %v4041_v26 = vadd.f32 %v4022_v30, %v3935_v38  ;;  %vm14418_vm10 = vmmov %vm14399_vm1  ;;  %v6807_v38 = vld [vmem:[#allocation2 + $0xb0] sm:$0xff] }
 0x483   : > { %v4044_v34 = vadd.f32 %v9647_v49, %v3938_v56  ;;  %v4066_v30 = vmax.f32 %v4058_v51, 0.0  ;;  %v14419_v49 = vld [vmem:[#allocation57_spill] sm:$0xff]  ;;  %v4038_v0 = vadd.f32 %v12948_v4, %v3932_v21  ;;  %v4054_v44 = vadd.f32 %v12987_v43, %v4039_v33  ;;  %v14422_v4 = vld [vmem:[#allocation34_spill] sm:$0xff] }
 0x484   : > { %v12979_v60 = vpop.f32.mrf.mxu1  ;;  %v4025_v41 = vpop.f32.mrf.mxu0  ;;  %v4056_v59 = vadd.f32 %v12987_v43, %v4041_v26  ;;  %v6813_v33 = vld [vmem:[#allocation2 + $0xe0] sm:$0xff] }
 0x485   : > { %v4059_v24 = vadd.f32 %v12987_v43, %v4044_v34  ;;  %v4042_v58 = vadd.f32 %v4025_v41, %v3936_v57  ;;  %v3931_v57 = vadd.f32 %v14419_v49, %v3829_v3  ;;  %v4055_v34 = vadd.f32 %v12987_v43, %v4040_v8  ;;  %v6808_v41 = vld [vmem:[#allocation2 + $0xb8] sm:$0xff] }
 0x486   : > { %v12993_v12 = vpop.f32.mrf.mxu1  ;;  %v9686_v22 = vpop.f32.mrf.mxu0  ;;  %9889 = vmatmul.mubr.msk.bf16.vlgmr.msra.gmra.mxu0 %vm14399_vm1, %v14412_v27  ;;  %vm14421_vm1 = vnez %v14420_v6  ;;  %v4064_v51 = vmax.f32 %v4056_v59, 0.0  ;;  %v6830_v25 = vpack.c.bf16 %v6808_v41, %v6807_v38  ;;  %v6812_v8 = vld [vmem:[#allocation2 + $0xd8] sm:$0xff]  ;;  %v6814_v59 = vld [vmem:[#allocation2 + $0xe8] sm:$0xff] }
 0x487   : > { %v4067_v17 = vmax.f32 %v4059_v24, 0.0  ;;  %v4057_v46 = vadd.f32 %v12987_v43, %v4042_v58  ;;  %v13004_v35 = vadd.f32 %v9686_v22, %v12916_v18  ;;  %9892 = vmatprep.mubr.msk.bf16.mxu0 %vm14415_vm4, %v14414_v19  ;;  %v6828_v18 = vpack.c.bf16 %v6804_v37, %v6803_v40  ;;  %v14424_v58 = vld [vmem:[#allocation21_spill] sm:$0xff]  ;;  %v6809_v40 = vld [vmem:[#allocation2 + $0xc0] sm:$0xff]  ;;  %v6810_v37 = vld [vmem:[#allocation2 + $0xc8] sm:$0xff] }
 0x488   : > { %v13006_v13 = vpop.f32.mrf.mxu1  ;;  %9863 = vmatmul.mubr.msk.bf16.gmra.mxu1 %vm14413_vm7, %v6842_v55  ;;  %v5246_v2 = vpop.f32.mrf.mxu0  ;;  %v4037_v55 = vadd.f32 %v12925_v36, %v3931_v57  ;;  %vm14423_vm7 = vmmov %vm14415_vm4  ;;  %vm14425_vm4 = vnez %v14424_v58  ;;  %v4063_v28 = vmax.f32 %v4055_v34, 0.0  ;;  %v4053_v36 = vadd.f32 %v12987_v43, %v4038_v0 }
 0x489   : > { %9866 = vmatprep.mubr.msk.bf16.mxu1 %vm14418_vm10, %v6843_v23  ;;  %v13016_v56 = vadd.f32 %v5246_v2, %v12930_v7  ;;  %9954 = vmatprep.subr.mxu0 %v4067_v17  ;;  %v4065_v7 = vmax.f32 %v4057_v46, 0.0  ;;  %v6844_v53 = vsel %vm14421_vm1, %v6828_v18, 0  ;;  %v6845_v1 = vsel %vm14425_vm4, %v6829_v63, 0  ;;  %vm14426_vm10 = vmmov %vm14423_vm7 }
 0x48a   : > { %v13018_v14 = vpop.f32.mrf.mxu1  ;;  %v9687_v11 = vpop.f32.mrf.mxu0  ;;  %9955 = vmatpush3.msra.mxu0 %v4067_v17  ;;  %vm14428_vm1 = vmmov %vm14423_vm7  ;;  %v4062_v22 = vmax.f32 %v4054_v44, 0.0  ;;  %v4052_v27 = vadd.f32 %v12987_v43, %v4037_v55  ;;  %v6831_v46 = vpack.c.bf16 %v6810_v37, %v6809_v40  ;;  %v4061_v5 = vmax.f32 %v4053_v36, 0.0  ;;  %v6811_v43 = vld [vmem:[#allocation2 + $0xd0] sm:$0xff]  ;;  %v14444_v37 = vld [vmem:[#allocation41_spill] sm:$0xff] }
 0x48b   : > { %v13024_v15 = vadd.f32 %v9687_v11, %v12939_v62  ;;  %9956 = vmatprep.subr.mxu0 %v4066_v30  ;;  %v6832_v49 = vpack.c.bf16 %v6812_v8, %v6811_v43  ;;  %v6833_v0 = vpack.c.bf16 %v6814_v59, %v6813_v33  ;;  %v6819_v43 = vld [vmem:[#allocation2 + $0x110] sm:$0xff]  ;;  %v6820_v8 = vld [vmem:[#allocation2 + $0x118] sm:$0xff] }
 0x48c   : > { %v13026_v9 = vpop.f32.mrf.mxu1  ;;  %v5249_v31 = vpop.f32.mrf.mxu0  ;;  %9957 = vmatpush3.msra.mxu0 %v4066_v30  ;;  %v4060_v2 = vmax.f32 %v4052_v27, 0.0  ;;  %v14434_v30 = vld [vmem:[#allocation18_spill] sm:$0xff]  ;;  %v6836_v33 = vpack.c.bf16 %v6820_v8, %v6819_v43 }
 0x48d   : > { %v13034_v48 = vadd.f32 %v5249_v31, %v12953_v50  ;;  %9958 = vmatprep.subr.mxu0 %v4065_v7  ;;  %v6848_v41 = vsel %vm12184_vm5, %v6832_v49, 0  ;;  %v14465_v8 = vld [vmem:[#allocation14_spill] sm:$0xff] }
 0x48e   : > { %v13036_v62 = vpop.f32.mrf.mxu1  ;;  %v9690_v24 = vpop.f32.mrf.mxu0  ;;  %9893 = vmatmul.mubr.msk.bf16.gmra.mxu0 %vm14423_vm7, %v14422_v4  ;;  %vm14429_vm7 = vmmov %vm14428_vm1  ;;  %v6816_v4 = vld [vmem:[#allocation2 + $0xf8] sm:$0xff] }
 0x48f   : > { %v13045_v50 = vadd.f32 %v9690_v24, %v12962_v10  ;;  %9959 = vmatpush3.msra.mxu0 %v4065_v7  ;;  %9896 = vmatprep.mubr.msk.bf16.mxu0 %vm14428_vm1, %v14427_v39  ;;  %v14436_v7 = vld [vmem:[#allocation38_spill] sm:$0xff]  ;;  %v6815_v24 = vld [vmem:[#allocation2 + $0xf0] sm:$0xff] }
 0x490   : > { %v13047_v23 = vpop.f32.mrf.mxu1  ;;  %9867 = vmatmul.mubr.msk.bf16.gmra.mxu1 %vm14426_vm10, %v6844_v53  ;;  %9960 = vmatprep.subr.mxu0 %v4064_v51  ;;  %v5262_v45 = vpop.f32.mrf.mxu0  ;;  %vm14433_vm10 = vmmov %vm14428_vm1  ;;  %vm14435_vm1 = vnez %v14434_v30 }
 0x491   : > { %v13054_v26 = vadd.f32 %v5262_v45, %v12973_v32  ;;  %9961 = vmatpush3.msra.mxu0 %v4064_v51  ;;  %9870 = vmatprep.mubr.msk.bf16.mxu1 %vm14429_vm7, %v6845_v1  ;;  %v14430_v32 = vld [vmem:[#allocation23_spill] sm:$0xff]  ;;  %v6847_v21 = vsel %vm14435_vm1, %v6831_v46, 0 }
 0x492   : > { %v5082_v10 = vpop.f32.mrf.mxu1  ;;  %9962 = vmatprep.subr.mxu0 %v4063_v28  ;;  %v9691_v17 = vpop.f32.mrf.mxu0  ;;  %vm14431_vm4 = vnez %v14430_v32  ;;  %v14442_v1 = vld [vmem:[#allocation39_spill] sm:$0xff] }
 0x493   : > { %v13059_v19 = vadd.f32 %v9691_v17, %v12979_v60  ;;  %9963 = vmatpush3.msra.mxu0 %v4063_v28  ;;  %v6846_v42 = vsel %vm14431_vm4, %v6830_v25, 0  ;;  %v14432_v60 = vld [vmem:[#allocation36_spill] sm:$0xff]  ;;  %vm14437_vm4 = vmmov %vm14429_vm7  ;;  %v6834_v28 = vpack.c.bf16 %v6816_v4, %v6815_v24 }
 0x494   : > { %v9665_v29 = vpop.f32.mrf.mxu1  ;;  %9964 = vmatprep.subr.mxu0 %v4062_v22  ;;  %v5265_v47 = vpop.f32.mrf.mxu0  ;;  %vm14445_vm5 = vmmov %vm14437_vm4  ;;  %v7395_v4 = vld [vmem:[#allocation2 + $0x32] sm:$0xff] }
 0x495   : > { %v13064_v61 = vadd.f32 %v5265_v47, %v12993_v12  ;;  %9965 = vmatpush3.msra.mxu0 %v4062_v22  ;;  %v6850_v17 = vsel %vm12255_vm14, %v6834_v28, 0 }
 0x496   : > { %v5085_v3 = vpop.f32.mrf.mxu1  ;;  %9966 = vmatprep.subr.mxu0 %v4061_v5  ;;  %v9694_v18 = vpop.f32.mrf.mxu0  ;;  %9897 = vmatmul.mubr.msk.bf16.gmra.mxu0 %vm14433_vm10, %v14432_v60  ;;  %vm14438_vm10 = vmmov %vm14437_vm4 }
 0x497   : > { %v13071_v11 = vadd.f32 %v9694_v18, %v13006_v13  ;;  %9967 = vmatpush3.msra.mxu0 %v4061_v5  ;;  %9900 = vmatprep.mubr.msk.bf16.mxu0 %vm14437_vm4, %v14436_v7  ;;  %v14448_v5 = vld [vmem:[#allocation32_spill] sm:$0xff] }
 0x498   : > { %v9668_v12 = vpop.f32.mrf.mxu1  ;;  %9871 = vmatmul.mubr.msk.bf16.gmra.mxu1 %vm14429_vm7, %v6846_v42  ;;  %9968 = vmatprep.subr.mxu0 %v4060_v2  ;;  %v5278_v63 = vpop.f32.mrf.mxu0  ;;  %vm14443_vm7 = vmmov %vm14437_vm4  ;;  %v6851_v42 = vsel %vm14319_vm8, %v14448_v5, 0  ;;  %v7394_v18 = vld [vmem:[#allocation2 + $0x2a] sm:$0xff] }
 0x499   : > { %v13077_v57 = vadd.f32 %v5278_v63, %v13018_v14  ;;  %9969 = vmatpush3.msra.mxu0 %v4060_v2  ;;  %9874 = vmatprep.mubr.msk.bf16.mxu1 %vm14438_vm10, %v6847_v21  ;;  %v14440_v14 = vld [vmem:[#allocation22_spill] sm:$0xff]  ;;  %vm14446_vm10 = vmmov %vm14437_vm4 }
 0x49a   : > { %v5098_v34 = vpop.f32.mrf.mxu1  ;;  %v9695_v13 = vpop.f32.mrf.mxu0  ;;  %vm14441_vm1 = vnez %v14440_v14  ;;  %v14450_v2 = vld [vmem:[#allocation42_spill] sm:$0xff] }
 0x49b   : > { %v13081_v31 = vadd.f32 %v9695_v13, %v13026_v9  ;;  %v6849_v51 = vsel %vm14441_vm1, %v6833_v0, 0  ;;  %vm14451_vm1 = vmmov %vm14437_vm4 }
 0x49c   : > { %v9669_v6 = vpop.f32.mrf.mxu1  ;;  %v5281_v53 = vpop.f32.mrf.mxu0  ;;  %vm14454_vm14 = vmmov %vm14451_vm1 }
 0x49d   : > { %v13086_v44 = vadd.f32 %v5281_v53, %v13036_v62  ;;  %v14456_v53 = vld [vmem:[#allocation5_spill] sm:$0xff] }
 0x49e   : > { %v5101_v55 = vpop.f32.mrf.mxu1  ;;  %v9698_v58 = vpop.f32.mrf.mxu0  ;;  %9901 = vmatmul.mubr.msk.bf16.gmra.mxu0 %vm14443_vm7, %v14442_v1  ;;  %vm14452_vm7 = vmmov %vm14451_vm1  ;;  %vm14457_vm8 = vnez %v14456_v53  ;;  %v14460_v1 = vld [vmem:[#allocation50_spill] sm:$0xff] }
 0x49f   : > { %v13093_v9 = vadd.f32 %v9698_v58, %v13047_v23  ;;  %9904 = vmatprep.mubr.msk.bf16.mxu0 %vm14445_vm5, %v14444_v37  ;;  %v6852_v38 = vsel %vm14457_vm8, %v6836_v33, 0  ;;  %v7396_v58 = vld [vmem:[#allocation2 + $0x3a] sm:$0xff]  ;;  %v7397_v37 = vld [vmem:[#allocation2 + $0x42] sm:$0xff] }
 0x4a0   : > { %v9672_v40 = vpop.f32.mrf.mxu1  ;;  %9875 = vmatmul.mubr.msk.bf16.gmra.mxu1 %vm14437_vm4, %v6848_v41  ;;  %v5294_v62 = vpop.f32.mrf.mxu0  ;;  %vm14455_vm4 = vmmov %vm14451_vm1  ;;  %v7400_v33 = vld [vmem:[#allocation2 + $0x5a] sm:$0xff] }
 0x4a1   : > { %9878 = vmatprep.mubr.msk.bf16.mxu1 %vm14446_vm10, %v6849_v51  ;;  %v13099_v36 = vadd.f32 %v5294_v62, %v5082_v10  ;;  %v14458_v51 = vld [vmem:[#allocation20_spill] sm:$0xff]  ;;  %vm14461_vm10 = vmmov %vm14451_vm1 }
 0x4a2   : > { %v5114_v45 = vpop.f32.mrf.mxu1  ;;  %v9699_v39 = vpop.f32.mrf.mxu0  ;;  %vm14459_vm5 = vnez %v14458_v51  ;;  %v7130_v51 = vld [vmem:[#allocation2 + $0x119] sm:$0xff] }
 0x4a3   : > { %v13101_v25 = vadd.f32 %v9699_v39, %v9665_v29  ;;  %v7393_v29 = vld [vmem:[#allocation2 + $0x22] sm:$0xff]  ;;  %v14462_v39 = vld [vmem:[#allocation53_spill] sm:$0xff] }
 0x4a4   : > { %v9673_v22 = vpop.f32.mrf.mxu1  ;;  %v5297_v27 = vpop.f32.mrf.mxu0  ;;  %v7425_v7 = vpack.c.bf16 %v7394_v18, %v7393_v29  ;;  %v14467_v18 = vld [vmem:[#allocation17_spill] sm:$0xff] }
 0x4a5   : > { %v13105_v46 = vadd.f32 %v5297_v27, %v5085_v3  ;;  %v14453_v3 = vld [vmem:[#allocation48_spill] sm:$0xff]  ;;  %v7426_v27 = vpack.c.bf16 %v7396_v58, %v7395_v4  ;;  %vm14468_vm8 = vnez %v14467_v18 }
 0x4a6   : > { %v5117_v47 = vpop.f32.mrf.mxu1  ;;  %v9702_v10 = vpop.f32.mrf.mxu0  ;;  %9905 = vmatmul.mubr.msk.bf16.gmra.mxu0 %vm14451_vm1, %v14450_v2  ;;  %v7441_v24 = vsel %vm14459_vm5, %v7425_v7, 0  ;;  %v14469_v7 = vld [vmem:[#allocation54_spill] sm:$0xff]  ;;  %vm14470_vm5 = vmmov %vm14451_vm1 }
 0x4a7   : > { %v13112_v60 = vadd.f32 %v9702_v10, %v9668_v12  ;;  %9908 = vmatprep.mubr.msk.bf16.mxu0 %vm14454_vm14, %v14453_v3  ;;  %vm14464_vm14 = vmmov %vm14451_vm1 }
 0x4a8   : > { %v9676_v30 = vpop.f32.mrf.mxu1  ;;  %9879 = vmatmul.mubr.msk.bf16.gmra.mxu1 %vm14452_vm7, %v6850_v17  ;;  %v5310_v21 = vpop.f32.mrf.mxu0  ;;  %vm14463_vm7 = vmmov %vm14451_vm1 }
 0x4a9   : > { %9882 = vmatprep.mubr.msk.bf16.mxu1 %vm14455_vm4, %v6851_v42  ;;  %v13118_v59 = vadd.f32 %v5310_v21, %v5098_v34  ;;  %vm14466_vm4 = vnez %v14465_v8  ;;  %v7399_v21 = vld [vmem:[#allocation2 + $0x52] sm:$0xff] }
 0x4aa   : > { %v5130_v63 = vpop.f32.mrf.mxu1  ;;  %v9703_v49 = vpop.f32.mrf.mxu0  ;;  %v7442_v10 = vsel %vm14466_vm4, %v7426_v27, 0  ;;  %v7428_v58 = vpack.c.bf16 %v7400_v33, %v7399_v21  ;;  %vm7806_vm4 = vcmask 523264   ;;  %v7405_v33 = vld [vmem:[#allocation2 + $0x82] sm:$0xff] }
 0x4ab   : > { %v13120_v0 = vadd.f32 %v9703_v49, %v9669_v6  ;;  %v7398_v6 = vld [vmem:[#allocation2 + $0x4a] sm:$0xff]  ;;  %v7401_v49 = vld [vmem:[#allocation2 + $0x62] sm:$0xff] }
 0x4ac   : > { %v9677_v13 = vpop.f32.mrf.mxu1  ;;  %v5313_v12 = vpop.f32.mrf.mxu0  ;;  %v7427_v5 = vpack.c.bf16 %v7398_v6, %v7397_v37 }
 0x4ad   : > { %v13124_v41 = vadd.f32 %v5313_v12, %v5101_v55 }
 0x4ae   : > { %v5133_v14 = vpop.f32.mrf.mxu1  ;;  %v9706_v34 = vpop.f32.mrf.mxu0  ;;  %9909 = vmatmul.mubr.msk.bf16.gmra.mxu0 %vm14461_vm10, %v14460_v1  ;;  %v7443_v3 = vsel %vm14468_vm8, %v7427_v5, 0  ;;  %vm14471_vm10 = vmmov %vm14451_vm1 }
 0x4af   : > { %v13130_v62 = vadd.f32 %v9706_v34, %v9672_v40  ;;  %9912 = vmatprep.mubr.msk.bf16.mxu0 %vm14463_vm7, %v14462_v39  ;;  %vm14473_vm7 = vmmov %vm14451_vm1 }
 0x4b0   : > { %v9680_v28 = vpop.f32.mrf.mxu1  ;;  %9883 = vmatmul.mubr.msk.bf16.gmra.mxu1 %vm14451_vm1, %v6852_v38  ;;  %v5326_v55 = vpop.f32.mrf.mxu0  ;;  %v14472_v38 = vld [vmem:[#allocation58_spill] sm:$0xff]  ;;  %vm14477_vm8 = vmmov %vm14451_vm1 }
 0x4b1   : > { %9922 = vmatprep.mubr.msk.bf16.mxu1 %vm14464_vm14, %v7441_v24  ;;  %v13136_v23 = vadd.f32 %v5326_v55, %v5114_v45 }
 0x4b2   : > { %v5146_v17 = vpop.f32.mrf.mxu1  ;;  %v9707_v32 = vpop.f32.mrf.mxu0 }
 0x4b3   : > { %v13138_v42 = vadd.f32 %v9707_v32, %v9673_v22  ;;  %v7402_v22 = vld [vmem:[#allocation2 + $0x6a] sm:$0xff] }
 0x4b4   : > { %v9681_v43 = vpop.f32.mrf.mxu1  ;;  %v5329_v40 = vpop.f32.mrf.mxu0  ;;  %v7429_v37 = vpack.c.bf16 %v7402_v22, %v7401_v49 }
 0x4b5   : > { %v13142_v2 = vadd.f32 %v5329_v40, %v5117_v47  ;;  %v7129_v47 = vld [vmem:[#allocation2 + $0x111] sm:$0xff]  ;;  %v14474_v40 = vld [vmem:[#allocation7_spill] sm:$0xff] }
 0x4b6   : > { %v5149_v29 = vpop.f32.mrf.mxu1  ;;  %v9710_v45 = vpop.f32.mrf.mxu0  ;;  %9913 = vmatmul.mubr.msk.bf16.gmra.mxu0 %vm14470_vm5, %v14469_v7  ;;  %v7146_v39 = vpack.c.bf16 %v7130_v51, %v7129_v47  ;;  %vm14475_vm14 = vnez %v14474_v40  ;;  %v7445_v18 = vsel %vm14344_vm2, %v7429_v37, 0  ;;  %vm14478_vm5 = vmmov %vm14451_vm1  ;;  %v7407_v40 = vld [vmem:[#allocation2 + $0x92] sm:$0xff] }
 0x4b7   : > { %v13148_v12 = vadd.f32 %v9710_v45, %v9676_v30  ;;  %9916 = vmatprep.mubr.msk.bf16.mxu0 %vm14451_vm1, %v14472_v38  ;;  %v7406_v45 = vld [vmem:[#allocation2 + $0x8a] sm:$0xff]  ;;  %vm14479_vm2 = vmmov %vm14451_vm1 }
 0x4b8   : > { %v9720_v53 = vpop.f32.mrf.mxu1  ;;  %9923 = vmatmul.mubr.msk.bf16.vlgmr.msra.gmra.mxu1 %vm14471_vm10, %v7442_v10  ;;  %v5342_v4 = vpop.f32.mrf.mxu0  ;;  %v7431_v47 = vpack.c.bf16 %v7406_v45, %v7405_v33 }
 0x4b9   : > { %v5845_v24 = vadd.f32 %v9720_v53, %v13004_v35  ;;  %9926 = vmatprep.mubr.msk.bf16.mxu1 %vm14473_vm7, %v7443_v3  ;;  %v13155_v34 = vadd.f32 %v5342_v4, %v5130_v63  ;;  %v7444_v35 = vsel %vm14475_vm14, %v7428_v58, 0  ;;  %v7774_v63 = vld [vmem:[%s13889_s2] sm:$0xff] }
 0x4ba   : > { %v5716_v1 = vpop.f32.mrf.mxu1  ;;  %v9711_v6 = vpop.f32.mrf.mxu0  ;;  %v7404_v3 = vld [vmem:[#allocation2 + $0x7a] sm:$0xff] }
 0x4bb   : > { %v5843_v30 = vadd.f32 %v5716_v1, %v13016_v56  ;;  %v13158_v55 = vadd.f32 %v9711_v6, %v9677_v13  ;;  %v7403_v13 = vld [vmem:[#allocation2 + $0x72] sm:$0xff]  ;;  %v7775_v1 = vld [vmem:[%s13889_s2 + $0x8] sm:$0xff] }
 0x4bc   : > { %v9721_v27 = vpop.f32.mrf.mxu1  ;;  %v5345_v32 = vpop.f32.mrf.mxu0  ;;  %v7430_v53 = vpack.c.bf16 %v7404_v3, %v7403_v13  ;;  %v7410_v56 = vld [vmem:[#allocation2 + $0xaa] sm:$0xff] }
 0x4bd   : > { %v5846_v5 = vadd.f32 %v9721_v27, %v13024_v15  ;;  %v13166_v8 = vadd.f32 %v5345_v32, %v5133_v14  ;;  %v7447_v32 = vsel %vm12393_vm0, %v7431_v47, 0  ;;  %vm14483_vm0 = vmmov %vm14451_vm1  ;;  %v7779_v47 = vld [vmem:[%s13889_s2 + $0x28] sm:$0xff] }
 0x4be   : > { %v5719_v10 = vpop.f32.mrf.mxu1  ;;  %v9714_v15 = vpop.f32.mrf.mxu0  ;;  %9917 = vmatmul.mubr.msk.bf16.gmra.mxu0 %vm14477_vm8, %v7146_v39  ;;  %vm14497_vm14 = vmmov %vm14483_vm0  ;;  %vm14498_vm8 = vnez %v14305_v16 }
 0x4bf   : > { %v5844_v21 = vadd.f32 %v5719_v10, %v13034_v48  ;;  %v13172_v7 = vadd.f32 %v9714_v15, %v9680_v28  ;;  %9970 = vmatprep.mubr.msk.f32.mxu0 %vm7806_vm4, %v7774_v63  ;;  %v7409_v10 = vld [vmem:[#allocation2 + $0xa2] sm:$0xff] }
 0x4c0   : > { %v9724_v49 = vpop.f32.mrf.mxu1  ;;  %9927 = vmatmul.mubr.msk.bf16.gmra.mxu1 %vm14478_vm5, %v7444_v35  ;;  %v5358_v22 = vpop.f32.mrf.mxu0  ;;  %v7408_v35 = vld [vmem:[#allocation2 + $0x9a] sm:$0xff]  ;;  %vm14500_vm5 = vmmov %vm14483_vm0 }
 0x4c1   : > { %v5849_v14 = vadd.f32 %v9724_v49, %v13045_v50  ;;  %9930 = vmatprep.mubr.msk.bf16.mxu1 %vm14479_vm2, %v7445_v18  ;;  %v13178_v38 = vadd.f32 %v5358_v22, %v5146_v17  ;;  %v7446_v17 = vsel %vm12387_vm13, %v7430_v53, 0  ;;  %vm14482_vm13 = vmmov %vm14451_vm1  ;;  %v7778_v15 = vld [vmem:[%s13889_s2 + $0x20] sm:$0xff]  ;;  %v7433_v49 = vpack.c.bf16 %v7410_v56, %v7409_v10 }
 0x4c2   : > { %v5732_v48 = vpop.f32.mrf.mxu1  ;;  %v9715_v28 = vpop.f32.mrf.mxu0  ;;  %v7782_v56 = vld [vmem:[%s13889_s2 + $0x40] sm:$0xff]  ;;  %vm14492_vm1 = vmmov %vm14483_vm0 }
 0x4c3   : > { %v13181_v51 = vadd.f32 %v5732_v48, %v13054_v26  ;;  %v13183_v4 = vadd.f32 %v9715_v28, %v9681_v43  ;;  %v7776_v26 = vld [vmem:[%s13889_s2 + $0x10] sm:$0xff]  ;;  %vm14501_vm2 = vmmov %vm14483_vm0 }
 0x4c4   : > { %v9725_v58 = vpop.f32.mrf.mxu1  ;;  %v5361_v37 = vpop.f32.mrf.mxu0 }
 0x4c5   : > { %v13189_v50 = vadd.f32 %v9725_v58, %v13059_v19  ;;  %v13196_v39 = vadd.f32 %v5361_v37, %v5149_v29  ;;  %v7777_v29 = vld [vmem:[%s13889_s2 + $0x18] sm:$0xff]  ;;  %v14489_v58 = vld [vmem:[#allocation27_spill] sm:$0xff] }
 0x4c6   : > { %v5735_v43 = vpop.f32.mrf.mxu1  ;;  %v9754_v19 = vpop.f32.mrf.mxu0  ;;  %9971 = vmatmul.mubr.msk.f32.vlgmr.msra.gmra.mxu0 %vm7806_vm4, %v7775_v1  ;;  %v7780_v1 = vld [vmem:[%s13889_s2 + $0x30] sm:$0xff]  ;;  %vm14490_vm10 = vnez %v14489_v58 }
 0x4c7   : > { %v13201_v63 = vadd.f32 %v5735_v43, %v13064_v61  ;;  %v13204_v18 = vadd.f32 %v9754_v19, %v5845_v24  ;;  %9973 = vmatprep.mubr.msk.f32.mxu0 %vm7806_vm4, %v7776_v26  ;;  %v7432_v24 = vpack.c.bf16 %v7408_v35, %v7407_v40  ;;  %v7411_v26 = vld [vmem:[#allocation2 + $0xb2] sm:$0xff]  ;;  %v7412_v43 = vld [vmem:[#allocation2 + $0xba] sm:$0xff]  ;;  %v7414_v40 = vld [vmem:[#allocation2 + $0xca] sm:$0xff] }
 0x4c8   : > { %v9728_v13 = vpop.f32.mrf.mxu1  ;;  %9931 = vmatmul.mubr.msk.bf16.gmra.mxu1 %vm14482_vm13, %v7446_v17  ;;  %v6026_v61 = vpop.f32.mrf.mxu0  ;;  %v7449_v17 = vsel %vm12450_vm9, %v7433_v49, 0  ;;  %vm14487_vm9 = vmmov %vm14483_vm0  ;;  %v7783_v49 = vld [vmem:[%s13889_s2 + $0x48] sm:$0xff] }
 0x4c9   : > { %v13212_v3 = vadd.f32 %v9728_v13, %v13071_v11  ;;  %9934 = vmatprep.mubr.msk.bf16.mxu1 %vm14483_vm0, %v7447_v32  ;;  %v13218_v33 = vadd.f32 %v6026_v61, %v5843_v30  ;;  %v7413_v32 = vld [vmem:[#allocation2 + $0xc2] sm:$0xff]  ;;  %vm14521_vm13 = vmmov %vm14483_vm0 }
 0x4ca   : > { %v5748_v45 = vpop.f32.mrf.mxu1  ;;  %v9755_v53 = vpop.f32.mrf.mxu0  ;;  %9974 = vmatmul.mubr.msk.f32.gmra.mxu0 %vm7806_vm4, %v7777_v29  ;;  %v7435_v61 = vpack.c.bf16 %v7414_v40, %v7413_v32  ;;  %v7786_v40 = vld [vmem:[%s13889_s2 + $0x60] sm:$0xff] }
 0x4cb   : > { %v13221_v22 = vadd.f32 %v5748_v45, %v13077_v57  ;;  %v13224_v11 = vadd.f32 %v9755_v53, %v5846_v5  ;;  %9976 = vmatprep.mubr.msk.f32.mxu0 %vm7806_vm4, %v7778_v15  ;;  %v7448_v57 = vsel %vm12442_vm6, %v7432_v24, 0  ;;  %vm14486_vm6 = vmmov %vm14483_vm0 }
 0x4cc   : > { %v9729_v48 = vpop.f32.mrf.mxu1  ;;  %v6029_v28 = vpop.f32.mrf.mxu0 }
 0x4cd   : > { %v13231_v30 = vadd.f32 %v9729_v48, %v13081_v31  ;;  %v13238_v5 = vadd.f32 %v6029_v28, %v5844_v21  ;;  %v7781_v21 = vld [vmem:[%s13889_s2 + $0x38] sm:$0xff] }
 0x4ce   : > { %v5751_v37 = vpop.f32.mrf.mxu1  ;;  %v9758_v31 = vpop.f32.mrf.mxu0  ;;  %9977 = vmatmul.mubr.msk.f32.gmra.mxu0 %vm7806_vm4, %v7779_v47  ;;  %v7784_v47 = vld [vmem:[%s13889_s2 + $0x50] sm:$0xff]  ;;  %v14494_v48 = vld [vmem:[#allocation29_spill] sm:$0xff] }
 0x4cf   : > { %v13243_v27 = vadd.f32 %v5751_v37, %v13086_v44  ;;  %v13246_v35 = vadd.f32 %v9758_v31, %v5849_v14  ;;  %9979 = vmatprep.mubr.msk.f32.mxu0 %vm7806_vm4, %v7780_v1  ;;  %v7434_v14 = vpack.c.bf16 %v7412_v43, %v7411_v26  ;;  %v7415_v1 = vld [vmem:[#allocation2 + $0xd2] sm:$0xff]  ;;  %v7416_v37 = vld [vmem:[#allocation2 + $0xda] sm:$0xff]  ;;  %v7418_v26 = vld [vmem:[#allocation2 + $0xea] sm:$0xff]  ;;  %vm14495_vm7 = vnez %v14494_v48 }
 0x4d0   : > { %v9732_v19 = vpop.f32.mrf.mxu1  ;;  %9935 = vmatmul.mubr.msk.bf16.gmra.mxu1 %vm14486_vm6, %v7448_v57  ;;  %v6042_v44 = vpop.f32.mrf.mxu0  ;;  %v7451_v57 = vsel %vm14490_vm10, %v7435_v61, 0  ;;  %v7787_v61 = vld [vmem:[%s13889_s2 + $0x68] sm:$0xff]  ;;  %vm14522_vm6 = vmmov %vm14483_vm0 }
 0x4d1   : > { %v5857_v10 = vadd.f32 %v9732_v19, %v13093_v9  ;;  %9938 = vmatprep.mubr.msk.bf16.mxu1 %vm14487_vm9, %v7449_v17  ;;  %v13259_v13 = vadd.f32 %v6042_v44, %v13181_v51  ;;  %v7417_v17 = vld [vmem:[#allocation2 + $0xe2] sm:$0xff]  ;;  %vm14523_vm9 = vmmov %vm14483_vm0 }
 0x4d2   : > { %v5764_v29 = vpop.f32.mrf.mxu1  ;;  %v9759_v24 = vpop.f32.mrf.mxu0  ;;  %9980 = vmatmul.mubr.msk.f32.gmra.mxu0 %vm7806_vm4, %v7781_v21  ;;  %v7437_v44 = vpack.c.bf16 %v7418_v26, %v7417_v17  ;;  %vm14524_vm10 = vmmov %vm14483_vm0 }
 0x4d3   : > { %v13262_v15 = vadd.f32 %v5764_v29, %v13099_v36  ;;  %v13266_v9 = vadd.f32 %v9759_v24, %v13189_v50  ;;  %9982 = vmatprep.mubr.msk.f32.mxu0 %vm7806_vm4, %v7782_v56  ;;  %v7450_v36 = vsel %vm12492_vm15, %v7434_v14, 0  ;;  %vm14491_vm15 = vmmov %vm14483_vm0 }
 0x4d4   : > { %v9733_v45 = vpop.f32.mrf.mxu1  ;;  %v6045_v53 = vpop.f32.mrf.mxu0 }
 0x4d5   : > { %v5858_v51 = vadd.f32 %v9733_v45, %v13101_v25  ;;  %v13279_v50 = vadd.f32 %v6045_v53, %v13201_v63  ;;  %v7785_v63 = vld [vmem:[%s13889_s2 + $0x58] sm:$0xff] }
 0x4d6   : > { %v5767_v28 = vpop.f32.mrf.mxu1  ;;  %v9762_v25 = vpop.f32.mrf.mxu0  ;;  %9983 = vmatmul.mubr.msk.f32.gmra.mxu0 %vm7806_vm4, %v7783_v49 }
 0x4d7   : > { %v5856_v6 = vadd.f32 %v5767_v28, %v13105_v46  ;;  %v13286_v43 = vadd.f32 %v9762_v25, %v13212_v3  ;;  %9985 = vmatprep.mubr.msk.f32.mxu0 %vm7806_vm4, %v7784_v47  ;;  %v7436_v3 = vpack.c.bf16 %v7416_v37, %v7415_v1  ;;  %v7419_v47 = vld [vmem:[#allocation2 + $0xf2] sm:$0xff]  ;;  %v7420_v28 = vld [vmem:[#allocation2 + $0xfa] sm:$0xff] }
 0x4d8   : > { %v9736_v31 = vpop.f32.mrf.mxu1  ;;  %9939 = vmatmul.mubr.msk.bf16.gmra.mxu1 %vm14491_vm15, %v7450_v36  ;;  %v6058_v46 = vpop.f32.mrf.mxu0  ;;  %v7453_v36 = vsel %vm14495_vm7, %v7437_v44, 0  ;;  %vm14525_vm15 = vmmov %vm14483_vm0 }
 0x4d9   : > { %v5861_v32 = vadd.f32 %v9736_v31, %v13112_v60  ;;  %9942 = vmatprep.mubr.msk.bf16.mxu1 %vm14492_vm1, %v7451_v57  ;;  %v13299_v19 = vadd.f32 %v6058_v46, %v13221_v22  ;;  %v7452_v49 = vsel %vm12539_vm3, %v7436_v3, 0  ;;  %vm14496_vm3 = vmmov %vm14483_vm0 }
 0x4da   : > { %v5780_v21 = vpop.f32.mrf.mxu1  ;;  %v9763_v14 = vpop.f32.mrf.mxu0  ;;  %9986 = vmatmul.mubr.msk.f32.gmra.mxu0 %vm7806_vm4, %v7785_v63  ;;  %vm14526_vm1 = vmmov %vm14483_vm0 }
 0x4db   : > { %v5859_v56 = vadd.f32 %v5780_v21, %v13118_v59  ;;  %v13304_v60 = vadd.f32 %v9763_v14, %v13231_v30  ;;  %9988 = vmatprep.mubr.msk.f32.mxu0 %vm7806_vm4, %v7786_v40  ;;  %v7788_v59 = vld [vmem:[%s13889_s2 + $0x70] sm:$0xff]  ;;  %v7791_v40 = vld [vmem:[%s13889_s2 + $0x88] sm:$0xff]  ;;  %v7455_v14 = vsel %vm14498_vm8, %v12920_v52, 0  ;;  %vm14527_vm7 = vmmov %vm14483_vm0 }
 0x4dc   : > { %v9737_v29 = vpop.f32.mrf.mxu1  ;;  %v6061_v24 = vpop.f32.mrf.mxu0  ;;  %vm14530_vm8 = vmmov %vm14483_vm0 }
 0x4dd   : > { %v5862_v22 = vadd.f32 %v9737_v29, %v13120_v0  ;;  %v13317_v30 = vadd.f32 %v6061_v24, %v13243_v27  ;;  %v7789_v27 = vld [vmem:[%s13889_s2 + $0x78] sm:$0xff] }
 0x4de   : > { %v5783_v53 = vpop.f32.mrf.mxu1  ;;  %v9766_v0 = vpop.f32.mrf.mxu0  ;;  %9989 = vmatmul.mubr.msk.f32.gmra.mxu0 %vm7806_vm4, %v7787_v61  ;;  %v7423_v29 = vld [vmem:[#allocation2 + $0x112] sm:$0xff]  ;;  %v7424_v61 = vld [vmem:[#allocation2 + $0x11a] sm:$0xff] }
 0x4df   : > { %v5860_v58 = vadd.f32 %v5783_v53, %v13124_v41  ;;  %v13323_v57 = vadd.f32 %v9766_v0, %v5857_v10  ;;  %9991 = vmatprep.mubr.msk.f32.mxu0 %vm7806_vm4, %v7788_v59  ;;  %v7790_v41 = vld [vmem:[%s13889_s2 + $0x80] sm:$0xff]  ;;  %v7438_v10 = vpack.c.bf16 %v7420_v28, %v7419_v47 }
 0x4e0   : > { %v9740_v1 = vpop.f32.mrf.mxu1  ;;  %9943 = vmatmul.mubr.msk.bf16.gmra.mxu1 %vm14496_vm3, %v7452_v49  ;;  %v6074_v25 = vpop.f32.mrf.mxu0  ;;  %vm14528_vm3 = vmmov %vm14483_vm0 }
 0x4e1   : > { %v5865_v37 = vadd.f32 %v9740_v1, %v13130_v62  ;;  %9946 = vmatprep.mubr.msk.bf16.mxu1 %vm14497_vm14, %v7453_v36  ;;  %v13336_v17 = vadd.f32 %v6074_v25, %v13262_v15  ;;  %v7454_v15 = vsel %vm14383_vm12, %v7438_v10, 0  ;;  %vm14499_vm12 = vmmov %vm14483_vm0 }
 0x4e2   : > { %v5796_v26 = vpop.f32.mrf.mxu1  ;;  %v9767_v63 = vpop.f32.mrf.mxu0  ;;  %9992 = vmatmul.mubr.msk.f32.gmra.mxu0 %vm7806_vm4, %v7789_v27  ;;  %vm14529_vm14 = vmmov %vm14483_vm0 }
 0x4e3   : > { %v5863_v31 = vadd.f32 %v5796_v26, %v13136_v23  ;;  %v13340_v46 = vadd.f32 %v9767_v63, %v5858_v51  ;;  %9994 = vmatprep.mubr.msk.f32.mxu0 %vm7806_vm4, %v7790_v41  ;;  %v7792_v23 = vld [vmem:[%s13889_s2 + $0x90] sm:$0xff] }
 0x4e4   : > { %v9741_v62 = vpop.f32.mrf.mxu1  ;;  %v6077_v21 = vpop.f32.mrf.mxu0 }
 0x4e5   : > { %v5866_v3 = vadd.f32 %v9741_v62, %v13138_v42  ;;  %v13352_v44 = vadd.f32 %v6077_v21, %v5856_v6  ;;  %v7793_v6 = vld [vmem:[%s13889_s2 + $0x98] sm:$0xff] }
 0x4e6   : > { %v5799_v51 = vpop.f32.mrf.mxu1  ;;  %v9770_v42 = vpop.f32.mrf.mxu0  ;;  %9995 = vmatmul.mubr.msk.f32.gmra.mxu0 %vm7806_vm4, %v7791_v40 }
 0x4e7   : > { %v5864_v24 = vadd.f32 %v5799_v51, %v13142_v2  ;;  %v13359_v54 = vadd.f32 %v9770_v42, %v5861_v32  ;;  %9997 = vmatprep.mubr.msk.f32.mxu0 %vm7806_vm4, %v7792_v23  ;;  %v7794_v2 = vld [vmem:[%s13889_s2 + $0xa0] sm:$0xff]  ;;  %v7440_v32 = vpack.c.bf16 %v7424_v61, %v7423_v29 }
 0x4e8   : > { %v9744_v45 = vpop.f32.mrf.mxu1  ;;  %9947 = vmatmul.mubr.msk.bf16.gmra.mxu1 %vm14499_vm12, %v7454_v15  ;;  %v6090_v52 = vpop.f32.mrf.mxu0  ;;  %vm14531_vm12 = vmmov %vm14483_vm0 }
 0x4e9   : > { %v5869_v16 = vadd.f32 %v9744_v45, %v13148_v12  ;;  %9950 = vmatprep.mubr.msk.bf16.mxu1 %vm14500_vm5, %v7455_v14  ;;  %v13371_v49 = vadd.f32 %v6090_v52, %v5859_v56  ;;  %v7795_v12 = vld [vmem:[%s13889_s2 + $0xa8] sm:$0xff]  ;;  %v7456_v56 = vsel %vm12608_vm11, %v7440_v32, 0  ;;  %vm14519_vm11 = vmmov %vm14483_vm0 }
 0x4ea   : > { %v5812_v59 = vpop.f32.mrf.mxu1  ;;  %v9771_v48 = vpop.f32.mrf.mxu0  ;;  %9998 = vmatmul.mubr.msk.f32.gmra.mxu0 %vm7806_vm4, %v7793_v6  ;;  %vm14532_vm5 = vmmov %vm14483_vm0 }
 0x4eb   : > { %v5867_v53 = vadd.f32 %v5812_v59, %v13155_v34  ;;  %v13375_v36 = vadd.f32 %v9771_v48, %v5862_v22  ;;  %10000 = vmatprep.mubr.msk.f32.mxu0 %vm7806_vm4, %v7794_v2  ;;  %v7796_v34 = vld [vmem:[%s13889_s2 + $0xb0] sm:$0xff] }
 0x4ec   : > { %v9745_v47 = vpop.f32.mrf.mxu1  ;;  %v6093_v0 = vpop.f32.mrf.mxu0 }
 0x4ed   : > { %v5870_v28 = vadd.f32 %v9745_v47, %v13158_v55  ;;  %v13387_v1 = vadd.f32 %v6093_v0, %v5860_v58 }
 0x4ee   : > { %v5815_v22 = vpop.f32.mrf.mxu1  ;;  %v9774_v25 = vpop.f32.mrf.mxu0  ;;  %10001 = vmatmul.mubr.msk.f32.gmra.mxu0 %vm7806_vm4, %v7795_v12 }
 0x4ef   : > { %v5868_v27 = vadd.f32 %v5815_v22, %v13166_v8  ;;  %v13391_v41 = vadd.f32 %v9774_v25, %v5865_v37  ;;  %10003 = vmatprep.mubr.msk.f32.mxu0 %vm7806_vm4, %v7796_v34  ;;  %v7798_v8 = vld [vmem:[%s13889_s2 + $0xc0] sm:$0xff] }
 0x4f0   : > { %v9748_v10 = vpop.f32.mrf.mxu1  ;;  %9951 = vmatmul.mubr.msk.bf16.gmra.mxu1 %vm14501_vm2, %v7456_v56  ;;  %v6106_v58 = vpop.f32.mrf.mxu0  ;;  %vm14534_vm2 = vmmov %vm14483_vm0 }
 0x4f1   : > { %v5873_v55 = vadd.f32 %v9748_v10, %v13172_v7  ;;  %v13402_v26 = vadd.f32 %v6106_v58, %v5863_v31  ;;  %v7799_v7 = vld [vmem:[%s13889_s2 + $0xc8] sm:$0xff]  ;;  %v7800_v31 = vld [vmem:[%s13889_s2 + $0xd0] sm:$0xff] }
 0x4f2   : > { %v5828_v37 = vpop.f32.mrf.mxu1  ;;  %v9775_v62 = vpop.f32.mrf.mxu0  ;;  %10004 = vmatmul.mubr.msk.f32.gmra.mxu0 %vm7806_vm4, %v7797_v20 }
 0x4f3   : > { %v5871_v63 = vadd.f32 %v5828_v37, %v13178_v38  ;;  %v13406_v40 = vadd.f32 %v9775_v62, %v5866_v3  ;;  %10006 = vmatprep.mubr.msk.f32.mxu0 %vm7806_vm4, %v7798_v8 }
 0x4f4   : > { %v9749_v21 = vpop.f32.mrf.mxu1  ;;  %v6109_v23 = vpop.f32.mrf.mxu0 }
 0x4f5   : > { %v5874_v15 = vadd.f32 %v9749_v21, %v13183_v4  ;;  %v13416_v38 = vadd.f32 %v6109_v23, %v5864_v24  ;;  %v7801_v4 = vld [vmem:[%s13889_s2 + $0xd8] sm:$0xff]  ;;  %v7802_v24 = vld [vmem:[%s13889_s2 + $0xe0] sm:$0xff] }
 0x4f6   : > { %v5831_v51 = vpop.f32.mrf.mxu1  ;;  %v9778_v14 = vpop.f32.mrf.mxu0  ;;  %10007 = vmatmul.mubr.msk.f32.gmra.mxu0 %vm7806_vm4, %v7799_v7 }
 0x4f7   : > { %v5872_v3 = vadd.f32 %v5831_v51, %v13196_v39  ;;  %v13420_v29 = vadd.f32 %v9778_v14, %v5869_v16  ;;  %10009 = vmatprep.mubr.msk.f32.mxu0 %vm7806_vm4, %v7800_v31 }
 0x4f8   : > { %v9788_v61 = vpop.f32.mrf.mxu1  ;;  %v6122_v45 = vpop.f32.mrf.mxu0 }
 0x4f9   : > { %v6449_v42 = vadd.f32 %v9788_v61, %v13204_v18  ;;  %v13430_v39 = vadd.f32 %v6122_v45, %v5867_v53  ;;  %v7803_v18 = vld [vmem:[%s13889_s2 + $0xe8] sm:$0xff]  ;;  %v7804_v53 = vld [vmem:[%s13889_s2 + $0xf0] sm:$0xff] }
 0x4fa   : > { %v6320_v6 = vpop.f32.mrf.mxu1  ;;  %v9779_v52 = vpop.f32.mrf.mxu0  ;;  %10010 = vmatmul.mubr.msk.f32.gmra.mxu0 %vm7806_vm4, %v7801_v4 }
 0x4fb   : > { %v6447_v16 = vadd.f32 %v6320_v6, %v13218_v33  ;;  %v13434_v2 = vadd.f32 %v9779_v52, %v5870_v28  ;;  %10012 = vmatprep.mubr.msk.f32.mxu0 %vm7806_vm4, %v7802_v24 }
 0x4fc   : > { %v9789_v32 = vpop.f32.mrf.mxu1  ;;  %v6125_v48 = vpop.f32.mrf.mxu0 }
 0x4fd   : > { %v6450_v59 = vadd.f32 %v9789_v32, %v13224_v11  ;;  %v13444_v33 = vadd.f32 %v6125_v48, %v5868_v27  ;;  %v7805_v11 = vld [vmem:[%s13889_s2 + $0xf8] sm:$0xff] }
 0x4fe   : > { %v6323_v47 = vpop.f32.mrf.mxu1  ;;  %v9782_v28 = vpop.f32.mrf.mxu0  ;;  %10013 = vmatmul.mubr.msk.f32.gmra.mxu0 %vm7806_vm4, %v7803_v18 }
 0x4ff   : > { %v6448_v12 = vadd.f32 %v6323_v47, %v13238_v5  ;;  %v13448_v0 = vadd.f32 %v9782_v28, %v5873_v55  ;;  %10015 = vmatprep.mubr.msk.f32.mxu0 %vm7806_vm4, %v7804_v53 }
 0x500   : > { %v9792_v56 = vpop.f32.mrf.mxu1  ;;  %v6138_v22 = vpop.f32.mrf.mxu0 }
 0x501   : > { %v6453_v34 = vadd.f32 %v9792_v56, %v13246_v35  ;;  %v13455_v27 = vadd.f32 %v6138_v22, %v5871_v63 }
 0x502   : > { %v6336_v25 = vpop.f32.mrf.mxu1  ;;  %v9783_v10 = vpop.f32.mrf.mxu0  ;;  %10016 = vmatmul.mubr.msk.f32.gmra.mxu0 %vm7806_vm4, %v7805_v11  ;;  %vm14520_vm4 = vmmov %vm14483_vm0 }
 0x503   : > { %v6451_v5 = vadd.f32 %v6336_v25, %v13259_v13  ;;  %v13459_v20 = vadd.f32 %v9783_v10, %v5874_v15 }
 0x504   : > { %v9793_v55 = vpop.f32.mrf.mxu1  ;;  %v6141_v8 = vpop.f32.mrf.mxu0 }
 0x505   : > { %v6454_v58 = vadd.f32 %v9793_v55, %v13266_v9  ;;  %v13462_v37 = vadd.f32 %v6141_v8, %v5872_v3 }
 0x506   : > { %v6339_v62 = vpop.f32.mrf.mxu1  ;;  %v9822_v21 = vpop.f32.mrf.mxu0 }
 0x507   : > { %v6452_v35 = vadd.f32 %v6339_v62, %v13279_v50  ;;  %v13465_v63 = vadd.f32 %v9822_v21, %v6449_v42 }
 0x508   : > { %v9796_v7 = vpop.f32.mrf.mxu1  ;;  %v6630_v23 = vpop.f32.mrf.mxu0 }
 0x509   : > { %v6457_v13 = vadd.f32 %v9796_v7, %v13286_v43  ;;  %v13468_v31 = vadd.f32 %v6630_v23, %v6447_v16 }
 0x50a   : > { %v6352_v15 = vpop.f32.mrf.mxu1  ;;  %v9823_v14 = vpop.f32.mrf.mxu0 }
 0x50b   : > { %v6455_v51 = vadd.f32 %v6352_v15, %v13299_v19  ;;  %v13471_v9 = vadd.f32 %v9823_v14, %v6450_v59 }
 0x50c   : > { %v9797_v3 = vpop.f32.mrf.mxu1  ;;  %v6633_v4 = vpop.f32.mrf.mxu0 }
 0x50d   : > { %v6458_v61 = vadd.f32 %v9797_v3, %v13304_v60  ;;  %v13474_v50 = vadd.f32 %v6633_v4, %v6448_v12 }
 0x50e   : > { %v6355_v42 = vpop.f32.mrf.mxu1  ;;  %v9826_v24 = vpop.f32.mrf.mxu0 }
 0x50f   : > { %v6456_v45 = vadd.f32 %v6355_v42, %v13317_v30  ;;  %v13477_v43 = vadd.f32 %v9826_v24, %v6453_v34 }
 0x510   : > { %v9800_v6 = vpop.f32.mrf.mxu1  ;;  %v6646_v52 = vpop.f32.mrf.mxu0 }
 0x511   : > { %v6461_v16 = vadd.f32 %v9800_v6, %v13323_v57  ;;  %v13480_v19 = vadd.f32 %v6646_v52, %v6451_v5 }
 0x512   : > { %v6368_v32 = vpop.f32.mrf.mxu1  ;;  %v9827_v59 = vpop.f32.mrf.mxu0 }
 0x513   : > { %v6459_v18 = vadd.f32 %v6368_v32, %v13336_v17  ;;  %v13483_v60 = vadd.f32 %v9827_v59, %v6454_v58 }
 0x514   : > { %v9801_v48 = vpop.f32.mrf.mxu1  ;;  %v6649_v47 = vpop.f32.mrf.mxu0 }
 0x515   : > { %v6462_v53 = vadd.f32 %v9801_v48, %v13340_v46  ;;  %v13486_v30 = vadd.f32 %v6649_v47, %v6452_v35 }
 0x516   : > { %v6371_v12 = vpop.f32.mrf.mxu1  ;;  %v9830_v56 = vpop.f32.mrf.mxu0 }
 0x517   : > { %v6460_v28 = vadd.f32 %v6371_v12, %v13352_v44  ;;  %v13489_v57 = vadd.f32 %v9830_v56, %v6457_v13 }
 0x518   : > { %v9804_v11 = vpop.f32.mrf.mxu1  ;;  %v6662_v22 = vpop.f32.mrf.mxu0 }
 0x519   : > { %v6465_v34 = vadd.f32 %v9804_v11, %v13359_v54  ;;  %v13492_v17 = vadd.f32 %v6662_v22, %v6455_v51 }
 0x51a   : > { %v6384_v25 = vpop.f32.mrf.mxu1  ;;  %v9831_v10 = vpop.f32.mrf.mxu0 }
 0x51b   : > { %v6463_v5 = vadd.f32 %v6384_v25, %v13371_v49  ;;  %v13495_v46 = vadd.f32 %v9831_v10, %v6458_v61 }
 0x51c   : > { %v9805_v55 = vpop.f32.mrf.mxu1  ;;  %v6665_v8 = vpop.f32.mrf.mxu0 }
 0x51d   : > { %v6466_v58 = vadd.f32 %v9805_v55, %v13375_v36  ;;  %v13498_v44 = vadd.f32 %v6665_v8, %v6456_v45 }
 0x51e   : > { %v6387_v62 = vpop.f32.mrf.mxu1  ;;  %v9834_v21 = vpop.f32.mrf.mxu0 }
 0x51f   : > { %v6464_v35 = vadd.f32 %v6387_v62, %v13387_v1  ;;  %v13501_v54 = vadd.f32 %v9834_v21, %v6461_v16 }
 0x520   : > { %v9808_v7 = vpop.f32.mrf.mxu1  ;;  %v6678_v23 = vpop.f32.mrf.mxu0 }
 0x521   : > { %v6469_v13 = vadd.f32 %v9808_v7, %v13391_v41  ;;  %v13504_v49 = vadd.f32 %v6678_v23, %v6459_v18 }
 0x522   : > { %v6400_v15 = vpop.f32.mrf.mxu1  ;;  %v9835_v14 = vpop.f32.mrf.mxu0 }
 0x523   : > { %v6467_v51 = vadd.f32 %v6400_v15, %v13402_v26  ;;  %v13507_v36 = vadd.f32 %v9835_v14, %v6462_v53 }
 0x524   : > { %v9809_v3 = vpop.f32.mrf.mxu1  ;;  %v6681_v4 = vpop.f32.mrf.mxu0 }
 0x525   : > { %v6470_v61 = vadd.f32 %v9809_v3, %v13406_v40  ;;  %v13510_v1 = vadd.f32 %v6681_v4, %v6460_v28 }
 0x526   : > { %v6403_v42 = vpop.f32.mrf.mxu1  ;;  %v9838_v24 = vpop.f32.mrf.mxu0 }
 0x527   : > { %v6468_v45 = vadd.f32 %v6403_v42, %v13416_v38  ;;  %v13513_v41 = vadd.f32 %v9838_v24, %v6465_v34 }
 0x528   : > { %v9812_v6 = vpop.f32.mrf.mxu1  ;;  %v6694_v52 = vpop.f32.mrf.mxu0 }
 0x529   : > { %v6473_v16 = vadd.f32 %v9812_v6, %v13420_v29  ;;  %v13516_v26 = vadd.f32 %v6694_v52, %v6463_v5 }
 0x52a   : > { %v6416_v32 = vpop.f32.mrf.mxu1  ;;  %v9839_v59 = vpop.f32.mrf.mxu0 }
 0x52b   : > { %v6471_v18 = vadd.f32 %v6416_v32, %v13430_v39  ;;  %v13519_v40 = vadd.f32 %v9839_v59, %v6466_v58 }
 0x52c   : > { %v9813_v48 = vpop.f32.mrf.mxu1  ;;  %v6697_v47 = vpop.f32.mrf.mxu0 }
 0x52d   : > { %v6474_v53 = vadd.f32 %v9813_v48, %v13434_v2  ;;  %v13522_v38 = vadd.f32 %v6697_v47, %v6464_v35 }
 0x52e   : > { %v6419_v12 = vpop.f32.mrf.mxu1  ;;  %v9842_v56 = vpop.f32.mrf.mxu0 }
 0x52f   : > { %v6472_v28 = vadd.f32 %v6419_v12, %v13444_v33  ;;  %v13525_v29 = vadd.f32 %v9842_v56, %v6469_v13 }
 0x530   : > { %v9816_v11 = vpop.f32.mrf.mxu1  ;;  %v6710_v22 = vpop.f32.mrf.mxu0 }
 0x531   : > { %v6477_v34 = vadd.f32 %v9816_v11, %v13448_v0  ;;  %v13528_v39 = vadd.f32 %v6710_v22, %v6467_v51 }
 0x532   : > { %v6432_v25 = vpop.f32.mrf.mxu1  ;;  %v9843_v10 = vpop.f32.mrf.mxu0 }
 0x533   : > { %v6475_v5 = vadd.f32 %v6432_v25, %v13455_v27  ;;  %v13531_v2 = vadd.f32 %v9843_v10, %v6470_v61 }
 0x534   : > { %v9817_v55 = vpop.f32.mrf.mxu1  ;;  %v6713_v8 = vpop.f32.mrf.mxu0 }
 0x535   : > { %v6478_v58 = vadd.f32 %v9817_v55, %v13459_v20  ;;  %v13534_v33 = vadd.f32 %v6713_v8, %v6468_v45 }
 0x536   : > { %v6435_v62 = vpop.f32.mrf.mxu1  ;;  %v9846_v21 = vpop.f32.mrf.mxu0 }
 0x537   : > { %v6476_v35 = vadd.f32 %v6435_v62, %v13462_v37  ;;  %v13537_v0 = vadd.f32 %v9846_v21, %v6473_v16 }
 0x538   : > { %v9856_v7 = vpop.f32.mrf.mxu1  ;;  %v6726_v27 = vpop.f32.mrf.mxu0 }
 0x539   : > { %v13540_v13 = vadd.f32 %v9856_v7, %v13465_v63  ;;  %v13542_v23 = vadd.f32 %v6726_v27, %v6471_v18 }
 0x53a   : > { %v6940_v15 = vpop.f32.mrf.mxu1  ;;  %v9847_v20 = vpop.f32.mrf.mxu0 }
 0x53b   : > { %v13545_v51 = vadd.f32 %v6940_v15, %v13468_v31  ;;  %v13547_v14 = vadd.f32 %v9847_v20, %v6474_v53 }
 0x53c   : > { %v9857_v3 = vpop.f32.mrf.mxu1  ;;  %v6729_v61 = vpop.f32.mrf.mxu0 }
 0x53d   : > { %v13550_v37 = vadd.f32 %v9857_v3, %v13471_v9  ;;  %v13552_v4 = vadd.f32 %v6729_v61, %v6472_v28 }
 0x53e   : > { %v13554_v42 = vpop.f32.mrf.mxu1  ;;  %v9850_v63 = vpop.f32.mrf.mxu0 }
 0x53f   : > { %14502 = vst [vmem:[#allocation24_spill] sm:$0xff] %v13552_v4  ;;  %v13556_v45 = vadd.f32 %v9850_v63, %v6477_v34 }
 0x540   : > { %v9860_v24 = vpop.f32.mrf.mxu1  ;;  %v6742_v31 = vpop.f32.mrf.mxu0 }
 0x541   : > { %v13559_v6 = vadd.f32 %v9860_v24, %v13477_v43  ;;  %v13561_v16 = vadd.f32 %v6742_v31, %v6475_v5 }
 0x542   : > { %v6956_v52 = vpop.f32.mrf.mxu1  ;;  %v9851_v9 = vpop.f32.mrf.mxu0 }
 0x543   : > { %v13564_v32 = vadd.f32 %v6956_v52, %v13480_v19  ;;  %v13566_v18 = vadd.f32 %v9851_v9, %v6478_v58 }
 0x544   : > { %v9861_v59 = vpop.f32.mrf.mxu1  ;;  %v6745_v53 = vpop.f32.mrf.mxu0 }
 0x545   : > { %v13569_v48 = vadd.f32 %v9861_v59, %v13483_v60  ;;  %v13571_v47 = vadd.f32 %v6745_v53, %v6476_v35 }
 0x546   : > { %v13573_v12 = vpop.f32.mrf.mxu1  ;;  %v13575_v43 = vpop.f32.mrf.mxu0 }
 0x547   : > { %14503 = vst [vmem:[#allocation40_spill] sm:$0xff] %v13571_v47 }
 0x548   : > { %v9864_v28 = vpop.f32.mrf.mxu1  ;;  %v13580_v19 = vpop.f32.mrf.mxu0 }
 0x549   : > { %v13578_v56 = vadd.f32 %v9864_v28, %v13489_v57 }
 0x54a   : > { %v6972_v11 = vpop.f32.mrf.mxu1  ;;  %v13585_v22 = vpop.f32.mrf.mxu0 }
 0x54b   : > { %v13583_v34 = vadd.f32 %v6972_v11, %v13492_v17 }
 0x54c   : > { %v9865_v60 = vpop.f32.mrf.mxu1  ;;  %v13590_v5 = vpop.f32.mrf.mxu0 }
 0x54d   : > { %v13588_v25 = vadd.f32 %v9865_v60, %v13495_v46 }
 0x54e   : > { %v13592_v10 = vpop.f32.mrf.mxu1  ;;  %v13594_v55 = vpop.f32.mrf.mxu0 }
 0x550   : > { %v9868_v57 = vpop.f32.mrf.mxu1  ;;  %v13599_v8 = vpop.f32.mrf.mxu0 }
 0x551   : > { %v13597_v58 = vadd.f32 %v9868_v57, %v13501_v54 }
 0x552   : > { %v6988_v17 = vpop.f32.mrf.mxu1  ;;  %v13604_v35 = vpop.f32.mrf.mxu0 }
 0x553   : > { %v13602_v62 = vadd.f32 %v6988_v17, %v13504_v49 }
 0x554   : > { %v9869_v46 = vpop.f32.mrf.mxu1  ;;  %v13609_v7 = vpop.f32.mrf.mxu0 }
 0x555   : > { %v13607_v21 = vadd.f32 %v9869_v46, %v13507_v36 }
 0x556   : > { %v13611_v27 = vpop.f32.mrf.mxu1  ;;  %v13613_v15 = vpop.f32.mrf.mxu0 }
 0x558   : > { %v9872_v54 = vpop.f32.mrf.mxu1  ;;  %v13618_v3 = vpop.f32.mrf.mxu0 }
 0x559   : > { %v13616_v20 = vadd.f32 %v9872_v54, %v13513_v41 }
 0x55a   : > { %v7004_v49 = vpop.f32.mrf.mxu1  ;;  %v13623_v63 = vpop.f32.mrf.mxu0 }
 0x55b   : > { %v13621_v61 = vadd.f32 %v7004_v49, %v13516_v26 }
 0x55c   : > { %v9873_v36 = vpop.f32.mrf.mxu1  ;;  %v13628_v31 = vpop.f32.mrf.mxu0 }
 0x55d   : > { %v13626_v24 = vadd.f32 %v9873_v36, %v13519_v40 }
 0x55e   : > { %v13630_v52 = vpop.f32.mrf.mxu1  ;;  %v13632_v9 = vpop.f32.mrf.mxu0 }
 0x560   : > { %v9876_v41 = vpop.f32.mrf.mxu1  ;;  %v13637_v53 = vpop.f32.mrf.mxu0 }
 0x561   : > { %v13635_v59 = vadd.f32 %v9876_v41, %v13525_v29 }
 0x562   : > { %v7020_v26 = vpop.f32.mrf.mxu1  ;;  %v13642_v11 = vpop.f32.mrf.mxu0 }
 0x563   : > { %14504 = vst [vmem:[#allocation43_spill] sm:$0xff] %v13635_v59  ;;  %v13640_v28 = vadd.f32 %v7020_v26, %v13528_v39 }
 0x564   : > { %v9877_v40 = vpop.f32.mrf.mxu1  ;;  %v13647_v57 = vpop.f32.mrf.mxu0 }
 0x565   : > { %v13645_v60 = vadd.f32 %v9877_v40, %v13531_v2 }
 0x566   : > { %v13649_v17 = vpop.f32.mrf.mxu1  ;;  %v13651_v46 = vpop.f32.mrf.mxu0 }
 0x568   : > { %v9880_v29 = vpop.f32.mrf.mxu1  ;;  %v13656_v49 = vpop.f32.mrf.mxu0 }
 0x569   : > { %v13654_v54 = vadd.f32 %v9880_v29, %v13537_v0 }
 0x56a   : > { %v7036_v39 = vpop.f32.mrf.mxu1  ;;  %v13661_v41 = vpop.f32.mrf.mxu0 }
 0x56b   : > { %14505 = vst [vmem:[#allocation52_spill] sm:$0xff] %v13654_v54  ;;  %v13659_v36 = vadd.f32 %v7036_v39, %v13542_v23 }
 0x56c   : > { %v9881_v2 = vpop.f32.mrf.mxu1  ;;  %v13666_v40 = vpop.f32.mrf.mxu0 }
 0x56d   : > { %14506 = vst [vmem:[#allocation30_spill] sm:$0xff] %v13659_v36  ;;  %v13664_v26 = vadd.f32 %v9881_v2, %v13547_v14 }
 0x56e   : > { %v13668_v47 = vpop.f32.mrf.mxu1  ;;  %v13670_v4 = vpop.f32.mrf.mxu0 }
 0x56f   : > { %14507 = vst [vmem:[#allocation37_spill] sm:$0xff] %v13664_v26  ;;  %14508 = vst [vmem:[#allocation47_spill] sm:$0xff] %v13668_v47 }
 0x570   : > { %14509 = vst [vmem:[#allocation49_spill] sm:$0xff] %v13670_v4  ;;  %v9884_v0 = vpop.f32.mrf.mxu1  ;;  %v13675_v54 = vpop.f32.mrf.mxu0 }
 0x571   : > { %v13673_v29 = vadd.f32 %v9884_v0, %v13556_v45 }
 0x572   : > { %v7052_v23 = vpop.f32.mrf.mxu1  ;;  %v13680_v36 = vpop.f32.mrf.mxu0 }
 0x573   : > { %14510 = vst [vmem:[#allocation44_spill] sm:$0xff] %v13673_v29  ;;  %v13678_v39 = vadd.f32 %v7052_v23, %v13561_v16  ;;  %14512 = vst [vmem:[#allocation51_spill] sm:$0xff] %v13680_v36  ;;  %v7068_v16 = vadd.f32 %v13554_v42, %v13474_v50  ;;  %v13709_v42 = vld [vmem:[%s13891_s4] ss:$0 sm:$0xff] }
 0x574   : > { %v9885_v14 = vpop.f32.mrf.mxu1  ;;  %v13685_v26 = vpop.f32.mrf.mxu0 }
 0x575   : > { %14511 = vst [vmem:[#allocation45_spill] sm:$0xff] %v13678_v39  ;;  %v13683_v2 = vadd.f32 %v9885_v14, %v13566_v18  ;;  %v7362_v59 = vadd.f32 %v13590_v5, %v7068_v16  ;;  %v7361_v14 = vadd.f32 %v13580_v19, %v13545_v51  ;;  %v7363_v51 = vadd.f32 %v13575_v43, %v13540_v13 }
 0x576   : > { %v13687_v47 = vpop.f32.mrf.mxu1  ;;  %v13689_v4 = vpop.f32.mrf.mxu0  ;;  %v7072_v16 = vadd.f32 %v13573_v12, %v13486_v30  ;;  %v7365_v13 = vadd.f32 %v13599_v8, %v13564_v32  ;;  %v7368_v30 = vadd.f32 %v13604_v35, %v13569_v48 }
 0x577   : > { %14513 = vst [vmem:[#allocation25_spill] sm:$0xff] %v13683_v2  ;;  %14514 = vst [vmem:[#allocation26_spill] sm:$0xff] %v13687_v47 }
 0x578   : > { %14515 = vst [vmem:[#allocation46_spill] sm:$0xff] %v13689_v4  ;;  %v9924_v45 = vpop.f32.mrf.mxu1  ;;  %v13691_v0 = vpop.f32.mrf.mxu0 }
 0x579   : > { %14516 = vst [vmem:[#allocation31_spill] sm:$0xff] %v13691_v0  ;;  %v7364_v0 = vadd.f32 %v13585_v22, %v13550_v37  ;;  %v7673_v22 = vadd.f32 %v9924_v45, %v7363_v51  ;;  %v7367_v51 = vadd.f32 %v13594_v55, %v13559_v6 }
 0x57a   : > { %v7544_v29 = vpop.f32.mrf.mxu1  ;;  %v13695_v23 = vpop.f32.mrf.mxu0 }
 0x57b   : > { %v7671_v36 = vadd.f32 %v7544_v29, %v7361_v14 }
 0x57c   : > { %v9925_v39 = vpop.f32.mrf.mxu1  ;;  %v13698_v18 = vpop.f32.mrf.mxu0 }
 0x57d   : > { %v7674_v19 = vadd.f32 %v9925_v39, %v7364_v0  ;;  %v7710_v29 = vadd.f32 %v13709_v42, %v7671_v36  ;;  %v7712_v36 = vadd.f32 %v13709_v42, %v7673_v22 }
 0x57e   : > { %v7547_v2 = vpop.f32.mrf.mxu1  ;;  %v13702_v4 = vpop.f32.mrf.mxu0 }
 0x57f   : > { %v7672_v47 = vadd.f32 %v7547_v2, %v7362_v59  ;;  %14517 = vst [vmem:[#allocation33_spill] sm:$0xff] %v13702_v4  ;;  %v7366_v4 = vadd.f32 %v13609_v7, %v7072_v16  ;;  %v7742_v0 = vmax.f32 %v7710_v29, 0.0 }
 0x580   : > { %v9928_v50 = vpop.f32.mrf.mxu1  ;;  %v13711_v5 = vpop.f32.mrf.mxu0 }
 0x581   : > { %14518 = vst [vmem:[#allocation55_spill] sm:$0xff] %v13711_v5  ;;  %v7711_v59 = vadd.f32 %v13709_v42, %v7672_v47  ;;  %v7713_v47 = vadd.f32 %v13709_v42, %v7674_v19 }
 0x582   : > { %v7560_v2 = vpop.f32.mrf.mxu1  ;;  %v13718_v37 = vpop.f32.mrf.mxu0 }
 0x583   : > { %v7743_v39 = vmax.f32 %v7711_v59, 0.0  ;;  %v7675_v45 = vadd.f32 %v7560_v2, %v7365_v13  ;;  %v7745_v16 = vmax.f32 %v7713_v47, 0.0  ;;  %v7076_v2 = vadd.f32 %v13592_v10, %v13498_v44 }
 0x584   : > { %v9929_v14 = vpop.f32.mrf.mxu1  ;;  %v13723_v5 = vpop.f32.mrf.mxu0  ;;  %v7677_v13 = vadd.f32 %v9928_v50, %v7367_v51 }
 0x585   : > { %v7678_v48 = vadd.f32 %v9929_v14, %v7368_v30  ;;  %v7714_v29 = vadd.f32 %v13709_v42, %v7675_v45  ;;  %v7744_v14 = vmax.f32 %v7712_v36, 0.0  ;;  %v7369_v30 = vadd.f32 %v13618_v3, %v13583_v34 }
 0x586   : > { %v7563_v43 = vpop.f32.mrf.mxu1  ;;  %v9972_v7 = vpop.f32.mrf.mxu0  ;;  %v7716_v36 = vadd.f32 %v13709_v42, %v7677_v13 }
 0x587   : > { %v7676_v12 = vadd.f32 %v7563_v43, %v7366_v4  ;;  %v8129_v32 = vadd.f32 %v9972_v7, %v7743_v39  ;;  %v7370_v43 = vadd.f32 %v13628_v31, %v7076_v2  ;;  %v7717_v47 = vadd.f32 %v13709_v42, %v7678_v48 }
 0x588   : > { %v9932_v8 = vpop.f32.mrf.mxu1  ;;  %v7969_v19 = vpop.f32.mrf.mxu0 }
 0x589   : > { %v7715_v4 = vadd.f32 %v13709_v42, %v7676_v12  ;;  %8161 = vst.msk [vmem:[%s13733_s26 + $0x8] sm:$0xff] %vm14519_vm11, %v8129_v32  ;;  %v8128_v35 = vadd.f32 %v7969_v19, %v7742_v0  ;;  %v7372_v12 = vadd.f32 %v13623_v63, %v13588_v25  ;;  %v7746_v32 = vmax.f32 %v7714_v29, 0.0  ;;  %vm14537_vm11 = vmmov %vm14483_vm0 }
 0x58a   : > { %v7576_v59 = vpop.f32.mrf.mxu1  ;;  %v9975_v22 = vpop.f32.mrf.mxu0  ;;  %v7371_v0 = vadd.f32 %v13613_v15, %v13578_v56 }
 0x58b   : > { %8160 = vst.msk [vmem:[%s13733_s26] sm:$0xff] %vm14520_vm4, %v8128_v35  ;;  %v8131_v6 = vadd.f32 %v9975_v22, %v7745_v16  ;;  %v7747_v50 = vmax.f32 %v7715_v4, 0.0  ;;  %v7679_v31 = vadd.f32 %v7576_v59, %v7369_v30  ;;  %v7749_v4 = vmax.f32 %v7717_v47, 0.0  ;;  %vm14540_vm4 = vmmov %vm14483_vm0 }
 0x58c   : > { %v9933_v55 = vpop.f32.mrf.mxu1  ;;  %v7979_v39 = vpop.f32.mrf.mxu0  ;;  %v7080_v35 = vadd.f32 %v13611_v27, %v13510_v1  ;;  %v7681_v16 = vadd.f32 %v9932_v8, %v7371_v0  ;;  %v7748_v22 = vmax.f32 %v7716_v36, 0.0 }
 0x58d   : > { %8163 = vst.msk [vmem:[%s13733_s26 + $0x18] sm:$0xff] %vm14521_vm13, %v8131_v6  ;;  %v8130_v44 = vadd.f32 %v7979_v39, %v7744_v14  ;;  %v7682_v19 = vadd.f32 %v9933_v55, %v7372_v12  ;;  %v7718_v2 = vadd.f32 %v13709_v42, %v7679_v31  ;;  %v7373_v6 = vadd.f32 %v13637_v53, %v13602_v62  ;;  %vm14543_vm13 = vmmov %vm14483_vm0 }
 0x58e   : > { %v7579_v10 = vpop.f32.mrf.mxu1  ;;  %v9978_v45 = vpop.f32.mrf.mxu0  ;;  %v7374_v13 = vadd.f32 %v13647_v57, %v7080_v35  ;;  %v7376_v14 = vadd.f32 %v13642_v11, %v13607_v21  ;;  %v7720_v30 = vadd.f32 %v13709_v42, %v7681_v16  ;;  %v7379_v16 = vadd.f32 %v13651_v46, %v13616_v20 }
 0x58f   : > { %v7680_v7 = vadd.f32 %v7579_v10, %v7370_v43  ;;  %8162 = vst.msk [vmem:[%s13733_s26 + $0x10] sm:$0xff] %vm14483_vm0, %v8130_v44  ;;  %v8133_v34 = vadd.f32 %v9978_v45, %v7747_v50  ;;  %v7721_v55 = vadd.f32 %v13709_v42, %v7682_v19  ;;  %v7750_v47 = vmax.f32 %v7718_v2, 0.0 }
 0x590   : > { %v9936_v3 = vpop.f32.mrf.mxu1  ;;  %v7989_v51 = vpop.f32.mrf.mxu0  ;;  %v7375_v44 = vadd.f32 %v13632_v9, %v13597_v58  ;;  %v7084_v45 = vadd.f32 %v13630_v52, %v13522_v38  ;;  %v7377_v19 = vadd.f32 %v13656_v49, %v13621_v61 }
 0x591   : > { %v7719_v48 = vadd.f32 %v13709_v42, %v7680_v7  ;;  %8165 = vst.msk [vmem:[%s13733_s26 + $0x28] sm:$0xff] %vm14522_vm6, %v8133_v34  ;;  %v8132_v25 = vadd.f32 %v7989_v51, %v7746_v32  ;;  %v7753_v7 = vmax.f32 %v7721_v55, 0.0  ;;  %v7752_v32 = vmax.f32 %v7720_v30, 0.0  ;;  %v14533_v30 = vld [vmem:[#allocation51_spill] sm:$0xff]  ;;  %vm14547_vm6 = vmmov %vm14483_vm0 }
 0x592   : > { %v7592_v63 = vpop.f32.mrf.mxu1  ;;  %v9981_v59 = vpop.f32.mrf.mxu0  ;;  %v7685_v31 = vadd.f32 %v9936_v3, %v7375_v44  ;;  %v7378_v0 = vadd.f32 %v13666_v40, %v7084_v45 }
 0x593   : > { %8164 = vst.msk [vmem:[%s13733_s26 + $0x20] sm:$0xff] %vm14523_vm9, %v8132_v25  ;;  %v8135_v56 = vadd.f32 %v9981_v59, %v7749_v4  ;;  %v7751_v8 = vmax.f32 %v7719_v48, 0.0  ;;  %v7683_v57 = vadd.f32 %v7592_v63, %v7373_v6  ;;  %v7380_v25 = vadd.f32 %v13661_v41, %v13626_v24  ;;  %vm14550_vm9 = vmmov %vm14483_vm0 }
 0x594   : > { %v9937_v15 = vpop.f32.mrf.mxu1  ;;  %v7999_v29 = vpop.f32.mrf.mxu0  ;;  %v7724_v35 = vadd.f32 %v13709_v42, %v7685_v31  ;;  %v14538_v31 = vld [vmem:[#allocation24_spill] sm:$0xff] }
 0x595   : > { %8167 = vst.msk [vmem:[%s13733_s26 + $0x38] sm:$0xff] %vm14524_vm10, %v8135_v56  ;;  %v8134_v1 = vadd.f32 %v7999_v29, %v7748_v22  ;;  %v7686_v50 = vadd.f32 %v9937_v15, %v7376_v14  ;;  %v7722_v34 = vadd.f32 %v13709_v42, %v7683_v57  ;;  %v7381_v14 = vadd.f32 %v13675_v54, %v13640_v28  ;;  %vm14553_vm10 = vmmov %vm14483_vm0 }
 0x596   : > { %v7595_v27 = vpop.f32.mrf.mxu1  ;;  %v9984_v39 = vpop.f32.mrf.mxu0  ;;  %v7384_v57 = vadd.f32 %v14533_v30, %v13645_v60 }
 0x597   : > { %v7684_v43 = vadd.f32 %v7595_v27, %v7374_v13  ;;  %8166 = vst.msk [vmem:[%s13733_s26 + $0x30] sm:$0xff] %vm14525_vm15, %v8134_v1  ;;  %v8137_v62 = vadd.f32 %v9984_v39, %v7751_v8  ;;  %v7725_v48 = vadd.f32 %v13709_v42, %v7686_v50  ;;  %v7754_v59 = vmax.f32 %v7722_v34, 0.0  ;;  %v14536_v50 = vld [vmem:[#allocation49_spill] sm:$0xff]  ;;  %v14539_v34 = vld [vmem:[#allocation47_spill] sm:$0xff]  ;;  %vm14555_vm15 = vmmov %vm14483_vm0 }
 0x598   : > { %v9940_v53 = vpop.f32.mrf.mxu1  ;;  %v8009_v10 = vpop.f32.mrf.mxu0  ;;  %v7088_v13 = vadd.f32 %v13649_v17, %v13534_v33  ;;  %v7756_v1 = vmax.f32 %v7724_v35, 0.0 }
 0x599   : > { %v7723_v12 = vadd.f32 %v13709_v42, %v7684_v43  ;;  %8169 = vst.msk [vmem:[%s13733_s26 + $0x48] sm:$0xff] %vm14526_vm1, %v8137_v62  ;;  %v8136_v21 = vadd.f32 %v8009_v10, %v7750_v47  ;;  %v7757_v22 = vmax.f32 %v7725_v48, 0.0  ;;  %v7689_v6 = vadd.f32 %v9940_v53, %v7379_v16  ;;  %v14535_v10 = vld [vmem:[#allocation43_spill] sm:$0xff]  ;;  %vm14558_vm1 = vmmov %vm14483_vm0 }
 0x59a   : > { %v7608_v11 = vpop.f32.mrf.mxu1  ;;  %v9987_v36 = vpop.f32.mrf.mxu0  ;;  %v7382_v27 = vadd.f32 %v13685_v26, %v7088_v13  ;;  %v14546_v13 = vld [vmem:[#allocation46_spill] sm:$0xff] }
 0x59b   : > { %8168 = vst.msk [vmem:[%s13733_s26 + $0x40] sm:$0xff] %vm14527_vm7, %v8136_v21  ;;  %v8139_v58 = vadd.f32 %v9987_v36, %v7753_v7  ;;  %v7755_v3 = vmax.f32 %v7723_v12, 0.0  ;;  %v7687_v40 = vadd.f32 %v7608_v11, %v7377_v19  ;;  %v7728_v47 = vadd.f32 %v13709_v42, %v7689_v6  ;;  %vm14559_vm7 = vmmov %vm14483_vm0 }
 0x59c   : > { %v9941_v9 = vpop.f32.mrf.mxu1  ;;  %v8019_v51 = vpop.f32.mrf.mxu0  ;;  %v7383_v12 = vadd.f32 %v14536_v50, %v14535_v10 }
 0x59d   : > { %8171 = vst.msk [vmem:[%s13733_s26 + $0x58] sm:$0xff] %vm14528_vm3, %v8139_v58  ;;  %v8138_v38 = vadd.f32 %v8019_v51, %v7752_v32  ;;  %v7690_v56 = vadd.f32 %v9941_v9, %v7380_v25  ;;  %v7726_v55 = vadd.f32 %v13709_v42, %v7687_v40  ;;  %v7092_v58 = vadd.f32 %v14539_v34, %v14538_v31  ;;  %v14542_v25 = vld [vmem:[#allocation31_spill] sm:$0xff]  ;;  %v14556_v31 = vld [vmem:[#allocation44_spill] sm:$0xff]  ;;  %v14557_v34 = vld [vmem:[#allocation33_spill] sm:$0xff] }
 0x59e   : > { %v7611_v52 = vpop.f32.mrf.mxu1  ;;  %v9990_v4 = vpop.f32.mrf.mxu0  ;;  %v7760_v48 = vmax.f32 %v7728_v47, 0.0  ;;  %v14551_v47 = vld [vmem:[#allocation45_spill] sm:$0xff]  ;;  %vm14560_vm3 = vmmov %vm14483_vm0 }
 0x59f   : > { %v7688_v63 = vadd.f32 %v7611_v52, %v7378_v0  ;;  %8170 = vst.msk [vmem:[%s13733_s26 + $0x50] sm:$0xff] %vm14529_vm14, %v8138_v38  ;;  %v8141_v61 = vadd.f32 %v9990_v4, %v7755_v3  ;;  %v7729_v43 = vadd.f32 %v13709_v42, %v7690_v56  ;;  %v7758_v44 = vmax.f32 %v7726_v55, 0.0  ;;  %v14541_v3 = vld [vmem:[#allocation30_spill] sm:$0xff]  ;;  %vm14561_vm14 = vmmov %vm14483_vm0 }
 0x5a0   : > { %v9944_v49 = vpop.f32.mrf.mxu1  ;;  %v8029_v2 = vpop.f32.mrf.mxu0  ;;  %v7386_v38 = vadd.f32 %v13698_v18, %v7092_v58  ;;  %v7391_v58 = vadd.f32 %v14557_v34, %v14556_v31 }
 0x5a1   : > { %v7727_v15 = vadd.f32 %v13709_v42, %v7688_v63  ;;  %8173 = vst.msk [vmem:[%s13733_s26 + $0x68] sm:$0xff] %vm14530_vm8, %v8141_v61  ;;  %v8140_v24 = vadd.f32 %v8029_v2, %v7754_v59  ;;  %v7761_v36 = vmax.f32 %v7729_v43, 0.0  ;;  %v7693_v32 = vadd.f32 %v9944_v49, %v7383_v12  ;;  %v14544_v49 = vld [vmem:[#allocation37_spill] sm:$0xff]  ;;  %vm14562_vm8 = vmmov %vm14483_vm0 }
 0x5a2   : > { %v7624_v41 = vpop.f32.mrf.mxu1  ;;  %v9993_v29 = vpop.f32.mrf.mxu0  ;;  %v7385_v63 = vadd.f32 %v14542_v25, %v14541_v3  ;;  %v7388_v59 = vadd.f32 %v13695_v23, %v14544_v49  ;;  %v14554_v12 = vld [vmem:[#allocation25_spill] sm:$0xff] }
 0x5a3   : > { %8172 = vst.msk [vmem:[%s13733_s26 + $0x60] sm:$0xff] %vm14531_vm12, %v8140_v24  ;;  %v8143_v20 = vadd.f32 %v9993_v29, %v7757_v22  ;;  %v7759_v39 = vmax.f32 %v7727_v15, 0.0  ;;  %v7691_v26 = vadd.f32 %v7624_v41, %v7381_v14  ;;  %v7732_v56 = vadd.f32 %v13709_v42, %v7693_v32  ;;  %v14545_v22 = vld [vmem:[#allocation52_spill] sm:$0xff]  ;;  %vm14563_vm12 = vmmov %vm14483_vm0 }
 0x5a4   : > { %v9945_v46 = vpop.f32.mrf.mxu1  ;;  %v8039_v8 = vpop.f32.mrf.mxu0  ;;  %v7387_v29 = vadd.f32 %v14546_v13, %v14545_v22 }
 0x5a5   : > { %8175 = vst.msk [vmem:[%s13733_s26 + $0x78] sm:$0xff] %vm14532_vm5, %v8143_v20  ;;  %v8142_v33 = vadd.f32 %v8039_v8, %v7756_v1  ;;  %v7694_v11 = vadd.f32 %v9945_v46, %v7384_v57  ;;  %v7730_v0 = vadd.f32 %v13709_v42, %v7691_v26  ;;  %v14549_v8 = vld [vmem:[#allocation26_spill] sm:$0xff]  ;;  %v7764_v57 = vmax.f32 %v7732_v56, 0.0  ;;  %v14552_v26 = vld [vmem:[#allocation55_spill] sm:$0xff]  ;;  %vm14564_vm5 = vmmov %vm14483_vm0 }
 0x5a6   : > { %v7627_v17 = vpop.f32.mrf.mxu1  ;;  %v9996_v53 = vpop.f32.mrf.mxu0 }
 0x5a7   : > { %v7692_v62 = vadd.f32 %v7627_v17, %v7382_v27  ;;  %8174 = vst.msk [vmem:[%s13733_s26 + $0x70] sm:$0xff] %vm14534_vm2, %v8142_v33  ;;  %v8145_v28 = vadd.f32 %v9996_v53, %v7759_v39  ;;  %v7733_v4 = vadd.f32 %v13709_v42, %v7694_v11  ;;  %v7762_v41 = vmax.f32 %v7730_v0, 0.0  ;;  %v14548_v27 = vld [vmem:[#allocation40_spill] sm:$0xff]  ;;  %vm14565_vm2 = vmmov %vm14483_vm0 }
 0x5a8   : > { %v9948_v54 = vpop.f32.mrf.mxu1  ;;  %v8049_v21 = vpop.f32.mrf.mxu0  ;;  %v7096_v14 = vadd.f32 %v14549_v8, %v14548_v27 }
 0x5a9   : > { %v7731_v7 = vadd.f32 %v13709_v42, %v7692_v62  ;;  %8177 = vst.msk [vmem:[%s13733_s26 + $0x88] sm:$0xff] %vm14537_vm11, %v8145_v28  ;;  %v8144_v60 = vadd.f32 %v8049_v21, %v7758_v44  ;;  %v7765_v1 = vmax.f32 %v7733_v4, 0.0  ;;  %v7697_v33 = vadd.f32 %v9948_v54, %v7387_v29 }
 0x5aa   : > { %v7640_v45 = vpop.f32.mrf.mxu1  ;;  %v9999_v9 = vpop.f32.mrf.mxu0  ;;  %v7390_v62 = vadd.f32 %v13723_v5, %v7096_v14  ;;  %v7389_v28 = vadd.f32 %v14552_v26, %v14551_v47  ;;  %v7392_v21 = vadd.f32 %v13718_v37, %v14554_v12 }
 0x5ab   : > { %8176 = vst.msk [vmem:[%s13733_s26 + $0x80] sm:$0xff] %vm14540_vm4, %v8144_v60  ;;  %v8147_v51 = vadd.f32 %v9999_v9, %v7761_v36  ;;  %v7763_v61 = vmax.f32 %v7731_v7, 0.0  ;;  %v7695_v18 = vadd.f32 %v7640_v45, %v7385_v63  ;;  %v7736_v5 = vadd.f32 %v13709_v42, %v7697_v33 }
 0x5ac   : > { %v9949_v19 = vpop.f32.mrf.mxu1  ;;  %v8059_v52 = vpop.f32.mrf.mxu0 }
 0x5ad   : > { %8179 = vst.msk [vmem:[%s13733_s26 + $0x98] sm:$0xff] %vm14543_vm13, %v8147_v51  ;;  %v8146_v35 = vadd.f32 %v8059_v52, %v7760_v48  ;;  %v7698_v55 = vadd.f32 %v9949_v19, %v7388_v59  ;;  %v7734_v17 = vadd.f32 %v13709_v42, %v7695_v18  ;;  %v7768_v3 = vmax.f32 %v7736_v5, 0.0 }
 0x5ae   : > { %v7643_v40 = vpop.f32.mrf.mxu1  ;;  %v10002_v2 = vpop.f32.mrf.mxu0 }
 0x5af   : > { %v7696_v16 = vadd.f32 %v7643_v40, %v7386_v38  ;;  %8178 = vst.msk [vmem:[%s13733_s26 + $0x90] sm:$0xff] %vm14483_vm0, %v8146_v35  ;;  %v8149_v15 = vadd.f32 %v10002_v2, %v7763_v61  ;;  %v7737_v44 = vadd.f32 %v13709_v42, %v7698_v55  ;;  %v7766_v36 = vmax.f32 %v7734_v17, 0.0 }
 0x5b0   : > { %v9952_v24 = vpop.f32.mrf.mxu1  ;;  %v8069_v6 = vpop.f32.mrf.mxu0 }
 0x5b1   : > { %v7735_v20 = vadd.f32 %v13709_v42, %v7696_v16  ;;  %8181 = vst.msk [vmem:[%s13733_s26 + $0xa8] sm:$0xff] %vm14547_vm6, %v8149_v15  ;;  %v8148_v23 = vadd.f32 %v8069_v6, %v7762_v41  ;;  %v7769_v51 = vmax.f32 %v7737_v44, 0.0  ;;  %v7701_v48 = vadd.f32 %v9952_v24, %v7391_v58 }
 0x5b2   : > { %v7656_v46 = vpop.f32.mrf.mxu1  ;;  %v10005_v43 = vpop.f32.mrf.mxu0 }
 0x5b3   : > { %8180 = vst.msk [vmem:[%s13733_s26 + $0xa0] sm:$0xff] %vm14550_vm9, %v8148_v23  ;;  %v8151_v39 = vadd.f32 %v10005_v43, %v7765_v1  ;;  %v7767_v50 = vmax.f32 %v7735_v20, 0.0  ;;  %v7699_v60 = vadd.f32 %v7656_v46, %v7389_v28  ;;  %v7740_v61 = vadd.f32 %v13709_v42, %v7701_v48 }
 0x5b4   : > { %v9953_v30 = vpop.f32.mrf.mxu1  ;;  %v8079_v53 = vpop.f32.mrf.mxu0 }
 0x5b5   : > { %8183 = vst.msk [vmem:[%s13733_s26 + $0xb8] sm:$0xff] %vm14553_vm10, %v8151_v39  ;;  %v8150_v54 = vadd.f32 %v8079_v53, %v7764_v57  ;;  %v7702_v32 = vadd.f32 %v9953_v30, %v7392_v21  ;;  %v7738_v38 = vadd.f32 %v13709_v42, %v7699_v60  ;;  %v7772_v24 = vmax.f32 %v7740_v61, 0.0 }
 0x5b6   : > { %v7659_v10 = vpop.f32.mrf.mxu1  ;;  %v10008_v7 = vpop.f32.mrf.mxu0 }
 0x5b7   : > { %v7700_v11 = vadd.f32 %v7659_v10, %v7390_v62  ;;  %8182 = vst.msk [vmem:[%s13733_s26 + $0xb0] sm:$0xff] %vm14555_vm15, %v8150_v54  ;;  %v8153_v45 = vadd.f32 %v10008_v7, %v7767_v50  ;;  %v7741_v63 = vadd.f32 %v13709_v42, %v7702_v32  ;;  %v7770_v59 = vmax.f32 %v7738_v38, 0.0 }
 0x5b8   : > { %v8089_v9 = vpop.f32.mrf.mxu0 }
 0x5b9   : > { %v7739_v0 = vadd.f32 %v13709_v42, %v7700_v11  ;;  %8185 = vst.msk [vmem:[%s13733_s26 + $0xc8] sm:$0xff] %vm14558_vm1, %v8153_v45  ;;  %v8152_v37 = vadd.f32 %v8089_v9, %v7766_v36  ;;  %v7773_v56 = vmax.f32 %v7741_v63, 0.0 }
 0x5ba   : > { %v10011_v19 = vpop.f32.mrf.mxu0 }
 0x5bb   : > { %8184 = vst.msk [vmem:[%s13733_s26 + $0xc0] sm:$0xff] %vm14559_vm7, %v8152_v37  ;;  %v8155_v52 = vadd.f32 %v10011_v19, %v7769_v51  ;;  %v7771_v35 = vmax.f32 %v7739_v0, 0.0 }
 0x5bc   : > { %v8099_v25 = vpop.f32.mrf.mxu0 }
 0x5bd   : > { %8187 = vst.msk [vmem:[%s13733_s26 + $0xd8] sm:$0xff] %vm14560_vm3, %v8155_v52  ;;  %v8154_v4 = vadd.f32 %v8099_v25, %v7768_v3 }
 0x5be   : > { %v10014_v40 = vpop.f32.mrf.mxu0 }
 0x5bf   : > { %8186 = vst.msk [vmem:[%s13733_s26 + $0xd0] sm:$0xff] %vm14561_vm14, %v8154_v4  ;;  %v8157_v49 = vadd.f32 %v10014_v40, %v7771_v35 }
 0x5c0   : > { %v8109_v16 = vpop.f32.mrf.mxu0 }
 0x5c1   : > { %8189 = vst.msk [vmem:[%s13733_s26 + $0xe8] sm:$0xff] %vm14562_vm8, %v8157_v49  ;;  %v8156_v2 = vadd.f32 %v8109_v16, %v7770_v59 }
 0x5c2   : > { %v10017_v18 = vpop.f32.mrf.mxu0 }
 0x5c3   : > { %8188 = vst.msk [vmem:[%s13733_s26 + $0xe0] sm:$0xff] %vm14563_vm12, %v8156_v2  ;;  %v8159_v15 = vadd.f32 %v10017_v18, %v7773_v56 }
 0x5c4   : > { %v8119_v41 = vpop.f32.mrf.mxu0 }
 0x5c5   : > { %8191 = vst.msk [vmem:[%s13733_s26 + $0xf8] sm:$0xff] %vm14564_vm5, %v8159_v15  ;;  %v8158_v22 = vadd.f32 %v8119_v41, %v7772_v24 }
 0x5c7   : > { %8190 = vst.msk [vmem:[%s13733_s26 + $0xf0] sm:$0xff] %vm14565_vm2, %v8158_v22 }
 0x5c8 PF: > { %s21_s17 = sadd.s32 1, %s10074_s17  }
 0x5c9   : > { %p18_p4 = scmp.ge.s32.totalorder %s21_s17, 4  }
 0x5cb   :  { %20 = sbr.rel (!%p18_p4) target bundleno = 1 (0x1), region = 129 }

</bundles_post_ra>
